<compile_context>
chip_gen: v7x
topology: tpu7x:2x2x1
jax: 0.10.0
libtpu: 0.0.40
codegen_flags: <defaults>
</compile_context>

<pallas_src>
from functools import lru_cache

import jax
import jax.numpy as jnp
from jax.experimental import pallas as pl
from jax.experimental.pallas import tpu as pltpu

_BN_EPS = 1e-5


# ----------------------------------------------------------------------------
# helpers
# ----------------------------------------------------------------------------
def _fold_bn(bias, gamma, beta, mean, var):
    scale = gamma / jnp.sqrt(var + _BN_EPS)
    shift = (bias - mean) * scale + beta
    return scale.astype(jnp.float32), shift.astype(jnp.float32)


def _round_up(v, m):
    return -(-v // m) * m


@lru_cache(maxsize=None)
def _vmem_limit():
    """Scoped VMEM limit: ~75% of physical, capped at 96 MiB (fallback if query fails)."""
    try:
        cap = int(getattr(pltpu.get_tpu_info(), "vmem_capacity_bytes", 0))
    except Exception:  # pragma: no cover - defensive
        cap = 0
    if cap <= 0:
        cap = 128 * 1024 * 1024
    return min(int(cap * 0.75), 96 * 1024 * 1024)


def _pick_tile(total, bytes_per_unit, *, budget, min_steps=1, cap=1 << 30):
    """Largest divisor of `total` fitting `budget` that still yields >= min_steps
    grid steps (falls back to >=2 steps, then to the largest fitting tile)."""
    divs = [d for d in range(1, total + 1) if total % d == 0]
    fit = [d for d in divs if d <= cap and d * bytes_per_unit <= budget] or [1]
    for want in (min_steps, 2, 1):
        pref = [d for d in fit if total // d >= want]
        if pref:
            return max(pref)
    return max(fit)


# ----------------------------------------------------------------------------
# Kernel 1: ConvTranspose2d(k=2, s=2) + BN + ReLU with the depth-to-space
# interleave fused into the kernel's output layout.
#   x block:   (1, TRh, W, Cin)
#   w:         (Cin, 4*Coh)      columns ordered (kh, kw, co)
#   scale/shift: (1, 1, 4*Coh)
#   out block: (1, TRh, 2, W, 2*Coh)   -- bytes == (N, 2H, 2W, Coh) row-major
# ----------------------------------------------------------------------------
def _tconv_kernel(x_ref, w_ref, scale_ref, shift_ref, o_ref):
    two_coh = o_ref.shape[-1]
    acc = jnp.einsum("hwc,cf->hwf", x_ref[0], w_ref[...],
                     preferred_element_type=jnp.float32)
    y = jnp.maximum(acc * scale_ref[...] + shift_ref[...], 0.0).astype(o_ref.dtype)
    # first 2*Coh columns are kh=0 (-> output row 2h), last 2*Coh are kh=1 (-> 2h+1)
    o_ref[0, :, 0, :, :] = y[:, :, :two_coh]
    o_ref[0, :, 1, :, :] = y[:, :, two_coh:]


def _tconv2x2_bn_relu(x_nhwc, w_pt, b, gamma, beta, mean, var):
    """ConvTranspose2d(Cin, Coh, k=2, s=2) + BN + ReLU.  w_pt: (Cin, Coh, 2, 2)."""
    N, H, W, Cin = x_nhwc.shape
    Coh = w_pt.shape[1]
    # (Cin, Coh, kh, kw) -> (Cin, kh, kw, Coh) -> (Cin, 4*Coh)
    w2d = jnp.transpose(w_pt, (0, 2, 3, 1)).reshape(Cin, 4 * Coh).astype(jnp.bfloat16)
    scale, shift = _fold_bn(b, gamma, beta, mean, var)
    scale4 = jnp.tile(scale[None, None, :], (2, 2, 1)).reshape(1, 1, 4 * Coh)
    shift4 = jnp.tile(shift[None, None, :], (2, 2, 1)).reshape(1, 1, 4 * Coh)

    limit = _vmem_limit()
    fixed = 2 * (Cin * 4 * Coh * 2) + 2 * 4 * 4 * Coh          # resident constants (x2 buf)
    bytes_per_row = W * (2 * 2 * Cin                           # input block, double buffered
                         + 2 * 2 * (2 * 2 * Coh)               # output block (2 rows), double buffered
                         + 4 * 4 * Coh)                        # f32 matmul result
    budget = max(1 << 20, int(limit * 0.6) - fixed)
    min_steps = max(2, -(-8 // N))
    TRh = _pick_tile(H, bytes_per_row, budget=budget, min_steps=min_steps, cap=512)

    cost = pl.CostEstimate(
        flops=2 * N * H * W * Cin * 4 * Coh,
        transcendentals=0,
        bytes_accessed=int(x_nhwc.size) * 2 + int(w2d.size) * 2
                       + N * 4 * H * W * Coh * 2,
    )

    out = pl.pallas_call(
        _tconv_kernel,
        out_shape=jax.ShapeDtypeStruct((N, H, 2, W, 2 * Coh), jnp.bfloat16),
        grid=(N, H // TRh),
        in_specs=[
            pl.BlockSpec((1, TRh, W, Cin), lambda n, h: (n, h, 0, 0)),
            pl.BlockSpec((Cin, 4 * Coh), lambda n, h: (0, 0)),
            pl.BlockSpec((1, 1, 4 * Coh), lambda n, h: (0, 0, 0)),
            pl.BlockSpec((1, 1, 4 * Coh), lambda n, h: (0, 0, 0)),
        ],
        out_specs=pl.BlockSpec((1, TRh, 2, W, 2 * Coh), lambda n, h: (n, h, 0, 0, 0)),
        compiler_params=pltpu.CompilerParams(
            dimension_semantics=("parallel", "parallel"),
            vmem_limit_bytes=limit),
        cost_estimate=cost,
    )(x_nhwc, w2d, scale4, shift4)

    # free bitcast: (N, H, 2, W, 2*Coh) and (N, 2H, 2W, Coh) share the same bytes
    return out.reshape(N, 2 * H, 2 * W, Coh)


# ----------------------------------------------------------------------------
# Kernel 2: 3x3 conv (pad=1) + BN + ReLU over 1..K input tensors (fused concat).
# Grid = (N, row-tiles).  Each input tensor contributes three refs:
#   cur: (1, TR, Wf, C)   the row tile
#   top: (1, 1,  Wf, C)   row just above (clamped index, masked at t==0)
#   bot: (1, 1,  Wf, C)   row just below (clamped, masked at t==last)
# Then merged weight (Kp, Cout) with K groups padded to 128 lanes, scale/shift
# (1, 1, Cout), output (1, TR, Wf, Cout).  Scratch: one zero-border padded
# window per input + one lane-aligned im2col buffer consumed by one MXU matmul.
# ----------------------------------------------------------------------------
def _make_conv3x3_kernel(chans, pads):
    num_inputs = len(chans)

    def kernel(*refs):
        n_x = 3 * num_inputs
        x_refs = refs[:n_x]
        w_ref, scale_ref, shift_ref, o_ref = refs[n_x:n_x + 4]
        win_refs = refs[n_x + 4:n_x + 4 + num_inputs]
        xcol_ref = refs[n_x + 4 + num_inputs]

        t = pl.program_id(1)
        t_last = pl.num_programs(1) - 1
        _, tr, wf, _ = o_ref.shape

        col = 0
        for i in range(num_inputs):
            cur_ref = x_refs[3 * i]
            top_ref = x_refs[3 * i + 1]
            bot_ref = x_refs[3 * i + 2]
            win_ref = win_refs[i]
            c, cp = chans[i], pads[i]

            # interior rows (always fully overwritten)
            win_ref[1:tr + 1, 1:wf + 1, :] = cur_ref[0]
            # zero left/right padding columns (all rows -> also covers corners)
            win_ref[:, 0:1, :] = jnp.zeros((tr + 2, 1, c), win_ref.dtype)
            win_ref[:, wf + 1:wf + 2, :] = jnp.zeros((tr + 2, 1, c), win_ref.dtype)

            # top halo row: neighbor tile row, or zeros at the image boundary
            @pl.when(t > 0)
            def _(top_ref=top_ref, win_ref=win_ref):
                win_ref[0:1, 1:wf + 1, :] = top_ref[0]

            @pl.when(t == 0)
            def _(win_ref=win_ref, c=c):
                win_ref[0:1, 1:wf + 1, :] = jnp.zeros((1, wf, c), win_ref.dtype)

            # bottom halo row
            @pl.when(t < t_last)
            def _(bot_ref=bot_ref, win_ref=win_ref):
                win_ref[tr + 1:tr + 2, 1:wf + 1, :] = bot_ref[0]

            @pl.when(t == t_last)
            def _(win_ref=win_ref, c=c):
                win_ref[tr + 1:tr + 2, 1:wf + 1, :] = jnp.zeros((1, wf, c), win_ref.dtype)

            # im2col: columns ordered (input, kh, kw, ci[padded to 128 lanes]).
            zfill = (jnp.zeros((tr, wf, cp - c), win_ref.dtype) if cp > c else None)
            for kh in range(3):
                for kw in range(3):
                    sl = win_ref[kh:kh + tr, kw:kw + wf, :]
                    if zfill is not None:
                        sl = jnp.concatenate([sl, zfill], axis=-1)
                    xcol_ref[:, :, col:col + cp] = sl
                    col += cp

        # One big matmul: K = 9 * sum(pad128(Cin_i)), f32 accumulate on the MXU.
        y = jnp.einsum("rwk,kc->rwc", xcol_ref[...], w_ref[...],
                       preferred_element_type=jnp.float32)
        y = jnp.maximum(y * scale_ref[...] + shift_ref[...], 0.0)
        o_ref[0] = y.astype(o_ref.dtype)

    return kernel


def _conv3x3_bn_relu(xs, w_splits, b, gamma, beta, mean, var,
                     out_dtype=jnp.bfloat16):
    """Conv2d(k=3, s=1, p=1) + BN + ReLU over the channel-concat of `xs`.
    xs: list of NHWC bf16 arrays sharing (N, R, Wf); w_splits[i]: (Cout, C_i, 3, 3)."""
    N, R, Wf = xs[0].shape[:3]
    for x in xs[1:]:
        assert x.shape[:3] == (N, R, Wf)
    Cout = w_splits[0].shape[0]
    chans = [int(x.shape[-1]) for x in xs]
    pads = [c if c % 128 == 0 else _round_up(c, 128) for c in chans]
    Kp = 9 * sum(pads)

    # (Cout, C_i, 3, 3) -> (3, 3, C_i, Cout), pad C_i to 128-multiple with zero
    # rows, flatten to (9*pad_i, Cout); stack along K to match the im2col order.
    w_parts = []
    for w, c, cp in zip(w_splits, chans, pads):
        wt = jnp.transpose(w, (2, 3, 1, 0))
        if cp > c:
            wt = jnp.pad(wt, ((0, 0), (0, 0), (0, cp - c), (0, 0)))
        w_parts.append(wt.reshape(9 * cp, Cout))
    w9 = jnp.concatenate(w_parts, axis=0).astype(jnp.bfloat16)

    scale, shift = _fold_bn(b, gamma, beta, mean, var)
    scale = scale.reshape(1, 1, Cout)
    shift = shift.reshape(1, 1, Cout)

    sum_c = sum(chans)
    out_isz = jnp.dtype(out_dtype).itemsize
    limit = _vmem_limit()
    fixed = 2 * (Kp * Cout * 2) + 4 * 4 * Cout                 # resident constants (x2 buf)
    bytes_per_row = Wf * (2 * 2 * 2 * sum_c                    # bf16 input blocks, double buffered
                          + 2 * out_isz * Cout                 # output block, double buffered
                          + 2 * sum_c                          # padded-window scratches
                          + 2 * Kp                             # im2col scratch (bf16)
                          + 4 * Cout)                          # f32 matmul result
    budget = max(1 << 20, int(limit * 0.6) - fixed)
    min_steps = max(2, -(-8 // N))
    TR = _pick_tile(R, bytes_per_row, budget=budget, min_steps=min_steps, cap=512)
    grid = (N, R // TR)

    in_specs, args = [], []
    for x in xs:
        C = x.shape[-1]
        in_specs.append(pl.BlockSpec((1, TR, Wf, C), lambda n, t: (n, t, 0, 0)))
        in_specs.append(pl.BlockSpec(
            (1, 1, Wf, C),
            lambda n, t, TR=TR: (n, jnp.maximum(t * TR - 1, 0), 0, 0)))
        in_specs.append(pl.BlockSpec(
            (1, 1, Wf, C),
            lambda n, t, TR=TR, R=R: (n, jnp.minimum((t + 1) * TR, R - 1), 0, 0)))
        args += [x, x, x]
    in_specs.append(pl.BlockSpec((Kp, Cout), lambda n, t: (0, 0)))
    in_specs.append(pl.BlockSpec((1, 1, Cout), lambda n, t: (0, 0, 0)))
    in_specs.append(pl.BlockSpec((1, 1, Cout), lambda n, t: (0, 0, 0)))
    args += [w9, scale, shift]

    scratch = [pltpu.VMEM((TR + 2, Wf + 2, c), jnp.bfloat16) for c in chans]
    scratch.append(pltpu.VMEM((TR, Wf, Kp), jnp.bfloat16))

    cost = pl.CostEstimate(
        flops=2 * N * R * Wf * Kp * Cout,
        transcendentals=0,
        bytes_accessed=sum(int(x.size) * 2 for x in xs) + int(w9.size) * 2
                       + N * R * Wf * Cout * out_isz,
    )

    return pl.pallas_call(
        _make_conv3x3_kernel(tuple(chans), tuple(pads)),
        out_shape=jax.ShapeDtypeStruct((N, R, Wf, Cout), out_dtype),
        grid=grid,
        in_specs=in_specs,
        out_specs=pl.BlockSpec((1, TR, Wf, Cout), lambda n, t: (n, t, 0, 0)),
        scratch_shapes=scratch,
        compiler_params=pltpu.CompilerParams(
            dimension_semantics=("parallel", "parallel"),
            vmem_limit_bytes=limit),
        cost_estimate=cost,
    )(*args)


# ----------------------------------------------------------------------------
# Parameters + forward (matches UpSamplingBlock with use_transpose_conv=True,
# BatchNorm in eval mode).
# ----------------------------------------------------------------------------
def init_params(key, in_channels, skip_channels, out_channels):
    coh = in_channels // 2
    cin_fwd = coh + skip_channels
    ks = jax.random.split(key, 12)

    def w(k, shape, fan_in):
        return (jax.random.normal(k, shape, jnp.float32) / jnp.sqrt(fan_in)).astype(jnp.float32)

    def bn(k, c):
        k1, k2, k3, k4 = jax.random.split(k, 4)
        return dict(
            gamma=1.0 + 0.1 * jax.random.normal(k1, (c,), jnp.float32),
            beta=0.1 * jax.random.normal(k2, (c,), jnp.float32),
            mean=0.1 * jax.random.normal(k3, (c,), jnp.float32),
            var=0.5 + jnp.abs(jax.random.normal(k4, (c,), jnp.float32)),
        )

    return dict(
        tconv_w=w(ks[0], (in_channels, coh, 2, 2), in_channels * 4),
        tconv_b=0.1 * jax.random.normal(ks[1], (coh,), jnp.float32),
        bn1=bn(ks[2], coh),
        conv1_w=w(ks[3], (out_channels, cin_fwd, 3, 3), cin_fwd * 9),
        conv1_b=0.1 * jax.random.normal(ks[4], (out_channels,), jnp.float32),
        bn2=bn(ks[5], out_channels),
        conv2_w=w(ks[6], (out_channels, out_channels, 3, 3), out_channels * 9),
        conv2_b=0.1 * jax.random.normal(ks[7], (out_channels,), jnp.float32),
        bn3=bn(ks[8], out_channels),
    )


def upsampling_block_forward(x_nchw, x_skip_nchw, params):
    """UpSamplingBlock.forward.  NCHW in/out; bf16 NHWC compute internally."""
    # TODO(synk): fold NCHW<->NHWC transposes + bf16 cast into the first/last kernels.
    x = jnp.transpose(x_nchw, (0, 2, 3, 1)).astype(jnp.bfloat16)         # NHWC
    xs = jnp.transpose(x_skip_nchw, (0, 2, 3, 1)).astype(jnp.bfloat16)   # NHWC

    bn1, bn2, bn3 = params["bn1"], params["bn2"], params["bn3"]

    x_hat = _tconv2x2_bn_relu(x, params["tconv_w"], params["tconv_b"],
                              bn1["gamma"], bn1["beta"], bn1["mean"], bn1["var"])

    # torch.cat((x_skip, x_hat), dim=1) fused into conv1: two inputs, one merged weight.
    skip_c = xs.shape[-1]
    w1 = params["conv1_w"]
    h = _conv3x3_bn_relu([xs, x_hat], [w1[:, :skip_c], w1[:, skip_c:]],
                         params["conv1_b"],
                         bn2["gamma"], bn2["beta"], bn2["mean"], bn2["var"],
                         out_dtype=jnp.bfloat16)
    h = _conv3x3_bn_relu([h], [params["conv2_w"]],
                         params["conv2_b"],
                         bn3["gamma"], bn3["beta"], bn3["mean"], bn3["var"],
                         out_dtype=jnp.float32)

    return jnp.transpose(h, (0, 3, 1, 2))                                # NCHW


# ----------------------------------------------------------------------------
# Pure-JAX reference (f32) for a loose numerical check.
# ----------------------------------------------------------------------------
def _reference_forward(x_nchw, x_skip_nchw, params):
    def bn_relu(y, b, bn):
        s = bn["gamma"] / jnp.sqrt(bn["var"] + _BN_EPS)
        return jnp.maximum((y + b - bn["mean"]) * s + bn["beta"], 0.0)

    x = jnp.transpose(x_nchw, (0, 2, 3, 1))
    xs = jnp.transpose(x_skip_nchw, (0, 2, 3, 1))
    N, H, W, _ = x.shape
    wt = params["tconv_w"]                                     # (Cin, Coh, 2, 2)
    Coh = wt.shape[1]
    y = jnp.einsum("nhwi,iokl->nhkwlo", x, wt).reshape(N, 2 * H, 2 * W, Coh)
    x_hat = bn_relu(y, params["tconv_b"], params["bn1"])
    cat = jnp.concatenate([xs, x_hat], axis=-1)

    def conv3(z, w):
        k = jnp.transpose(w, (2, 3, 1, 0))                     # (O,I,3,3)->HWIO
        return jax.lax.conv_general_dilated(
            z, k, (1, 1), "SAME", dimension_numbers=("NHWC", "HWIO", "NHWC"))

    h = bn_relu(conv3(cat, params["conv1_w"]), params["conv1_b"], params["bn2"])
    h = bn_relu(conv3(h, params["conv2_w"]), params["conv2_b"], params["bn3"])
    return jnp.transpose(h, (0, 3, 1, 2))


if __name__ == "__main__":
    key = jax.random.PRNGKey(0)
    k_x, k_skip, k_p = jax.random.split(key, 3)

    in_channels, skip_channels, out_channels = 8, 4, 8
    N, H, W = 2, 8, 8  # x_skip is at 2x spatial resolution

    x = jax.random.normal(k_x, (N, in_channels, H, W), jnp.float32)               # NCHW
    x_skip = jax.random.normal(k_skip, (N, skip_channels, 2 * H, 2 * W), jnp.float32)

    params = init_params(k_p, in_channels, skip_channels, out_channels)

    fwd = jax.jit(upsampling_block_forward)
    out = fwd(x, x_skip, params)
    jax.block_until_ready(out)

    assert out.shape == (N, out_channels, 2 * H, 2 * W), out.shape
    assert bool(jnp.all(jnp.isfinite(out)))

    ref = _reference_forward(x, x_skip, params)
    err = float(jnp.max(jnp.abs(out - ref)))
    scale = float(jnp.max(jnp.abs(ref))) + 1e-6
    assert err <= 0.08 * scale + 1e-2, (err, scale)  # bf16-compute tolerance

    print("KERNEL_OK")
</pallas_src>

<mosaic_0001>
module attributes {stable_mosaic.version = 11 : i64} {
  func.func @_tconv_kernel(%arg0: i32, %arg1: i32, %arg2: memref<1x2x8x8xbf16, #tpu.memory_space<vmem>>, %arg3: memref<8x16xbf16, #tpu.memory_space<vmem>>, %arg4: memref<1x1x16xf32, #tpu.memory_space<vmem>>, %arg5: memref<1x1x16xf32, #tpu.memory_space<vmem>>, %arg6: memref<1x2x2x8x8xbf16, #tpu.memory_space<vmem>>) attributes {dimension_semantics = [#tpu.dimension_semantics<parallel>, #tpu.dimension_semantics<parallel>], iteration_bounds = array<i64: 2, 4>, scalar_prefetch = 0 : i64, scratch_operands = 0 : i64, tpu.core_type = #tpu.core_type<tc>, window_params = [{transform_indices = @transform_0, window_bounds = array<i64: 1, 2, 8, 8>}, {pipeline_mode = #tpu.pipeline_mode<synchronous>, transform_indices = @transform_1, window_bounds = array<i64: 8, 16>}, {pipeline_mode = #tpu.pipeline_mode<synchronous>, transform_indices = @transform_2, window_bounds = array<i64: 1, 1, 16>}, {pipeline_mode = #tpu.pipeline_mode<synchronous>, transform_indices = @transform_3, window_bounds = array<i64: 1, 1, 16>}, {transform_indices = @transform_4, window_bounds = array<i64: 1, 2, 2, 8, 8>}]} {
    %c0 = arith.constant 0 : index
    %c0_0 = arith.constant 0 : index
    %c0_1 = arith.constant 0 : index
    %c0_2 = arith.constant 0 : index
    %0 = vector.load %arg2[%c0, %c0_0, %c0_1, %c0_2] : memref<1x2x8x8xbf16, #tpu.memory_space<vmem>>, vector<1x2x8x8xbf16>
    %1 = vector.shape_cast %0 : vector<1x2x8x8xbf16> to vector<2x8x8xbf16>
    %c0_3 = arith.constant 0 : index
    %c0_4 = arith.constant 0 : index
    %2 = vector.load %arg3[%c0_3, %c0_4] : memref<8x16xbf16, #tpu.memory_space<vmem>>, vector<8x16xbf16>
    "tpu.trace_start"() <{level = 10 : i32, message = "hwc,cf->hwf"}> : () -> ()
    %cst = arith.constant dense<0.000000e+00> : vector<2x8x16xf32>
    %3 = tpu.matmul %1, %2, %cst {dimension_numbers = #tpu.dot_dimension_numbers<[2], [0], [0, 1], [1], [0, 0, 0, 1, 1, 1], [], []>} : vector<2x8x8xbf16>, vector<8x16xbf16>, vector<2x8x16xf32> -> vector<2x8x16xf32>
    "tpu.trace_stop"() : () -> ()
    %c0_5 = arith.constant 0 : index
    %c0_6 = arith.constant 0 : index
    %c0_7 = arith.constant 0 : index
    %4 = vector.load %arg4[%c0_5, %c0_6, %c0_7] : memref<1x1x16xf32, #tpu.memory_space<vmem>>, vector<1x1x16xf32>
    %5 = vector.broadcast %4 : vector<1x1x16xf32> to vector<2x8x16xf32>
    %6 = arith.mulf %3, %5 : vector<2x8x16xf32>
    %c0_8 = arith.constant 0 : index
    %c0_9 = arith.constant 0 : index
    %c0_10 = arith.constant 0 : index
    %7 = vector.load %arg5[%c0_8, %c0_9, %c0_10] : memref<1x1x16xf32, #tpu.memory_space<vmem>>, vector<1x1x16xf32>
    %8 = vector.broadcast %7 : vector<1x1x16xf32> to vector<2x8x16xf32>
    %9 = arith.addf %6, %8 : vector<2x8x16xf32>
    %cst_11 = arith.constant 0.000000e+00 : f32
    %10 = vector.broadcast %cst_11 : f32 to vector<2x8x16xf32>
    %11 = arith.maximumf %9, %10 : vector<2x8x16xf32>
    %12 = arith.truncf %11 : vector<2x8x16xf32> to vector<2x8x16xbf16>
    %13 = vector.extract_strided_slice %12 {offsets = [0, 0, 0], sizes = [2, 8, 8], strides = [1, 1, 1]} : vector<2x8x16xbf16> to vector<2x8x8xbf16>
    %c0_12 = arith.constant 0 : index
    %c0_13 = arith.constant 0 : index
    %c0_14 = arith.constant 0 : index
    %c0_15 = arith.constant 0 : index
    %c0_16 = arith.constant 0 : index
    %14 = vector.load %arg6[%c0_12, %c0_13, %c0_14, %c0_15, %c0_16] : memref<1x2x2x8x8xbf16, #tpu.memory_space<vmem>>, vector<1x2x1x8x8xbf16>
    %15 = vector.shape_cast %14 : vector<1x2x1x8x8xbf16> to vector<2x8x8xbf16>
    %16 = vector.shape_cast %13 : vector<2x8x8xbf16> to vector<1x2x1x8x8xbf16>
    tpu.vector_store %arg6[%c0_12, %c0_13, %c0_14, %c0_15, %c0_16], %16 {strides = array<i32>} : memref<1x2x2x8x8xbf16, #tpu.memory_space<vmem>>, vector<1x2x1x8x8xbf16>,
    %17 = vector.extract_strided_slice %12 {offsets = [0, 0, 8], sizes = [2, 8, 8], strides = [1, 1, 1]} : vector<2x8x16xbf16> to vector<2x8x8xbf16>
    %c0_17 = arith.constant 0 : index
    %c0_18 = arith.constant 0 : index
    %c1 = arith.constant 1 : index
    %c0_19 = arith.constant 0 : index
    %c0_20 = arith.constant 0 : index
    %18 = vector.load %arg6[%c0_17, %c0_18, %c1, %c0_19, %c0_20] : memref<1x2x2x8x8xbf16, #tpu.memory_space<vmem>>, vector<1x2x1x8x8xbf16>
    %19 = vector.shape_cast %18 : vector<1x2x1x8x8xbf16> to vector<2x8x8xbf16>
    %20 = vector.shape_cast %17 : vector<2x8x8xbf16> to vector<1x2x1x8x8xbf16>
    tpu.vector_store %arg6[%c0_17, %c0_18, %c1, %c0_19, %c0_20], %20 {strides = array<i32>} : memref<1x2x2x8x8xbf16, #tpu.memory_space<vmem>>, vector<1x2x1x8x8xbf16>,
    return
  }
  func.func @transform_0(%arg0: i32, %arg1: i32) -> (i32, i32, i32, i32) {
    %c0_i32 = arith.constant 0 : i32
    %c0_i32_0 = arith.constant 0 : i32
    %c0_i32_1 = arith.constant 0 : i32
    return %arg0, %arg1, %c0_i32, %c0_i32_0 : i32, i32, i32, i32
  }
  func.func @transform_1(%arg0: i32, %arg1: i32) -> (i32, i32) {
    %c0_i32 = arith.constant 0 : i32
    %c0_i32_0 = arith.constant 0 : i32
    %c0_i32_1 = arith.constant 0 : i32
    return %c0_i32, %c0_i32_0 : i32, i32
  }
  func.func @transform_2(%arg0: i32, %arg1: i32) -> (i32, i32, i32) {
    %c0_i32 = arith.constant 0 : i32
    %c0_i32_0 = arith.constant 0 : i32
    %c0_i32_1 = arith.constant 0 : i32
    %c0_i32_2 = arith.constant 0 : i32
    return %c0_i32, %c0_i32_0, %c0_i32_1 : i32, i32, i32
  }
  func.func @transform_3(%arg0: i32, %arg1: i32) -> (i32, i32, i32) {
    %c0_i32 = arith.constant 0 : i32
    %c0_i32_0 = arith.constant 0 : i32
    %c0_i32_1 = arith.constant 0 : i32
    %c0_i32_2 = arith.constant 0 : i32
    return %c0_i32, %c0_i32_0, %c0_i32_1 : i32, i32, i32
  }
  func.func @transform_4(%arg0: i32, %arg1: i32) -> (i32, i32, i32, i32, i32) {
    %c0_i32 = arith.constant 0 : i32
    %c0_i32_0 = arith.constant 0 : i32
    %c0_i32_1 = arith.constant 0 : i32
    %c0_i32_2 = arith.constant 0 : i32
    return %arg0, %arg1, %c0_i32, %c0_i32_0, %c0_i32_1 : i32, i32, i32, i32, i32
  }
}

module attributes {stable_mosaic.version = 11 : i64} {
  func.func @kernel(%arg0: i32, %arg1: i32, %arg2: memref<1x4x16x4xbf16, #tpu.memory_space<vmem>>, %arg3: memref<1x1x16x4xbf16, #tpu.memory_space<vmem>>, %arg4: memref<1x1x16x4xbf16, #tpu.memory_space<vmem>>, %arg5: memref<1x4x16x4xbf16, #tpu.memory_space<vmem>>, %arg6: memref<1x1x16x4xbf16, #tpu.memory_space<vmem>>, %arg7: memref<1x1x16x4xbf16, #tpu.memory_space<vmem>>, %arg8: memref<2304x8xbf16, #tpu.memory_space<vmem>>, %arg9: memref<1x1x8xf32, #tpu.memory_space<vmem>>, %arg10: memref<1x1x8xf32, #tpu.memory_space<vmem>>, %arg11: memref<1x4x16x8xbf16, #tpu.memory_space<vmem>>, %arg12: memref<6x18x4xbf16, #tpu.memory_space<vmem>>, %arg13: memref<6x18x4xbf16, #tpu.memory_space<vmem>>, %arg14: memref<4x16x2304xbf16, #tpu.memory_space<vmem>>) attributes {dimension_semantics = [#tpu.dimension_semantics<parallel>, #tpu.dimension_semantics<parallel>], iteration_bounds = array<i64: 2, 4>, scalar_prefetch = 0 : i64, scratch_operands = 3 : i64, tpu.core_type = #tpu.core_type<tc>, window_params = [{transform_indices = @transform_0, window_bounds = array<i64: 1, 4, 16, 4>}, {transform_indices = @transform_1, window_bounds = array<i64: 1, 1, 16, 4>}, {transform_indices = @transform_2, window_bounds = array<i64: 1, 1, 16, 4>}, {transform_indices = @transform_3, window_bounds = array<i64: 1, 4, 16, 4>}, {transform_indices = @transform_4, window_bounds = array<i64: 1, 1, 16, 4>}, {transform_indices = @transform_5, window_bounds = array<i64: 1, 1, 16, 4>}, {pipeline_mode = #tpu.pipeline_mode<synchronous>, transform_indices = @transform_6, window_bounds = array<i64: 2304, 8>}, {pipeline_mode = #tpu.pipeline_mode<synchronous>, transform_indices = @transform_7, window_bounds = array<i64: 1, 1, 8>}, {pipeline_mode = #tpu.pipeline_mode<synchronous>, transform_indices = @transform_8, window_bounds = array<i64: 1, 1, 8>}, {transform_indices = @transform_9, window_bounds = array<i64: 1, 4, 16, 8>}]} {
    %c0 = arith.constant 0 : index
    %c0_0 = arith.constant 0 : index
    %c0_1 = arith.constant 0 : index
    %c0_2 = arith.constant 0 : index
    %0 = vector.load %arg2[%c0, %c0_0, %c0_1, %c0_2] : memref<1x4x16x4xbf16, #tpu.memory_space<vmem>>, vector<1x4x16x4xbf16>
    %1 = vector.shape_cast %0 : vector<1x4x16x4xbf16> to vector<4x16x4xbf16>
    %c1 = arith.constant 1 : index
    %c1_3 = arith.constant 1 : index
    %c0_4 = arith.constant 0 : index
    %2 = vector.load %arg12[%c1, %c1_3, %c0_4] : memref<6x18x4xbf16, #tpu.memory_space<vmem>>, vector<4x16x4xbf16>
    tpu.vector_store %arg12[%c1, %c1_3, %c0_4], %1 {strides = array<i32>} : memref<6x18x4xbf16, #tpu.memory_space<vmem>>, vector<4x16x4xbf16>,
    %cst = arith.constant 0.000000e+00 : bf16
    %3 = vector.broadcast %cst : bf16 to vector<6x1x4xbf16>
    %c0_5 = arith.constant 0 : index
    %c0_6 = arith.constant 0 : index
    %c0_7 = arith.constant 0 : index
    %4 = vector.load %arg12[%c0_5, %c0_6, %c0_7] : memref<6x18x4xbf16, #tpu.memory_space<vmem>>, vector<6x1x4xbf16>
    tpu.vector_store %arg12[%c0_5, %c0_6, %c0_7], %3 {strides = array<i32>} : memref<6x18x4xbf16, #tpu.memory_space<vmem>>, vector<6x1x4xbf16>,
    %cst_8 = arith.constant 0.000000e+00 : bf16
    %5 = vector.broadcast %cst_8 : bf16 to vector<6x1x4xbf16>
    %c0_9 = arith.constant 0 : index
    %c17 = arith.constant 17 : index
    %c0_10 = arith.constant 0 : index
    %6 = vector.load %arg12[%c0_9, %c17, %c0_10] : memref<6x18x4xbf16, #tpu.memory_space<vmem>>, vector<6x1x4xbf16>
    tpu.vector_store %arg12[%c0_9, %c17, %c0_10], %5 {strides = array<i32>} : memref<6x18x4xbf16, #tpu.memory_space<vmem>>, vector<6x1x4xbf16>,
    %c0_i32 = arith.constant 0 : i32
    %7 = arith.cmpi sgt, %arg1, %c0_i32 : i32
    %8 = arith.extui %7 : i1 to i32
    %c0_i32_11 = arith.constant 0 : i32
    %9 = arith.cmpi ne, %8, %c0_i32_11 : i32
    scf.if %9 {
      %c0_149 = arith.constant 0 : index
      %c0_150 = arith.constant 0 : index
      %c0_151 = arith.constant 0 : index
      %c0_152 = arith.constant 0 : index
      %109 = vector.load %arg3[%c0_149, %c0_150, %c0_151, %c0_152] : memref<1x1x16x4xbf16, #tpu.memory_space<vmem>>, vector<1x1x16x4xbf16>
      %110 = vector.shape_cast %109 : vector<1x1x16x4xbf16> to vector<1x16x4xbf16>
      %c0_153 = arith.constant 0 : index
      %c1_154 = arith.constant 1 : index
      %c0_155 = arith.constant 0 : index
      %111 = vector.load %arg12[%c0_153, %c1_154, %c0_155] : memref<6x18x4xbf16, #tpu.memory_space<vmem>>, vector<1x16x4xbf16>
      tpu.vector_store %arg12[%c0_153, %c1_154, %c0_155], %110 {strides = array<i32>} : memref<6x18x4xbf16, #tpu.memory_space<vmem>>, vector<1x16x4xbf16>,
    } else {
    }
    %c0_i32_12 = arith.constant 0 : i32
    %10 = arith.cmpi eq, %arg1, %c0_i32_12 : i32
    %11 = arith.extui %10 : i1 to i32
    %c0_i32_13 = arith.constant 0 : i32
    %12 = arith.cmpi ne, %11, %c0_i32_13 : i32
    scf.if %12 {
      %cst_149 = arith.constant 0.000000e+00 : bf16
      %109 = vector.broadcast %cst_149 : bf16 to vector<1x16x4xbf16>
      %c0_150 = arith.constant 0 : index
      %c1_151 = arith.constant 1 : index
      %c0_152 = arith.constant 0 : index
      %110 = vector.load %arg12[%c0_150, %c1_151, %c0_152] : memref<6x18x4xbf16, #tpu.memory_space<vmem>>, vector<1x16x4xbf16>
      tpu.vector_store %arg12[%c0_150, %c1_151, %c0_152], %109 {strides = array<i32>} : memref<6x18x4xbf16, #tpu.memory_space<vmem>>, vector<1x16x4xbf16>,
    } else {
    }
    %c3_i32 = arith.constant 3 : i32
    %13 = arith.cmpi slt, %arg1, %c3_i32 : i32
    %14 = arith.extui %13 : i1 to i32
    %c0_i32_14 = arith.constant 0 : i32
    %15 = arith.cmpi ne, %14, %c0_i32_14 : i32
    scf.if %15 {
      %c0_149 = arith.constant 0 : index
      %c0_150 = arith.constant 0 : index
      %c0_151 = arith.constant 0 : index
      %c0_152 = arith.constant 0 : index
      %109 = vector.load %arg4[%c0_149, %c0_150, %c0_151, %c0_152] : memref<1x1x16x4xbf16, #tpu.memory_space<vmem>>, vector<1x1x16x4xbf16>
      %110 = vector.shape_cast %109 : vector<1x1x16x4xbf16> to vector<1x16x4xbf16>
      %c5 = arith.constant 5 : index
      %c1_153 = arith.constant 1 : index
      %c0_154 = arith.constant 0 : index
      %111 = vector.load %arg12[%c5, %c1_153, %c0_154] : memref<6x18x4xbf16, #tpu.memory_space<vmem>>, vector<1x16x4xbf16>
      tpu.vector_store %arg12[%c5, %c1_153, %c0_154], %110 {strides = array<i32>} : memref<6x18x4xbf16, #tpu.memory_space<vmem>>, vector<1x16x4xbf16>,
    } else {
    }
    %c3_i32_15 = arith.constant 3 : i32
    %16 = arith.cmpi eq, %arg1, %c3_i32_15 : i32
    %17 = arith.extui %16 : i1 to i32
    %c0_i32_16 = arith.constant 0 : i32
    %18 = arith.cmpi ne, %17, %c0_i32_16 : i32
    scf.if %18 {
      %cst_149 = arith.constant 0.000000e+00 : bf16
      %109 = vector.broadcast %cst_149 : bf16 to vector<1x16x4xbf16>
      %c5 = arith.constant 5 : index
      %c1_150 = arith.constant 1 : index
      %c0_151 = arith.constant 0 : index
      %110 = vector.load %arg12[%c5, %c1_150, %c0_151] : memref<6x18x4xbf16, #tpu.memory_space<vmem>>, vector<1x16x4xbf16>
      tpu.vector_store %arg12[%c5, %c1_150, %c0_151], %109 {strides = array<i32>} : memref<6x18x4xbf16, #tpu.memory_space<vmem>>, vector<1x16x4xbf16>,
    } else {
    }
    %cst_17 = arith.constant 0.000000e+00 : bf16
    %19 = vector.broadcast %cst_17 : bf16 to vector<4x16x124xbf16>
    %c0_18 = arith.constant 0 : index
    %c0_19 = arith.constant 0 : index
    %c0_20 = arith.constant 0 : index
    %20 = vector.load %arg12[%c0_18, %c0_19, %c0_20] : memref<6x18x4xbf16, #tpu.memory_space<vmem>>, vector<4x16x4xbf16>
    %21 = tpu.concatenate %20, %19 in 2 : vector<4x16x4xbf16>, vector<4x16x124xbf16> -> vector<4x16x128xbf16>
    %c0_21 = arith.constant 0 : index
    %c0_22 = arith.constant 0 : index
    %c0_23 = arith.constant 0 : index
    %22 = vector.load %arg14[%c0_21, %c0_22, %c0_23] : memref<4x16x2304xbf16, #tpu.memory_space<vmem>>, vector<4x16x128xbf16>
    tpu.vector_store %arg14[%c0_21, %c0_22, %c0_23], %21 {strides = array<i32>} : memref<4x16x2304xbf16, #tpu.memory_space<vmem>>, vector<4x16x128xbf16>,
    %c0_24 = arith.constant 0 : index
    %c1_25 = arith.constant 1 : index
    %c0_26 = arith.constant 0 : index
    %23 = vector.load %arg12[%c0_24, %c1_25, %c0_26] : memref<6x18x4xbf16, #tpu.memory_space<vmem>>, vector<4x16x4xbf16>
    %24 = tpu.concatenate %23, %19 in 2 : vector<4x16x4xbf16>, vector<4x16x124xbf16> -> vector<4x16x128xbf16>
    %c0_27 = arith.constant 0 : index
    %c0_28 = arith.constant 0 : index
    %c128 = arith.constant 128 : index
    %25 = vector.load %arg14[%c0_27, %c0_28, %c128] : memref<4x16x2304xbf16, #tpu.memory_space<vmem>>, vector<4x16x128xbf16>
    tpu.vector_store %arg14[%c0_27, %c0_28, %c128], %24 {strides = array<i32>} : memref<4x16x2304xbf16, #tpu.memory_space<vmem>>, vector<4x16x128xbf16>,
    %c0_29 = arith.constant 0 : index
    %c2 = arith.constant 2 : index
    %c0_30 = arith.constant 0 : index
    %26 = vector.load %arg12[%c0_29, %c2, %c0_30] : memref<6x18x4xbf16, #tpu.memory_space<vmem>>, vector<4x16x4xbf16>
    %27 = tpu.concatenate %26, %19 in 2 : vector<4x16x4xbf16>, vector<4x16x124xbf16> -> vector<4x16x128xbf16>
    %c0_31 = arith.constant 0 : index
    %c0_32 = arith.constant 0 : index
    %c256 = arith.constant 256 : index
    %28 = vector.load %arg14[%c0_31, %c0_32, %c256] : memref<4x16x2304xbf16, #tpu.memory_space<vmem>>, vector<4x16x128xbf16>
    tpu.vector_store %arg14[%c0_31, %c0_32, %c256], %27 {strides = array<i32>} : memref<4x16x2304xbf16, #tpu.memory_space<vmem>>, vector<4x16x128xbf16>,
    %c1_33 = arith.constant 1 : index
    %c0_34 = arith.constant 0 : index
    %c0_35 = arith.constant 0 : index
    %29 = vector.load %arg12[%c1_33, %c0_34, %c0_35] : memref<6x18x4xbf16, #tpu.memory_space<vmem>>, vector<4x16x4xbf16>
    %30 = tpu.concatenate %29, %19 in 2 : vector<4x16x4xbf16>, vector<4x16x124xbf16> -> vector<4x16x128xbf16>
    %c0_36 = arith.constant 0 : index
    %c0_37 = arith.constant 0 : index
    %c384 = arith.constant 384 : index
    %31 = vector.load %arg14[%c0_36, %c0_37, %c384] : memref<4x16x2304xbf16, #tpu.memory_space<vmem>>, vector<4x16x128xbf16>
    tpu.vector_store %arg14[%c0_36, %c0_37, %c384], %30 {strides = array<i32>} : memref<4x16x2304xbf16, #tpu.memory_space<vmem>>, vector<4x16x128xbf16>,
    %c1_38 = arith.constant 1 : index
    %c1_39 = arith.constant 1 : index
    %c0_40 = arith.constant 0 : index
    %32 = vector.load %arg12[%c1_38, %c1_39, %c0_40] : memref<6x18x4xbf16, #tpu.memory_space<vmem>>, vector<4x16x4xbf16>
    %33 = tpu.concatenate %32, %19 in 2 : vector<4x16x4xbf16>, vector<4x16x124xbf16> -> vector<4x16x128xbf16>
    %c0_41 = arith.constant 0 : index
    %c0_42 = arith.constant 0 : index
    %c512 = arith.constant 512 : index
    %34 = vector.load %arg14[%c0_41, %c0_42, %c512] : memref<4x16x2304xbf16, #tpu.memory_space<vmem>>, vector<4x16x128xbf16>
    tpu.vector_store %arg14[%c0_41, %c0_42, %c512], %33 {strides = array<i32>} : memref<4x16x2304xbf16, #tpu.memory_space<vmem>>, vector<4x16x128xbf16>,
    %c1_43 = arith.constant 1 : index
    %c2_44 = arith.constant 2 : index
    %c0_45 = arith.constant 0 : index
    %35 = vector.load %arg12[%c1_43, %c2_44, %c0_45] : memref<6x18x4xbf16, #tpu.memory_space<vmem>>, vector<4x16x4xbf16>
    %36 = tpu.concatenate %35, %19 in 2 : vector<4x16x4xbf16>, vector<4x16x124xbf16> -> vector<4x16x128xbf16>
    %c0_46 = arith.constant 0 : index
    %c0_47 = arith.constant 0 : index
    %c640 = arith.constant 640 : index
    %37 = vector.load %arg14[%c0_46, %c0_47, %c640] : memref<4x16x2304xbf16, #tpu.memory_space<vmem>>, vector<4x16x128xbf16>
    tpu.vector_store %arg14[%c0_46, %c0_47, %c640], %36 {strides = array<i32>} : memref<4x16x2304xbf16, #tpu.memory_space<vmem>>, vector<4x16x128xbf16>,
    %c2_48 = arith.constant 2 : index
    %c0_49 = arith.constant 0 : index
    %c0_50 = arith.constant 0 : index
    %38 = vector.load %arg12[%c2_48, %c0_49, %c0_50] : memref<6x18x4xbf16, #tpu.memory_space<vmem>>, vector<4x16x4xbf16>
    %39 = tpu.concatenate %38, %19 in 2 : vector<4x16x4xbf16>, vector<4x16x124xbf16> -> vector<4x16x128xbf16>
    %c0_51 = arith.constant 0 : index
    %c0_52 = arith.constant 0 : index
    %c768 = arith.constant 768 : index
    %40 = vector.load %arg14[%c0_51, %c0_52, %c768] : memref<4x16x2304xbf16, #tpu.memory_space<vmem>>, vector<4x16x128xbf16>
    tpu.vector_store %arg14[%c0_51, %c0_52, %c768], %39 {strides = array<i32>} : memref<4x16x2304xbf16, #tpu.memory_space<vmem>>, vector<4x16x128xbf16>,
    %c2_53 = arith.constant 2 : index
    %c1_54 = arith.constant 1 : index
    %c0_55 = arith.constant 0 : index
    %41 = vector.load %arg12[%c2_53, %c1_54, %c0_55] : memref<6x18x4xbf16, #tpu.memory_space<vmem>>, vector<4x16x4xbf16>
    %42 = tpu.concatenate %41, %19 in 2 : vector<4x16x4xbf16>, vector<4x16x124xbf16> -> vector<4x16x128xbf16>
    %c0_56 = arith.constant 0 : index
    %c0_57 = arith.constant 0 : index
    %c896 = arith.constant 896 : index
    %43 = vector.load %arg14[%c0_56, %c0_57, %c896] : memref<4x16x2304xbf16, #tpu.memory_space<vmem>>, vector<4x16x128xbf16>
    tpu.vector_store %arg14[%c0_56, %c0_57, %c896], %42 {strides = array<i32>} : memref<4x16x2304xbf16, #tpu.memory_space<vmem>>, vector<4x16x128xbf16>,
    %c2_58 = arith.constant 2 : index
    %c2_59 = arith.constant 2 : index
    %c0_60 = arith.constant 0 : index
    %44 = vector.load %arg12[%c2_58, %c2_59, %c0_60] : memref<6x18x4xbf16, #tpu.memory_space<vmem>>, vector<4x16x4xbf16>
    %45 = tpu.concatenate %44, %19 in 2 : vector<4x16x4xbf16>, vector<4x16x124xbf16> -> vector<4x16x128xbf16>
    %c0_61 = arith.constant 0 : index
    %c0_62 = arith.constant 0 : index
    %c1024 = arith.constant 1024 : index
    %46 = vector.load %arg14[%c0_61, %c0_62, %c1024] : memref<4x16x2304xbf16, #tpu.memory_space<vmem>>, vector<4x16x128xbf16>
    tpu.vector_store %arg14[%c0_61, %c0_62, %c1024], %45 {strides = array<i32>} : memref<4x16x2304xbf16, #tpu.memory_space<vmem>>, vector<4x16x128xbf16>,
    %c0_63 = arith.constant 0 : index
    %c0_64 = arith.constant 0 : index
    %c0_65 = arith.constant 0 : index
    %c0_66 = arith.constant 0 : index
    %47 = vector.load %arg5[%c0_63, %c0_64, %c0_65, %c0_66] : memref<1x4x16x4xbf16, #tpu.memory_space<vmem>>, vector<1x4x16x4xbf16>
    %48 = vector.shape_cast %47 : vector<1x4x16x4xbf16> to vector<4x16x4xbf16>
    %c1_67 = arith.constant 1 : index
    %c1_68 = arith.constant 1 : index
    %c0_69 = arith.constant 0 : index
    %49 = vector.load %arg13[%c1_67, %c1_68, %c0_69] : memref<6x18x4xbf16, #tpu.memory_space<vmem>>, vector<4x16x4xbf16>
    tpu.vector_store %arg13[%c1_67, %c1_68, %c0_69], %48 {strides = array<i32>} : memref<6x18x4xbf16, #tpu.memory_space<vmem>>, vector<4x16x4xbf16>,
    %cst_70 = arith.constant 0.000000e+00 : bf16
    %50 = vector.broadcast %cst_70 : bf16 to vector<6x1x4xbf16>
    %c0_71 = arith.constant 0 : index
    %c0_72 = arith.constant 0 : index
    %c0_73 = arith.constant 0 : index
    %51 = vector.load %arg13[%c0_71, %c0_72, %c0_73] : memref<6x18x4xbf16, #tpu.memory_space<vmem>>, vector<6x1x4xbf16>
    tpu.vector_store %arg13[%c0_71, %c0_72, %c0_73], %50 {strides = array<i32>} : memref<6x18x4xbf16, #tpu.memory_space<vmem>>, vector<6x1x4xbf16>,
    %cst_74 = arith.constant 0.000000e+00 : bf16
    %52 = vector.broadcast %cst_74 : bf16 to vector<6x1x4xbf16>
    %c0_75 = arith.constant 0 : index
    %c17_76 = arith.constant 17 : index
    %c0_77 = arith.constant 0 : index
    %53 = vector.load %arg13[%c0_75, %c17_76, %c0_77] : memref<6x18x4xbf16, #tpu.memory_space<vmem>>, vector<6x1x4xbf16>
    tpu.vector_store %arg13[%c0_75, %c17_76, %c0_77], %52 {strides = array<i32>} : memref<6x18x4xbf16, #tpu.memory_space<vmem>>, vector<6x1x4xbf16>,
    %c0_i32_78 = arith.constant 0 : i32
    %54 = arith.cmpi sgt, %arg1, %c0_i32_78 : i32
    %55 = arith.extui %54 : i1 to i32
    %c0_i32_79 = arith.constant 0 : i32
    %56 = arith.cmpi ne, %55, %c0_i32_79 : i32
    scf.if %56 {
      %c0_149 = arith.constant 0 : index
      %c0_150 = arith.constant 0 : index
      %c0_151 = arith.constant 0 : index
      %c0_152 = arith.constant 0 : index
      %109 = vector.load %arg6[%c0_149, %c0_150, %c0_151, %c0_152] : memref<1x1x16x4xbf16, #tpu.memory_space<vmem>>, vector<1x1x16x4xbf16>
      %110 = vector.shape_cast %109 : vector<1x1x16x4xbf16> to vector<1x16x4xbf16>
      %c0_153 = arith.constant 0 : index
      %c1_154 = arith.constant 1 : index
      %c0_155 = arith.constant 0 : index
      %111 = vector.load %arg13[%c0_153, %c1_154, %c0_155] : memref<6x18x4xbf16, #tpu.memory_space<vmem>>, vector<1x16x4xbf16>
      tpu.vector_store %arg13[%c0_153, %c1_154, %c0_155], %110 {strides = array<i32>} : memref<6x18x4xbf16, #tpu.memory_space<vmem>>, vector<1x16x4xbf16>,
    } else {
    }
    %c0_i32_80 = arith.constant 0 : i32
    %57 = arith.cmpi eq, %arg1, %c0_i32_80 : i32
    %58 = arith.extui %57 : i1 to i32
    %c0_i32_81 = arith.constant 0 : i32
    %59 = arith.cmpi ne, %58, %c0_i32_81 : i32
    scf.if %59 {
      %cst_149 = arith.constant 0.000000e+00 : bf16
      %109 = vector.broadcast %cst_149 : bf16 to vector<1x16x4xbf16>
      %c0_150 = arith.constant 0 : index
      %c1_151 = arith.constant 1 : index
      %c0_152 = arith.constant 0 : index
      %110 = vector.load %arg13[%c0_150, %c1_151, %c0_152] : memref<6x18x4xbf16, #tpu.memory_space<vmem>>, vector<1x16x4xbf16>
      tpu.vector_store %arg13[%c0_150, %c1_151, %c0_152], %109 {strides = array<i32>} : memref<6x18x4xbf16, #tpu.memory_space<vmem>>, vector<1x16x4xbf16>,
    } else {
    }
    %c3_i32_82 = arith.constant 3 : i32
    %60 = arith.cmpi slt, %arg1, %c3_i32_82 : i32
    %61 = arith.extui %60 : i1 to i32
    %c0_i32_83 = arith.constant 0 : i32
    %62 = arith.cmpi ne, %61, %c0_i32_83 : i32
    scf.if %62 {
      %c0_149 = arith.constant 0 : index
      %c0_150 = arith.constant 0 : index
      %c0_151 = arith.constant 0 : index
      %c0_152 = arith.constant 0 : index
      %109 = vector.load %arg7[%c0_149, %c0_150, %c0_151, %c0_152] : memref<1x1x16x4xbf16, #tpu.memory_space<vmem>>, vector<1x1x16x4xbf16>
      %110 = vector.shape_cast %109 : vector<1x1x16x4xbf16> to vector<1x16x4xbf16>
      %c5 = arith.constant 5 : index
      %c1_153 = arith.constant 1 : index
      %c0_154 = arith.constant 0 : index
      %111 = vector.load %arg13[%c5, %c1_153, %c0_154] : memref<6x18x4xbf16, #tpu.memory_space<vmem>>, vector<1x16x4xbf16>
      tpu.vector_store %arg13[%c5, %c1_153, %c0_154], %110 {strides = array<i32>} : memref<6x18x4xbf16, #tpu.memory_space<vmem>>, vector<1x16x4xbf16>,
    } else {
    }
    %c3_i32_84 = arith.constant 3 : i32
    %63 = arith.cmpi eq, %arg1, %c3_i32_84 : i32
    %64 = arith.extui %63 : i1 to i32
    %c0_i32_85 = arith.constant 0 : i32
    %65 = arith.cmpi ne, %64, %c0_i32_85 : i32
    scf.if %65 {
      %cst_149 = arith.constant 0.000000e+00 : bf16
      %109 = vector.broadcast %cst_149 : bf16 to vector<1x16x4xbf16>
      %c5 = arith.constant 5 : index
      %c1_150 = arith.constant 1 : index
      %c0_151 = arith.constant 0 : index
      %110 = vector.load %arg13[%c5, %c1_150, %c0_151] : memref<6x18x4xbf16, #tpu.memory_space<vmem>>, vector<1x16x4xbf16>
      tpu.vector_store %arg13[%c5, %c1_150, %c0_151], %109 {strides = array<i32>} : memref<6x18x4xbf16, #tpu.memory_space<vmem>>, vector<1x16x4xbf16>,
    } else {
    }
    %cst_86 = arith.constant 0.000000e+00 : bf16
    %66 = vector.broadcast %cst_86 : bf16 to vector<4x16x124xbf16>
    %c0_87 = arith.constant 0 : index
    %c0_88 = arith.constant 0 : index
    %c0_89 = arith.constant 0 : index
    %67 = vector.load %arg13[%c0_87, %c0_88, %c0_89] : memref<6x18x4xbf16, #tpu.memory_space<vmem>>, vector<4x16x4xbf16>
    %68 = tpu.concatenate %67, %66 in 2 : vector<4x16x4xbf16>, vector<4x16x124xbf16> -> vector<4x16x128xbf16>
    %c0_90 = arith.constant 0 : index
    %c0_91 = arith.constant 0 : index
    %c1152 = arith.constant 1152 : index
    %69 = vector.load %arg14[%c0_90, %c0_91, %c1152] : memref<4x16x2304xbf16, #tpu.memory_space<vmem>>, vector<4x16x128xbf16>
    tpu.vector_store %arg14[%c0_90, %c0_91, %c1152], %68 {strides = array<i32>} : memref<4x16x2304xbf16, #tpu.memory_space<vmem>>, vector<4x16x128xbf16>,
    %c0_92 = arith.constant 0 : index
    %c1_93 = arith.constant 1 : index
    %c0_94 = arith.constant 0 : index
    %70 = vector.load %arg13[%c0_92, %c1_93, %c0_94] : memref<6x18x4xbf16, #tpu.memory_space<vmem>>, vector<4x16x4xbf16>
    %71 = tpu.concatenate %70, %66 in 2 : vector<4x16x4xbf16>, vector<4x16x124xbf16> -> vector<4x16x128xbf16>
    %c0_95 = arith.constant 0 : index
    %c0_96 = arith.constant 0 : index
    %c1280 = arith.constant 1280 : index
    %72 = vector.load %arg14[%c0_95, %c0_96, %c1280] : memref<4x16x2304xbf16, #tpu.memory_space<vmem>>, vector<4x16x128xbf16>
    tpu.vector_store %arg14[%c0_95, %c0_96, %c1280], %71 {strides = array<i32>} : memref<4x16x2304xbf16, #tpu.memory_space<vmem>>, vector<4x16x128xbf16>,
    %c0_97 = arith.constant 0 : index
    %c2_98 = arith.constant 2 : index
    %c0_99 = arith.constant 0 : index
    %73 = vector.load %arg13[%c0_97, %c2_98, %c0_99] : memref<6x18x4xbf16, #tpu.memory_space<vmem>>, vector<4x16x4xbf16>
    %74 = tpu.concatenate %73, %66 in 2 : vector<4x16x4xbf16>, vector<4x16x124xbf16> -> vector<4x16x128xbf16>
    %c0_100 = arith.constant 0 : index
    %c0_101 = arith.constant 0 : index
    %c1408 = arith.constant 1408 : index
    %75 = vector.load %arg14[%c0_100, %c0_101, %c1408] : memref<4x16x2304xbf16, #tpu.memory_space<vmem>>, vector<4x16x128xbf16>
    tpu.vector_store %arg14[%c0_100, %c0_101, %c1408], %74 {strides = array<i32>} : memref<4x16x2304xbf16, #tpu.memory_space<vmem>>, vector<4x16x128xbf16>,
    %c1_102 = arith.constant 1 : index
    %c0_103 = arith.constant 0 : index
    %c0_104 = arith.constant 0 : index
    %76 = vector.load %arg13[%c1_102, %c0_103, %c0_104] : memref<6x18x4xbf16, #tpu.memory_space<vmem>>, vector<4x16x4xbf16>
    %77 = tpu.concatenate %76, %66 in 2 : vector<4x16x4xbf16>, vector<4x16x124xbf16> -> vector<4x16x128xbf16>
    %c0_105 = arith.constant 0 : index
    %c0_106 = arith.constant 0 : index
    %c1536 = arith.constant 1536 : index
    %78 = vector.load %arg14[%c0_105, %c0_106, %c1536] : memref<4x16x2304xbf16, #tpu.memory_space<vmem>>, vector<4x16x128xbf16>
    tpu.vector_store %arg14[%c0_105, %c0_106, %c1536], %77 {strides = array<i32>} : memref<4x16x2304xbf16, #tpu.memory_space<vmem>>, vector<4x16x128xbf16>,
    %c1_107 = arith.constant 1 : index
    %c1_108 = arith.constant 1 : index
    %c0_109 = arith.constant 0 : index
    %79 = vector.load %arg13[%c1_107, %c1_108, %c0_109] : memref<6x18x4xbf16, #tpu.memory_space<vmem>>, vector<4x16x4xbf16>
    %80 = tpu.concatenate %79, %66 in 2 : vector<4x16x4xbf16>, vector<4x16x124xbf16> -> vector<4x16x128xbf16>
    %c0_110 = arith.constant 0 : index
    %c0_111 = arith.constant 0 : index
    %c1664 = arith.constant 1664 : index
    %81 = vector.load %arg14[%c0_110, %c0_111, %c1664] : memref<4x16x2304xbf16, #tpu.memory_space<vmem>>, vector<4x16x128xbf16>
    tpu.vector_store %arg14[%c0_110, %c0_111, %c1664], %80 {strides = array<i32>} : memref<4x16x2304xbf16, #tpu.memory_space<vmem>>, vector<4x16x128xbf16>,
    %c1_112 = arith.constant 1 : index
    %c2_113 = arith.constant 2 : index
    %c0_114 = arith.constant 0 : index
    %82 = vector.load %arg13[%c1_112, %c2_113, %c0_114] : memref<6x18x4xbf16, #tpu.memory_space<vmem>>, vector<4x16x4xbf16>
    %83 = tpu.concatenate %82, %66 in 2 : vector<4x16x4xbf16>, vector<4x16x124xbf16> -> vector<4x16x128xbf16>
    %c0_115 = arith.constant 0 : index
    %c0_116 = arith.constant 0 : index
    %c1792 = arith.constant 1792 : index
    %84 = vector.load %arg14[%c0_115, %c0_116, %c1792] : memref<4x16x2304xbf16, #tpu.memory_space<vmem>>, vector<4x16x128xbf16>
    tpu.vector_store %arg14[%c0_115, %c0_116, %c1792], %83 {strides = array<i32>} : memref<4x16x2304xbf16, #tpu.memory_space<vmem>>, vector<4x16x128xbf16>,
    %c2_117 = arith.constant 2 : index
    %c0_118 = arith.constant 0 : index
    %c0_119 = arith.constant 0 : index
    %85 = vector.load %arg13[%c2_117, %c0_118, %c0_119] : memref<6x18x4xbf16, #tpu.memory_space<vmem>>, vector<4x16x4xbf16>
    %86 = tpu.concatenate %85, %66 in 2 : vector<4x16x4xbf16>, vector<4x16x124xbf16> -> vector<4x16x128xbf16>
    %c0_120 = arith.constant 0 : index
    %c0_121 = arith.constant 0 : index
    %c1920 = arith.constant 1920 : index
    %87 = vector.load %arg14[%c0_120, %c0_121, %c1920] : memref<4x16x2304xbf16, #tpu.memory_space<vmem>>, vector<4x16x128xbf16>
    tpu.vector_store %arg14[%c0_120, %c0_121, %c1920], %86 {strides = array<i32>} : memref<4x16x2304xbf16, #tpu.memory_space<vmem>>, vector<4x16x128xbf16>,
    %c2_122 = arith.constant 2 : index
    %c1_123 = arith.constant 1 : index
    %c0_124 = arith.constant 0 : index
    %88 = vector.load %arg13[%c2_122, %c1_123, %c0_124] : memref<6x18x4xbf16, #tpu.memory_space<vmem>>, vector<4x16x4xbf16>
    %89 = tpu.concatenate %88, %66 in 2 : vector<4x16x4xbf16>, vector<4x16x124xbf16> -> vector<4x16x128xbf16>
    %c0_125 = arith.constant 0 : index
    %c0_126 = arith.constant 0 : index
    %c2048 = arith.constant 2048 : index
    %90 = vector.load %arg14[%c0_125, %c0_126, %c2048] : memref<4x16x2304xbf16, #tpu.memory_space<vmem>>, vector<4x16x128xbf16>
    tpu.vector_store %arg14[%c0_125, %c0_126, %c2048], %89 {strides = array<i32>} : memref<4x16x2304xbf16, #tpu.memory_space<vmem>>, vector<4x16x128xbf16>,
    %c2_127 = arith.constant 2 : index
    %c2_128 = arith.constant 2 : index
    %c0_129 = arith.constant 0 : index
    %91 = vector.load %arg13[%c2_127, %c2_128, %c0_129] : memref<6x18x4xbf16, #tpu.memory_space<vmem>>, vector<4x16x4xbf16>
    %92 = tpu.concatenate %91, %66 in 2 : vector<4x16x4xbf16>, vector<4x16x124xbf16> -> vector<4x16x128xbf16>
    %c0_130 = arith.constant 0 : index
    %c0_131 = arith.constant 0 : index
    %c2176 = arith.constant 2176 : index
    %93 = vector.load %arg14[%c0_130, %c0_131, %c2176] : memref<4x16x2304xbf16, #tpu.memory_space<vmem>>, vector<4x16x128xbf16>
    tpu.vector_store %arg14[%c0_130, %c0_131, %c2176], %92 {strides = array<i32>} : memref<4x16x2304xbf16, #tpu.memory_space<vmem>>, vector<4x16x128xbf16>,
    %c0_132 = arith.constant 0 : index
    %c0_133 = arith.constant 0 : index
    %c0_134 = arith.constant 0 : index
    %94 = vector.load %arg14[%c0_132, %c0_133, %c0_134] : memref<4x16x2304xbf16, #tpu.memory_space<vmem>>, vector<4x16x2304xbf16>
    %c0_135 = arith.constant 0 : index
    %c0_136 = arith.constant 0 : index
    %95 = vector.load %arg8[%c0_135, %c0_136] : memref<2304x8xbf16, #tpu.memory_space<vmem>>, vector<2304x8xbf16>
    "tpu.trace_start"() <{level = 10 : i32, message = "rwk,kc->rwc"}> : () -> ()
    %cst_137 = arith.constant dense<0.000000e+00> : vector<4x16x8xf32>
    %96 = tpu.matmul %94, %95, %cst_137 {dimension_numbers = #tpu.dot_dimension_numbers<[2], [0], [0, 1], [1], [0, 0, 0, 1, 1, 1], [], []>} : vector<4x16x2304xbf16>, vector<2304x8xbf16>, vector<4x16x8xf32> -> vector<4x16x8xf32>
    "tpu.trace_stop"() : () -> ()
    %c0_138 = arith.constant 0 : index
    %c0_139 = arith.constant 0 : index
    %c0_140 = arith.constant 0 : index
    %97 = vector.load %arg9[%c0_138, %c0_139, %c0_140] : memref<1x1x8xf32, #tpu.memory_space<vmem>>, vector<1x1x8xf32>
    %98 = vector.broadcast %97 : vector<1x1x8xf32> to vector<4x16x8xf32>
    %99 = arith.mulf %96, %98 : vector<4x16x8xf32>
    %c0_141 = arith.constant 0 : index
    %c0_142 = arith.constant 0 : index
    %c0_143 = arith.constant 0 : index
    %100 = vector.load %arg10[%c0_141, %c0_142, %c0_143] : memref<1x1x8xf32, #tpu.memory_space<vmem>>, vector<1x1x8xf32>
    %101 = vector.broadcast %100 : vector<1x1x8xf32> to vector<4x16x8xf32>
    %102 = arith.addf %99, %101 : vector<4x16x8xf32>
    %cst_144 = arith.constant 0.000000e+00 : f32
    %103 = vector.broadcast %cst_144 : f32 to vector<4x16x8xf32>
    %104 = arith.maximumf %102, %103 : vector<4x16x8xf32>
    %105 = arith.truncf %104 : vector<4x16x8xf32> to vector<4x16x8xbf16>
    %c0_145 = arith.constant 0 : index
    %c0_146 = arith.constant 0 : index
    %c0_147 = arith.constant 0 : index
    %c0_148 = arith.constant 0 : index
    %106 = vector.load %arg11[%c0_145, %c0_146, %c0_147, %c0_148] : memref<1x4x16x8xbf16, #tpu.memory_space<vmem>>, vector<1x4x16x8xbf16>
    %107 = vector.shape_cast %106 : vector<1x4x16x8xbf16> to vector<4x16x8xbf16>
    %108 = vector.shape_cast %105 : vector<4x16x8xbf16> to vector<1x4x16x8xbf16>
    tpu.vector_store %arg11[%c0_145, %c0_146, %c0_147, %c0_148], %108 {strides = array<i32>} : memref<1x4x16x8xbf16, #tpu.memory_space<vmem>>, vector<1x4x16x8xbf16>,
    return
  }
  func.func @transform_0(%arg0: i32, %arg1: i32) -> (i32, i32, i32, i32) {
    %c0_i32 = arith.constant 0 : i32
    %c0_i32_0 = arith.constant 0 : i32
    %c0_i32_1 = arith.constant 0 : i32
    return %arg0, %arg1, %c0_i32, %c0_i32_0 : i32, i32, i32, i32
  }
  func.func @transform_1(%arg0: i32, %arg1: i32) -> (i32, i32, i32, i32) {
    %c4_i32 = arith.constant 4 : i32
    %0 = arith.muli %arg1, %c4_i32 : i32
    %c1_i32 = arith.constant 1 : i32
    %1 = arith.subi %0, %c1_i32 : i32
    %c0_i32 = arith.constant 0 : i32
    %2 = arith.maxsi %1, %c0_i32 : i32
    %c0_i32_0 = arith.constant 0 : i32
    %c0_i32_1 = arith.constant 0 : i32
    %c0_i32_2 = arith.constant 0 : i32
    return %arg0, %2, %c0_i32_0, %c0_i32_1 : i32, i32, i32, i32
  }
  func.func @transform_2(%arg0: i32, %arg1: i32) -> (i32, i32, i32, i32) {
    %c1_i32 = arith.constant 1 : i32
    %0 = arith.addi %arg1, %c1_i32 : i32
    %c4_i32 = arith.constant 4 : i32
    %1 = arith.muli %0, %c4_i32 : i32
    %c15_i32 = arith.constant 15 : i32
    %2 = arith.minsi %1, %c15_i32 : i32
    %c0_i32 = arith.constant 0 : i32
    %c0_i32_0 = arith.constant 0 : i32
    %c0_i32_1 = arith.constant 0 : i32
    return %arg0, %2, %c0_i32, %c0_i32_0 : i32, i32, i32, i32
  }
  func.func @transform_3(%arg0: i32, %arg1: i32) -> (i32, i32, i32, i32) {
    %c0_i32 = arith.constant 0 : i32
    %c0_i32_0 = arith.constant 0 : i32
    %c0_i32_1 = arith.constant 0 : i32
    return %arg0, %arg1, %c0_i32, %c0_i32_0 : i32, i32, i32, i32
  }
  func.func @transform_4(%arg0: i32, %arg1: i32) -> (i32, i32, i32, i32) {
    %c4_i32 = arith.constant 4 : i32
    %0 = arith.muli %arg1, %c4_i32 : i32
    %c1_i32 = arith.constant 1 : i32
    %1 = arith.subi %0, %c1_i32 : i32
    %c0_i32 = arith.constant 0 : i32
    %2 = arith.maxsi %1, %c0_i32 : i32
    %c0_i32_0 = arith.constant 0 : i32
    %c0_i32_1 = arith.constant 0 : i32
    %c0_i32_2 = arith.constant 0 : i32
    return %arg0, %2, %c0_i32_0, %c0_i32_1 : i32, i32, i32, i32
  }
  func.func @transform_5(%arg0: i32, %arg1: i32) -> (i32, i32, i32, i32) {
    %c1_i32 = arith.constant 1 : i32
    %0 = arith.addi %arg1, %c1_i32 : i32
    %c4_i32 = arith.constant 4 : i32
    %1 = arith.muli %0, %c4_i32 : i32
    %c15_i32 = arith.constant 15 : i32
    %2 = arith.minsi %1, %c15_i32 : i32
    %c0_i32 = arith.constant 0 : i32
    %c0_i32_0 = arith.constant 0 : i32
    %c0_i32_1 = arith.constant 0 : i32
    return %arg0, %2, %c0_i32, %c0_i32_0 : i32, i32, i32, i32
  }
  func.func @transform_6(%arg0: i32, %arg1: i32) -> (i32, i32) {
    %c0_i32 = arith.constant 0 : i32
    %c0_i32_0 = arith.constant 0 : i32
    %c0_i32_1 = arith.constant 0 : i32
    return %c0_i32, %c0_i32_0 : i32, i32
  }
  func.func @transform_7(%arg0: i32, %arg1: i32) -> (i32, i32, i32) {
    %c0_i32 = arith.constant 0 : i32
    %c0_i32_0 = arith.constant 0 : i32
    %c0_i32_1 = arith.constant 0 : i32
    %c0_i32_2 = arith.constant 0 : i32
    return %c0_i32, %c0_i32_0, %c0_i32_1 : i32, i32, i32
  }
  func.func @transform_8(%arg0: i32, %arg1: i32) -> (i32, i32, i32) {
    %c0_i32 = arith.constant 0 : i32
    %c0_i32_0 = arith.constant 0 : i32
    %c0_i32_1 = arith.constant 0 : i32
    %c0_i32_2 = arith.constant 0 : i32
    return %c0_i32, %c0_i32_0, %c0_i32_1 : i32, i32, i32
  }
  func.func @transform_9(%arg0: i32, %arg1: i32) -> (i32, i32, i32, i32) {
    %c0_i32 = arith.constant 0 : i32
    %c0_i32_0 = arith.constant 0 : i32
    %c0_i32_1 = arith.constant 0 : i32
    return %arg0, %arg1, %c0_i32, %c0_i32_0 : i32, i32, i32, i32
  }
}

module attributes {stable_mosaic.version = 11 : i64} {
  func.func @kernel(%arg0: i32, %arg1: i32, %arg2: memref<1x4x16x8xbf16, #tpu.memory_space<vmem>>, %arg3: memref<1x1x16x8xbf16, #tpu.memory_space<vmem>>, %arg4: memref<1x1x16x8xbf16, #tpu.memory_space<vmem>>, %arg5: memref<1152x8xbf16, #tpu.memory_space<vmem>>, %arg6: memref<1x1x8xf32, #tpu.memory_space<vmem>>, %arg7: memref<1x1x8xf32, #tpu.memory_space<vmem>>, %arg8: memref<1x4x16x8xf32, #tpu.memory_space<vmem>>, %arg9: memref<6x18x8xbf16, #tpu.memory_space<vmem>>, %arg10: memref<4x16x1152xbf16, #tpu.memory_space<vmem>>) attributes {dimension_semantics = [#tpu.dimension_semantics<parallel>, #tpu.dimension_semantics<parallel>], iteration_bounds = array<i64: 2, 4>, scalar_prefetch = 0 : i64, scratch_operands = 2 : i64, tpu.core_type = #tpu.core_type<tc>, window_params = [{transform_indices = @transform_0, window_bounds = array<i64: 1, 4, 16, 8>}, {transform_indices = @transform_1, window_bounds = array<i64: 1, 1, 16, 8>}, {transform_indices = @transform_2, window_bounds = array<i64: 1, 1, 16, 8>}, {pipeline_mode = #tpu.pipeline_mode<synchronous>, transform_indices = @transform_3, window_bounds = array<i64: 1152, 8>}, {pipeline_mode = #tpu.pipeline_mode<synchronous>, transform_indices = @transform_4, window_bounds = array<i64: 1, 1, 8>}, {pipeline_mode = #tpu.pipeline_mode<synchronous>, transform_indices = @transform_5, window_bounds = array<i64: 1, 1, 8>}, {transform_indices = @transform_6, window_bounds = array<i64: 1, 4, 16, 8>}]} {
    %c0 = arith.constant 0 : index
    %c0_0 = arith.constant 0 : index
    %c0_1 = arith.constant 0 : index
    %c0_2 = arith.constant 0 : index
    %0 = vector.load %arg2[%c0, %c0_0, %c0_1, %c0_2] : memref<1x4x16x8xbf16, #tpu.memory_space<vmem>>, vector<1x4x16x8xbf16>
    %1 = vector.shape_cast %0 : vector<1x4x16x8xbf16> to vector<4x16x8xbf16>
    %c1 = arith.constant 1 : index
    %c1_3 = arith.constant 1 : index
    %c0_4 = arith.constant 0 : index
    %2 = vector.load %arg9[%c1, %c1_3, %c0_4] : memref<6x18x8xbf16, #tpu.memory_space<vmem>>, vector<4x16x8xbf16>
    tpu.vector_store %arg9[%c1, %c1_3, %c0_4], %1 {strides = array<i32>} : memref<6x18x8xbf16, #tpu.memory_space<vmem>>, vector<4x16x8xbf16>,
    %cst = arith.constant 0.000000e+00 : bf16
    %3 = vector.broadcast %cst : bf16 to vector<6x1x8xbf16>
    %c0_5 = arith.constant 0 : index
    %c0_6 = arith.constant 0 : index
    %c0_7 = arith.constant 0 : index
    %4 = vector.load %arg9[%c0_5, %c0_6, %c0_7] : memref<6x18x8xbf16, #tpu.memory_space<vmem>>, vector<6x1x8xbf16>
    tpu.vector_store %arg9[%c0_5, %c0_6, %c0_7], %3 {strides = array<i32>} : memref<6x18x8xbf16, #tpu.memory_space<vmem>>, vector<6x1x8xbf16>,
    %cst_8 = arith.constant 0.000000e+00 : bf16
    %5 = vector.broadcast %cst_8 : bf16 to vector<6x1x8xbf16>
    %c0_9 = arith.constant 0 : index
    %c17 = arith.constant 17 : index
    %c0_10 = arith.constant 0 : index
    %6 = vector.load %arg9[%c0_9, %c17, %c0_10] : memref<6x18x8xbf16, #tpu.memory_space<vmem>>, vector<6x1x8xbf16>
    tpu.vector_store %arg9[%c0_9, %c17, %c0_10], %5 {strides = array<i32>} : memref<6x18x8xbf16, #tpu.memory_space<vmem>>, vector<6x1x8xbf16>,
    %c0_i32 = arith.constant 0 : i32
    %7 = arith.cmpi sgt, %arg1, %c0_i32 : i32
    %8 = arith.extui %7 : i1 to i32
    %c0_i32_11 = arith.constant 0 : i32
    %9 = arith.cmpi ne, %8, %c0_i32_11 : i32
    scf.if %9 {
      %c0_80 = arith.constant 0 : index
      %c0_81 = arith.constant 0 : index
      %c0_82 = arith.constant 0 : index
      %c0_83 = arith.constant 0 : index
      %61 = vector.load %arg3[%c0_80, %c0_81, %c0_82, %c0_83] : memref<1x1x16x8xbf16, #tpu.memory_space<vmem>>, vector<1x1x16x8xbf16>
      %62 = vector.shape_cast %61 : vector<1x1x16x8xbf16> to vector<1x16x8xbf16>
      %c0_84 = arith.constant 0 : index
      %c1_85 = arith.constant 1 : index
      %c0_86 = arith.constant 0 : index
      %63 = vector.load %arg9[%c0_84, %c1_85, %c0_86] : memref<6x18x8xbf16, #tpu.memory_space<vmem>>, vector<1x16x8xbf16>
      tpu.vector_store %arg9[%c0_84, %c1_85, %c0_86], %62 {strides = array<i32>} : memref<6x18x8xbf16, #tpu.memory_space<vmem>>, vector<1x16x8xbf16>,
    } else {
    }
    %c0_i32_12 = arith.constant 0 : i32
    %10 = arith.cmpi eq, %arg1, %c0_i32_12 : i32
    %11 = arith.extui %10 : i1 to i32
    %c0_i32_13 = arith.constant 0 : i32
    %12 = arith.cmpi ne, %11, %c0_i32_13 : i32
    scf.if %12 {
      %cst_80 = arith.constant 0.000000e+00 : bf16
      %61 = vector.broadcast %cst_80 : bf16 to vector<1x16x8xbf16>
      %c0_81 = arith.constant 0 : index
      %c1_82 = arith.constant 1 : index
      %c0_83 = arith.constant 0 : index
      %62 = vector.load %arg9[%c0_81, %c1_82, %c0_83] : memref<6x18x8xbf16, #tpu.memory_space<vmem>>, vector<1x16x8xbf16>
      tpu.vector_store %arg9[%c0_81, %c1_82, %c0_83], %61 {strides = array<i32>} : memref<6x18x8xbf16, #tpu.memory_space<vmem>>, vector<1x16x8xbf16>,
    } else {
    }
    %c3_i32 = arith.constant 3 : i32
    %13 = arith.cmpi slt, %arg1, %c3_i32 : i32
    %14 = arith.extui %13 : i1 to i32
    %c0_i32_14 = arith.constant 0 : i32
    %15 = arith.cmpi ne, %14, %c0_i32_14 : i32
    scf.if %15 {
      %c0_80 = arith.constant 0 : index
      %c0_81 = arith.constant 0 : index
      %c0_82 = arith.constant 0 : index
      %c0_83 = arith.constant 0 : index
      %61 = vector.load %arg4[%c0_80, %c0_81, %c0_82, %c0_83] : memref<1x1x16x8xbf16, #tpu.memory_space<vmem>>, vector<1x1x16x8xbf16>
      %62 = vector.shape_cast %61 : vector<1x1x16x8xbf16> to vector<1x16x8xbf16>
      %c5 = arith.constant 5 : index
      %c1_84 = arith.constant 1 : index
      %c0_85 = arith.constant 0 : index
      %63 = vector.load %arg9[%c5, %c1_84, %c0_85] : memref<6x18x8xbf16, #tpu.memory_space<vmem>>, vector<1x16x8xbf16>
      tpu.vector_store %arg9[%c5, %c1_84, %c0_85], %62 {strides = array<i32>} : memref<6x18x8xbf16, #tpu.memory_space<vmem>>, vector<1x16x8xbf16>,
    } else {
    }
    %c3_i32_15 = arith.constant 3 : i32
    %16 = arith.cmpi eq, %arg1, %c3_i32_15 : i32
    %17 = arith.extui %16 : i1 to i32
    %c0_i32_16 = arith.constant 0 : i32
    %18 = arith.cmpi ne, %17, %c0_i32_16 : i32
    scf.if %18 {
      %cst_80 = arith.constant 0.000000e+00 : bf16
      %61 = vector.broadcast %cst_80 : bf16 to vector<1x16x8xbf16>
      %c5 = arith.constant 5 : index
      %c1_81 = arith.constant 1 : index
      %c0_82 = arith.constant 0 : index
      %62 = vector.load %arg9[%c5, %c1_81, %c0_82] : memref<6x18x8xbf16, #tpu.memory_space<vmem>>, vector<1x16x8xbf16>
      tpu.vector_store %arg9[%c5, %c1_81, %c0_82], %61 {strides = array<i32>} : memref<6x18x8xbf16, #tpu.memory_space<vmem>>, vector<1x16x8xbf16>,
    } else {
    }
    %cst_17 = arith.constant 0.000000e+00 : bf16
    %19 = vector.broadcast %cst_17 : bf16 to vector<4x16x120xbf16>
    %c0_18 = arith.constant 0 : index
    %c0_19 = arith.constant 0 : index
    %c0_20 = arith.constant 0 : index
    %20 = vector.load %arg9[%c0_18, %c0_19, %c0_20] : memref<6x18x8xbf16, #tpu.memory_space<vmem>>, vector<4x16x8xbf16>
    %21 = tpu.concatenate %20, %19 in 2 : vector<4x16x8xbf16>, vector<4x16x120xbf16> -> vector<4x16x128xbf16>
    %c0_21 = arith.constant 0 : index
    %c0_22 = arith.constant 0 : index
    %c0_23 = arith.constant 0 : index
    %22 = vector.load %arg10[%c0_21, %c0_22, %c0_23] : memref<4x16x1152xbf16, #tpu.memory_space<vmem>>, vector<4x16x128xbf16>
    tpu.vector_store %arg10[%c0_21, %c0_22, %c0_23], %21 {strides = array<i32>} : memref<4x16x1152xbf16, #tpu.memory_space<vmem>>, vector<4x16x128xbf16>,
    %c0_24 = arith.constant 0 : index
    %c1_25 = arith.constant 1 : index
    %c0_26 = arith.constant 0 : index
    %23 = vector.load %arg9[%c0_24, %c1_25, %c0_26] : memref<6x18x8xbf16, #tpu.memory_space<vmem>>, vector<4x16x8xbf16>
    %24 = tpu.concatenate %23, %19 in 2 : vector<4x16x8xbf16>, vector<4x16x120xbf16> -> vector<4x16x128xbf16>
    %c0_27 = arith.constant 0 : index
    %c0_28 = arith.constant 0 : index
    %c128 = arith.constant 128 : index
    %25 = vector.load %arg10[%c0_27, %c0_28, %c128] : memref<4x16x1152xbf16, #tpu.memory_space<vmem>>, vector<4x16x128xbf16>
    tpu.vector_store %arg10[%c0_27, %c0_28, %c128], %24 {strides = array<i32>} : memref<4x16x1152xbf16, #tpu.memory_space<vmem>>, vector<4x16x128xbf16>,
    %c0_29 = arith.constant 0 : index
    %c2 = arith.constant 2 : index
    %c0_30 = arith.constant 0 : index
    %26 = vector.load %arg9[%c0_29, %c2, %c0_30] : memref<6x18x8xbf16, #tpu.memory_space<vmem>>, vector<4x16x8xbf16>
    %27 = tpu.concatenate %26, %19 in 2 : vector<4x16x8xbf16>, vector<4x16x120xbf16> -> vector<4x16x128xbf16>
    %c0_31 = arith.constant 0 : index
    %c0_32 = arith.constant 0 : index
    %c256 = arith.constant 256 : index
    %28 = vector.load %arg10[%c0_31, %c0_32, %c256] : memref<4x16x1152xbf16, #tpu.memory_space<vmem>>, vector<4x16x128xbf16>
    tpu.vector_store %arg10[%c0_31, %c0_32, %c256], %27 {strides = array<i32>} : memref<4x16x1152xbf16, #tpu.memory_space<vmem>>, vector<4x16x128xbf16>,
    %c1_33 = arith.constant 1 : index
    %c0_34 = arith.constant 0 : index
    %c0_35 = arith.constant 0 : index
    %29 = vector.load %arg9[%c1_33, %c0_34, %c0_35] : memref<6x18x8xbf16, #tpu.memory_space<vmem>>, vector<4x16x8xbf16>
    %30 = tpu.concatenate %29, %19 in 2 : vector<4x16x8xbf16>, vector<4x16x120xbf16> -> vector<4x16x128xbf16>
    %c0_36 = arith.constant 0 : index
    %c0_37 = arith.constant 0 : index
    %c384 = arith.constant 384 : index
    %31 = vector.load %arg10[%c0_36, %c0_37, %c384] : memref<4x16x1152xbf16, #tpu.memory_space<vmem>>, vector<4x16x128xbf16>
    tpu.vector_store %arg10[%c0_36, %c0_37, %c384], %30 {strides = array<i32>} : memref<4x16x1152xbf16, #tpu.memory_space<vmem>>, vector<4x16x128xbf16>,
    %c1_38 = arith.constant 1 : index
    %c1_39 = arith.constant 1 : index
    %c0_40 = arith.constant 0 : index
    %32 = vector.load %arg9[%c1_38, %c1_39, %c0_40] : memref<6x18x8xbf16, #tpu.memory_space<vmem>>, vector<4x16x8xbf16>
    %33 = tpu.concatenate %32, %19 in 2 : vector<4x16x8xbf16>, vector<4x16x120xbf16> -> vector<4x16x128xbf16>
    %c0_41 = arith.constant 0 : index
    %c0_42 = arith.constant 0 : index
    %c512 = arith.constant 512 : index
    %34 = vector.load %arg10[%c0_41, %c0_42, %c512] : memref<4x16x1152xbf16, #tpu.memory_space<vmem>>, vector<4x16x128xbf16>
    tpu.vector_store %arg10[%c0_41, %c0_42, %c512], %33 {strides = array<i32>} : memref<4x16x1152xbf16, #tpu.memory_space<vmem>>, vector<4x16x128xbf16>,
    %c1_43 = arith.constant 1 : index
    %c2_44 = arith.constant 2 : index
    %c0_45 = arith.constant 0 : index
    %35 = vector.load %arg9[%c1_43, %c2_44, %c0_45] : memref<6x18x8xbf16, #tpu.memory_space<vmem>>, vector<4x16x8xbf16>
    %36 = tpu.concatenate %35, %19 in 2 : vector<4x16x8xbf16>, vector<4x16x120xbf16> -> vector<4x16x128xbf16>
    %c0_46 = arith.constant 0 : index
    %c0_47 = arith.constant 0 : index
    %c640 = arith.constant 640 : index
    %37 = vector.load %arg10[%c0_46, %c0_47, %c640] : memref<4x16x1152xbf16, #tpu.memory_space<vmem>>, vector<4x16x128xbf16>
    tpu.vector_store %arg10[%c0_46, %c0_47, %c640], %36 {strides = array<i32>} : memref<4x16x1152xbf16, #tpu.memory_space<vmem>>, vector<4x16x128xbf16>,
    %c2_48 = arith.constant 2 : index
    %c0_49 = arith.constant 0 : index
    %c0_50 = arith.constant 0 : index
    %38 = vector.load %arg9[%c2_48, %c0_49, %c0_50] : memref<6x18x8xbf16, #tpu.memory_space<vmem>>, vector<4x16x8xbf16>
    %39 = tpu.concatenate %38, %19 in 2 : vector<4x16x8xbf16>, vector<4x16x120xbf16> -> vector<4x16x128xbf16>
    %c0_51 = arith.constant 0 : index
    %c0_52 = arith.constant 0 : index
    %c768 = arith.constant 768 : index
    %40 = vector.load %arg10[%c0_51, %c0_52, %c768] : memref<4x16x1152xbf16, #tpu.memory_space<vmem>>, vector<4x16x128xbf16>
    tpu.vector_store %arg10[%c0_51, %c0_52, %c768], %39 {strides = array<i32>} : memref<4x16x1152xbf16, #tpu.memory_space<vmem>>, vector<4x16x128xbf16>,
    %c2_53 = arith.constant 2 : index
    %c1_54 = arith.constant 1 : index
    %c0_55 = arith.constant 0 : index
    %41 = vector.load %arg9[%c2_53, %c1_54, %c0_55] : memref<6x18x8xbf16, #tpu.memory_space<vmem>>, vector<4x16x8xbf16>
    %42 = tpu.concatenate %41, %19 in 2 : vector<4x16x8xbf16>, vector<4x16x120xbf16> -> vector<4x16x128xbf16>
    %c0_56 = arith.constant 0 : index
    %c0_57 = arith.constant 0 : index
    %c896 = arith.constant 896 : index
    %43 = vector.load %arg10[%c0_56, %c0_57, %c896] : memref<4x16x1152xbf16, #tpu.memory_space<vmem>>, vector<4x16x128xbf16>
    tpu.vector_store %arg10[%c0_56, %c0_57, %c896], %42 {strides = array<i32>} : memref<4x16x1152xbf16, #tpu.memory_space<vmem>>, vector<4x16x128xbf16>,
    %c2_58 = arith.constant 2 : index
    %c2_59 = arith.constant 2 : index
    %c0_60 = arith.constant 0 : index
    %44 = vector.load %arg9[%c2_58, %c2_59, %c0_60] : memref<6x18x8xbf16, #tpu.memory_space<vmem>>, vector<4x16x8xbf16>
    %45 = tpu.concatenate %44, %19 in 2 : vector<4x16x8xbf16>, vector<4x16x120xbf16> -> vector<4x16x128xbf16>
    %c0_61 = arith.constant 0 : index
    %c0_62 = arith.constant 0 : index
    %c1024 = arith.constant 1024 : index
    %46 = vector.load %arg10[%c0_61, %c0_62, %c1024] : memref<4x16x1152xbf16, #tpu.memory_space<vmem>>, vector<4x16x128xbf16>
    tpu.vector_store %arg10[%c0_61, %c0_62, %c1024], %45 {strides = array<i32>} : memref<4x16x1152xbf16, #tpu.memory_space<vmem>>, vector<4x16x128xbf16>,
    %c0_63 = arith.constant 0 : index
    %c0_64 = arith.constant 0 : index
    %c0_65 = arith.constant 0 : index
    %47 = vector.load %arg10[%c0_63, %c0_64, %c0_65] : memref<4x16x1152xbf16, #tpu.memory_space<vmem>>, vector<4x16x1152xbf16>
    %c0_66 = arith.constant 0 : index
    %c0_67 = arith.constant 0 : index
    %48 = vector.load %arg5[%c0_66, %c0_67] : memref<1152x8xbf16, #tpu.memory_space<vmem>>, vector<1152x8xbf16>
    "tpu.trace_start"() <{level = 10 : i32, message = "rwk,kc->rwc"}> : () -> ()
    %cst_68 = arith.constant dense<0.000000e+00> : vector<4x16x8xf32>
    %49 = tpu.matmul %47, %48, %cst_68 {dimension_numbers = #tpu.dot_dimension_numbers<[2], [0], [0, 1], [1], [0, 0, 0, 1, 1, 1], [], []>} : vector<4x16x1152xbf16>, vector<1152x8xbf16>, vector<4x16x8xf32> -> vector<4x16x8xf32>
    "tpu.trace_stop"() : () -> ()
    %c0_69 = arith.constant 0 : index
    %c0_70 = arith.constant 0 : index
    %c0_71 = arith.constant 0 : index
    %50 = vector.load %arg6[%c0_69, %c0_70, %c0_71] : memref<1x1x8xf32, #tpu.memory_space<vmem>>, vector<1x1x8xf32>
    %51 = vector.broadcast %50 : vector<1x1x8xf32> to vector<4x16x8xf32>
    %52 = arith.mulf %49, %51 : vector<4x16x8xf32>
    %c0_72 = arith.constant 0 : index
    %c0_73 = arith.constant 0 : index
    %c0_74 = arith.constant 0 : index
    %53 = vector.load %arg7[%c0_72, %c0_73, %c0_74] : memref<1x1x8xf32, #tpu.memory_space<vmem>>, vector<1x1x8xf32>
    %54 = vector.broadcast %53 : vector<1x1x8xf32> to vector<4x16x8xf32>
    %55 = arith.addf %52, %54 : vector<4x16x8xf32>
    %cst_75 = arith.constant 0.000000e+00 : f32
    %56 = vector.broadcast %cst_75 : f32 to vector<4x16x8xf32>
    %57 = arith.maximumf %55, %56 : vector<4x16x8xf32>
    %c0_76 = arith.constant 0 : index
    %c0_77 = arith.constant 0 : index
    %c0_78 = arith.constant 0 : index
    %c0_79 = arith.constant 0 : index
    %58 = vector.load %arg8[%c0_76, %c0_77, %c0_78, %c0_79] : memref<1x4x16x8xf32, #tpu.memory_space<vmem>>, vector<1x4x16x8xf32>
    %59 = vector.shape_cast %58 : vector<1x4x16x8xf32> to vector<4x16x8xf32>
    %60 = vector.shape_cast %57 : vector<4x16x8xf32> to vector<1x4x16x8xf32>
    tpu.vector_store %arg8[%c0_76, %c0_77, %c0_78, %c0_79], %60 {strides = array<i32>} : memref<1x4x16x8xf32, #tpu.memory_space<vmem>>, vector<1x4x16x8xf32>,
    return
  }
  func.func @transform_0(%arg0: i32, %arg1: i32) -> (i32, i32, i32, i32) {
    %c0_i32 = arith.constant 0 : i32
    %c0_i32_0 = arith.constant 0 : i32
    %c0_i32_1 = arith.constant 0 : i32
    return %arg0, %arg1, %c0_i32, %c0_i32_0 : i32, i32, i32, i32
  }
  func.func @transform_1(%arg0: i32, %arg1: i32) -> (i32, i32, i32, i32) {
    %c4_i32 = arith.constant 4 : i32
    %0 = arith.muli %arg1, %c4_i32 : i32
    %c1_i32 = arith.constant 1 : i32
    %1 = arith.subi %0, %c1_i32 : i32
    %c0_i32 = arith.constant 0 : i32
    %2 = arith.maxsi %1, %c0_i32 : i32
    %c0_i32_0 = arith.constant 0 : i32
    %c0_i32_1 = arith.constant 0 : i32
    %c0_i32_2 = arith.constant 0 : i32
    return %arg0, %2, %c0_i32_0, %c0_i32_1 : i32, i32, i32, i32
  }
  func.func @transform_2(%arg0: i32, %arg1: i32) -> (i32, i32, i32, i32) {
    %c1_i32 = arith.constant 1 : i32
    %0 = arith.addi %arg1, %c1_i32 : i32
    %c4_i32 = arith.constant 4 : i32
    %1 = arith.muli %0, %c4_i32 : i32
    %c15_i32 = arith.constant 15 : i32
    %2 = arith.minsi %1, %c15_i32 : i32
    %c0_i32 = arith.constant 0 : i32
    %c0_i32_0 = arith.constant 0 : i32
    %c0_i32_1 = arith.constant 0 : i32
    return %arg0, %2, %c0_i32, %c0_i32_0 : i32, i32, i32, i32
  }
  func.func @transform_3(%arg0: i32, %arg1: i32) -> (i32, i32) {
    %c0_i32 = arith.constant 0 : i32
    %c0_i32_0 = arith.constant 0 : i32
    %c0_i32_1 = arith.constant 0 : i32
    return %c0_i32, %c0_i32_0 : i32, i32
  }
  func.func @transform_4(%arg0: i32, %arg1: i32) -> (i32, i32, i32) {
    %c0_i32 = arith.constant 0 : i32
    %c0_i32_0 = arith.constant 0 : i32
    %c0_i32_1 = arith.constant 0 : i32
    %c0_i32_2 = arith.constant 0 : i32
    return %c0_i32, %c0_i32_0, %c0_i32_1 : i32, i32, i32
  }
  func.func @transform_5(%arg0: i32, %arg1: i32) -> (i32, i32, i32) {
    %c0_i32 = arith.constant 0 : i32
    %c0_i32_0 = arith.constant 0 : i32
    %c0_i32_1 = arith.constant 0 : i32
    %c0_i32_2 = arith.constant 0 : i32
    return %c0_i32, %c0_i32_0, %c0_i32_1 : i32, i32, i32
  }
  func.func @transform_6(%arg0: i32, %arg1: i32) -> (i32, i32, i32, i32) {
    %c0_i32 = arith.constant 0 : i32
    %c0_i32_0 = arith.constant 0 : i32
    %c0_i32_1 = arith.constant 0 : i32
    return %arg0, %arg1, %c0_i32, %c0_i32_0 : i32, i32, i32, i32
  }
}

</mosaic_0001>

<bundles_post_ra>
// kernel: tile.10
= control target key start
LH: loop header
LB: loop body
LE: loop exit
PB: predicated region body
PF: predicated region fallthrough
CT: control target
= control target key end

     0   :  { %s28_s0 = inlined_call_operand.vmem [shape: f32[4], index: 0, kind: input, shape index: {}]   ;;  %s29_s1 = inlined_call_operand.vmem [shape: f32[2,1,2,1,1,4], index: 1, kind: output, shape index: {}]  }
   0x1   :  { %v4_v0 = vld [vmem:[%s28_s0] ss:$0 sm:$0xff] }
   0x2   :  { %5 = vst [vmem:[%s29_s1] sm:$0x3] %v4_v0  ;;  %8 = vst [vmem:[%s29_s1 + $0x2] sm:$0x3] %v4_v0 }

// kernel: tile.11
= control target key start
LH: loop header
LB: loop body
LE: loop exit
PB: predicated region body
PF: predicated region fallthrough
CT: control target
= control target key end

     0   :  { %s109_s0 = inlined_call_operand.vmem [shape: f32[2,1,2,1,1,4], index: 0, kind: input, shape index: {}]   ;;  %s110_s1 = inlined_call_operand.hbm [shape: f32[1,1,16], index: 1, kind: output, shape index: {}]  }
   0x1   :  { %v48_v0 = vld [vmem:[%s109_s0 + $0x2] sm:$0x3]  ;;  %v9_v1 = vld [vmem:[%s109_s0] sm:$0x3] }
   0x2   :  { %8 = vst [vmem:[#allocation3 + $0x8] sm:$0x3] %v48_v0  ;;  %10 = vst [vmem:[#allocation3] sm:$0x3] %v9_v1 }
   0x3   :  { %2 = vsyncpa [#allocation1], 0  ;;  %vm12_vm0 = vcmask 31744   ;;  %s77_s0 = smov 12   ;;  %s78_s10 = smov 4   ;;  %vm18_vm1 = vcmask 130144  }
   0x4   :  { %s79_s11 = smov 8   ;;  %vm24_vm2 = vcmask 97344   ;;  %vm30_vm3 = vcmask 64544   ;;  %s80_s12 = smov [#allocation0]  }
   0x5   :  { %s42_s13 = sshll.u32 %s80_s12, 4  ;;  %s43_s13 = int_to_ptr.vmem [resolvable:$true] %s42_s13 }
   0x6   :  { %s53_s14 = scalar_lea.vmem %s43_s13, 16  ;;  %s57_s15 = scalar_lea.vmem %s43_s13, 32 }
   0x7   :  { %p54_p0 = scmp.ne.s32.totalorder %s43_s13, %s53_s14  ;;  %p58_p1 = scmp.lt.s32.totalorder %s43_s13, %s43_s13 }
   0x8   :  { %p59_p2 = scmp.lt.s32.totalorder %s57_s15, %s53_s14 }
   0x9   :  { %v15_v2 = vld [vmem:[#allocation3 + $0x9] sm:$0x1]   ;;  %v27_v3 = vld [vmem:[#allocation3 + $0x1] sm:$0x1]   ;;  %v11_v4 = vld [vmem:[#allocation3] sm:$0x1]  }
   0xa   :  { %16 = vrot.lane.b32.xlu0 %v15_v2, %s77_s0  ;;  %28 = vrot.lane.b32.xlu1 %v27_v3, %s78_s10  ;;  %v21_v5 = vld [vmem:[#allocation3 + $0x8] sm:$0x1]   ;;  %13 = vst.msk [vmem:[#allocation2] sm:$0x1] %vm12_vm0, %v11_v4   ;;  %p60_p3 = por %p59_p2, %p58_p1 }
   0xc   :  { %p61_p4 = pnand %p60_p3, %p54_p0 }
   0xe   :  { %22 = vrot.lane.b32.xlu0 %v21_v5, %s79_s11 }
  0x7c   :  { %v17_v6 = vpop.permute.xlu0 %16   ;;  %v29_v7 = vpop.permute.xlu1 %28  }
  0x7d   :  { %19 = vst.msk [vmem:[#allocation2] sm:$0x1] %vm18_vm1, %v17_v6  }
  0x80   :  { %v23_v8 = vpop.permute.xlu0 %22  }
  0x81   :  { %25 = vst.msk [vmem:[#allocation2] sm:$0x1] %vm24_vm2, %v23_v8  }
  0x82   :  { %31 = vst.msk [vmem:[#allocation2] sm:$0x1] %vm30_vm3, %v29_v7  }
  0x89   :  { %v35_v9 = vld [vmem:[#allocation2] sm:$0x1] }
  0x8a   :  { %37 = vst [vmem:[#allocation0] sm:$0x1] %v35_v9 }
  0x8b   :  { %64 = shalt.err (!%p61_p4)
}
  0x8c   :  { %s65_s18 = scalar_lea.hbm %s110_s1, 16 }
  0x8d   :  { %p66_p5 = scmp.ne.s32.totalorder %s110_s1, %s65_s18  ;;  %p69_p6 = scmp.lt.u32.totalorder %s65_s18, %s110_s1 }
  0x8f   :  { %p71_p7 = pnand %p69_p6, %p66_p5 }
  0x91   :  { %74 = shalt.err (!%p71_p7)
}
  0x92   :  { %45 = dma.vmem_to_hbm [thread:$0]  %s43_s13, 16, %s110_s1, [#allocation1]  }
  0x93   :  { %75 = dma.done.wait [#allocation1], 16  }
  0x94   :  { %76 = vsyncadd [#allocation1], 4294967280 }
  0x95   :  { %47 = vsyncpa [#allocation1], 1 }

// kernel: upsampling_block_forward.3
= control target key start
LH: loop header
LB: loop body
LE: loop exit
PB: predicated region body
PF: predicated region fallthrough
CT: control target
= control target key end

     0   :  { %s1239_s0 = inlined_call_operand.hbm [shape: bf16[2,8,8,8], index: 0, kind: input, shape index: {}]   ;;  %s1240_s1 = inlined_call_operand.hbm [shape: bf16[8,16], index: 1, kind: input, shape index: {}]   ;;  %s1241_s2 = inlined_call_operand.hbm [shape: f32[1,1,16], index: 2, kind: input, shape index: {}]   ;;  %s1242_s3 = inlined_call_operand.hbm [shape: f32[1,1,16], index: 3, kind: input, shape index: {}]   ;;  %s1243_s4 = inlined_call_operand.hbm [shape: bf16[2,8,2,8,8], index: 4, kind: output, shape index: {}]  }
   0x1   :  { %1251 = sst [smem:[#allocation18_spill]] %s1240_s1 }
   0x2   :  { %1252 = sst [smem:[#allocation19_spill]] %s1241_s2 }
   0x3   :  { %1253 = sst [smem:[#allocation20_spill]] %s1242_s3 }
   0x4   :  { %9 = vsyncpa [#allocation3], 0 }
   0x5   :  { %11 = vsyncpa [#allocation3 + $0x1], 0 }
   0x6   :  { %12 = vsyncpa [#allocation6], 0 }
   0x7   :  { %13 = vsyncpa [#allocation9], 0 }
   0x8   :  { %14 = vsyncpa [#allocation4], 0 }
   0x9   :  { %16 = vsyncpa [#allocation4 + $0x1], 0  ;;  %s927_s15 = smov 0   ;;  %s929_s16 = smov 0  }
   0xa   :  { %s931_s17 = smov 0   ;;  %s933_s18 = smov 0  }
   0xb   :  { %s935_s19 = smov 0   ;;  %s937_s20 = smov 0  }
   0xc   :  { %s939_s21 = smov 0   ;;  %s941_s22 = smov 0  }
   0xd LB: > { %s508_s23 = sadd.s32 4294967295, %s888_s22   ;;  %s509_s24 = sadd.s32 4294967294, %s888_s22   ;;  %s888_s22 = sphi %s941_s22, %s22_s22   ;;  %s884_s21 = sphi %s939_s21, %s1284_s21   ;;  %s880_s20 = sphi %s937_s20, %s1283_s20   ;;  %s876_s19 = sphi %s935_s19, %s1282_s19   ;;  %s872_s18 = sphi %s933_s18, %s1281_s18   ;;  %s868_s17 = sphi %s931_s17, %s1280_s17   ;;  %s864_s16 = sphi %s929_s16, %s1279_s16   ;;  %s860_s15 = sphi %s927_s15, %s1278_s15  }
   0xe   : > { %p56_p0 = scmp.ne.s32.totalorder %s864_s16, %s860_s15  ;;  %p971_p1 = scmp.eq.s32.totalorder %s508_s23, 0 }
   0xf   : > { %p975_p2 = scmp.eq.s32.totalorder %s508_s23, 7  ;;  %p151_p3 = scmp.eq.s32.totalorder %s509_s24, 7 }
  0x10   : > { %s1254_s25 = scalar_select %p971_p1, 1, 0 }
  0x11   : > { %s1255_s26 = scalar_select %p975_p2, 1, 0 }
  0x12   : > { %p981_p4 = por %p971_p1, %p56_p0  ;;  %p510_p5 = scmp.ge.s32.totalorder %s888_s22, 1 }
  0x13   : > { %p986_p6 = por %p151_p3, %p56_p0  ;;  %p158_p7 = scmp.lt.s32.totalorder %s888_s22, 9 }
  0x14   : > { %s1256_s27 = scalar_select %p981_p4, 1, 0 }
  0x15   : > { %s1257_s28 = scalar_select %p986_p6, 1, 0 }
  0x16   : > { %p991_p8 = pnand %p510_p5, %p158_p7  ;;  %s890_s30 = smov [#allocation5]  }
  0x17   : > { %1258 = sst [smem:[#allocation15_spill]] %s1257_s28  ;;  %s171_s5 = sshll.u32 %s890_s30, 4  ;;  %s172_s5 = int_to_ptr.vmem [resolvable:$true] %s171_s5 }
  0x18   : > { %s1259_s29 = scalar_select %p991_p8, 1, 0 }
  0x19   : > { %p567_p9 = pneg %p991_p8  ;;  %s891_s6 = smov [#allocation7]  }
  0x1a   : > { %s182_s7 = sshll.u32 %s891_s6, 4  ;;  %s892_s9 = smov [#allocation8]   ;;  %s1003_s7 = int_to_ptr.vmem [resolvable:$true] %s182_s7 }
  0x1b   : > { %p999_p10 = pnand %p567_p9, %p971_p1  ;;  %s193_s10 = sshll.u32 %s892_s9, 4  ;;  %s1005_s10 = int_to_ptr.vmem [resolvable:$true] %s193_s10 }
  0x1c   : > { %s1261_s1 = sld [smem:[#allocation18_spill]] }
  0x1d   : > { %p1015_p12 = pneg %p999_p10 }
  0x22   : > { %s668_s13 = scalar_lea.hbm %s1261_s1, 64 }
  0x23   : > { %p669_p11 = scmp.ne.s32.totalorder %s1261_s1, %s668_s13  ;;  %p675_p3 = scmp.lt.u32.totalorder %s668_s13, %s1261_s1 }
  0x25   : > { %p671_p13 = pnand %p1015_p12, %p669_p11 }
  0x27   : > { %p672_p0 = pneg %p671_p13 }
  0x29   : > { %p677_p5 = pnand %p675_p3, %p672_p0 }
  0x2b   : > { %680 = shalt.err (!%p677_p5)
}
  0x2c   : > { %s681_s9 = scalar_lea.vmem %s172_s5, 64  ;;  %p689_p1 = scmp.lt.s32.totalorder %s172_s5, %s172_s5 }
  0x2d   : > { %p682_p7 = scmp.ne.s32.totalorder %s172_s5, %s681_s9  ;;  %p690_p4 = scmp.lt.s32.totalorder %s681_s9, %s681_s9 }
  0x2f   : > { %p684_p9 = pnand %p682_p7, %p1015_p12  ;;  %p691_p8 = por %p690_p4, %p689_p1 }
  0x31   : > { %p685_p6 = pneg %p684_p9 }
  0x33   : > { %p692_p2 = pnand %p691_p8, %p685_p6 }
  0x35   : > { %695 = shalt.err (!%p692_p2)
}
  0x36   : > { %570 = dma.hbm_to_vmem [thread:$0]  (!%p999_p10), %s1261_s1, 64, %s172_s5, [#allocation6]  }
  0x37   : > { %s1263_s2 = sld [smem:[#allocation19_spill]] }
  0x3d   : > { %s696_s23 = scalar_lea.hbm %s1263_s2, 16 }
  0x3e   : > { %p697_p11 = scmp.ne.s32.totalorder %s1263_s2, %s696_s23  ;;  %p703_p2 = scmp.lt.u32.totalorder %s696_s23, %s1263_s2 }
  0x40   : > { %p699_p13 = pnand %p697_p11, %p1015_p12 }
  0x42   : > { %p700_p1 = pneg %p699_p13 }
  0x44   : > { %p705_p4 = pnand %p703_p2, %p700_p1 }
  0x46   : > { %708 = shalt.err (!%p705_p4)
}
  0x47   : > { %s709_s5 = scalar_lea.vmem %s1003_s7, 16  ;;  %s716_s11 = scalar_lea.vmem %s1003_s7, 32 }
  0x48   : > { %p710_p6 = scmp.ne.s32.totalorder %s1003_s7, %s709_s5  ;;  %p717_p3 = scmp.lt.s32.totalorder %s1003_s7, %s1003_s7 }
  0x49   : > { %p718_p5 = scmp.lt.s32.totalorder %s716_s11, %s709_s5 }
  0x4a   : > { %p712_p8 = pnand %p710_p6, %p1015_p12 }
  0x4b   : > { %p719_p7 = por %p718_p5, %p717_p3 }
  0x4c   : > { %p713_p0 = pneg %p712_p8 }
  0x4e   : > { %p720_p9 = pnand %p719_p7, %p713_p0 }
  0x50   : > { %723 = shalt.err (!%p720_p9)
}
  0x51   : > { %573 = dma.hbm_to_vmem [thread:$0]  (!%p999_p10), %s1263_s2, 16, %s1003_s7, [#allocation6]  }
  0x52   : > { %s1264_s3 = sld [smem:[#allocation20_spill]] }
  0x58   : > { %s724_s23 = scalar_lea.hbm %s1264_s3, 16 }
  0x59   : > { %p725_p11 = scmp.ne.s32.totalorder %s1264_s3, %s724_s23  ;;  %p731_p2 = scmp.lt.u32.totalorder %s724_s23, %s1264_s3 }
  0x5b   : > { %p727_p13 = pnand %p725_p11, %p1015_p12 }
  0x5d   : > { %p728_p1 = pneg %p727_p13 }
  0x5f   : > { %p733_p4 = pnand %p731_p2, %p728_p1 }
  0x61   : > { %736 = shalt.err (!%p733_p4)
}
  0x62   : > { %s737_s7 = scalar_lea.vmem %s1005_s10, 16  ;;  %s744_s11 = scalar_lea.vmem %s1005_s10, 32 }
  0x63   : > { %p738_p6 = scmp.ne.s32.totalorder %s1005_s10, %s737_s7  ;;  %p745_p3 = scmp.lt.s32.totalorder %s1005_s10, %s1005_s10 }
  0x64   : > { %p746_p5 = scmp.lt.s32.totalorder %s744_s11, %s737_s7 }
  0x65   : > { %p740_p8 = pnand %p738_p6, %p1015_p12 }
  0x66   : > { %p747_p7 = por %p746_p5, %p745_p3 }
  0x67   : > { %p741_p0 = pneg %p740_p8 }
  0x69   : > { %p748_p9 = pnand %p747_p7, %p741_p0 }
  0x6b   : > { %751 = shalt.err (!%p748_p9)
}
  0x6c   : > { %576 = dma.hbm_to_vmem [thread:$0]  (!%p999_p10), %s1264_s3, 16, %s1005_s10, [#allocation9]  }
  0x6d   : > { %s31_s24 = sadd.s32 1, %s880_s20  ;;  %s34_s8 = sadd.s32 1, %s884_s21 }
  0x6e   : > { %p32_p12 = scmp.ge.s32.totalorder %s31_s24, 4  ;;  %s43_s13 = sadd.s32 1, %s868_s17 }
  0x6f   : > { %p50_p11 = scmp.ne.s32.totalorder %s868_s17, %s864_s16  ;;  %p51_p13 = scmp.eq.s32.totalorder %s888_s22, 0 }
  0x70   : > { %s1286_s24 = smov (%p32_p12, %s31_s24), 0  ;;  %s1288_s8 = smov (!%p32_p12, %s34_s8), %s884_s21 }
  0x71   : > { %1265 = sst [smem:[#allocation16_spill]] %s1286_s24  ;;  %s39_s14 = ssub.s32 %s880_s20, %s1286_s24 }
  0x72   : > { %p36_p1 = scmp.ge.s32.totalorder %s1288_s8, 2  ;;  %p1266_p2 = scmp.ne.s32.totalorder %s1255_s26, 0 }
  0x73   : > { %p1096_p10 = por %p51_p13, %p50_p11  ;;  %p588_p6 = scmp.lt.s32.totalorder %s888_s22, 8 }
  0x74   : > { %p1092_p4 = por %p1266_p2, %p50_p11  ;;  %s1290_s8 = smov (%p36_p1, %s1288_s8), 0 }
  0x75   : > { %1269 = sst [smem:[#allocation17_spill]] %s1290_s8  ;;  %s204_s30 = sand.u32 1, %s868_s17  }
  0x76   : > { %s516_s6 = sshll.u32 %s880_s20, 1  ;;  %s38_s9 = ssub.s32 %s884_s21, %s1290_s8 }
  0x77   : > { %s40_s5 = sor.u32 %s39_s14, %s38_s9  ;;  %s515_s7 = sshll.u32 %s204_s30, 3 }
  0x78   : > { %p41_p8 = scmp.eq.s32.totalorder %s40_s5, 0  ;;  %s517_s26 = sshll.u32 %s884_s21, 3 }
  0x79   : > { %s208_s11 = scalar_lea.vmem [#allocation2], %s515_s7  ;;  %s214_s1 = sadd.s32 %s517_s26, %s516_s6 }
  0x7a   : > { %s217_s28 = sshll.u32 %s208_s11, 4  ;;  %s518_s2 = sshll.u32 %s214_s1, 6  ;;  %s1111_s28 = int_to_ptr.vmem [resolvable:$true] %s217_s28 }
  0x7b   : > { %s1109_s12 = scalar_select %p41_p8, %s868_s17, %s43_s13  }
  0x7c   : > { %p1117_p0 = pnand %p588_p6, %p1096_p10  ;;  %s1124_s14 = scalar_lea.hbm %s1239_s0, %s518_s2 }
  0x7d   : > { %s1126_s13 = scalar_lea.sflag [#allocation3], %s204_s30  ;;  %s752_s1 = scalar_lea.hbm %s1124_s14, 128 }
  0x7e   : > { %p753_p3 = scmp.ne.s32.totalorder %s1124_s14, %s752_s1  ;;  %p754_p5 = pneg %p1117_p0 }
  0x7f   : > { %s757_s8 = scalar_lea.hbm %s1239_s0, 1024  ;;  %p758_p12 = scmp.lt.u32.totalorder %s1124_s14, %s1239_s0 }
  0x80   : > { %p755_p7 = pnand %p754_p5, %p753_p3  ;;  %p759_p11 = scmp.lt.u32.totalorder %s757_s8, %s752_s1 }
  0x81   : > { %p761_p1 = scmp.lt.u32.totalorder %s752_s1, %s1124_s14 }
  0x82   : > { %p756_p9 = pneg %p755_p7  ;;  %p760_p13 = por %p759_p11, %p758_p12 }
  0x84   : > { %p762_p2 = por %p761_p1, %p760_p13 }
  0x86   : > { %p763_p10 = pnand %p762_p2, %p756_p9 }
  0x88   : > { %766 = shalt.err (!%p763_p10)
}
  0x89   : > { %s767_s30 = scalar_lea.vmem %s1111_s28, 128  ;;  %s893_s9 = smov [#allocation2]  }
  0x8a   : > { %p768_p6 = scmp.ne.s32.totalorder %s1111_s28, %s767_s30  ;;  %s772_s5 = sshll.u32 %s893_s9, 4  ;;  %s773_s5 = int_to_ptr.vmem [resolvable:$false] %s772_s5 }
  0x8b   : > { %s774_s7 = scalar_lea.vmem %s773_s5, 256  ;;  %p775_p7 = scmp.lt.s32.totalorder %s1111_s28, %s773_s5 }
  0x8c   : > { %p770_p8 = pnand %p768_p6, %p754_p5  ;;  %p776_p12 = scmp.lt.s32.totalorder %s774_s7, %s767_s30 }
  0x8e   : > { %p771_p3 = pneg %p770_p8  ;;  %p777_p11 = por %p776_p12, %p775_p7 }
  0x90   : > { %p778_p13 = pnand %p777_p11, %p771_p3 }
  0x92   : > { %781 = shalt.err (!%p778_p13)
}
  0x93   : > { %s894_s26 = smov 64   ;;  %s895_s11 = smov 4  }
  0x94   : > { %580 = dma.hbm_to_vmem [thread:$0]  (!%p1117_p0), %s1124_s14, 128, %s1111_s28, %s1126_s13, %s894_s26, %s894_s26, %s895_s11  }
  0x95   : > { %p1271_p5 = scmp.ne.s32.totalorder %s1259_s29, 0 }
  0x96   : > { %s1157_s1 = sand.u32 (!%p1271_p5), 1, %s864_s16   ;;  %p1272_p9 = scmp.ne.s32.totalorder (!%p1271_p5), %s1256_s27, 0 }
  0x97   : > { %229 = sbr.rel (%p1271_p5) target bundleno = 524 (0x20c), region = 36  ;;  %s520_s10 = sshll.u32 (!%p1271_p5), %s1157_s1, 3 }
  0x98   : > { %s232_s24 = scalar_lea.sflag (!%p1271_p5), [#allocation3], %s1157_s1  ;;  %s235_s8 = scalar_lea.vmem (!%p1271_p5), [#allocation2], %s520_s10 }
  0x9e   : > { %843 = dma.done.wait (%p1272_p9), %s232_s24, 128  }
  0x9f   : > { %845 = vsyncadd (%p1272_p9), %s232_s24, 4294967168  ;;  %p1273_p1 = scmp.ne.s32.totalorder %s1254_s25, 0 }
  0xa1   : > { %847 = dma.done.wait (%p1273_p1), [#allocation6], 80  }
  0xa2   : > { %849 = vsyncadd (%p1273_p1), [#allocation6], 4294967216 }
  0xa3   : > { %851 = dma.done.wait (%p1273_p1), [#allocation9], 16  }
  0xa4   : > { %853 = vsyncadd (%p1273_p1), [#allocation9], 4294967280  ;;  %v896_v0 = vmov 0.0   ;;  %vm897_vm0 = vmmov 0   ;;  %vm287_vm1 = vcmask 1043456   ;;  %v667_v3 = vld [vmem:[%s235_s8] sm:$0xff]  }
  0xa5   : > { %545 = vmatprep.subr.bf16.mxu0 %v896_v0  ;;  %547 = vmatprep.mubr.msk.bf16.mxu0 %vm897_vm0, %v896_v0  ;;  %v277_v1 = vld [vmem:[#allocation5] sm:$0xf]  ;;  %vm283_vm2 = vcmask 64512   ;;  %v527_v4 = vld [vmem:[#allocation7] ss:$0 sm:$0xff]  ;;  %s524_s3 = sshll.u32 %s1157_s1, 4 }
  0xa6   : > { %v289_v2 = vsel %vm287_vm1, %v277_v1, 0  ;;  %v528_v6 = vld [vmem:[#allocation8] ss:$0 sm:$0xff]  ;;  %vm354_vm3 = vcmask 60416   ;;  %s898_s25 = smov 120   ;;  %s271_s27 = scalar_lea.vmem [#allocation10], %s524_s3 }
  0xa7   : > { %546 = vmatpush3.bf16.msra.mxu0 %v289_v2  ;;  %s542_s29 = sshll.u32 %s872_s18, 2  ;;  %s536_s28 = sshll.u32 %s876_s19, 4 }
  0xa8   : > { %s386_s14 = sadd.s32 %s542_s29, %s536_s28  ;;  %s389_s13 = sshll.u32 %s271_s27, 4  ;;  %s1178_s13 = int_to_ptr.vmem [resolvable:$true] %s389_s13 }
  0xa9   : > { %s537_s2 = sshll.u32 %s386_s14, 6  ;;  %s373_s18 = scalar_lea.sflag [#allocation4], %s1157_s1 }
  0xaa   : > { %548 = vmatmul.mubr.msk.bf16.vlgmr.msra.gmra.mrb[0].mxu0 %vm283_vm2, %v667_v3  ;;  %s1184_s9 = scalar_lea.hbm %s1243_s4, %s537_s2  ;;  %s782_s19 = scalar_lea.vmem %s1178_s13, 256 }
  0xab   : > { %p783_p0 = scmp.ne.s32.totalorder %s1178_s13, %s782_s19  ;;  %s899_s5 = smov [#allocation10]  }
  0xac   : > { %s786_s7 = sshll.u32 %s899_s5, 4  ;;  %s787_s7 = int_to_ptr.vmem [resolvable:$false] %s786_s7 }
  0xad   : > { %p784_p2 = pnand %p783_p0, %p1092_p4  ;;  %s788_s26 = scalar_lea.vmem %s787_s7, 512 }
  0xae   : > { %p789_p6 = scmp.lt.s32.totalorder %s1178_s13, %s787_s7  ;;  %p790_p8 = scmp.lt.s32.totalorder %s788_s26, %s782_s19 }
  0xaf   : > { %p785_p10 = pneg %p784_p2 }
  0xb0   : > { %p791_p3 = por %p790_p8, %p789_p6 }
  0xb2   : > { %p792_p7 = pnand %p791_p3, %p785_p10 }
 0x17d   : > { %v325_v5 = vpop.f32.mrb[0].mxu0 }
 0x17e   : > { %v339_v7 = vmul.f32 %v527_v4, %v325_v5  ;;  %v549_v8 = vpop.f32.mrb[1].mxu0 }
 0x17f   : > { %v328_v9 = vpop.f32.mrb[2].mxu0 }
 0x180   : > { %v340_v10 = vmul.f32 %v527_v4, %v328_v9  ;;  %v550_v11 = vpop.f32.mrb[3].mxu0  ;;  %v348_v12 = vadd.f32 %v528_v6, %v339_v7 }
 0x182   : > { %v349_v13 = vadd.f32 %v528_v6, %v340_v10  ;;  %v350_v14 = vmax.f32 %v348_v12, 0.0 }
 0x184   : > { %v351_v15 = vmax.f32 %v349_v13, 0.0  ;;  %v352_v16 = vpack.c.bf16 %v350_v14, %v350_v14 }
 0x186   : > { %v353_v17 = vpack.c.bf16 %v351_v15, %v351_v15  ;;  %363 = vrot.lane.b32.xlu0 %v352_v16, %s898_s25  ;;  %355 = vst.msk [vmem:[%s271_s27] sm:$0xf] %vm354_vm3, %v352_v16 }
 0x188   : > { %356 = vst.msk [vmem:[%s271_s27 + $0x8] sm:$0xf] %vm354_vm3, %v353_v17 }
 0x18a   : > { %365 = vrot.lane.b32.xlu0 %v353_v17, %s898_s25 }
 0x1f8   : > { %v364_v18 = vpop.permute.xlu0 %363 }
 0x1f9   : > { %531 = vst.msk [vmem:[%s271_s27 + $0x4] sm:$0xf] %vm354_vm3, %v364_v18 }
 0x1fc   : > { %v366_v19 = vpop.permute.xlu0 %365 }
 0x1fd   : > { %532 = vst.msk [vmem:[%s271_s27 + $0xc] sm:$0xf] %vm354_vm3, %v366_v19 }
 0x1fe   : > { %795 = shalt.err (!%p792_p7)
}
 0x1ff   : > { %s796_s11 = scalar_lea.hbm %s1184_s9, 256  ;;  %s800_s8 = scalar_lea.hbm %s1243_s4, 2048 }
 0x200   : > { %p797_p12 = scmp.ne.s32.totalorder %s1184_s9, %s796_s11  ;;  %p801_p5 = scmp.lt.u32.totalorder %s1184_s9, %s1243_s4 }
 0x201   : > { %p802_p9 = scmp.lt.u32.totalorder %s800_s8, %s796_s11  ;;  %p804_p0 = scmp.lt.u32.totalorder %s796_s11, %s1184_s9 }
 0x202   : > { %p798_p11 = pnand %p797_p12, %p1092_p4 }
 0x203   : > { %p803_p1 = por %p802_p9, %p801_p5 }
 0x204   : > { %p799_p13 = pneg %p798_p11 }
 0x205   : > { %p805_p2 = por %p804_p0, %p803_p1 }
 0x207   : > { %p806_p10 = pnand %p805_p2, %p799_p13 }
 0x209   : > { %809 = shalt.err (!%p806_p10)
}
 0x20a   : > { %s900_s27 = smov 64   ;;  %s901_s29 = smov 4  }
 0x20b   : > { %565 = dma.vmem_to_hbm [thread:$0]  (%p1092_p4), %s1178_s13, 256, %s1184_s9, %s373_s18, %s900_s27, %s900_s27, %s901_s29  }
 0x20c PF: > { %s1274_s28 = sld [smem:[#allocation15_spill]]  ;;  %p592_p6 = scmp.ge.s32.totalorder %s888_s22, 2 }
 0x20d   : > { %s404_s14 = sand.u32 1, %s860_s15  }
 0x20e   : > { %s405_s2 = scalar_lea.sflag [#allocation4], %s404_s14 }
 0x212   : > { %p1275_p8 = scmp.ne.s32.totalorder %s1274_s28, 0 }
 0x214   : > { %p582_p3 = pnand %p592_p6, %p1275_p8 }
 0x216   : > { %855 = dma.done.wait (!%p582_p3), %s405_s2, 256  }
 0x217   : > { %857 = vsyncadd (!%p582_p3), %s405_s2, 4294967040  ;;  %s22_s22 = sadd.s32 1, %s888_s22   ;;  %s1276_s23 = sld [smem:[#allocation16_spill]] }
 0x218   : > { %p19_p7 = scmp.ge.s32.totalorder %s22_s22, 10   ;;  %s1277_s1 = sld [smem:[#allocation17_spill]] }
 0x219   : > { %s1278_s15 = smov %s864_s16  ;;  %s1279_s16 = smov %s868_s17 }
 0x21a   : > { %s1280_s17 = smov %s1109_s12  ;;  %s1281_s18 = smov %s880_s20 }
 0x21b   : > { %s1282_s19 = smov %s884_s21  ;;  %21 = sbr.rel (!%p19_p7) target bundleno = 13 (0xd), region = 94 }
 0x21d   : > { %s1283_s20 = smov %s1276_s23 }
 0x21e   : > { %s1284_s21 = smov %s1277_s1 }
 0x222   :  { %410 = vsyncpa [#allocation3], 1 }
 0x223   :  { %412 = vsyncpa [#allocation3 + $0x1], 1 }
 0x224   :  { %413 = vsyncpa [#allocation6], 1 }
 0x225   :  { %414 = vsyncpa [#allocation9], 1 }
 0x226   :  { %415 = vsyncpa [#allocation4], 1 }
 0x227   :  { %417 = vsyncpa [#allocation4 + $0x1], 1 }

// kernel: upsampling_block_forward.5
= control target key start
LH: loop header
LB: loop body
LE: loop exit
PB: predicated region body
PF: predicated region fallthrough
CT: control target
= control target key end

     0   :  { %s4458_s0 = inlined_call_operand.hbm [shape: bf16[2,16,16,8], index: 0, kind: input, shape index: {}, may-alias: {0,1,2}]   ;;  %s4459_s1 = inlined_call_operand.hbm [shape: bf16[2,16,16,8], index: 1, kind: input, shape index: {}, may-alias: {0,1,2}]   ;;  %s4460_s2 = inlined_call_operand.hbm [shape: bf16[2,16,16,8], index: 2, kind: input, shape index: {}, may-alias: {0,1,2}]   ;;  %s4461_s3 = inlined_call_operand.hbm [shape: bf16[1152,8], index: 3, kind: input, shape index: {}]   ;;  %s4462_s4 = inlined_call_operand.hbm [shape: f32[1,1,8], index: 4, kind: input, shape index: {}]   ;;  %s4463_s5 = inlined_call_operand.hbm [shape: f32[1,1,8], index: 5, kind: input, shape index: {}]   ;;  %s4464_s6 = inlined_call_operand.hbm [shape: f32[2,16,16,8], index: 6, kind: output, shape index: {}]  }
   0x1   :  { %4495 = sst [smem:[#allocation37_spill]] %s4458_s0 }
   0x2   :  { %4496 = sst [smem:[#allocation38_spill]] %s4459_s1 }
   0x3   :  { %4497 = sst [smem:[#allocation39_spill]] %s4460_s2 }
   0x4   :  { %4498 = sst [smem:[#allocation40_spill]] %s4461_s3 }
   0x5   :  { %4499 = sst [smem:[#allocation41_spill]] %s4462_s4 }
   0x6   :  { %4500 = sst [smem:[#allocation42_spill]] %s4463_s5 }
   0x7   :  { %4501 = sst [smem:[#allocation43_spill]] %s4464_s6 }
   0x8   :  { %11 = vsyncpa [#allocation5], 0 }
   0x9   :  { %13 = vsyncpa [#allocation5 + $0x1], 0 }
   0xa   :  { %14 = vsyncpa [#allocation8], 0 }
   0xb   :  { %16 = vsyncpa [#allocation8 + $0x1], 0 }
   0xc   :  { %17 = vsyncpa [#allocation11], 0 }
   0xd   :  { %18 = vsyncpa [#allocation14], 0 }
   0xe   :  { %19 = vsyncpa [#allocation6], 0 }
   0xf   :  { %21 = vsyncpa [#allocation6 + $0x1], 0  ;;  %s3700_s21 = smov 0   ;;  %s3702_s22 = smov 0  }
  0x10   :  { %s3704_s23 = smov 0   ;;  %s3706_s24 = smov 0  }
  0x11   :  { %s3708_s25 = smov 0   ;;  %s3710_s26 = smov 0  }
  0x12   :  { %s3712_s27 = smov 0   ;;  %s3714_s28 = smov 0  }
  0x13   :  { %s3716_s29 = smov 0   ;;  %s3718_s30 = smov 0  }
  0x14   :  { %s3720_s7 = smov 0   ;;  %s3722_s8 = smov 0  }
  0x15   :  { %s3724_s9 = smov 0   ;;  %s3726_s10 = smov 0  }
  0x16 LB: > { %4502 = sst [smem:[#allocation22_spill]] %s3598_s21  ;;  %s3771_s11 = sadd.s32 4294967295, %s3650_s10   ;;  %s3650_s10 = sphi %s3726_s10, %s27_s10   ;;  %s3646_s9 = sphi %s3724_s9, %s4592_s9   ;;  %s3642_s8 = sphi %s3722_s8, %s4591_s8   ;;  %s3638_s7 = sphi %s3720_s7, %s4600_s7   ;;  %s3634_s30 = sphi %s3718_s30, %s4589_s30   ;;  %s3630_s29 = sphi %s3716_s29, %s4599_s29   ;;  %s3626_s28 = sphi %s3714_s28, %s4598_s28   ;;  %s3622_s27 = sphi %s3712_s27, %s4597_s27   ;;  %s3618_s26 = sphi %s3710_s26, %s4596_s26   ;;  %s3614_s25 = sphi %s3708_s25, %s4595_s25   ;;  %s3610_s24 = sphi %s3706_s24, %s4594_s24   ;;  %s3606_s23 = sphi %s3704_s23, %s4593_s23   ;;  %s3602_s22 = sphi %s3702_s22, %s4585_s22   ;;  %s3598_s21 = sphi %s3700_s21, %s4584_s21  }
  0x17   : > { %4503 = sst [smem:[#allocation23_spill]] %s3602_s22  ;;  %p2603_p0 = scmp.ge.s32.totalorder %s3650_s10, 1 }
  0x18   : > { %4504 = sst [smem:[#allocation24_spill]] %s3606_s23  ;;  %p4466_p1 = scmp.eq.s32.totalorder %s3771_s11, 0 }
  0x19   : > { %4505 = sst [smem:[#allocation25_spill]] %s3614_s25  ;;  %p235_p3 = scmp.lt.s32.totalorder %s3650_s10, 9 }
  0x1a   : > { %4506 = sst [smem:[#allocation26_spill]] %s3634_s30  ;;  %s3652_s13 = smov [#allocation10]  }
  0x1b   : > { %4507 = sst [smem:[#allocation27_spill]] %s3638_s7  ;;  %p3777_p4 = pnand %p2603_p0, %p235_p3 }
  0x1c   : > { %4508 = sst [smem:[#allocation28_spill]] %s3642_s8  ;;  %s247_s14 = sshll.u32 %s3652_s13, 4  ;;  %s248_s14 = int_to_ptr.vmem [resolvable:$true] %s247_s14 }
  0x1d   : > { %4509 = sst [smem:[#allocation29_spill]] %s3646_s9  ;;  %p3029_p5 = pneg %p3777_p4 }
  0x1e   : > { %s4510_s12 = scalar_select %p3777_p4, 1, 0 }
  0x1f   : > { %p3785_p6 = pnand %p3029_p5, %p4466_p1  ;;  %s4513_s3 = sld [smem:[#allocation40_spill]] }
  0x20   : > { %4511 = sst [smem:[#allocation30_spill]] %s4510_s12 }
  0x21   : > { %s4512_s15 = scalar_select %p3785_p6, 1, 0 }
  0x22   : > { %p3797_p8 = pneg %p3785_p6 }
  0x25   : > { %s3314_s18 = scalar_lea.hbm %s4513_s3, 9216 }
  0x26   : > { %p3315_p7 = scmp.ne.s32.totalorder %s4513_s3, %s3314_s18  ;;  %p3321_p11 = scmp.lt.u32.totalorder %s3314_s18, %s4513_s3 }
  0x28   : > { %p3317_p9 = pnand %p3797_p8, %p3315_p7 }
  0x2a   : > { %p3318_p10 = pneg %p3317_p9 }
  0x2c   : > { %p3323_p12 = pnand %p3321_p11, %p3318_p10 }
  0x2e   : > { %3326 = shalt.err (!%p3323_p12)
}
  0x2f   : > { %s3327_s16 = scalar_lea.vmem %s248_s14, 9216  ;;  %p3335_p5 = scmp.lt.s32.totalorder %s248_s14, %s248_s14 }
  0x30   : > { %p3328_p13 = scmp.ne.s32.totalorder %s248_s14, %s3327_s16  ;;  %p3336_p2 = scmp.lt.s32.totalorder %s3327_s16, %s3327_s16 }
  0x32   : > { %p3330_p0 = pnand %p3328_p13, %p3797_p8  ;;  %p3337_p1 = por %p3336_p2, %p3335_p5 }
  0x34   : > { %p3331_p3 = pneg %p3330_p0 }
  0x36   : > { %p3338_p4 = pnand %p3337_p1, %p3331_p3 }
  0x38   : > { %3341 = shalt.err (!%p3338_p4)
}
  0x39   : > { %s4470_s17 = smov 64   ;;  %s4472_s6 = smov 4  }
  0x3a   : > { %3032 = dma.hbm_to_vmem [thread:$0]  (!%p3785_p6), %s4513_s3, 9216, %s248_s14, [#allocation11], %s4470_s17, %s4470_s17, %s4472_s6  }
  0x3b   : > { %s36_s19 = sadd.s32 1, %s3642_s8  ;;  %s39_s20 = sadd.s32 1, %s3646_s9 }
  0x3c   : > { %p37_p1 = scmp.ge.s32.totalorder %s36_s19, 4  ;;  %p4486_p2 = scmp.eq.s32.totalorder %s3650_s10, 0 }
  0x3d   : > { %s2597_s16 = sshll.u32 %s3642_s8, 2  ;;  %s84_s30 = sadd.s32 1, %s3618_s26 }
  0x3e   : > { %s4602_s19 = smov (%p37_p1, %s36_s19), 0  ;;  %s4604_s20 = smov (!%p37_p1, %s39_s20), %s3646_s9 }
  0x3f   : > { %4515 = sst [smem:[#allocation31_spill]] %s4602_s19  ;;  %s44_s12 = ssub.s32 %s3642_s8, %s4602_s19 }
  0x40   : > { %s2598_s2 = sadd.s32 4294967295, %s2597_s16  ;;  %p41_p4 = scmp.ge.s32.totalorder %s4604_s20, 2 }
  0x41   : > { %p73_p7 = scmp.gt.s32.totalorder %s2598_s2, 0  ;;  %s2599_s14 = sshll.u32 %s4602_s19, 2 }
  0x42   : > { %p91_p9 = scmp.ne.s32.totalorder %s3618_s26, %s3614_s25  ;;  %s4606_s20 = smov (%p41_p4, %s4604_s20), 0 }
  0x43   : > { %4516 = sst [smem:[#allocation32_spill]] %s4606_s20  ;;  %s4608_s2 = smov (!%p73_p7, %s2598_s2), 0 }
  0x44   : > { %s3833_s7 = ssub.s32 %s3646_s9, %s4606_s20  ;;  %s2600_s18 = sadd.s32 4294967295, %s2599_s14 }
  0x45   : > { %4517 = sst [smem:[#allocation33_spill]] %s3833_s7  ;;  %s3836_s17 = sor.u32 %s44_s12, %s3833_s7 }
  0x46   : > { %p77_p10 = scmp.gt.s32.totalorder %s2600_s18, 0  ;;  %p3841_p12 = por %p91_p9, %p4486_p2 }
  0x47   : > { %p97_p13 = scmp.ne.s32.totalorder %s3614_s25, %s3610_s24  ;;  %s3847_s3 = sadd.s32 4, %s2597_s16 }
  0x48   : > { %s4610_s18 = smov (!%p77_p10, %s2600_s18), 0  ;;  %4519 = sst [smem:[#allocation34_spill]] %s3847_s3 }
  0x49   : > { %s80_s20 = ssub.s32 %s4608_s2, %s4610_s18  ;;  %p4520_p3 = scmp.eq.s32.totalorder %s3771_s11, 0 }
  0x4a   : > { %s81_s12 = sor.u32 %s80_s20, %s3833_s7  ;;  %s3857_s21 = sadd.s32 4, %s2599_s14 }
  0x4b   : > { %p3853_p5 = por %p97_p13, %p4520_p3  ;;  %p82_p1 = scmp.eq.s32.totalorder %s81_s12, 0 }
  0x4c   : > { %p4485_p7 = scmp.lt.s32.totalorder %s3650_s10, 8  ;;  %s3865_s16 = sshll.u32 %s3646_s9, 5 }
  0x4d   : > { %s4521_s19 = scalar_select %p3853_p5, 1, 0 }
  0x4e   : > { %s3862_s24 = scalar_select %p82_p1, %s3618_s26, %s84_s30  }
  0x4f   : > { %4522 = sst [smem:[#allocation35_spill]] %s4521_s19  ;;  %s307_s18 = sand.u32 1, %s3650_s10  }
  0x50   : > { %s309_s20 = sand.u32 1, %s3618_s26   ;;  %s2616_s7 = sshll.u32 %s4608_s2, 1 }
  0x51   : > { %s2613_s25 = sshll.u32 %s309_s20, 3  ;;  %s321_s22 = sadd.s32 %s2616_s7, %s3865_s16 }
  0x52   : > { %s2618_s3 = sshll.u32 %s321_s22, 6  ;;  %s311_s19 = scalar_lea.vmem [#allocation7], %s2613_s25 }
  0x53   : > { %s324_s12 = sshll.u32 %s311_s19, 4  ;;  %s4523_s1 = sld [smem:[#allocation38_spill]]  ;;  %s3875_s12 = int_to_ptr.vmem [resolvable:$true] %s324_s12 }
  0x54   : > { %p3881_p9 = pnand %p4485_p7, %p3841_p12  ;;  %s3655_s2 = smov [#allocation12]  }
  0x55   : > { %s261_s22 = sshll.u32 %s3655_s2, 4  ;;  %s3887_s0 = scalar_lea.sflag [#allocation8], %s307_s18  ;;  %s3885_s22 = int_to_ptr.vmem [resolvable:$true] %s261_s22 }
  0x56   : > { %p3344_p13 = pneg %p3881_p9 }
  0x59   : > { %s3873_s14 = scalar_lea.hbm %s4523_s1, %s2618_s3  ;;  %s3347_s6 = scalar_lea.hbm %s4523_s1, 4096 }
  0x5a   : > { %s3342_s3 = scalar_lea.hbm %s3873_s14, 128  ;;  %p3348_p12 = scmp.lt.u32.totalorder %s3873_s14, %s4523_s1 }
  0x5b   : > { %p3343_p10 = scmp.ne.s32.totalorder %s3873_s14, %s3342_s3  ;;  %p3349_p4 = scmp.lt.u32.totalorder %s3347_s6, %s3342_s3 }
  0x5c   : > { %p3351_p7 = scmp.lt.u32.totalorder %s3342_s3, %s3873_s14 }
  0x5d   : > { %p3345_p3 = pnand %p3344_p13, %p3343_p10  ;;  %p3350_p0 = por %p3349_p4, %p3348_p12 }
  0x5f   : > { %p3346_p1 = pneg %p3345_p3  ;;  %p3352_p2 = por %p3351_p7, %p3350_p0 }
  0x61   : > { %p3353_p11 = pnand %p3352_p2, %p3346_p1 }
  0x63   : > { %3356 = shalt.err (!%p3353_p11)
}
  0x64   : > { %s3357_s18 = scalar_lea.vmem %s3875_s12, 128  ;;  %s3656_s20 = smov [#allocation7]  }
  0x65   : > { %p3358_p10 = scmp.ne.s32.totalorder %s3875_s12, %s3357_s18  ;;  %s3362_s2 = sshll.u32 %s3656_s20, 4  ;;  %s3363_s2 = int_to_ptr.vmem [resolvable:$false] %s3362_s2 }
  0x66   : > { %s3364_s23 = scalar_lea.vmem %s3363_s2, 256  ;;  %p3365_p6 = scmp.lt.s32.totalorder %s3875_s12, %s3363_s2 }
  0x67   : > { %p3360_p3 = pnand %p3358_p10, %p3344_p13  ;;  %p3366_p4 = scmp.lt.s32.totalorder %s3364_s23, %s3357_s18 }
  0x69   : > { %p3361_p5 = pneg %p3360_p3  ;;  %p3367_p12 = por %p3366_p4, %p3365_p6 }
  0x6b   : > { %p3368_p0 = pnand %p3367_p12, %p3361_p5 }
  0x6d   : > { %3371 = shalt.err (!%p3368_p0)
}
  0x6e   : > { %s4525_s3 = smov 4   ;;  %s4526_s25 = smov 64  }
  0x6f   : > { %3045 = dma.hbm_to_vmem [thread:$0]  (!%p3881_p9), %s3873_s14, 128, %s3875_s12, %s3887_s0, %s4526_s25, %s4526_s25, %s4525_s3  }
  0x70   : > { %s4527_s4 = sld [smem:[#allocation41_spill]] }
  0x76   : > { %s3372_s7 = scalar_lea.hbm %s4527_s4, 16 }
  0x77   : > { %p3373_p6 = scmp.ne.s32.totalorder %s4527_s4, %s3372_s7  ;;  %p3379_p5 = scmp.lt.u32.totalorder %s3372_s7, %s4527_s4 }
  0x79   : > { %p3375_p2 = pnand %p3373_p6, %p3797_p8 }
  0x7b   : > { %p3376_p11 = pneg %p3375_p2 }
  0x7d   : > { %p3381_p7 = pnand %p3379_p5, %p3376_p11 }
  0x7f   : > { %3384 = shalt.err (!%p3381_p7)
}
  0x80   : > { %s3385_s12 = scalar_lea.vmem %s3885_s22, 16  ;;  %s3392_s14 = scalar_lea.vmem %s3885_s22, 32 }
  0x81   : > { %p3386_p9 = scmp.ne.s32.totalorder %s3885_s22, %s3385_s12  ;;  %p3393_p10 = scmp.lt.s32.totalorder %s3885_s22, %s3885_s22 }
  0x82   : > { %p3394_p3 = scmp.lt.s32.totalorder %s3392_s14, %s3385_s12 }
  0x83   : > { %p3388_p13 = pnand %p3386_p9, %p3797_p8 }
  0x84   : > { %p3395_p4 = por %p3394_p3, %p3393_p10 }
  0x85   : > { %p3389_p1 = pneg %p3388_p13 }
  0x87   : > { %p3396_p12 = pnand %p3395_p4, %p3389_p1 }
  0x89   : > { %3399 = shalt.err (!%p3396_p12)
}
  0x8a   : > { %p4528_p0 = scmp.ne.s32.totalorder %s4512_s15, 0  ;;  %s3657_s19 = smov [#allocation13]  }
  0x8b   : > { %s272_s7 = sshll.u32 %s3657_s19, 4  ;;  %s4529_s5 = sld [smem:[#allocation42_spill]]  ;;  %s273_s7 = int_to_ptr.vmem [resolvable:$true] %s272_s7 }
  0x8c   : > { %3035 = dma.hbm_to_vmem [thread:$0]  (!%p4528_p0), %s4527_s4, 16, %s3885_s22, [#allocation11]  }
  0x91   : > { %s3400_s30 = scalar_lea.hbm %s4529_s5, 16 }
  0x92   : > { %p3401_p6 = scmp.ne.s32.totalorder %s4529_s5, %s3400_s30  ;;  %p3407_p5 = scmp.lt.u32.totalorder %s3400_s30, %s4529_s5 }
  0x94   : > { %p3403_p2 = pnand %p3401_p6, %p3797_p8 }
  0x96   : > { %p3404_p11 = pneg %p3403_p2 }
  0x98   : > { %p3409_p7 = pnand %p3407_p5, %p3404_p11 }
  0x9a   : > { %3412 = shalt.err (!%p3409_p7)
}
  0x9b   : > { %s3413_s22 = scalar_lea.vmem %s273_s7, 16  ;;  %s3420_s23 = scalar_lea.vmem %s273_s7, 32 }
  0x9c   : > { %p3414_p9 = scmp.ne.s32.totalorder %s273_s7, %s3413_s22  ;;  %p3421_p10 = scmp.lt.s32.totalorder %s273_s7, %s273_s7 }
  0x9d   : > { %p3422_p3 = scmp.lt.s32.totalorder %s3420_s23, %s3413_s22 }
  0x9e   : > { %p3416_p13 = pnand %p3414_p9, %p3797_p8 }
  0x9f   : > { %p3423_p4 = por %p3422_p3, %p3421_p10 }
  0xa0   : > { %p3417_p1 = pneg %p3416_p13 }
  0xa2   : > { %p3424_p12 = pnand %p3423_p4, %p3417_p1 }
  0xa4   : > { %3427 = shalt.err (!%p3424_p12)
}
  0xa5   : > { %3038 = dma.hbm_to_vmem [thread:$0]  (!%p4528_p0), %s4529_s5, 16, %s273_s7, [#allocation14]  }
  0xa6   : > { %s2596_s1 = sadd.s32 4294967294, %s3650_s10   ;;  %s48_s15 = sadd.s32 1, %s3630_s29 }
  0xa7   : > { %p4530_p8 = scmp.eq.s32.totalorder %s3836_s17, 0  ;;  %p55_p6 = scmp.ne.s32.totalorder %s3630_s29, %s3626_s28 }
  0xa8   : > { %p61_p2 = scmp.ne.s32.totalorder %s3626_s28, %s3622_s27  ;;  %p228_p11 = scmp.eq.s32.totalorder %s2596_s1, 7 }
  0xa9   : > { %s3965_s13 = scalar_select %p4530_p8, %s3630_s29, %s48_s15  }
  0xaa   : > { %s283_s20 = sand.u32 1, %s3630_s29   ;;  %p4532_p5 = scmp.eq.s32.totalorder %s3650_s10, 0 }
  0xab   : > { %4531 = sst [smem:[#allocation36_spill]] %s3965_s13  ;;  %p4533_p9 = scmp.eq.s32.totalorder %s3771_s11, 0 }
  0xac   : > { %p57_p7 = por %p4532_p5, %p55_p6  ;;  %p4535_p1 = scmp.eq.s32.totalorder %s3771_s11, 7 }
  0xad   : > { %p3976_p13 = por %p4533_p9, %p61_p2  ;;  %p3986_p0 = por %p228_p11, %p61_p2 }
  0xae   : > { %p3982_p10 = por %p4535_p1, %p55_p6  ;;  %s2608_s30 = sshll.u32 %s283_s20, 5 }
  0xaf   : > { %s4537_s17 = scalar_select %p3986_p0, 1, 0 }
  0xb0   : > { %s4536_s7 = scalar_select %p3982_p10, 1, 0 }
  0xb1   : > { %s2781_s18 = sshll.u32 %s3642_s8, 3  ;;  %s287_s14 = scalar_lea.vmem [#allocation4], %s2608_s30 }
  0xb2   : > { %s294_s12 = sadd.s32 %s2781_s18, %s3865_s16  ;;  %s297_s22 = sshll.u32 %s287_s14, 4  ;;  %s3992_s22 = int_to_ptr.vmem [resolvable:$true] %s297_s22 }
  0xb3   : > { %s2612_s23 = sshll.u32 %s294_s12, 6  ;;  %s4538_s1 = sld [smem:[#allocation37_spill]] }
  0xb4   : > { %p4539_p3 = scmp.lt.s32.totalorder %s3650_s10, 8  ;;  %s4005_s30 = scalar_lea.sflag [#allocation5], %s283_s20 }
  0xb6   : > { %p4001_p4 = pnand %p4539_p3, %p57_p7 }
  0xb8   : > { %p3430_p8 = pneg %p4001_p4 }
  0xb9   : > { %s3997_s15 = scalar_lea.hbm %s4538_s1, %s2612_s23  ;;  %s3433_s23 = scalar_lea.hbm %s4538_s1, 4096 }
  0xba   : > { %s3428_s18 = scalar_lea.hbm %s3997_s15, 512  ;;  %p3434_p11 = scmp.lt.u32.totalorder %s3997_s15, %s4538_s1 }
  0xbb   : > { %p3429_p12 = scmp.ne.s32.totalorder %s3997_s15, %s3428_s18  ;;  %p3435_p5 = scmp.lt.u32.totalorder %s3433_s23, %s3428_s18 }
  0xbc   : > { %p3437_p9 = scmp.lt.u32.totalorder %s3428_s18, %s3997_s15 }
  0xbd   : > { %p3431_p6 = pnand %p3430_p8, %p3429_p12  ;;  %p3436_p7 = por %p3435_p5, %p3434_p11 }
  0xbf   : > { %p3432_p2 = pneg %p3431_p6  ;;  %p3438_p1 = por %p3437_p9, %p3436_p7 }
  0xc1   : > { %p3439_p3 = pnand %p3438_p1, %p3432_p2 }
  0xc3   : > { %3442 = shalt.err (!%p3439_p3)
}
  0xc4   : > { %s3443_s20 = scalar_lea.vmem %s3992_s22, 512  ;;  %s3658_s12 = smov [#allocation4]  }
  0xc5   : > { %p3444_p12 = scmp.ne.s32.totalorder %s3992_s22, %s3443_s20  ;;  %s3448_s14 = sshll.u32 %s3658_s12, 4  ;;  %s3449_s14 = int_to_ptr.vmem [resolvable:$false] %s3448_s14 }
  0xc6   : > { %s3450_s6 = scalar_lea.vmem %s3449_s14, 1024  ;;  %p3451_p10 = scmp.lt.s32.totalorder %s3992_s22, %s3449_s14 }
  0xc7   : > { %p3446_p6 = pnand %p3444_p12, %p3430_p8  ;;  %p3452_p11 = scmp.lt.s32.totalorder %s3450_s6, %s3443_s20 }
  0xc9   : > { %p3447_p0 = pneg %p3446_p6  ;;  %p3453_p5 = por %p3452_p11, %p3451_p10 }
  0xcb   : > { %p3454_p7 = pnand %p3453_p5, %p3447_p0 }
  0xcd   : > { %3457 = shalt.err (!%p3454_p7)
}
  0xce   : > { %s4541_s18 = sld [smem:[#allocation24_spill]]  ;;  %s4542_s23 = sld [smem:[#allocation34_spill]] }
  0xcf   : > { %s4543_s19 = sld [smem:[#allocation23_spill]]  ;;  %s4545_s20 = sld [smem:[#allocation33_spill]] }
  0xd0   : > { %s4544_s12 = sld [smem:[#allocation22_spill]]  ;;  %p4547_p0 = scmp.lt.s32.totalorder %s3857_s21, 15 }
  0xd1   : > { %3042 = dma.hbm_to_vmem [thread:$0]  (!%p4001_p4), %s3997_s15, 512, %s3992_s22, %s4005_s30, %s4526_s25, %s4526_s25, %s4525_s3  }
  0xd2   : > { %s4614_s21 = smov (!%p4547_p0, %s3857_s21), 15  ;;  %p4548_p9 = scmp.eq.s32.totalorder %s3650_s10, 0 }
  0xd3   : > { %p4549_p12 = scmp.eq.s32.totalorder %s3771_s11, 0  ;;  %s4551_s13 = sld [smem:[#allocation39_spill]] }
  0xd4   : > { %s120_s4 = sadd.s32 1, %s4541_s18  ;;  %p4546_p10 = scmp.lt.s32.totalorder %s4542_s23, 15 }
  0xd5   : > { %p127_p8 = scmp.ne.s32.totalorder %s4541_s18, %s4543_s19  ;;  %s336_s6 = sand.u32 1, %s4541_s18  }
  0xd6   : > { %s4612_s23 = smov (!%p4546_p10, %s4542_s23), 15  ;;  %p133_p2 = scmp.ne.s32.totalorder %s4543_s19, %s4544_s12 }
  0xd7   : > { %s116_s14 = ssub.s32 %s4612_s23, %s4614_s21  ;;  %p129_p1 = por %p127_p8, %p4548_p9 }
  0xd8   : > { %s117_s1 = sor.u32 %s116_s14, %s4545_s20  ;;  %p4053_p6 = por %p133_p2, %p4549_p12 }
  0xd9   : > { %p118_p3 = scmp.eq.s32.totalorder %s117_s1, 0  ;;  %s2619_s22 = sshll.u32 %s336_s6, 3 }
  0xda   : > { %s4550_s5 = scalar_select %p4053_p6, 1, 0 }
  0xdb   : > { %s2621_s15 = sshll.u32 %s4612_s23, 1  ;;  %s4616_s18 = smov (!%p118_p3, %s4541_s18), %s120_s4 }
  0xdc   : > { %s348_s30 = sadd.s32 %s2621_s15, %s3865_s16  ;;  %s338_s8 = scalar_lea.vmem [#allocation9], %s2619_s22 }
  0xdd   : > { %s2623_s9 = sshll.u32 %s348_s30, 6  ;;  %s351_s19 = sshll.u32 %s338_s8, 4  ;;  %s4066_s19 = int_to_ptr.vmem [resolvable:$true] %s351_s19 }
  0xde   : > { %s4064_s20 = scalar_lea.hbm %s4551_s13, %s2623_s9  ;;  %p4552_p4 = scmp.lt.s32.totalorder %s3650_s10, 8 }
  0xdf   : > { %s3458_s16 = scalar_lea.hbm %s4064_s20, 128  ;;  %s3463_s23 = scalar_lea.hbm %s4551_s13, 4096 }
  0xe0   : > { %p4070_p11 = pnand %p4552_p4, %p129_p1  ;;  %p3459_p5 = scmp.ne.s32.totalorder %s4064_s20, %s3458_s16 }
  0xe1   : > { %p3464_p8 = scmp.lt.u32.totalorder %s4064_s20, %s4551_s13  ;;  %p3465_p2 = scmp.lt.u32.totalorder %s3463_s23, %s3458_s16 }
  0xe2   : > { %p3460_p7 = pneg %p4070_p11  ;;  %p3467_p1 = scmp.lt.u32.totalorder %s3458_s16, %s4064_s20 }
  0xe3   : > { %p3466_p9 = por %p3465_p2, %p3464_p8 }
  0xe4   : > { %p3461_p10 = pnand %p3460_p7, %p3459_p5 }
  0xe5   : > { %p3468_p3 = por %p3467_p1, %p3466_p9 }
  0xe6   : > { %p3462_p0 = pneg %p3461_p10 }
  0xe8   : > { %p3469_p12 = pnand %p3468_p3, %p3462_p0 }
  0xea   : > { %3472 = shalt.err (!%p3469_p12)
}
  0xeb   : > { %s3473_s6 = scalar_lea.vmem %s4066_s19, 128  ;;  %s3659_s22 = smov [#allocation9]  }
  0xec   : > { %p3474_p4 = scmp.ne.s32.totalorder %s4066_s19, %s3473_s6  ;;  %s3478_s15 = sshll.u32 %s3659_s22, 4  ;;  %s3479_s15 = int_to_ptr.vmem [resolvable:$false] %s3478_s15 }
  0xed   : > { %s3480_s30 = scalar_lea.vmem %s3479_s15, 256  ;;  %p3481_p6 = scmp.lt.s32.totalorder %s4066_s19, %s3479_s15 }
  0xee   : > { %p3476_p5 = pnand %p3474_p4, %p3460_p7  ;;  %p3482_p8 = scmp.lt.s32.totalorder %s3480_s30, %s3473_s6 }
  0xf0   : > { %p3477_p10 = pneg %p3476_p5  ;;  %p3483_p2 = por %p3482_p8, %p3481_p6 }
  0xf2   : > { %p3484_p9 = pnand %p3483_p2, %p3477_p10 }
  0xf4   : > { %3487 = shalt.err (!%p3484_p9)
}
  0xf5   : > { %3048 = dma.hbm_to_vmem [thread:$0]  (!%p4070_p11), %s4064_s20, 128, %s4066_s19, %s3887_s0, %s4526_s25, %s4526_s25, %s4525_s3  }
  0xf6   : > { %s4554_s12 = sld [smem:[#allocation30_spill]] }
  0xfc   : > { %p4555_p7 = scmp.ne.s32.totalorder %s4554_s12, 0 }
  0xfd   : > { %s4106_s21 = sand.u32 (!%p4555_p7), 1, %s3626_s28  }
  0xfe   : > { %363 = sbr.rel (%p4555_p7) target bundleno = 710 (0x2c6), region = 44  ;;  %s2625_s16 = sshll.u32 (!%p4555_p7), %s4106_s21, 5 }
  0xff   : > { %s366_s8 = scalar_lea.sflag (!%p4555_p7), [#allocation5], %s4106_s21  ;;  %s4110_s9 = scalar_lea.vmem (!%p4555_p7), [#allocation4], %s2625_s16 }
 0x105   : > { %3573 = dma.done.wait (%p3976_p13), %s366_s8, 512  }
 0x106   : > { %3575 = vsyncadd (%p3976_p13), %s366_s8, 4294966784  ;;  %s4556_s0 = sld [smem:[#allocation25_spill]]  ;;  %s4557_s3 = sld [smem:[#allocation35_spill]] }
 0x107   : > { %s374_s25 = sand.u32 1, %s3771_s11  }
 0x108   : > { %s375_s1 = scalar_lea.sflag [#allocation8], %s374_s25 }
 0x10c   : > { %s376_s19 = sand.u32 1, %s4556_s0   ;;  %p4558_p6 = scmp.ne.s32.totalorder %s4557_s3, 0 }
 0x10d   : > { %s4118_s20 = sshll.u32 %s376_s19, 3 }
 0x10e   : > { %s378_s23 = scalar_lea.vmem [#allocation7], %s4118_s20 }
 0x10f   : > { %3577 = dma.done.wait (%p4558_p6), %s375_s1, 128  }
 0x110   : > { %3579 = vsyncadd (%p4558_p6), %s375_s1, 4294967168  ;;  %s4559_s4 = sld [smem:[#allocation23_spill]]  ;;  %p4560_p13 = scmp.ne.s32.totalorder %s4550_s5, 0 }
 0x116   : > { %s385_s14 = sand.u32 1, %s4559_s4  }
 0x117   : > { %s4126_s2 = sshll.u32 %s385_s14, 3 }
 0x118   : > { %s387_s6 = scalar_lea.vmem [#allocation9], %s4126_s2 }
 0x119   : > { %3581 = dma.done.wait (%p4560_p13), %s375_s1, 128  }
 0x11a   : > { %3583 = vsyncadd (%p4560_p13), %s375_s1, 4294967168  ;;  %p4561_p11 = scmp.eq.s32.totalorder %s3771_s11, 0 }
 0x11c   : > { %3585 = dma.done.wait (%p4561_p11), [#allocation11], 9232   ;;  %p4562_p0 = pmov %p4561_p11 }
 0x11e   : > { %3587 = vsyncadd (%p4562_p0), [#allocation11], 4294958064  ;;  %p4563_p1 = pmov %p4562_p0 }
 0x11f   : > { %p4564_p3 = pmov %p4562_p0 }
 0x120   : > { %3589 = dma.done.wait (%p4563_p1), [#allocation14], 16  }
 0x121   : > { %3591 = vsyncadd (%p4564_p3), [#allocation14], 4294967280  ;;  %s2631_s22 = sshll.u32 %s4106_s21, 6  ;;  %vm457_vm0 = vsmask.f32 256  ;;  %vm541_vm2 = vcmask 60416  }
 0x122   : > { %vm542_vm1 = vsmask.f32 7938  ;;  %v449_v0 = vld [vmem:[%s4110_s9] sm:$0xf]  ;;  %vm549_vm3 = vcmask 57344   ;;  %s4228_s5 = scalar_lea.vmem [#allocation15], %s2631_s22 }
 0x123   : > { %v450_v1 = vld [vmem:[%s4110_s9 + $0x4] sm:$0xf]  ;;  %v461_v2 = vshrl.u32 %v449_v0, 16  ;;  %v464_v3 = vshll.u32 %v449_v0, 16  ;;  %vm458_vm4 = vsmask.f32 4368  ;;  %vm4148_vm5 = vmand %vm541_vm2, %vm542_vm1 }
 0x124   : > { %v469_v4 = vshrl.u32 %v450_v1, 16  ;;  %v544_v5 = vld [vmem:[#allocation2 + $0xc] sm:$0xf]  ;;  %v451_v6 = vld [vmem:[%s4110_s9 + $0x8] sm:$0xf]  ;;  %v472_v8 = vshll.u32 %v450_v1, 16  ;;  %vm4154_vm6 = vmand %vm549_vm3, %vm457_vm0 }
 0x125   : > { %v452_v7 = vld [vmem:[%s4110_s9 + $0xc] sm:$0xf]  ;;  %v463_v9 = vrot.slane %v461_v2, 7  ;;  %v478_v13 = vshrl.u32 %v451_v6, 16  ;;  %v481_v14 = vshll.u32 %v451_v6, 16  ;;  %vm4168_vm7 = vmor %vm457_vm0, %vm458_vm4  ;;  %s4573_s11 = sld [smem:[#allocation26_spill]] }
 0x126   : > { %v471_v11 = vrot.slane %v469_v4, 7  ;;  %v551_v12 = vld [vmem:[#allocation2 + $0x14] sm:$0x1]  ;;  %v554_v16 = vld [vmem:[#allocation2 + $0x18] sm:$0xf]  ;;  %v486_v17 = vshrl.u32 %v452_v7, 16  ;;  %vm4182_vm8 = vmand %vm549_vm3, %vm542_vm1 }
 0x127   : > { %v453_v18 = vld [vmem:[%s4110_s9 + $0x10] sm:$0xf]  ;;  %v489_v19 = vshll.u32 %v452_v7, 16  ;;  %v466_v20 = vor.u32 %v464_v3, %v463_v9  ;;  %v480_v22 = vrot.slane %v478_v13, 7  ;;  %v454_v24 = vld [vmem:[%s4110_s9 + $0x14] sm:$0xf] }
 0x128   : > { %v476_v21 = vrot.slane %v471_v11, 4  ;;  %v495_v23 = vshrl.u32 %v453_v18, 16  ;;  %v488_v25 = vrot.slane %v486_v17, 7  ;;  %v558_v26 = vld [vmem:[#allocation2 + $0x20] sm:$0x1]  ;;  %v498_v27 = vshll.u32 %v453_v18, 16 }
 0x129   : > { %v503_v28 = vshrl.u32 %v454_v24, 16  ;;  %v467_v29 = vrot.slane %v463_v9, 4  ;;  %v545_v30 = vsel %vm4148_vm5, %v466_v20, %v544_v5  ;;  %v483_v32 = vor.u32 %v481_v14, %v480_v22  ;;  %v561_v34 = vld [vmem:[#allocation2 + $0x24] sm:$0xf]  ;;  %v455_v35 = vld [vmem:[%s4110_s9 + $0x18] sm:$0xf] }
 0x12a   : > { %v552_v31 = vsel %vm4154_vm6, %v476_v21, %v551_v12  ;;  %v497_v33 = vrot.slane %v495_v23, 7  ;;  %546 = vst [vmem:[#allocation2 + $0xc] sm:$0xf] %v545_v30  ;;  %v493_v36 = vrot.slane %v488_v25, 4  ;;  %v512_v38 = vshrl.u32 %v455_v35, 16 }
 0x12b   : > { %553 = vst [vmem:[#allocation2 + $0x14] sm:$0x1] %v552_v31  ;;  %v505_v37 = vrot.slane %v503_v28, 7  ;;  %v515_v39 = vshll.u32 %v455_v35, 16  ;;  %v456_v40 = vld [vmem:[%s4110_s9 + $0x1c] sm:$0xf]  ;;  %v555_v42 = vsel %vm4148_vm5, %v483_v32, %v554_v16  ;;  %v474_v47 = vor.u32 %v472_v8, %v471_v11 }
 0x12c   : > { %v500_v43 = vor.u32 %v498_v27, %v497_v33  ;;  %v565_v44 = vld [vmem:[#allocation2 + $0x2c] sm:$0x1]  ;;  %v568_v45 = vld [vmem:[#allocation2 + $0x30] sm:$0xf]  ;;  %v520_v46 = vshrl.u32 %v456_v40, 16  ;;  %v559_v48 = vsel %vm4154_vm6, %v493_v36, %v558_v26  ;;  %v514_v50 = vrot.slane %v512_v38, 7 }
 0x12d   : > { %556 = vst [vmem:[#allocation2 + $0x18] sm:$0xf] %v555_v42  ;;  %v510_v49 = vrot.slane %v505_v37, 4  ;;  %v572_v51 = vld [vmem:[#allocation2 + $0x38] sm:$0x1]  ;;  %v484_v52 = vrot.slane %v480_v22, 4  ;;  %v475_v55 = vsel %vm4168_vm7, %v467_v29, %v474_v47  ;;  %v491_v56 = vor.u32 %v489_v19, %v488_v25 }
 0x12e   : > { %560 = vst [vmem:[#allocation2 + $0x20] sm:$0x1] %v559_v48  ;;  %v562_v53 = vsel %vm4148_vm5, %v500_v43, %v561_v34  ;;  %v522_v54 = vrot.slane %v520_v46, 7  ;;  %v575_v57 = vld [vmem:[#allocation2] sm:$0x1]  ;;  %v517_v61 = vor.u32 %v515_v39, %v514_v50  ;;  %v501_v62 = vrot.slane %v497_v33, 4 }
 0x12f   : > { %v590_v58 = vld [vmem:[#allocation2 + $0x3c] sm:$0x1]  ;;  %563 = vst [vmem:[#allocation2 + $0x24] sm:$0xf] %v562_v53  ;;  %v566_v60 = vsel %vm4154_vm6, %v510_v49, %v565_v44  ;;  %548 = vst.msk [vmem:[#allocation2 + $0x10] sm:$0xf] %vm541_vm2, %v475_v55  ;;  %v492_v3 = vsel %vm4168_vm7, %v484_v52, %v491_v56 }
 0x130   : > { %v506_v63 = vshll.u32 %v454_v24, 16  ;;  %v594_v0 = vld [vmem:[#allocation2 + $0x8] sm:$0x1]  ;;  %v609_v1 = vld [vmem:[#allocation2 + $0x44] sm:$0x1]  ;;  %v527_v2 = vrot.slane %v522_v54, 4  ;;  %v569_v6 = vsel %vm4148_vm5, %v517_v61, %v568_v45 }
 0x131   : > { %567 = vst [vmem:[#allocation2 + $0x2c] sm:$0x1] %v566_v60  ;;  %v518_v4 = vrot.slane %v514_v50, 4  ;;  %v523_v5 = vshll.u32 %v456_v40, 16  ;;  %557 = vst.msk [vmem:[#allocation2 + $0x1c] sm:$0xf] %vm541_vm2, %v492_v3 }
 0x132   : > { %v508_v7 = vor.u32 %v506_v63, %v505_v37  ;;  %v576_v8 = vsel %vm4154_vm6, 0, %v575_v57  ;;  %v591_v9 = vsel %vm4154_vm6, 0, %v590_v58  ;;  %570 = vst [vmem:[#allocation2 + $0x30] sm:$0xf] %v569_v6  ;;  %v573_v11 = vsel %vm4154_vm6, %v527_v2, %v572_v51  ;;  %v578_v13 = vld [vmem:[#allocation2 + $0xc] sm:$0x1] }
 0x133   : > { %v525_v12 = vor.u32 %v523_v5, %v522_v54  ;;  %577 = vst [vmem:[#allocation2] sm:$0x1] %v576_v8  ;;  %592 = vst [vmem:[#allocation2 + $0x3c] sm:$0x1] %v591_v9  ;;  %v595_v14 = vsel %vm4182_vm8, 0, %v594_v0  ;;  %v610_v17 = vsel %vm4182_vm8, 0, %v609_v1 }
 0x134   : > { %v597_v16 = vld [vmem:[#allocation2 + $0x14] sm:$0x1]  ;;  %574 = vst [vmem:[#allocation2 + $0x38] sm:$0x1] %v573_v11  ;;  %v509_v18 = vsel %vm4168_vm7, %v501_v62, %v508_v7  ;;  %v579_v19 = vsel %vm4154_vm6, 0, %v578_v13  ;;  %p2632_p12 = scmp.le.s32.totalorder %s4573_s11, 0 }
 0x135   : > { %596 = vst [vmem:[#allocation2 + $0x8] sm:$0x1] %v595_v14  ;;  %v598_v20 = vsel %vm4182_vm8, 0, %v597_v16  ;;  %611 = vst [vmem:[#allocation2 + $0x44] sm:$0x1] %v610_v17  ;;  %v526_v21 = vsel %vm4168_vm7, %v518_v4, %v525_v12 }
 0x136   : > { %564 = vst.msk [vmem:[#allocation2 + $0x28] sm:$0xf] %vm541_vm2, %v509_v18  ;;  %580 = vst [vmem:[#allocation2 + $0xc] sm:$0x1] %v579_v19  ;;  %v581_v22 = vld [vmem:[#allocation2 + $0x18] sm:$0x1] }
 0x137   : > { %599 = vst [vmem:[#allocation2 + $0x14] sm:$0x1] %v598_v20  ;;  %571 = vst.msk [vmem:[#allocation2 + $0x34] sm:$0xf] %vm541_vm2, %v526_v21  ;;  %v582_v23 = vsel %vm4154_vm6, 0, %v581_v22  ;;  %615 = sbr.rel (%p2632_p12) target bundleno = 326 (0x146), region = 72 }
 0x138   : > { %v600_v24 = vld [vmem:[#allocation2 + $0x20] sm:$0x1]  ;;  %583 = vst [vmem:[#allocation2 + $0x18] sm:$0x1] %v582_v23  ;;  %v584_v25 = vld [vmem:[#allocation2 + $0x24] sm:$0x1] }
 0x139   : > { %v601_v26 = vsel %vm4182_vm8, 0, %v600_v24  ;;  %v585_v27 = vsel %vm4154_vm6, 0, %v584_v25  ;;  %v603_v28 = vld [vmem:[#allocation2 + $0x2c] sm:$0x1]  ;;  %v587_v30 = vld [vmem:[#allocation2 + $0x30] sm:$0x1] }
 0x13a   : > { %602 = vst [vmem:[#allocation2 + $0x20] sm:$0x1] %v601_v26  ;;  %586 = vst [vmem:[#allocation2 + $0x24] sm:$0x1] %v585_v27  ;;  %v604_v29 = vsel %vm4182_vm8, 0, %v603_v28  ;;  %v588_v31 = vsel %vm4154_vm6, 0, %v587_v30 }
 0x13b   : > { %605 = vst [vmem:[#allocation2 + $0x2c] sm:$0x1] %v604_v29  ;;  %v606_v32 = vld [vmem:[#allocation2 + $0x38] sm:$0x1]  ;;  %589 = vst [vmem:[#allocation2 + $0x30] sm:$0x1] %v588_v31 }
 0x13c   : > { %v607_v33 = vsel %vm4182_vm8, 0, %v606_v32  ;;  %v616_v34 = vld [vmem:[%s378_s23] sm:$0xf] (!%p2632_p12)  ;;  %v617_v35 = vld [vmem:[%s378_s23 + $0x4] sm:$0xf] (!%p2632_p12) }
 0x13d   : > { %608 = vst [vmem:[#allocation2 + $0x38] sm:$0x1] %v607_v33  ;;  %v619_v36 = vshrl.u32 (!%p2632_p12), %v616_v34, 16  ;;  %v622_v37 = vshll.u32 (!%p2632_p12), %v616_v34, 16  ;;  %v627_v38 = vshrl.u32 (!%p2632_p12), %v617_v35, 16  ;;  %v630_v39 = vshll.u32 (!%p2632_p12), %v617_v35, 16 }
 0x13e   : > { %v638_v43 = vld [vmem:[#allocation2] sm:$0xf]  ;;  %v642_v44 = vld [vmem:[#allocation2 + $0x8] sm:$0x1] }
 0x13f   : > { %v621_v40 = vrot.slane %v619_v36, 7  ;;  %v629_v42 = vrot.slane %v627_v38, 7 }
 0x141   : > { %v624_v45 = vor.u32 %v622_v37, %v621_v40  ;;  %v625_v46 = vrot.slane %v621_v40, 4  ;;  %v632_v47 = vor.u32 %v630_v39, %v629_v42  ;;  %v634_v48 = vrot.slane %v629_v42, 4 }
 0x143   : > { %v639_v49 = vsel %vm4148_vm5, %v624_v45, %v638_v43  ;;  %v633_v50 = vsel %vm4168_vm7, %v625_v46, %v632_v47  ;;  %v643_v51 = vsel %vm4154_vm6, %v634_v48, %v642_v44 }
 0x144   : > { %640 = vst [vmem:[#allocation2] sm:$0xf] %v639_v49  ;;  %641 = vst.msk [vmem:[#allocation2 + $0x4] sm:$0xf] %vm541_vm2, %v633_v50 }
 0x145   : > { %644 = vst [vmem:[#allocation2 + $0x8] sm:$0x1] %v643_v51 }
 0x146 PF: > { %s4574_s15 = sld [smem:[#allocation26_spill]] }
 0x14c   : > { %p2633_p4 = scmp.ne.s32.totalorder %s4574_s15, 0 }
 0x14d   : > { %v649_v52 = vld [vmem:[#allocation2] sm:$0xf] (!%p2633_p4)  ;;  %v653_v53 = vld [vmem:[#allocation2 + $0x8] sm:$0x1] (!%p2633_p4)  ;;  %v3660_v55 = vmov (!%p2633_p4), 0  }
 0x14e   : > { %648 = sbr.rel (%p2633_p4) target bundleno = 341 (0x155), region = 76  ;;  %v650_v54 = vsel (!%p2633_p4), %vm4148_vm5, 0, %v649_v52  ;;  %652 = vst.msk [vmem:[#allocation2 + $0x4] sm:$0xf] (!%p2633_p4), %vm541_vm2, %v3660_v55  ;;  %v654_v56 = vsel (!%p2633_p4), %vm4154_vm6, 0, %v653_v53 }
 0x14f   : > { %651 = vst [vmem:[#allocation2] sm:$0xf] (!%p2633_p4), %v650_v54  ;;  %655 = vst [vmem:[#allocation2 + $0x8] sm:$0x1] (!%p2633_p4), %v654_v56 }
 0x155 PF: > { %s4575_s30 = sld [smem:[#allocation26_spill]] }
 0x15b   : > { %p2634_p5 = scmp.ge.s32.totalorder %s4575_s30, 3 }
 0x15c   : > { %v660_v57 = vld [vmem:[%s387_s6] sm:$0xf] (!%p2634_p5)  ;;  %v661_v58 = vld [vmem:[%s387_s6 + $0x4] sm:$0xf] (!%p2634_p5) }
 0x15d   : > { %659 = sbr.rel (%p2634_p5) target bundleno = 358 (0x166), region = 80  ;;  %v663_v59 = vshrl.u32 (!%p2634_p5), %v660_v57, 16  ;;  %v666_v60 = vshll.u32 (!%p2634_p5), %v660_v57, 16  ;;  %v671_v61 = vshrl.u32 (!%p2634_p5), %v661_v58, 16  ;;  %v674_v62 = vshll.u32 (!%p2634_p5), %v661_v58, 16 }
 0x15e   : > { %v683_v1 = vld [vmem:[#allocation2 + $0x3c] sm:$0xf] (!%p2634_p5)  ;;  %v687_v2 = vld [vmem:[#allocation2 + $0x44] sm:$0x1] (!%p2634_p5) }
 0x15f   : > { %v665_v63 = vrot.slane (!%p2634_p5), %v663_v59, 7  ;;  %v673_v0 = vrot.slane (!%p2634_p5), %v671_v61, 7 }
 0x161   : > { %v668_v3 = vor.u32 (!%p2634_p5), %v666_v60, %v665_v63  ;;  %v669_v4 = vrot.slane (!%p2634_p5), %v665_v63, 4  ;;  %v676_v5 = vor.u32 (!%p2634_p5), %v674_v62, %v673_v0  ;;  %v678_v6 = vrot.slane (!%p2634_p5), %v673_v0, 4 }
 0x163   : > { %v684_v7 = vsel (!%p2634_p5), %vm4148_vm5, %v668_v3, %v683_v1  ;;  %v677_v8 = vsel (!%p2634_p5), %vm4168_vm7, %v669_v4, %v676_v5  ;;  %v688_v9 = vsel (!%p2634_p5), %vm4154_vm6, %v678_v6, %v687_v2 }
 0x164   : > { %685 = vst [vmem:[#allocation2 + $0x3c] sm:$0xf] %v684_v7  ;;  %686 = vst.msk [vmem:[#allocation2 + $0x40] sm:$0xf] %vm541_vm2, %v677_v8 }
 0x165   : > { %689 = vst [vmem:[#allocation2 + $0x44] sm:$0x1] %v688_v9 }
 0x166 PF: > { %s4576_s12 = sld [smem:[#allocation26_spill]] }
 0x16c   : > { %p2635_p10 = scmp.ne.s32.totalorder %s4576_s12, 3 }
 0x16d   : > { %v695_v11 = vld [vmem:[#allocation2 + $0x3c] sm:$0xf] (!%p2635_p10)  ;;  %v699_v12 = vld [vmem:[#allocation2 + $0x44] sm:$0x1] (!%p2635_p10)  ;;  %v3661_v14 = vmov (!%p2635_p10), 0  }
 0x16e   : > { %693 = sbr.rel (%p2635_p10) target bundleno = 373 (0x175), region = 84  ;;  %v696_v13 = vsel (!%p2635_p10), %vm4148_vm5, 0, %v695_v11  ;;  %698 = vst.msk [vmem:[#allocation2 + $0x40] sm:$0xf] (!%p2635_p10), %vm541_vm2, %v3661_v14  ;;  %v700_v41 = vsel (!%p2635_p10), %vm4154_vm6, 0, %v699_v12 }
 0x16f   : > { %697 = vst [vmem:[#allocation2 + $0x3c] sm:$0xf] (!%p2635_p10), %v696_v13  ;;  %701 = vst [vmem:[#allocation2 + $0x44] sm:$0x1] (!%p2635_p10), %v700_v41 }
 0x175 PF: > { %v3182_v16 = vld [vmem:[#allocation10 + $0x40] sm:$0xff]   ;;  %v3186_v20 = vld [vmem:[#allocation10 + $0x48] sm:$0xff]   ;;  %v3190_v15 = vld [vmem:[#allocation10 + $0x50] sm:$0xff]   ;;  %vm730_vm9 = vcmask 64512   ;;  %vm808_vm10 = vsmask.f32 7424 }
 0x176   : > { %v3183_v17 = vld [vmem:[#allocation10 + $0xc0] sm:$0xff]   ;;  %2797 = vmatprep.subr.bf16.mxu0 %v3182_v16  ;;  %v3187_v10 = vld [vmem:[#allocation10 + $0xc8] sm:$0xff]   ;;  %v3191_v23 = vld [vmem:[#allocation10 + $0xd0] sm:$0xff]   ;;  %vm925_vm11 = vcmask 1046528   ;;  %s4577_s16 = sld [smem:[#allocation26_spill]]  ;;  %s4578_s8 = sld [smem:[#allocation27_spill]] }
 0x177   : > { %v3184_v18 = vld [vmem:[#allocation10] sm:$0xff]   ;;  %2837 = vmatprep.subr.bf16.mxu1 %v3183_v17  ;;  %v3188_v21 = vld [vmem:[#allocation10 + $0x8] sm:$0xff]   ;;  %v3192_v24 = vld [vmem:[#allocation10 + $0x10] sm:$0xff]   ;;  %s2427_s19 = sshll.u32 %s4228_s5, 4  ;;  %s4579_s23 = sld [smem:[#allocation43_spill]]  ;;  %s4374_s19 = int_to_ptr.vmem [resolvable:$true] %s2427_s19 }
 0x178   : > { %v3185_v19 = vld [vmem:[#allocation10 + $0x80] sm:$0xff]   ;;  %2798 = vmatpush3.bf16.msra.mxu0 %v3184_v18  ;;  %v3189_v22 = vld [vmem:[#allocation10 + $0x88] sm:$0xff]   ;;  %v3193_v25 = vld [vmem:[#allocation10 + $0x90] sm:$0xff]   ;;  %s2411_s2 = scalar_lea.sflag [#allocation6], %s4106_s21  ;;  %s3488_s6 = scalar_lea.vmem %s4374_s19, 1024 }
 0x179   : > { %2838 = vmatpush3.bf16.msra.mxu1 %v3185_v19  ;;  %2799 = vmatprep.subr.bf16.mxu0 %v3186_v20  ;;  %v3194_v26 = vld [vmem:[#allocation10 + $0x58] sm:$0xff]   ;;  %v3198_v30 = vld [vmem:[#allocation10 + $0x60] sm:$0xff]   ;;  %v3202_v34 = vld [vmem:[#allocation10 + $0x68] sm:$0xff]   ;;  %p3489_p8 = scmp.ne.s32.totalorder %s4374_s19, %s3488_s6  ;;  %p4581_p2 = scmp.ne.s32.totalorder %s4536_s7, 0 }
 0x17a   : > { %2839 = vmatprep.subr.bf16.mxu1 %v3187_v10  ;;  %v3195_v27 = vld [vmem:[#allocation10 + $0xd8] sm:$0xff]   ;;  %v3199_v31 = vld [vmem:[#allocation10 + $0xe0] sm:$0xff]   ;;  %v3203_v35 = vld [vmem:[#allocation10 + $0xe8] sm:$0xff]   ;;  %s3662_s22 = smov [#allocation15]  }
 0x17b   : > { %v3196_v28 = vld [vmem:[#allocation10 + $0x18] sm:$0xff]   ;;  %v3200_v32 = vld [vmem:[#allocation10 + $0x20] sm:$0xff]   ;;  %v3204_v36 = vld [vmem:[#allocation10 + $0x28] sm:$0xff]   ;;  %p3490_p9 = pnand %p3489_p8, %p4581_p2  ;;  %s3492_s11 = sshll.u32 %s3662_s22, 4  ;;  %s3493_s11 = int_to_ptr.vmem [resolvable:$false] %s3492_s11 }
 0x17c   : > { %2800 = vmatpush3.bf16.msra.mxu0 %v3188_v21  ;;  %v3197_v29 = vld [vmem:[#allocation10 + $0x98] sm:$0xff]   ;;  %v3201_v33 = vld [vmem:[#allocation10 + $0xa0] sm:$0xff]   ;;  %v3205_v37 = vld [vmem:[#allocation10 + $0xa8] sm:$0xff]   ;;  %s2784_s9 = sshll.u32 %s4577_s16, 3  ;;  %s2773_s0 = sshll.u32 %s4578_s8, 5 }
 0x17d   : > { %2840 = vmatpush3.bf16.msra.mxu1 %v3189_v22  ;;  %2801 = vmatprep.subr.bf16.mxu0 %v3190_v15  ;;  %v3206_v38 = vld [vmem:[#allocation10 + $0x70] sm:$0xff]   ;;  %v3210_v43 = vld [vmem:[#allocation10 + $0x78] sm:$0xff]   ;;  %v3215_v48 = vld [vmem:[#allocation2 + $0x8] ss:$0 sps:$4 sm:$0x11]   ;;  %s2424_s3 = sadd.s32 %s2784_s9, %s2773_s0  ;;  %s4580_s4 = smov %s4579_s23 }
 0x17e   : > { %2841 = vmatprep.subr.bf16.mxu1 %v3191_v23  ;;  %v3207_v39 = vld [vmem:[#allocation10 + $0xf0] sm:$0xff]   ;;  %v3211_v44 = vld [vmem:[#allocation10 + $0xf8] sm:$0xff]   ;;  %v3216_v49 = vld [vmem:[#allocation2 + $0xc] sm:$0xff]   ;;  %v795_v51 = vsel %vm730_vm9, %v3215_v48, 0  ;;  %s2774_s25 = sshll.u32 %s2424_s3, 7  ;;  %p3491_p7 = pneg %p3490_p9 }
 0x17f   : > { %v3208_v40 = vld [vmem:[#allocation10 + $0x30] sm:$0xff]   ;;  %v3212_v45 = vld [vmem:[#allocation10 + $0x38] sm:$0xff]   ;;  %v815_v54 = vshll.u32 %v795_v51, 16  ;;  %2789 = vmatprep.mubr.msk.bf16.mxu1 %vm730_vm9, %v3216_v49  ;;  %v3219_v59 = vld [vmem:[#allocation2 + $0x8] ss:$0 sps:$4 sm:$0x11]   ;;  %s4372_s14 = scalar_lea.hbm %s4579_s23, %s2774_s25  ;;  %p3495_p6 = scmp.lt.s32.totalorder %s4374_s19, %s3493_s11 }
 0x180   : > { %2802 = vmatpush3.bf16.msra.mxu0 %v3192_v24  ;;  %v3209_v42 = vld [vmem:[#allocation10 + $0xb0] sm:$0xff]   ;;  %v3213_v46 = vld [vmem:[#allocation10 + $0xb8] sm:$0xff]   ;;  %v3220_v60 = vld [vmem:[#allocation10 + $0x140] sm:$0xff]   ;;  %v904_v0 = vsel %vm730_vm9, %v3219_v59, 0  ;;  %s3494_s15 = scalar_lea.vmem %s3493_s11, 2048 }
 0x181   : > { %2842 = vmatpush3.bf16.msra.mxu1 %v3193_v25  ;;  %2803 = vmatprep.subr.bf16.mxu0 %v3194_v26  ;;  %v3214_v47 = vld [vmem:[#allocation2] sm:$0xff]   ;;  %v817_v57 = vrot.slane %v815_v54, 1  ;;  %v3221_v62 = vld [vmem:[#allocation10 + $0x1c0] sm:$0xff]   ;;  %v927_v2 = vrot.slane %v904_v0, 1  ;;  %v3224_v7 = vld [vmem:[#allocation10 + $0x148] sm:$0xff]   ;;  %p3496_p13 = scmp.lt.s32.totalorder %s3494_s15, %s3488_s6 }
 0x182   : > { %2843 = vmatprep.subr.bf16.mxu1 %v3195_v27  ;;  %v793_v50 = vsel %vm730_vm9, %v3214_v47, 0  ;;  %v3218_v55 = vld [vmem:[#allocation2] sm:$0xfe]   ;;  %v3222_v3 = vld [vmem:[#allocation10 + $0x100] sm:$0xff]   ;;  %v3225_v8 = vld [vmem:[#allocation10 + $0x1c8] sm:$0xff]  }
 0x183   : > { %v809_v52 = vshrl.u32 %v793_v50, 16  ;;  %v811_v53 = vshll.u32 %v793_v50, 16  ;;  %v3217_v58 = vld [vmem:[#allocation2] sm:$0xff]   ;;  %v902_v61 = vsel %vm730_vm9, %v3218_v55, 0  ;;  %v3223_v5 = vld [vmem:[#allocation10 + $0x180] sm:$0xff]   ;;  %v3226_v9 = vld [vmem:[#allocation10 + $0x108] sm:$0xff]   ;;  %p3497_p11 = por %p3496_p13, %p3495_p6 }
 0x184   : > { %2804 = vmatpush3.bf16.msra.mxu0 %v3196_v28  ;;  %v926_v1 = vrot.slane %v902_v61, 1  ;;  %v3227_v11 = vld [vmem:[#allocation10 + $0x188] sm:$0xff]   ;;  %v3230_v14 = vld [vmem:[#allocation2 + $0x18] sm:$0xff]   ;;  %v3247_v51 = vld [vmem:[#allocation2 + $0x20] ss:$0 sps:$4 sm:$0x11]  }
 0x185   : > { %2844 = vmatpush3.bf16.msra.mxu1 %v3197_v29  ;;  %2805 = vmatprep.subr.bf16.mxu0 %v3198_v30  ;;  %v813_v56 = vrot.slane %v811_v53, 1  ;;  %v3228_v12 = vld [vmem:[#allocation2 + $0xc] sm:$0xff]   ;;  %v3229_v13 = vld [vmem:[#allocation2 + $0x14] ss:$0 sps:$4 sm:$0x11]   ;;  %v3234_v17 = vld [vmem:[#allocation10 + $0x150] sm:$0xff]   ;;  %p3498_p0 = pnand %p3497_p11, %p3491_p7 }
 0x186   : > { %2845 = vmatprep.subr.bf16.mxu1 %v3199_v31  ;;  %v928_v6 = vsel %vm925_vm11, %v926_v1, %v927_v2  ;;  %v797_v41 = vsel %vm730_vm9, %v3228_v12, 0  ;;  %v799_v16 = vsel %vm730_vm9, %v3229_v13, 0  ;;  %v3235_v10 = vld [vmem:[#allocation10 + $0x1d0] sm:$0xff]   ;;  %v3232_v21 = vld [vmem:[#allocation2 + $0xc] sm:$0xfe]  }
 0x187   : > { %v814_v63 = vor.u32 %v813_v56, %v809_v52  ;;  %v819_v18 = vshrl.u32 %v797_v41, 16  ;;  %v821_v19 = vshll.u32 %v797_v41, 16  ;;  %v825_v20 = vshll.u32 %v799_v16, 16  ;;  %v3231_v23 = vld [vmem:[#allocation2 + $0xc] sm:$0xff]   ;;  %v3236_v25 = vld [vmem:[#allocation10 + $0x110] sm:$0xff]  }
 0x188   : > { %2806 = vmatpush3.bf16.msra.mxu0 %v3200_v32  ;;  %v3233_v24 = vld [vmem:[#allocation2 + $0x14] ss:$0 sps:$4 sm:$0x11]   ;;  %v906_v26 = vsel %vm730_vm9, %v3232_v21, 0  ;;  %v3237_v27 = vld [vmem:[#allocation10 + $0x190] sm:$0xff]   ;;  %v3238_v32 = vld [vmem:[#allocation10 + $0x158] sm:$0xff]  }
 0x189   : > { %2846 = vmatpush3.bf16.msra.mxu1 %v3201_v33  ;;  %2807 = vmatprep.subr.bf16.mxu0 %v3202_v34  ;;  %v818_v4 = vsel %vm808_vm10, %v814_v63, %v817_v57  ;;  %v823_v22 = vrot.slane %v821_v19, 1  ;;  %v827_v15 = vrot.slane %v825_v20, 1  ;;  %v908_v29 = vsel %vm730_vm9, %v3233_v24, 0  ;;  %v3246_v47 = vld [vmem:[#allocation2 + $0x18] sm:$0xfe]   ;;  %v3248_v52 = vld [vmem:[#allocation10 + $0x160] sm:$0xff]  }
 0x18a   : > { %2847 = vmatprep.subr.bf16.mxu1 %v3203_v35  ;;  %2071 = vmatprep.mubr.bf16.mxu0 %v818_v4  ;;  %v929_v30 = vrot.slane %v906_v26, 1  ;;  %v930_v31 = vrot.slane %v908_v29, 1  ;;  %v3239_v35 = vld [vmem:[#allocation10 + $0x1d8] sm:$0xff]   ;;  %v3245_v50 = vld [vmem:[#allocation2 + $0x18] sm:$0xff]   ;;  %v910_v53 = vsel %vm730_vm9, %v3246_v47, 0  ;;  %v3249_v54 = vld [vmem:[#allocation10 + $0x1e0] sm:$0xff]  }
 0x18b   : > { %v824_v28 = vor.u32 %v823_v22, %v819_v18  ;;  %v912_v56 = vsel %vm730_vm9, %v3247_v51, 0  ;;  %v932_v57 = vrot.slane %v910_v53, 1  ;;  %v3250_v59 = vld [vmem:[#allocation10 + $0x120] sm:$0xff]   ;;  %v3252_v63 = vld [vmem:[#allocation10 + $0x168] sm:$0xff]   ;;  %v3263_v13 = vld [vmem:[#allocation10 + $0x1f0] sm:$0xff]  }
 0x18c   : > { %2808 = vmatpush3.bf16.msra.mxu0 %v3204_v36  ;;  %v931_v34 = vsel %vm925_vm11, %v929_v30, %v930_v31  ;;  %v3240_v36 = vld [vmem:[#allocation10 + $0x118] sm:$0xff]   ;;  %v3251_v61 = vld [vmem:[#allocation10 + $0x1a0] sm:$0xff]   ;;  %v3253_v0 = vld [vmem:[#allocation10 + $0x1e8] sm:$0xff]  }
 0x18d   : > { %2848 = vmatpush3.bf16.msra.mxu1 %v3205_v37  ;;  %2809 = vmatprep.subr.bf16.mxu0 %v3206_v38  ;;  %v828_v33 = vsel %vm808_vm10, %v824_v28, %v827_v15  ;;  %v3241_v37 = vld [vmem:[#allocation10 + $0x198] sm:$0xff]   ;;  %v3242_v38 = vld [vmem:[#allocation2 + $0x18] sm:$0xff]   ;;  %v3254_v1 = vld [vmem:[#allocation10 + $0x128] sm:$0xff]  }
 0x18e   : > { %2849 = vmatprep.subr.bf16.mxu1 %v3207_v39  ;;  %v3243_v39 = vld [vmem:[#allocation2 + $0x20] ss:$0 sps:$4 sm:$0x11]   ;;  %v3255_v2 = vld [vmem:[#allocation10 + $0x1a8] sm:$0xff]   ;;  %v3264_v19 = vld [vmem:[#allocation10 + $0x130] sm:$0xff]  }
 0x18f   : > { %v3257_v4 = vld [vmem:[#allocation2 + $0x2c] ss:$0 sps:$4 sm:$0x11]   ;;  %v3266_v24 = vld [vmem:[#allocation10 + $0x178] sm:$0xff]   ;;  %v3270_v30 = vld [vmem:[#allocation2 + $0xc] sm:$0xfe]  }
 0x190   : > { %2810 = vmatpush3.bf16.msra.mxu0 %v3208_v40  ;;  %v3244_v40 = vld [vmem:[#allocation2 + $0x24] sm:$0xff]   ;;  %v3261_v18 = vld [vmem:[#allocation2 + $0x2c] ss:$0 sps:$4 sm:$0x11]   ;;  %v3276_v53 = vld [vmem:[#allocation2 + $0x18] sm:$0xff]  }
 0x191   : > { %2850 = vmatpush3.bf16.msra.mxu1 %v3209_v42  ;;  %2811 = vmatprep.subr.bf16.mxu0 %v3210_v43  ;;  %v801_v42 = vsel %vm730_vm9, %v3242_v38, 0  ;;  %v803_v43 = vsel %vm730_vm9, %v3243_v39, 0  ;;  %v916_v22 = vsel %vm730_vm9, %v3261_v18, 0  ;;  %v3268_v28 = vld [vmem:[#allocation10 + $0x138] sm:$0xff]   ;;  %v3274_v38 = vld [vmem:[#allocation2 + $0xc] sm:$0xff]  }
 0x192   : > { %2851 = vmatprep.subr.bf16.mxu1 %v3211_v44  ;;  %v829_v44 = vshrl.u32 %v801_v42, 16  ;;  %v3269_v29 = vld [vmem:[#allocation10 + $0x1b8] sm:$0xff]   ;;  %v3271_v31 = vld [vmem:[#allocation2 + $0x14] ss:$0 sps:$4 sm:$0x11]  }
 0x194   : > { %2812 = vmatpush3.bf16.msra.mxu0 %v3212_v45  ;;  %v831_v45 = vshll.u32 %v801_v42, 16 }
 0x195   : > { %2852 = vmatpush3.bf16.msra.mxu1 %v3213_v46  ;;  %2877 = vmatprep.subr.bf16.mxu0 %v3220_v60  ;;  %v835_v46 = vshll.u32 %v803_v43, 16 }
 0x196   : > { %2917 = vmatprep.subr.bf16.mxu1 %v3221_v62  ;;  %v833_v48 = vrot.slane %v831_v45, 1  ;;  %v3275_v45 = vld [vmem:[#allocation2 + $0x14] ss:$0 sps:$4 sm:$0x11]  }
 0x197   : > { %2785 = vmatmul.mubr.msk.bf16.vlgmr.msra.gmra.mrb[0].mxu0 %vm730_vm9, %v3217_v58  ;;  %v837_v49 = vrot.slane %v835_v46, 1  ;;  %v933_v58 = vrot.slane %v912_v56, 1 }
 0x198   : > { %2137 = vmatmul.mubr.bf16.vlgmr.msra.gmra.mrb[0].mxu1 %v928_v6  ;;  %2878 = vmatpush3.bf16.msra.mxu0 %v3222_v3  ;;  %v834_v55 = vor.u32 %v833_v48, %v829_v44  ;;  %v3256_v3 = vld [vmem:[#allocation2 + $0x24] sm:$0xff]   ;;  %v1035_v48 = vsel %vm730_vm9, %v3274_v38, 0 }
 0x199   : > { %2918 = vmatpush3.bf16.msra.mxu1 %v3223_v5  ;;  %2879 = vmatprep.subr.bf16.mxu0 %v3224_v7  ;;  %v934_v62 = vsel %vm925_vm11, %v932_v57, %v933_v58  ;;  %v3258_v5 = vld [vmem:[#allocation2 + $0x30] sm:$0xff]   ;;  %v805_v6 = vsel %vm730_vm9, %v3256_v3, 0  ;;  %v807_v7 = vsel %vm730_vm9, %v3257_v4, 0  ;;  %v1050_v51 = vshrl.u32 %v1035_v48, 16 }
 0x19a   : > { %2919 = vmatprep.subr.bf16.mxu1 %v3225_v8  ;;  %2790 = vmatprep.mubr.msk.bf16.mxu1 %vm730_vm9, %v3230_v14  ;;  %v838_v60 = vsel %vm808_vm10, %v834_v55, %v837_v49  ;;  %v3262_v8 = vld [vmem:[#allocation10 + $0x170] sm:$0xff]   ;;  %v845_v12 = vshll.u32 %v807_v7, 16  ;;  %v3260_v14 = vld [vmem:[#allocation2 + $0x24] sm:$0xfe]   ;;  %v3278_v57 = vld [vmem:[#allocation10 + $0x208] sm:$0xff]  }
 0x19b   : > { %2079 = vmatprep.mubr.bf16.mxu0 %v828_v33  ;;  %v914_v20 = vsel %vm730_vm9, %v3260_v14, 0  ;;  %v1143_v33 = vsel %vm730_vm9, %v3270_v30, 0  ;;  %v3288_v30 = vld [vmem:[#allocation2 + $0x24] sm:$0xfe]  }
 0x19c   : > { %2880 = vmatpush3.bf16.msra.mxu0 %v3226_v9  ;;  %v839_v9 = vshrl.u32 %v805_v6, 16  ;;  %v847_v16 = vrot.slane %v845_v12, 1  ;;  %v935_v15 = vrot.slane %v914_v20, 1 }
 0x19d   : > { %2920 = vmatpush3.bf16.msra.mxu1 %v3227_v11  ;;  %2881 = vmatprep.subr.bf16.mxu0 %v3234_v17  ;;  %v841_v11 = vshll.u32 %v805_v6, 16  ;;  %v3259_v17 = vld [vmem:[#allocation2 + $0x24] sm:$0xff]  }
 0x19e   : > { %2921 = vmatprep.subr.bf16.mxu1 %v3235_v10  ;;  %v3265_v10 = vld [vmem:[#allocation10 + $0x1b0] sm:$0xff]  }
 0x19f   : > { %2786 = vmatmul.mubr.msk.bf16.gmra.mrb[4].mxu0 %vm730_vm9, %v3231_v23  ;;  %v843_v41 = vrot.slane %v841_v11, 1  ;;  %v936_v23 = vrot.slane %v916_v22, 1  ;;  %v3285_v22 = vld [vmem:[#allocation2 + $0x24] sm:$0xff]  }
 0x1a0   : > { %2882 = vmatpush3.bf16.msra.mxu0 %v3236_v25  ;;  %2145 = vmatmul.mubr.bf16.gmra.mrb[4].mxu1 %v931_v34  ;;  %v3273_v34 = vld [vmem:[#allocation2 + $0x20] ss:$0 sps:$4 sm:$0x11]  }
 0x1a1   : > { %2922 = vmatpush3.bf16.msra.mxu1 %v3237_v27  ;;  %2883 = vmatprep.subr.bf16.mxu0 %v3238_v32  ;;  %v844_v21 = vor.u32 %v843_v41, %v839_v9  ;;  %v937_v26 = vsel %vm925_vm11, %v935_v15, %v936_v23  ;;  %v3267_v27 = vld [vmem:[#allocation10 + $0x1f8] sm:$0xff]   ;;  %v3272_v32 = vld [vmem:[#allocation2 + $0x18] sm:$0xff]  }
 0x1a2   : > { %2923 = vmatprep.subr.bf16.mxu1 %v3239_v35  ;;  %2791 = vmatprep.mubr.msk.bf16.mxu1 %vm730_vm9, %v3244_v40  ;;  %v1145_v35 = vsel %vm730_vm9, %v3271_v31, 0  ;;  %v1278_v40 = vsel %vm730_vm9, %v3273_v34, 0  ;;  %v3284_v41 = vld [vmem:[#allocation2 + $0x20] ss:$0 sps:$4 sm:$0x11]   ;;  %v3286_v15 = vld [vmem:[#allocation10 + $0x210] sm:$0xff]  }
 0x1a3   : > { %2087 = vmatprep.mubr.bf16.mxu0 %v838_v60  ;;  %v848_v25 = vsel %vm808_vm10, %v844_v21, %v847_v16  ;;  %v1167_v39 = vrot.slane %v1145_v35, 1  ;;  %v1297_v44 = vshll.u32 %v1278_v40, 16  ;;  %v1041_v21 = vsel %vm730_vm9, %v3284_v41, 0  ;;  %v3289_v31 = vld [vmem:[#allocation2 + $0x2c] ss:$0 sps:$4 sm:$0x11]  }
 0x1a4   : > { %2884 = vmatpush3.bf16.msra.mxu0 %v3240_v36  ;;  %v1166_v36 = vrot.slane %v1143_v33, 1  ;;  %v1151_v34 = vsel %vm730_vm9, %v3288_v30, 0  ;;  %v1153_v35 = vsel %vm730_vm9, %v3289_v31, 0  ;;  %v3307_v30 = vld [vmem:[#allocation2 + $0x20] ss:$0 sps:$4 sm:$0x11]  }
 0x1a5   : > { %2924 = vmatpush3.bf16.msra.mxu1 %v3241_v37  ;;  %2885 = vmatprep.subr.bf16.mxu0 %v3248_v52  ;;  %v1276_v37 = vsel %vm730_vm9, %v3272_v32, 0  ;;  %v1299_v49 = vrot.slane %v1297_v44, 1  ;;  %v1052_v52 = vshll.u32 %v1035_v48, 16  ;;  %v3292_v32 = vld [vmem:[#allocation2 + $0x24] sm:$0xff]   ;;  %v1172_v38 = vrot.slane %v1151_v34, 1 }
 0x1a6   : > { %2925 = vmatprep.subr.bf16.mxu1 %v3249_v54  ;;  %v1291_v42 = vshrl.u32 %v1276_v37, 16  ;;  %v1293_v43 = vshll.u32 %v1276_v37, 16  ;;  %v1168_v46 = vsel %vm925_vm11, %v1166_v36, %v1167_v39  ;;  %v3277_v54 = vld [vmem:[#allocation10 + $0x200] sm:$0xff]   ;;  %v3291_v36 = vld [vmem:[#allocation2 + $0x38] ss:$0 sps:$4 sm:$0x11]  }
 0x1a7   : > { %2787 = vmatmul.mubr.msk.bf16.gmra.mrb[8].mxu0 %vm730_vm9, %v3245_v50  ;;  %v1037_v50 = vsel %vm730_vm9, %v3275_v45, 0  ;;  %v1054_v58 = vrot.slane %v1052_v52, 1  ;;  %v1173_v39 = vrot.slane %v1153_v35, 1  ;;  %v1043_v44 = vsel %vm730_vm9, %v3292_v32, 0 }
 0x1a8   : > { %2886 = vmatpush3.bf16.msra.mxu0 %v3250_v59  ;;  %2153 = vmatmul.mubr.bf16.gmra.mrb[8].mxu1 %v934_v62  ;;  %v1295_v47 = vrot.slane %v1293_v43, 1  ;;  %v1056_v56 = vshll.u32 %v1037_v50, 16  ;;  %v3281_v59 = vld [vmem:[#allocation2 + $0x24] sm:$0xff]   ;;  %v3283_v62 = vld [vmem:[#allocation2 + $0x18] sm:$0xff]   ;;  %v1286_v43 = vsel %vm730_vm9, %v3291_v36, 0  ;;  %v1072_v50 = vshll.u32 %v1043_v44, 16 }
 0x1a9   : > { %2926 = vmatpush3.bf16.msra.mxu1 %v3251_v61  ;;  %2887 = vmatprep.subr.bf16.mxu0 %v3252_v63  ;;  %v1055_v63 = vor.u32 %v1054_v58, %v1050_v51  ;;  %v1039_v16 = vsel %vm730_vm9, %v3283_v62, 0  ;;  %v1174_v45 = vsel %vm925_vm11, %v1172_v38, %v1173_v39  ;;  %v3293_v48 = vld [vmem:[#allocation2 + $0x2c] ss:$0 sps:$4 sm:$0x11]   ;;  %v3294_v51 = vld [vmem:[#allocation2 + $0x30] sm:$0xff]   ;;  %v1386_v34 = vsel %vm730_vm9, %v3307_v30, 0 }
 0x1aa   : > { %2927 = vmatprep.subr.bf16.mxu1 %v3253_v0  ;;  %2792 = vmatprep.mubr.msk.bf16.mxu1 %vm730_vm9, %v3258_v5  ;;  %v1296_v55 = vor.u32 %v1295_v47, %v1291_v42  ;;  %v1058_v61 = vrot.slane %v1056_v56, 1  ;;  %v3279_v0 = vld [vmem:[#allocation2 + $0x18] sm:$0xfe]   ;;  %v3282_v5 = vld [vmem:[#allocation2 + $0x2c] ss:$0 sps:$4 sm:$0x11]  }
 0x1ab   : > { %2095 = vmatprep.mubr.bf16.mxu0 %v848_v25  ;;  %v1147_v4 = vsel %vm730_vm9, %v3279_v0, 0  ;;  %v1282_v12 = vsel %vm730_vm9, %v3282_v5, 0  ;;  %v1060_v18 = vshrl.u32 %v1039_v16, 16  ;;  %v1317_v47 = vshll.u32 %v1286_v43, 16  ;;  %v3296_v58 = vld [vmem:[#allocation10 + $0x228] sm:$0xff]  }
 0x1ac   : > { %2888 = vmatpush3.bf16.msra.mxu0 %v3254_v1  ;;  %v1300_v60 = vsel %vm808_vm10, %v1296_v55, %v1299_v49  ;;  %v3280_v1 = vld [vmem:[#allocation2 + $0x20] ss:$0 sps:$4 sm:$0x11]   ;;  %v1059_v3 = vsel %vm808_vm10, %v1055_v63, %v1058_v61  ;;  %v1169_v7 = vrot.slane %v1147_v4, 1  ;;  %v1307_v14 = vshll.u32 %v1282_v12, 16 }
 0x1ad   : > { %2928 = vmatpush3.bf16.msra.mxu1 %v3255_v2  ;;  %2889 = vmatprep.subr.bf16.mxu0 %v3262_v8  ;;  %v1280_v2 = vsel %vm730_vm9, %v3281_v59, 0  ;;  %v1149_v6 = vsel %vm730_vm9, %v3280_v1, 0  ;;  %v1070_v49 = vshrl.u32 %v1043_v44, 16  ;;  %v1074_v55 = vrot.slane %v1072_v50, 1  ;;  %v3297_v62 = vld [vmem:[#allocation2 + $0x30] sm:$0xfe]  }
 0x1ae   : > { %2929 = vmatprep.subr.bf16.mxu1 %v3263_v13  ;;  %v1301_v8 = vshrl.u32 %v1280_v2, 16  ;;  %v1303_v9 = vshll.u32 %v1280_v2, 16  ;;  %v1170_v11 = vrot.slane %v1149_v6, 1  ;;  %v3299_v63 = vld [vmem:[#allocation2 + $0x3c] sm:$0xff]   ;;  %v3301_v1 = vld [vmem:[#allocation2 + $0x30] sm:$0xff]  }
 0x1af   : > { %2788 = vmatmul.mubr.msk.bf16.gmra.mrb[12].mxu0 %vm730_vm9, %v3259_v17  ;;  %v3298_v0 = vld [vmem:[#allocation2 + $0x38] ss:$0 sps:$4 sm:$0x11]   ;;  %v1288_v4 = vsel %vm730_vm9, %v3299_v63, 0  ;;  %v3312_v50 = vld [vmem:[#allocation2 + $0x3c] sm:$0xfe]  }
 0x1b0   : > { %2890 = vmatpush3.bf16.msra.mxu0 %v3264_v19  ;;  %2161 = vmatmul.mubr.bf16.gmra.mrb[12].mxu1 %v937_v26  ;;  %v1305_v13 = vrot.slane %v1303_v9, 1  ;;  %v1171_v17 = vsel %vm925_vm11, %v1169_v7, %v1170_v11  ;;  %v1062_v19 = vshll.u32 %v1039_v16, 16  ;;  %v3287_v26 = vld [vmem:[#allocation10 + $0x218] sm:$0xff]   ;;  %v1157_v5 = vsel %vm730_vm9, %v3298_v0, 0 }
 0x1b1   : > { %2930 = vmatpush3.bf16.msra.mxu1 %v3265_v10  ;;  %2891 = vmatprep.subr.bf16.mxu0 %v3266_v24  ;;  %v1309_v10 = vrot.slane %v1307_v14, 1  ;;  %v1066_v24 = vshll.u32 %v1041_v21, 16  ;;  %v3300_v7 = vld [vmem:[#allocation2 + $0x44] ss:$0 sps:$4 sm:$0x11]   ;;  %v1176_v9 = vrot.slane %v1157_v5, 1 }
 0x1b2   : > { %2931 = vmatprep.subr.bf16.mxu1 %v3267_v27  ;;  %2201 = vmatprep.mubr.bf16.mxu0 %v1168_v46  ;;  %v1306_v20 = vor.u32 %v1305_v13, %v1301_v8  ;;  %v1064_v23 = vrot.slane %v1062_v19, 1  ;;  %v1321_v8 = vshrl.u32 %v1288_v4, 16  ;;  %v1323_v11 = vshll.u32 %v1288_v4, 16  ;;  %v3302_v13 = vld [vmem:[#allocation2 + $0x38] ss:$0 sps:$4 sm:$0x11]  }
 0x1b3   : > { %2266 = vmatprep.mubr.bf16.mxu1 %v1300_v60  ;;  %v1075_v60 = vor.u32 %v1074_v55, %v1070_v49  ;;  %v1290_v12 = vsel %vm730_vm9, %v3300_v7, 0  ;;  %v1049_v19 = vsel %vm730_vm9, %v3302_v13, 0  ;;  %v3304_v21 = vld [vmem:[#allocation10 + $0x230] sm:$0xff]  }
 0x1b4   : > { %2892 = vmatpush3.bf16.msra.mxu0 %v3268_v28  ;;  %v1310_v25 = vsel %vm808_vm10, %v1306_v20, %v1309_v10  ;;  %v1065_v27 = vor.u32 %v1064_v23, %v1060_v18  ;;  %v1068_v28 = vrot.slane %v1066_v24, 1  ;;  %v1325_v41 = vrot.slane %v1323_v11, 1  ;;  %v3303_v18 = vld [vmem:[#allocation2 + $0x3c] sm:$0xff]   ;;  %v3309_v36 = vld [vmem:[#allocation2 + $0x38] ss:$0 sps:$4 sm:$0x11]  }
 0x1b5   : > { %2932 = vmatpush3.bf16.msra.mxu1 %v3269_v29  ;;  %2969 = vmatprep.subr.bf16.mxu0 %v3277_v54  ;;  %v3290_v29 = vld [vmem:[#allocation2 + $0x30] sm:$0xff]   ;;  %v1327_v16 = vshll.u32 %v1290_v12, 16  ;;  %v1086_v23 = vshll.u32 %v1049_v19, 16  ;;  %v1394_v39 = vsel %vm730_vm9, %v3309_v36, 0 }
 0x1b6   : > { %2993 = vmatprep.subr.bf16.mxu1 %v3277_v54  ;;  %v1069_v33 = vsel %vm808_vm10, %v1065_v27, %v1068_v28  ;;  %v1284_v37 = vsel %vm730_vm9, %v3290_v29, 0  ;;  %v3306_v29 = vld [vmem:[#allocation2 + $0x18] sm:$0xfe]   ;;  %v1414_v44 = vrot.slane %v1394_v39, 1 }
 0x1b7   : > { %2202 = vmatmul.mubr.bf16.vlgmr.msra.gmra.mrb[16].mxu0 %v1059_v3  ;;  %v1311_v40 = vshrl.u32 %v1284_v37, 16  ;;  %v1313_v42 = vshll.u32 %v1284_v37, 16  ;;  %v1155_v3 = vsel %vm730_vm9, %v3297_v62, 0  ;;  %v1088_v27 = vrot.slane %v1086_v23, 1 }
 0x1b8   : > { %2793 = vmatmul.mubr.msk.bf16.vlgmr.msra.gmra.mrb[16].mxu1 %vm730_vm9, %v3276_v53  ;;  %2970 = vmatpush3.bf16.msra.mxu0 %v3277_v54  ;;  %v1319_v53 = vrot.slane %v1317_v47, 1  ;;  %v1175_v6 = vrot.slane %v1155_v3, 1  ;;  %v1384_v32 = vsel %vm730_vm9, %v3306_v29, 0  ;;  %v1408_v37 = vrot.slane %v1386_v34, 1 }
 0x1b9   : > { %3001 = vmatpush3.bf16.msra.mxu1 %v3277_v54  ;;  %2971 = vmatprep.subr.bf16.mxu0 %v3278_v57  ;;  %v1315_v46 = vrot.slane %v1313_v42, 1  ;;  %v1045_v54 = vsel %vm730_vm9, %v3293_v48, 0  ;;  %v1407_v35 = vrot.slane %v1384_v32, 1  ;;  %v3310_v42 = vld [vmem:[#allocation2 + $0x24] sm:$0xfe]  }
 0x1ba   : > { %2994 = vmatprep.subr.bf16.mxu1 %v3278_v57  ;;  %2209 = vmatprep.mubr.bf16.mxu0 %v1171_v17  ;;  %v1076_v56 = vshll.u32 %v1045_v54, 16  ;;  %v1177_v14 = vsel %vm925_vm11, %v1175_v6, %v1176_v9  ;;  %v1047_v17 = vsel %vm730_vm9, %v3301_v1, 0 }
 0x1bb   : > { %2274 = vmatprep.mubr.bf16.mxu1 %v1310_v25  ;;  %v1316_v52 = vor.u32 %v1315_v46, %v1311_v40  ;;  %v1080_v20 = vshrl.u32 %v1047_v17, 16  ;;  %v1082_v10 = vshll.u32 %v1047_v17, 16  ;;  %v3305_v25 = vld [vmem:[#allocation10 + $0x238] sm:$0xff]   ;;  %v1409_v43 = vsel %vm925_vm11, %v1407_v35, %v1408_v37 }
 0x1bc   : > { %2972 = vmatpush3.bf16.msra.mxu0 %v3278_v57  ;;  %v1078_v61 = vrot.slane %v1076_v56, 1  ;;  %v1388_v46 = vsel %vm730_vm9, %v3310_v42, 0 }
 0x1bd   : > { %3002 = vmatpush3.bf16.msra.mxu1 %v3278_v57  ;;  %2973 = vmatprep.subr.bf16.mxu0 %v3286_v15  ;;  %v3295_v57 = vld [vmem:[#allocation10 + $0x220] sm:$0xff]   ;;  %v1320_v59 = vsel %vm808_vm10, %v1316_v52, %v1319_v53  ;;  %v1084_v24 = vrot.slane %v1082_v10, 1  ;;  %v1410_v49 = vrot.slane %v1388_v46, 1  ;;  %v3313_v52 = vld [vmem:[#allocation2 + $0x44] ss:$0 sps:$4 sm:$0x11]  }
 0x1be   : > { %2995 = vmatprep.subr.bf16.mxu1 %v3286_v15  ;;  %v1079_v2 = vsel %vm808_vm10, %v1075_v60, %v1078_v61  ;;  %v1396_v53 = vsel %vm730_vm9, %v3312_v50, 0  ;;  %v1398_v55 = vsel %vm730_vm9, %v3313_v52, 0 }
 0x1bf   : > { %2210 = vmatmul.mubr.bf16.gmra.mrb[20].mxu0 %v1069_v33  ;;  %v1085_v28 = vor.u32 %v1084_v24, %v1080_v20  ;;  %v3308_v33 = vld [vmem:[#allocation2 + $0x30] sm:$0xfe]   ;;  %v1416_v56 = vrot.slane %v1396_v53, 1 }
 0x1c0   : > { %2794 = vmatmul.mubr.msk.bf16.gmra.mrb[20].mxu1 %vm730_vm9, %v3285_v22  ;;  %2974 = vmatpush3.bf16.msra.mxu0 %v3286_v15  ;;  %v1326_v22 = vor.u32 %v1325_v41, %v1321_v8  ;;  %v1392_v38 = vsel %vm730_vm9, %v3308_v33, 0 }
 0x1c1   : > { %3003 = vmatpush3.bf16.msra.mxu1 %v3286_v15  ;;  %2975 = vmatprep.subr.bf16.mxu0 %v3287_v26  ;;  %v1329_v15 = vrot.slane %v1327_v16, 1  ;;  %v1089_v31 = vsel %vm808_vm10, %v1085_v28, %v1088_v27  ;;  %v1413_v40 = vrot.slane %v1392_v38, 1 }
 0x1c2   : > { %2996 = vmatprep.subr.bf16.mxu1 %v3287_v26  ;;  %2217 = vmatprep.mubr.bf16.mxu0 %v1174_v45  ;;  %v3311_v45 = vld [vmem:[#allocation2 + $0x2c] ss:$0 sps:$4 sm:$0x11]  }
 0x1c3   : > { %2282 = vmatprep.mubr.bf16.mxu1 %v1320_v59  ;;  %v1415_v47 = vsel %vm925_vm11, %v1413_v40, %v1414_v44  ;;  %v1390_v48 = vsel %vm730_vm9, %v3311_v45, 0 }
 0x1c4   : > { %2976 = vmatpush3.bf16.msra.mxu0 %v3287_v26 }
 0x1c5   : > { %3004 = vmatpush3.bf16.msra.mxu1 %v3287_v26  ;;  %2977 = vmatprep.subr.bf16.mxu0 %v3295_v57  ;;  %v1330_v26 = vsel %vm808_vm10, %v1326_v22, %v1329_v15 }
 0x1c6   : > { %2997 = vmatprep.subr.bf16.mxu1 %v3295_v57 }
 0x1c7   : > { %2218 = vmatmul.mubr.bf16.gmra.mrb[24].mxu0 %v1079_v2 }
 0x1c8   : > { %2795 = vmatmul.mubr.msk.bf16.gmra.mrb[24].mxu1 %vm730_vm9, %v3294_v51  ;;  %2978 = vmatpush3.bf16.msra.mxu0 %v3295_v57  ;;  %v1411_v51 = vrot.slane %v1390_v48, 1 }
 0x1c9   : > { %3005 = vmatpush3.bf16.msra.mxu1 %v3295_v57  ;;  %2979 = vmatprep.subr.bf16.mxu0 %v3296_v58  ;;  %v1417_v57 = vrot.slane %v1398_v55, 1 }
 0x1ca   : > { %2998 = vmatprep.subr.bf16.mxu1 %v3296_v58  ;;  %2225 = vmatprep.mubr.bf16.mxu0 %v1177_v14  ;;  %v1412_v54 = vsel %vm925_vm11, %v1410_v49, %v1411_v51 }
 0x1cb   : > { %2290 = vmatprep.mubr.bf16.mxu1 %v1330_v26 }
 0x1cc   : > { %2980 = vmatpush3.bf16.msra.mxu0 %v3296_v58 }
 0x1cd   : > { %3006 = vmatpush3.bf16.msra.mxu1 %v3296_v58  ;;  %2981 = vmatprep.subr.bf16.mxu0 %v3304_v21  ;;  %v1418_v58 = vsel %vm925_vm11, %v1416_v56, %v1417_v57 }
 0x1ce   : > { %2999 = vmatprep.subr.bf16.mxu1 %v3304_v21 }
 0x1cf   : > { %2226 = vmatmul.mubr.bf16.gmra.mrb[28].mxu0 %v1089_v31 }
 0x1d0   : > { %2982 = vmatpush3.bf16.msra.mxu0 %v3304_v21  ;;  %2796 = vmatmul.mubr.msk.bf16.gmra.mrb[28].mxu1 %vm730_vm9, %v3303_v18 }
 0x1d1   : > { %3007 = vmatpush3.bf16.msra.mxu1 %v3304_v21  ;;  %2983 = vmatprep.subr.bf16.mxu0 %v3305_v25 }
 0x1d2   : > { %3000 = vmatprep.subr.bf16.mxu1 %v3305_v25  ;;  %2985 = vmatprep.mubr.bf16.mxu0 %v1409_v43 }
 0x1d3   : > { %2989 = vmatprep.mubr.bf16.mxu1 %v1415_v47 }
 0x1d4   : > { %2984 = vmatpush3.bf16.msra.mxu0 %v3305_v25 }
 0x1d5   : > { %3008 = vmatpush3.bf16.msra.mxu1 %v3305_v25 }
 0x1d7   : > { %2986 = vmatmul.mubr.bf16.vlgmr.msra.gmra.mrb[32].mxu0 %v1412_v54 }
 0x1d8   : > { %2990 = vmatmul.mubr.bf16.vlgmr.msra.gmra.mrb[32].mxu1 %v1418_v58 }
 0x26a   : > { %v2813_v59 = vpop.f32.mrb[0].mxu0 }
 0x26b   : > { %v2853_v60 = vpop.f32.mrb[0].mxu1  ;;  %v2814_v61 = vpop.f32.mrb[1].mxu0 }
 0x26c   : > { %v2854_v62 = vpop.f32.mrb[1].mxu1  ;;  %v2815_v63 = vadd.f32 %v2814_v61, %v2813_v59  ;;  %v2816_v1 = vpop.f32.mrb[2].mxu0 }
 0x26d   : > { %v2855_v0 = vadd.f32 %v2854_v62, %v2853_v60  ;;  %v2856_v2 = vpop.f32.mrb[2].mxu1  ;;  %v2817_v3 = vpop.f32.mrb[3].mxu0 }
 0x26e   : > { %v2857_v4 = vpop.f32.mrb[3].mxu1  ;;  %v2818_v6 = vadd.f32 %v2817_v3, %v2816_v1 }
 0x26f   : > { %v2139_v5 = vadd.f32 %v2855_v0, %v2815_v63  ;;  %v2858_v7 = vadd.f32 %v2857_v4, %v2856_v2 }
 0x271   : > { %v2142_v8 = vadd.f32 %v2858_v7, %v2818_v6 }
 0x272   : > { %v2819_v9 = vpop.f32.mrb[4].mxu0 }
 0x273   : > { %v2859_v11 = vpop.f32.mrb[4].mxu1  ;;  %v2820_v12 = vpop.f32.mrb[5].mxu0 }
 0x274   : > { %v2860_v13 = vpop.f32.mrb[5].mxu1  ;;  %v2821_v14 = vadd.f32 %v2820_v12, %v2819_v9  ;;  %v2822_v16 = vpop.f32.mrb[6].mxu0 }
 0x275   : > { %v2861_v41 = vadd.f32 %v2860_v13, %v2859_v11  ;;  %v2862_v17 = vpop.f32.mrb[6].mxu1  ;;  %v2823_v18 = vpop.f32.mrb[7].mxu0 }
 0x276   : > { %v2863_v19 = vpop.f32.mrb[7].mxu1  ;;  %v2824_v10 = vadd.f32 %v2823_v18, %v2822_v16 }
 0x277   : > { %v2147_v20 = vadd.f32 %v2861_v41, %v2821_v14  ;;  %v2864_v21 = vadd.f32 %v2863_v19, %v2862_v17 }
 0x279   : > { %v2150_v22 = vadd.f32 %v2864_v21, %v2824_v10 }
 0x27a   : > { %v2825_v15 = vpop.f32.mrb[8].mxu0 }
 0x27b   : > { %v2865_v23 = vpop.f32.mrb[8].mxu1  ;;  %v2826_v24 = vpop.f32.mrb[9].mxu0 }
 0x27c   : > { %v2866_v25 = vpop.f32.mrb[9].mxu1  ;;  %v2827_v26 = vadd.f32 %v2826_v24, %v2825_v15  ;;  %v2828_v28 = vpop.f32.mrb[10].mxu0 }
 0x27d   : > { %v2867_v27 = vadd.f32 %v2866_v25, %v2865_v23  ;;  %v2868_v29 = vpop.f32.mrb[10].mxu1  ;;  %v2829_v30 = vpop.f32.mrb[11].mxu0 }
 0x27e   : > { %v2869_v31 = vpop.f32.mrb[11].mxu1  ;;  %v2830_v33 = vadd.f32 %v2829_v30, %v2828_v28 }
 0x27f   : > { %v2155_v32 = vadd.f32 %v2867_v27, %v2827_v26  ;;  %v2870_v34 = vadd.f32 %v2869_v31, %v2868_v29 }
 0x281   : > { %v2158_v35 = vadd.f32 %v2870_v34, %v2830_v33 }
 0x282   : > { %v2831_v36 = vpop.f32.mrb[12].mxu0 }
 0x283   : > { %v2871_v37 = vpop.f32.mrb[12].mxu1  ;;  %v2832_v38 = vpop.f32.mrb[13].mxu0 }
 0x284   : > { %v2872_v39 = vpop.f32.mrb[13].mxu1  ;;  %v2833_v40 = vadd.f32 %v2832_v38, %v2831_v36  ;;  %v2834_v43 = vpop.f32.mrb[14].mxu0 }
 0x285   : > { %v2873_v42 = vadd.f32 %v2872_v39, %v2871_v37  ;;  %v2874_v44 = vpop.f32.mrb[14].mxu1  ;;  %v2835_v45 = vpop.f32.mrb[15].mxu0 }
 0x286   : > { %v2875_v46 = vpop.f32.mrb[15].mxu1  ;;  %v2836_v48 = vadd.f32 %v2835_v45, %v2834_v43 }
 0x287   : > { %v4350_v47 = vadd.f32 %v2873_v42, %v2833_v40  ;;  %v2876_v49 = vadd.f32 %v2875_v46, %v2874_v44 }
 0x289   : > { %v2166_v50 = vadd.f32 %v2876_v49, %v2836_v48 }
 0x28a   : > { %v2893_v53 = vpop.f32.mrb[16].mxu0 }
 0x28b   : > { %v2933_v51 = vpop.f32.mrb[16].mxu1  ;;  %v2894_v56 = vpop.f32.mrb[17].mxu0 }
 0x28c   : > { %v2934_v52 = vpop.f32.mrb[17].mxu1  ;;  %v2895_v58 = vadd.f32 %v2894_v56, %v2893_v53  ;;  %v2896_v59 = vpop.f32.mrb[18].mxu0 }
 0x28d   : > { %v2935_v54 = vadd.f32 %v2934_v52, %v2933_v51  ;;  %v2936_v55 = vpop.f32.mrb[18].mxu1  ;;  %v2897_v61 = vpop.f32.mrb[19].mxu0 }
 0x28e   : > { %v2937_v57 = vpop.f32.mrb[19].mxu1  ;;  %v2204_v62 = vadd.f32 %v2895_v58, %v2139_v5  ;;  %v2898_v63 = vadd.f32 %v2897_v61, %v2896_v59 }
 0x28f   : > { %v2938_v60 = vadd.f32 %v2937_v57, %v2936_v55  ;;  %v2769_v57 = vld [vmem:[#allocation13] ss:$0 sm:$0xff] }
 0x290   : > { %v2207_v0 = vadd.f32 %v2898_v63, %v2142_v8  ;;  %v2269_v1 = vadd.f32 %v2935_v54, %v2204_v62  ;;  %v2768_v54 = vld [vmem:[#allocation12] ss:$0 sm:$0xff] }
 0x292   : > { %v4352_v3 = vadd.f32 %v2938_v60, %v2207_v0  ;;  %v2899_v6 = vpop.f32.mrb[20].mxu0 }
 0x293   : > { %v2939_v2 = vpop.f32.mrb[20].mxu1  ;;  %v2900_v11 = vpop.f32.mrb[21].mxu0 }
 0x294   : > { %v2940_v4 = vpop.f32.mrb[21].mxu1  ;;  %v2901_v13 = vadd.f32 %v2900_v11, %v2899_v6  ;;  %v2902_v14 = vpop.f32.mrb[22].mxu0 }
 0x295   : > { %v2941_v7 = vadd.f32 %v2940_v4, %v2939_v2  ;;  %v2942_v9 = vpop.f32.mrb[22].mxu1  ;;  %v2903_v16 = vpop.f32.mrb[23].mxu0 }
 0x296   : > { %v2943_v12 = vpop.f32.mrb[23].mxu1  ;;  %v2212_v17 = vadd.f32 %v2901_v13, %v2147_v20  ;;  %v2904_v18 = vadd.f32 %v2903_v16, %v2902_v14 }
 0x297   : > { %v2944_v41 = vadd.f32 %v2943_v12, %v2942_v9 }
 0x298   : > { %v2215_v19 = vadd.f32 %v2904_v18, %v2150_v22  ;;  %v2277_v5 = vadd.f32 %v2941_v7, %v2212_v17 }
 0x29a   : > { %v2280_v10 = vadd.f32 %v2944_v41, %v2215_v19  ;;  %v2905_v15 = vpop.f32.mrb[24].mxu0 }
 0x29b   : > { %v2945_v8 = vpop.f32.mrb[24].mxu1  ;;  %v2906_v25 = vpop.f32.mrb[25].mxu0 }
 0x29c   : > { %v2946_v21 = vpop.f32.mrb[25].mxu1  ;;  %v2907_v27 = vadd.f32 %v2906_v25, %v2905_v15  ;;  %v2908_v28 = vpop.f32.mrb[26].mxu0 }
 0x29d   : > { %v2947_v23 = vadd.f32 %v2946_v21, %v2945_v8  ;;  %v2948_v24 = vpop.f32.mrb[26].mxu1  ;;  %v2909_v30 = vpop.f32.mrb[27].mxu0 }
 0x29e   : > { %v2949_v26 = vpop.f32.mrb[27].mxu1  ;;  %v2220_v31 = vadd.f32 %v2907_v27, %v2155_v32  ;;  %v2910_v33 = vadd.f32 %v2909_v30, %v2908_v28 }
 0x29f   : > { %v2950_v29 = vadd.f32 %v2949_v26, %v2948_v24 }
 0x2a0   : > { %v2223_v34 = vadd.f32 %v2910_v33, %v2158_v35  ;;  %v2285_v36 = vadd.f32 %v2947_v23, %v2220_v31 }
 0x2a2   : > { %v2288_v20 = vadd.f32 %v2950_v29, %v2223_v34  ;;  %v2911_v38 = vpop.f32.mrb[28].mxu0 }
 0x2a3   : > { %v2951_v37 = vpop.f32.mrb[28].mxu1  ;;  %v2912_v42 = vpop.f32.mrb[29].mxu0 }
 0x2a4   : > { %v2952_v22 = vpop.f32.mrb[29].mxu1  ;;  %v2913_v44 = vadd.f32 %v2912_v42, %v2911_v38  ;;  %v2914_v45 = vpop.f32.mrb[30].mxu0 }
 0x2a5   : > { %v2953_v39 = vadd.f32 %v2952_v22, %v2951_v37  ;;  %v2954_v40 = vpop.f32.mrb[30].mxu1  ;;  %v2915_v48 = vpop.f32.mrb[31].mxu0 }
 0x2a6   : > { %v2955_v43 = vpop.f32.mrb[31].mxu1  ;;  %v2228_v49 = vadd.f32 %v2913_v44, %v4350_v47  ;;  %v2916_v51 = vadd.f32 %v2915_v48, %v2914_v45 }
 0x2a7   : > { %v2956_v46 = vadd.f32 %v2955_v43, %v2954_v40 }
 0x2a8   : > { %v2231_v32 = vadd.f32 %v2916_v51, %v2166_v50  ;;  %v2293_v35 = vadd.f32 %v2953_v39, %v2228_v49 }
 0x2aa   : > { %v2296_v52 = vadd.f32 %v2956_v46, %v2231_v32  ;;  %v2987_v53 = vpop.f32.mrb[32].mxu0 }
 0x2ab   : > { %v2342_v55 = vadd.f32 %v2987_v53, %v2277_v5  ;;  %v2333_v56 = vpop.f32.mrb[33].mxu0  ;;  %v2991_v61 = vpop.f32.mrb[32].mxu1 }
 0x2ac   : > { %v2334_v58 = vadd.f32 %v2333_v56, %v2269_v1  ;;  %v2988_v59 = vpop.f32.mrb[34].mxu0  ;;  %v2358_v47 = vadd.f32 %v2991_v61, %v2293_v35  ;;  %v2349_v2 = vpop.f32.mrb[33].mxu1 }
 0x2ad   : > { %v2373_v60 = vmul.f32 %v2768_v54, %v2342_v55  ;;  %v2345_v62 = vadd.f32 %v2988_v59, %v2280_v10  ;;  %v2336_v63 = vpop.f32.mrb[35].mxu0  ;;  %v2350_v6 = vadd.f32 %v2349_v2, %v2285_v36  ;;  %v2992_v9 = vpop.f32.mrb[34].mxu1 }
 0x2ae   : > { %v2371_v0 = vmul.f32 %v2768_v54, %v2334_v58  ;;  %v2337_v50 = vadd.f32 %v2336_v63, %v4352_v3  ;;  %v2377_v11 = vmul.f32 %v2768_v54, %v2358_v47  ;;  %v2361_v1 = vadd.f32 %v2992_v9, %v2296_v52  ;;  %v2352_v14 = vpop.f32.mrb[35].mxu1 }
 0x2af   : > { %v2388_v4 = vadd.f32 %v2769_v57, %v2373_v60  ;;  %v2374_v7 = vmul.f32 %v2768_v54, %v2345_v62  ;;  %v2375_v16 = vmul.f32 %v2768_v54, %v2350_v6  ;;  %v2353_v18 = vadd.f32 %v2352_v14, %v2288_v20 }
 0x2b0   : > { %v2386_v12 = vadd.f32 %v2769_v57, %v2371_v0  ;;  %v2372_v13 = vmul.f32 %v2768_v54, %v2337_v50  ;;  %v2392_v19 = vadd.f32 %v2769_v57, %v2377_v11  ;;  %v2378_v5 = vmul.f32 %v2768_v54, %v2361_v1 }
 0x2b1   : > { %v2396_v41 = vmax.f32 %v2388_v4, 0.0  ;;  %v2389_v17 = vadd.f32 %v2769_v57, %v2374_v7  ;;  %v2390_v8 = vadd.f32 %v2769_v57, %v2375_v16  ;;  %v2376_v15 = vmul.f32 %v2768_v54, %v2353_v18 }
 0x2b2   : > { %v2394_v3 = vmax.f32 %v2386_v12, 0.0  ;;  %v2387_v10 = vadd.f32 %v2769_v57, %v2372_v13  ;;  %v2400_v23 = vmax.f32 %v2392_v19, 0.0  ;;  %v2393_v24 = vadd.f32 %v2769_v57, %v2378_v5 }
 0x2b3   : > { %2404 = vst.msk [vmem:[%s4228_s5 + $0x10] sm:$0xff] %vm730_vm9, %v2396_v41  ;;  %v2397_v21 = vmax.f32 %v2389_v17, 0.0  ;;  %v2398_v26 = vmax.f32 %v2390_v8, 0.0  ;;  %v2391_v27 = vadd.f32 %v2769_v57, %v2376_v15 }
 0x2b4   : > { %2402 = vst.msk [vmem:[%s4228_s5] sm:$0xff] %vm730_vm9, %v2394_v3  ;;  %v2395_v25 = vmax.f32 %v2387_v10, 0.0  ;;  %2408 = vst.msk [vmem:[%s4228_s5 + $0x30] sm:$0xff] %vm730_vm9, %v2400_v23  ;;  %v2401_v28 = vmax.f32 %v2393_v24, 0.0 }
 0x2b5   : > { %2405 = vst.msk [vmem:[%s4228_s5 + $0x18] sm:$0xff] %vm730_vm9, %v2397_v21  ;;  %2406 = vst.msk [vmem:[%s4228_s5 + $0x20] sm:$0xff] %vm730_vm9, %v2398_v26  ;;  %v2399_v29 = vmax.f32 %v2391_v27, 0.0 }
 0x2b6   : > { %2403 = vst.msk [vmem:[%s4228_s5 + $0x8] sm:$0xff] %vm730_vm9, %v2395_v25  ;;  %2409 = vst.msk [vmem:[%s4228_s5 + $0x38] sm:$0xff] %vm730_vm9, %v2401_v28 }
 0x2b7   : > { %2407 = vst.msk [vmem:[%s4228_s5 + $0x28] sm:$0xff] %vm730_vm9, %v2399_v29 }
 0x2b8   : > { %3501 = shalt.err (!%p3498_p0)
}
 0x2b9   : > { %s3502_s5 = scalar_lea.hbm %s4372_s14, 1024  ;;  %s3506_s16 = scalar_lea.hbm %s4580_s4, 8192 }
 0x2ba   : > { %p3503_p1 = scmp.ne.s32.totalorder %s4372_s14, %s3502_s5  ;;  %p3507_p4 = scmp.lt.u32.totalorder %s4372_s14, %s4580_s4 }
 0x2bb   : > { %p3508_p5 = scmp.lt.u32.totalorder %s3506_s16, %s3502_s5  ;;  %p3510_p8 = scmp.lt.u32.totalorder %s3502_s5, %s4372_s14 }
 0x2bc   : > { %p3504_p3 = pnand %p3503_p1, %p4581_p2 }
 0x2bd   : > { %p3509_p10 = por %p3508_p5, %p3507_p4 }
 0x2be   : > { %p3505_p12 = pneg %p3504_p3 }
 0x2bf   : > { %p3511_p9 = por %p3510_p8, %p3509_p10 }
 0x2c1   : > { %p3512_p7 = pnand %p3511_p9, %p3505_p12 }
 0x2c3   : > { %3515 = shalt.err (!%p3512_p7)
}
 0x2c4   : > { %s3663_s0 = smov 128   ;;  %s3664_s3 = smov 8  }
 0x2c5   : > { %3027 = dma.vmem_to_hbm [thread:$0]  (%p4581_p2), %s4374_s19, 1024, %s4372_s14, %s2411_s2, %s3663_s0, %s3663_s0, %s3664_s3  }
 0x2c6 PF: > { %p3060_p6 = scmp.ge.s32.totalorder %s3650_s10, 2  ;;  %s2442_s25 = sand.u32 1, %s3622_s27  }
 0x2c7   : > { %p4582_p13 = scmp.ne.s32.totalorder %s4537_s17, 0  ;;  %s2443_s20 = scalar_lea.sflag [#allocation6], %s2442_s25 }
 0x2c9   : > { %p3050_p11 = pnand %p3060_p6, %p4582_p13 }
 0x2cb   : > { %3593 = dma.done.wait (!%p3050_p11), %s2443_s20, 1024  }
 0x2cc   : > { %3595 = vsyncadd (!%p3050_p11), %s2443_s20, 4294966272  ;;  %s27_s10 = sadd.s32 1, %s3650_s10   ;;  %s4584_s21 = sld [smem:[#allocation23_spill]] }
 0x2cd   : > { %p4411_p0 = scmp.ge.s32.totalorder %s27_s10, 10   ;;  %s4585_s22 = sld [smem:[#allocation24_spill]] }
 0x2ce   : > { %s4586_s7 = sld [smem:[#allocation25_spill]]  ;;  %s4587_s19 = smov %s3862_s24 }
 0x2cf   : > { %s4588_s14 = sld [smem:[#allocation36_spill]]  ;;  %s4589_s30 = sld [smem:[#allocation28_spill]] }
 0x2d0   : > { %s4590_s17 = sld [smem:[#allocation29_spill]]  ;;  %s4591_s8 = sld [smem:[#allocation31_spill]] }
 0x2d1   : > { %s4592_s9 = sld [smem:[#allocation32_spill]]  ;;  %s4593_s23 = smov %s4616_s18 }
 0x2d2   : > { %s4595_s25 = smov %s3618_s26  ;;  %s4596_s26 = smov %s4587_s19 }
 0x2d3   : > { %s4597_s27 = smov %s3626_s28  ;;  %s4598_s28 = smov %s3630_s29 }
 0x2d4   : > { %s4594_s24 = smov %s4586_s7  ;;  %26 = sbr.rel (!%p4411_p0) target bundleno = 22 (0x16), region = 145 }
 0x2d5   : > { %s4599_s29 = smov %s4588_s14 }
 0x2d6   : > { %s4600_s7 = smov %s4590_s17 }
 0x2db   :  { %2448 = vsyncpa [#allocation5], 1 }
 0x2dc   :  { %2450 = vsyncpa [#allocation5 + $0x1], 1 }
 0x2dd   :  { %2451 = vsyncpa [#allocation8], 1 }
 0x2de   :  { %2453 = vsyncpa [#allocation8 + $0x1], 1 }
 0x2df   :  { %2454 = vsyncpa [#allocation11], 1 }
 0x2e0   :  { %2455 = vsyncpa [#allocation14], 1 }
 0x2e1   :  { %2456 = vsyncpa [#allocation6], 1 }
 0x2e2   :  { %2458 = vsyncpa [#allocation6 + $0x1], 1 }

// kernel: upsampling_block_forward.4
= control target key start
LH: loop header
LB: loop body
LE: loop exit
PB: predicated region body
PF: predicated region fallthrough
CT: control target
= control target key end

     0   :  { %s7674_s0 = inlined_call_operand.hbm [shape: bf16[2,16,16,4], index: 0, kind: input, shape index: {}, may-alias: {0,1,2}]   ;;  %s7675_s1 = inlined_call_operand.hbm [shape: bf16[2,16,16,4], index: 1, kind: input, shape index: {}, may-alias: {0,1,2}]   ;;  %s7676_s2 = inlined_call_operand.hbm [shape: bf16[2,16,16,4], index: 2, kind: input, shape index: {}, may-alias: {0,1,2}]   ;;  %s7677_s3 = inlined_call_operand.hbm [shape: bf16[2,16,16,4], index: 3, kind: input, shape index: {}, may-alias: {3,4,5}]   ;;  %s7678_s4 = inlined_call_operand.hbm [shape: bf16[2,16,16,4], index: 4, kind: input, shape index: {}, may-alias: {3,4,5}]   ;;  %s7679_s5 = inlined_call_operand.hbm [shape: bf16[2,16,16,4], index: 5, kind: input, shape index: {}, may-alias: {3,4,5}]   ;;  %s7680_s6 = inlined_call_operand.hbm [shape: bf16[2304,8], index: 6, kind: input, shape index: {}]   ;;  %s7681_s7 = inlined_call_operand.hbm [shape: f32[1,1,8], index: 7, kind: input, shape index: {}]   ;;  %s7682_s8 = inlined_call_operand.hbm [shape: f32[1,1,8], index: 8, kind: input, shape index: {}]   ;;  %s7683_s9 = inlined_call_operand.hbm [shape: bf16[2,16,16,8], index: 9, kind: output, shape index: {}]  }
   0x1   :  { %7733 = sst [smem:[#allocation51_spill]] %s7674_s0 }
   0x2   :  { %7734 = sst [smem:[#allocation52_spill]] %s7675_s1 }
   0x3   :  { %7735 = sst [smem:[#allocation53_spill]] %s7676_s2 }
   0x4   :  { %7736 = sst [smem:[#allocation54_spill]] %s7677_s3 }
   0x5   :  { %7737 = sst [smem:[#allocation55_spill]] %s7679_s5 }
   0x6   :  { %7738 = sst [smem:[#allocation56_spill]] %s7680_s6 }
   0x7   :  { %7739 = sst [smem:[#allocation57_spill]] %s7681_s7 }
   0x8   :  { %7740 = sst [smem:[#allocation58_spill]] %s7683_s9 }
   0x9   :  { %14 = vsyncpa [#allocation6], 0 }
   0xa   :  { %16 = vsyncpa [#allocation6 + $0x1], 0 }
   0xb   :  { %17 = vsyncpa [#allocation9], 0 }
   0xc   :  { %19 = vsyncpa [#allocation9 + $0x1], 0 }
   0xd   :  { %20 = vsyncpa [#allocation12], 0 }
   0xe   :  { %22 = vsyncpa [#allocation12 + $0x1], 0 }
   0xf   :  { %23 = vsyncpa [#allocation15], 0 }
  0x10   :  { %25 = vsyncpa [#allocation15 + $0x1], 0 }
  0x11   :  { %26 = vsyncpa [#allocation18], 0 }
  0x12   :  { %27 = vsyncpa [#allocation7], 0 }
  0x13   :  { %29 = vsyncpa [#allocation7 + $0x1], 0  ;;  %s6501_s30 = smov 0   ;;  %s6503_s10 = smov 0  }
  0x14   :  { %s6505_s11 = smov 0   ;;  %s6507_s12 = smov 0  }
  0x15   :  { %s6509_s13 = smov 0   ;;  %s6511_s14 = smov 0  }
  0x16   :  { %s6513_s15 = smov 0   ;;  %s6515_s16 = smov 0  }
  0x17   :  { %s6517_s17 = smov 0   ;;  %s6519_s18 = smov 0  }
  0x18   :  { %s6521_s19 = smov 0   ;;  %s6523_s20 = smov 0  }
  0x19   :  { %s6525_s21 = smov 0   ;;  %s6527_s22 = smov 0  }
  0x1a LB: > { %7741 = sst [smem:[#allocation30_spill]] %s6379_s30  ;;  %s6572_s23 = sadd.s32 4294967295, %s6431_s22   ;;  %s6431_s22 = sphi %s6527_s22, %s35_s22   ;;  %s6427_s21 = sphi %s6525_s21, %s7859_s21   ;;  %s6423_s20 = sphi %s6523_s20, %s7858_s20   ;;  %s6419_s19 = sphi %s6521_s19, %s7865_s19   ;;  %s6415_s18 = sphi %s6519_s18, %s7856_s18   ;;  %s6411_s17 = sphi %s6517_s17, %s7864_s17   ;;  %s6407_s16 = sphi %s6515_s16, %s7863_s16   ;;  %s6403_s15 = sphi %s6513_s15, %s7862_s15   ;;  %s6399_s14 = sphi %s6511_s14, %s7854_s14   ;;  %s6395_s13 = sphi %s6509_s13, %s7853_s13   ;;  %s6391_s12 = sphi %s6507_s12, %s7852_s12   ;;  %s6387_s11 = sphi %s6505_s11, %s7861_s11   ;;  %s6383_s10 = sphi %s6503_s10, %s7851_s10   ;;  %s6379_s30 = sphi %s6501_s30, %s7850_s30  }
  0x1b   : > { %7742 = sst [smem:[#allocation31_spill]] %s6383_s10  ;;  %p4791_p0 = scmp.ge.s32.totalorder %s6431_s22, 1 }
  0x1c   : > { %7743 = sst [smem:[#allocation32_spill]] %s6387_s11  ;;  %p7692_p1 = scmp.eq.s32.totalorder %s6572_s23, 0 }
  0x1d   : > { %7744 = sst [smem:[#allocation33_spill]] %s6395_s13  ;;  %p343_p3 = scmp.lt.s32.totalorder %s6431_s22, 9 }
  0x1e   : > { %7745 = sst [smem:[#allocation34_spill]] %s6399_s14  ;;  %s6433_s25 = smov [#allocation16]  }
  0x1f   : > { %7746 = sst [smem:[#allocation35_spill]] %s6403_s15  ;;  %p6578_p4 = pnand %p4791_p0, %p343_p3 }
  0x20   : > { %7747 = sst [smem:[#allocation36_spill]] %s6415_s18  ;;  %s355_s26 = sshll.u32 %s6433_s25, 4  ;;  %s356_s26 = int_to_ptr.vmem [resolvable:$true] %s355_s26 }
  0x21   : > { %7748 = sst [smem:[#allocation37_spill]] %s6419_s19  ;;  %p5553_p5 = pneg %p6578_p4 }
  0x22   : > { %7749 = sst [smem:[#allocation38_spill]] %s6423_s20  ;;  %s6434_s28 = smov [#allocation17]  }
  0x23   : > { %7750 = sst [smem:[#allocation39_spill]] %s6427_s21  ;;  %p6586_p6 = pnand %p5553_p5, %p7692_p1 }
  0x24   : > { %s7751_s24 = scalar_select %p6578_p4, 1, 0 }
  0x25   : > { %s7753_s27 = scalar_select %p6586_p6, 1, 0 }
  0x26   : > { %7752 = sst [smem:[#allocation40_spill]] %s7751_s24  ;;  %s369_s29 = sshll.u32 %s6434_s28, 4  ;;  %s6590_s29 = int_to_ptr.vmem [resolvable:$true] %s369_s29 }
  0x27   : > { %s7754_s6 = sld [smem:[#allocation56_spill]]  ;;  %p6600_p8 = pneg %p6586_p6 }
  0x2d   : > { %s5993_s18 = scalar_lea.hbm %s7754_s6, 18432 }
  0x2e   : > { %p5994_p7 = scmp.ne.s32.totalorder %s7754_s6, %s5993_s18  ;;  %p6000_p11 = scmp.lt.u32.totalorder %s5993_s18, %s7754_s6 }
  0x30   : > { %p5996_p9 = pnand %p6600_p8, %p5994_p7 }
  0x32   : > { %p5997_p10 = pneg %p5996_p9 }
  0x34   : > { %p6002_p12 = pnand %p6000_p11, %p5997_p10 }
  0x36   : > { %6005 = shalt.err (!%p6002_p12)
}
  0x37   : > { %s6006_s9 = scalar_lea.vmem %s356_s26, 18432  ;;  %p6014_p5 = scmp.lt.s32.totalorder %s356_s26, %s356_s26 }
  0x38   : > { %p6007_p13 = scmp.ne.s32.totalorder %s356_s26, %s6006_s9  ;;  %p6015_p2 = scmp.lt.s32.totalorder %s6006_s9, %s6006_s9 }
  0x3a   : > { %p6009_p0 = pnand %p6007_p13, %p6600_p8  ;;  %p6016_p1 = por %p6015_p2, %p6014_p5 }
  0x3c   : > { %p6010_p3 = pneg %p6009_p0 }
  0x3e   : > { %p6017_p4 = pnand %p6016_p1, %p6010_p3 }
  0x40   : > { %6020 = shalt.err (!%p6017_p4)
}
  0x41   : > { %s7697_s2 = smov 64   ;;  %s7699_s5 = smov 4  }
  0x42   : > { %5556 = dma.hbm_to_vmem [thread:$0]  (!%p6586_p6), %s7754_s6, 18432, %s356_s26, [#allocation15], %s7697_s2, %s7697_s2, %s7699_s5  }
  0x43   : > { %s7756_s7 = sld [smem:[#allocation57_spill]] }
  0x49   : > { %s6021_s30 = scalar_lea.hbm %s7756_s7, 16 }
  0x4a   : > { %p6022_p1 = scmp.ne.s32.totalorder %s7756_s7, %s6021_s30  ;;  %p6028_p7 = scmp.lt.u32.totalorder %s6021_s30, %s7756_s7 }
  0x4c   : > { %p6024_p2 = pnand %p6022_p1, %p6600_p8 }
  0x4e   : > { %p6025_p4 = pneg %p6024_p2 }
  0x50   : > { %p6030_p9 = pnand %p6028_p7, %p6025_p4 }
  0x52   : > { %6033 = shalt.err (!%p6030_p9)
}
  0x53   : > { %s6034_s26 = scalar_lea.vmem %s6590_s29, 16  ;;  %s6041_s10 = scalar_lea.vmem %s6590_s29, 32 }
  0x54   : > { %p6035_p10 = scmp.ne.s32.totalorder %s6590_s29, %s6034_s26  ;;  %p6042_p13 = scmp.lt.s32.totalorder %s6590_s29, %s6590_s29 }
  0x55   : > { %p6043_p0 = scmp.lt.s32.totalorder %s6041_s10, %s6034_s26 }
  0x56   : > { %p6037_p11 = pnand %p6035_p10, %p6600_p8 }
  0x57   : > { %p6044_p3 = por %p6043_p0, %p6042_p13 }
  0x58   : > { %p6038_p12 = pneg %p6037_p11 }
  0x5a   : > { %p6045_p5 = pnand %p6044_p3, %p6038_p12 }
  0x5c   : > { %6048 = shalt.err (!%p6045_p5)
}
  0x5d   : > { %5559 = dma.hbm_to_vmem [thread:$0]  (!%p6586_p6), %s7756_s7, 16, %s6590_s29, [#allocation18]  }
  0x5e   : > { %s44_s11 = sadd.s32 1, %s6423_s20  ;;  %s47_s18 = sadd.s32 1, %s6427_s21 }
  0x5f   : > { %p45_p1 = scmp.ge.s32.totalorder %s44_s11, 4  ;;  %p7712_p2 = scmp.eq.s32.totalorder %s6431_s22, 0 }
  0x60   : > { %s4779_s19 = sshll.u32 %s6423_s20, 2  ;;  %s92_s9 = sadd.s32 1, %s6399_s14 }
  0x61   : > { %s7867_s11 = smov (%p45_p1, %s44_s11), 0  ;;  %s7869_s18 = smov (!%p45_p1, %s47_s18), %s6427_s21 }
  0x62   : > { %7757 = sst [smem:[#allocation41_spill]] %s7867_s11  ;;  %s52_s24 = ssub.s32 %s6423_s20, %s7867_s11 }
  0x63   : > { %s4780_s28 = sadd.s32 4294967295, %s4779_s19  ;;  %p49_p4 = scmp.ge.s32.totalorder %s7869_s18, 2 }
  0x64   : > { %p81_p7 = scmp.gt.s32.totalorder %s4780_s28, 0  ;;  %s4781_s29 = sshll.u32 %s7867_s11, 2 }
  0x65   : > { %s7871_s18 = smov (%p49_p4, %s7869_s18), 0  ;;  %s4782_s10 = sadd.s32 4294967295, %s4781_s29 }
  0x66   : > { %7758 = sst [smem:[#allocation42_spill]] %s7871_s18  ;;  %s7873_s28 = smov (!%p81_p7, %s4780_s28), 0 }
  0x67   : > { %s6658_s26 = ssub.s32 %s6427_s21, %s7871_s18  ;;  %p85_p9 = scmp.gt.s32.totalorder %s4782_s10, 0 }
  0x68   : > { %7759 = sst [smem:[#allocation43_spill]] %s6658_s26  ;;  %s6661_s0 = sor.u32 %s52_s24, %s6658_s26 }
  0x69   : > { %p99_p11 = scmp.ne.s32.totalorder %s6399_s14, %s6395_s13  ;;  %s7875_s10 = smov (!%p85_p9, %s4782_s10), 0 }
  0x6a   : > { %p105_p13 = scmp.ne.s32.totalorder %s6395_s13, %s6391_s12  ;;  %s88_s2 = ssub.s32 %s7873_s28, %s7875_s10 }
  0x6b   : > { %p6668_p12 = por %p99_p11, %p7712_p2  ;;  %s6674_s5 = sadd.s32 4, %s4779_s19 }
  0x6c   : > { %7761 = sst [smem:[#allocation44_spill]] %s6674_s5  ;;  %s89_s24 = sor.u32 %s88_s2, %s6658_s26 }
  0x6d   : > { %p7762_p0 = scmp.eq.s32.totalorder %s6572_s23, 0  ;;  %p90_p5 = scmp.eq.s32.totalorder %s89_s24, 0 }
  0x6e   : > { %s6684_s7 = sadd.s32 4, %s4781_s29  ;;  %p7711_p4 = scmp.lt.s32.totalorder %s6431_s22, 8 }
  0x6f   : > { %p6679_p3 = por %p105_p13, %p7762_p0  ;;  %s6692_s12 = sshll.u32 %s6427_s21, 5 }
  0x70   : > { %s6688_s18 = scalar_select %p90_p5, %s6399_s14, %s92_s9  }
  0x71   : > { %s7763_s6 = scalar_select %p6679_p3, 1, 0 }
  0x72   : > { %7765 = sst [smem:[#allocation46_spill]] %s6688_s18  ;;  %s6695_s2 = sand.u32 1, %s6431_s22  }
  0x73   : > { %7764 = sst [smem:[#allocation45_spill]] %s7763_s6  ;;  %s417_s19 = sand.u32 1, %s6399_s14  }
  0x74   : > { %s4801_s10 = sshll.u32 %s417_s19, 3  ;;  %s4804_s11 = sshll.u32 %s7873_s28, 1 }
  0x75   : > { %s429_s24 = sadd.s32 %s4804_s11, %s6692_s12  ;;  %s419_s6 = scalar_lea.vmem [#allocation8], %s4801_s10 }
  0x76   : > { %s432_s13 = sshll.u32 %s419_s6, 4  ;;  %s4806_s26 = sshll.u32 %s429_s24, 6  ;;  %s6699_s13 = int_to_ptr.vmem [resolvable:$true] %s432_s13 }
  0x77   : > { %s7766_s1 = sld [smem:[#allocation52_spill]]  ;;  %p6710_p9 = pnand %p7711_p4, %p6668_p12 }
  0x78   : > { %s6717_s28 = scalar_lea.hbm %s7678_s4, %s4806_s26  ;;  %s497_s5 = scalar_lea.vmem [#allocation13], %s4801_s10 }
  0x79   : > { %s7767_s19 = scalar_select %p6710_p9, 1, 0 }
  0x7a   : > { %s6719_s24 = sshll.u32 %s497_s5, 4  ;;  %s7715_s30 = scalar_lea.sflag [#allocation9], %s6695_s2  ;;  %s6753_s24 = int_to_ptr.vmem [resolvable:$true] %s6719_s24 }
  0x7b   : > { %p7725_p13 = pneg %p6710_p9 }
  0x7d   : > { %s6704_s9 = scalar_lea.hbm %s7766_s1, %s4806_s26  ;;  %s6054_s11 = scalar_lea.hbm %s7766_s1, 4096 }
  0x7e   : > { %s6049_s29 = scalar_lea.hbm %s6704_s9, 128  ;;  %p6055_p5 = scmp.lt.u32.totalorder %s6704_s9, %s7766_s1 }
  0x7f   : > { %p6050_p11 = scmp.ne.s32.totalorder %s6704_s9, %s6049_s29  ;;  %p6056_p7 = scmp.lt.u32.totalorder %s6054_s11, %s6049_s29 }
  0x80   : > { %p6058_p4 = scmp.lt.u32.totalorder %s6049_s29, %s6704_s9 }
  0x81   : > { %p6052_p12 = pnand %p7725_p13, %p6050_p11  ;;  %p6057_p1 = por %p6056_p7, %p6055_p5 }
  0x83   : > { %p6053_p0 = pneg %p6052_p12  ;;  %p6059_p2 = por %p6058_p4, %p6057_p1 }
  0x85   : > { %p6060_p10 = pnand %p6059_p2, %p6053_p0 }
  0x87   : > { %6063 = shalt.err (!%p6060_p10)
}
  0x88   : > { %s6064_s26 = scalar_lea.vmem %s6699_s13, 128  ;;  %s6437_s21 = smov [#allocation8]  }
  0x89   : > { %p6065_p11 = scmp.ne.s32.totalorder %s6699_s13, %s6064_s26  ;;  %s6069_s18 = sshll.u32 %s6437_s21, 4  ;;  %s6070_s18 = int_to_ptr.vmem [resolvable:$false] %s6069_s18 }
  0x8a   : > { %s6071_s14 = scalar_lea.vmem %s6070_s18, 256  ;;  %p6072_p6 = scmp.lt.s32.totalorder %s6699_s13, %s6070_s18 }
  0x8b   : > { %p6067_p12 = pnand %p6065_p11, %p7725_p13  ;;  %p6073_p7 = scmp.lt.s32.totalorder %s6071_s14, %s6064_s26 }
  0x8d   : > { %p6068_p3 = pneg %p6067_p12  ;;  %p6074_p5 = por %p6073_p7, %p6072_p6 }
  0x8f   : > { %p6075_p1 = pnand %p6074_p5, %p6068_p3 }
  0x91   : > { %6078 = shalt.err (!%p6075_p1)
}
  0x92   : > { %s7768_s10 = smov 4   ;;  %s7769_s5 = smov 64  }
  0x93   : > { %5569 = dma.hbm_to_vmem [thread:$0]  (!%p6710_p9), %s6704_s9, 128, %s6699_s13, %s7715_s30, %s7769_s5, %s7769_s5, %s7768_s10  }
  0x94   : > { %s4778_s29 = sadd.s32 4294967294, %s6431_s22   ;;  %s56_s11 = sadd.s32 1, %s6411_s17 }
  0x95   : > { %p63_p6 = scmp.ne.s32.totalorder %s6411_s17, %s6407_s16  ;;  %p7770_p2 = scmp.eq.s32.totalorder %s6661_s0, 0 }
  0x96   : > { %p7772_p10 = scmp.eq.s32.totalorder %s6431_s22, 0  ;;  %p69_p4 = scmp.ne.s32.totalorder %s6407_s16, %s6403_s15 }
  0x97   : > { %s6762_s6 = scalar_select %p7770_p2, %s6411_s17, %s56_s11  }
  0x98   : > { %p65_p3 = por %p7772_p10, %p63_p6  ;;  %p7773_p0 = scmp.eq.s32.totalorder %s6572_s23, 7 }
  0x99   : > { %7771 = sst [smem:[#allocation47_spill]] %s6762_s6  ;;  %p336_p12 = scmp.eq.s32.totalorder %s4778_s29, 7 }
  0x9a   : > { %p6770_p11 = por %p7773_p0, %p63_p6  ;;  %p7776_p7 = scmp.eq.s32.totalorder %s6572_s23, 0 }
  0x9b   : > { %s7716_s9 = sand.u32 1, %s6411_s17   ;;  %p6781_p1 = por %p336_p12, %p69_p4 }
  0x9c   : > { %s7774_s26 = scalar_select %p6770_p11, 1, 0 }
  0x9d   : > { %p6776_p5 = por %p7776_p7, %p69_p4  ;;  %s6787_s21 = sshll.u32 %s7716_s9, 5 }
  0x9e   : > { %7775 = sst [smem:[#allocation48_spill]] %s7774_s26  ;;  %s5136_s18 = sshll.u32 %s6423_s20, 3 }
  0x9f   : > { %s7777_s13 = scalar_select %p6776_p5, 1, 0 }
  0xa0   : > { %s7779_s0 = scalar_select %p6781_p1, 1, 0 }
  0xa1   : > { %7778 = sst [smem:[#allocation49_spill]] %s7777_s13  ;;  %p7781_p6 = scmp.lt.s32.totalorder %s6431_s22, 8 }
  0xa2   : > { %7780 = sst [smem:[#allocation50_spill]] %s7779_s0  ;;  %s6797_s29 = sadd.s32 %s5136_s18, %s6692_s12 }
  0xa3   : > { %p6792_p2 = pnand %p7781_p6, %p65_p3  ;;  %s7722_s11 = sshll.u32 %s6797_s29, 6 }
  0xa4   : > { %s7783_s3 = sld [smem:[#allocation54_spill]]  ;;  %s473_s20 = scalar_lea.vmem [#allocation11], %s6787_s21 }
  0xa5   : > { %s483_s6 = sshll.u32 %s473_s20, 4  ;;  %s6438_s0 = smov [#allocation19]   ;;  %s6808_s6 = int_to_ptr.vmem [resolvable:$true] %s483_s6 }
  0xa6   : > { %s6810_s18 = sshll.u32 %s6438_s0, 4  ;;  %s7731_s15 = scalar_lea.sflag [#allocation12], %s6695_s2  ;;  %s381_s18 = int_to_ptr.vmem [resolvable:$true] %s6810_s18 }
  0xa7   : > { %p7730_p3 = pneg %p6792_p2 }
  0xaa   : > { %s6805_s9 = scalar_lea.hbm %s7783_s3, %s7722_s11  ;;  %s6084_s11 = scalar_lea.hbm %s7783_s3, 4096 }
  0xab   : > { %s6079_s26 = scalar_lea.hbm %s6805_s9, 512  ;;  %p6085_p12 = scmp.lt.u32.totalorder %s6805_s9, %s7783_s3 }
  0xac   : > { %p6080_p10 = scmp.ne.s32.totalorder %s6805_s9, %s6079_s26  ;;  %p6086_p7 = scmp.lt.u32.totalorder %s6084_s11, %s6079_s26 }
  0xad   : > { %p6088_p13 = scmp.lt.u32.totalorder %s6079_s26, %s6805_s9 }
  0xae   : > { %p6082_p4 = pnand %p7730_p3, %p6080_p10  ;;  %p6087_p6 = por %p6086_p7, %p6085_p12 }
  0xb0   : > { %p6083_p0 = pneg %p6082_p4  ;;  %p6089_p1 = por %p6088_p13, %p6087_p6 }
  0xb2   : > { %p6090_p11 = pnand %p6089_p1, %p6083_p0 }
  0xb4   : > { %6093 = shalt.err (!%p6090_p11)
}
  0xb5   : > { %s6094_s0 = scalar_lea.vmem %s6808_s6, 512  ;;  %s6439_s1 = smov [#allocation11]  }
  0xb6   : > { %p6095_p10 = scmp.ne.s32.totalorder %s6808_s6, %s6094_s0  ;;  %s6099_s30 = sshll.u32 %s6439_s1, 4  ;;  %s6100_s30 = int_to_ptr.vmem [resolvable:$false] %s6099_s30 }
  0xb7   : > { %s6101_s13 = scalar_lea.vmem %s6100_s30, 1024  ;;  %p6102_p9 = scmp.lt.s32.totalorder %s6808_s6, %s6100_s30 }
  0xb8   : > { %p6097_p4 = pnand %p6095_p10, %p7730_p3  ;;  %p6103_p12 = scmp.lt.s32.totalorder %s6101_s13, %s6094_s0 }
  0xba   : > { %p6098_p5 = pneg %p6097_p4  ;;  %p6104_p7 = por %p6103_p12, %p6102_p9 }
  0xbc   : > { %p6105_p13 = pnand %p6104_p7, %p6098_p5 }
  0xbe   : > { %6108 = shalt.err (!%p6105_p13)
}
  0xbf   : > { %5575 = dma.hbm_to_vmem [thread:$0]  (!%p6792_p2), %s6805_s9, 512, %s6808_s6, %s7731_s15, %s7769_s5, %s7769_s5, %s7768_s10  }
  0xc0   : > { %s6109_s20 = scalar_lea.hbm %s7682_s8, 16 }
  0xc1   : > { %p6110_p9 = scmp.ne.s32.totalorder %s7682_s8, %s6109_s20  ;;  %p6116_p1 = scmp.lt.u32.totalorder %s6109_s20, %s7682_s8 }
  0xc3   : > { %p6112_p11 = pnand %p6110_p9, %p6600_p8 }
  0xc5   : > { %p6113_p5 = pneg %p6112_p11 }
  0xc7   : > { %p6118_p0 = pnand %p6116_p1, %p6113_p5 }
  0xc9   : > { %6121 = shalt.err (!%p6118_p0)
}
  0xca   : > { %s6122_s3 = scalar_lea.vmem %s381_s18, 16  ;;  %s6129_s6 = scalar_lea.vmem %s381_s18, 32 }
  0xcb   : > { %p6123_p6 = scmp.ne.s32.totalorder %s381_s18, %s6122_s3  ;;  %p6130_p12 = scmp.lt.s32.totalorder %s381_s18, %s381_s18 }
  0xcc   : > { %p6131_p7 = scmp.lt.s32.totalorder %s6129_s6, %s6122_s3 }
  0xcd   : > { %p6125_p10 = pnand %p6123_p6, %p6600_p8 }
  0xce   : > { %p6132_p13 = por %p6131_p7, %p6130_p12 }
  0xcf   : > { %p6126_p4 = pneg %p6125_p10 }
  0xd1   : > { %p6133_p3 = pnand %p6132_p13, %p6126_p4 }
  0xd3   : > { %6136 = shalt.err (!%p6133_p3)
}
  0xd4   : > { %p7784_p9 = scmp.ne.s32.totalorder %s7753_s27, 0  ;;  %s7785_s11 = sshll.u32 %s6797_s29, 6 }
  0xd5   : > { %s7786_s0 = sld [smem:[#allocation51_spill]]  ;;  %s395_s3 = scalar_lea.vmem [#allocation5], %s6787_s21 }
  0xd6   : > { %5562 = dma.hbm_to_vmem [thread:$0]  (!%p7784_p9), %s7682_s8, 16, %s381_s18, [#allocation18]  }
  0xd7   : > { %s405_s27 = sshll.u32 %s395_s3, 4  ;;  %s7787_s30 = sand.u32 1, %s6411_s17   ;;  %s6870_s27 = int_to_ptr.vmem [resolvable:$true] %s405_s27 }
  0xd8   : > { %s6874_s13 = scalar_lea.sflag [#allocation6], %s7787_s30  ;;  %p7788_p3 = pneg %p6792_p2 }
  0xdb   : > { %s6867_s1 = scalar_lea.hbm %s7786_s0, %s7785_s11  ;;  %s6142_s9 = scalar_lea.hbm %s7786_s0, 4096 }
  0xdc   : > { %s6137_s6 = scalar_lea.hbm %s6867_s1, 512  ;;  %p6143_p1 = scmp.lt.u32.totalorder %s6867_s1, %s7786_s0 }
  0xdd   : > { %p6138_p8 = scmp.ne.s32.totalorder %s6867_s1, %s6137_s6  ;;  %p6144_p0 = scmp.lt.u32.totalorder %s6142_s9, %s6137_s6 }
  0xde   : > { %p6146_p10 = scmp.lt.u32.totalorder %s6137_s6, %s6867_s1 }
  0xdf   : > { %p6140_p11 = pnand %p6138_p8, %p7788_p3  ;;  %p6145_p6 = por %p6144_p0, %p6143_p1 }
  0xe1   : > { %p6141_p5 = pneg %p6140_p11  ;;  %p6147_p4 = por %p6146_p10, %p6145_p6 }
  0xe3   : > { %p6148_p12 = pnand %p6147_p4, %p6141_p5 }
  0xe5   : > { %6151 = shalt.err (!%p6148_p12)
}
  0xe6   : > { %s6152_s21 = scalar_lea.vmem %s6870_s27, 512  ;;  %p7789_p13 = pmov %p7788_p3 }
  0xe7   : > { %p6153_p7 = scmp.ne.s32.totalorder %s6870_s27, %s6152_s21  ;;  %s6440_s25 = smov [#allocation5]  }
  0xe8   : > { %s6157_s20 = sshll.u32 %s6440_s25, 4  ;;  %s6158_s20 = int_to_ptr.vmem [resolvable:$false] %s6157_s20 }
  0xe9   : > { %p6155_p9 = pnand %p6153_p7, %p7789_p13  ;;  %s6159_s3 = scalar_lea.vmem %s6158_s20, 1024 }
  0xea   : > { %p6160_p3 = scmp.lt.s32.totalorder %s6870_s27, %s6158_s20  ;;  %p6161_p11 = scmp.lt.s32.totalorder %s6159_s3, %s6152_s21 }
  0xeb   : > { %p6156_p8 = pneg %p6155_p9 }
  0xec   : > { %p6162_p1 = por %p6161_p11, %p6160_p3 }
  0xee   : > { %p6163_p0 = pnand %p6162_p1, %p6156_p8 }
  0xf0   : > { %6166 = shalt.err (!%p6163_p0)
}
  0xf1   : > { %s7790_s30 = sld [smem:[#allocation44_spill]]  ;;  %s7791_s6 = sld [smem:[#allocation32_spill]] }
  0xf2   : > { %s7792_s29 = sld [smem:[#allocation31_spill]]  ;;  %s7793_s18 = sld [smem:[#allocation30_spill]] }
  0xf3   : > { %s7794_s9 = sld [smem:[#allocation43_spill]]  ;;  %p7796_p6 = scmp.lt.s32.totalorder %s6684_s7, 15 }
  0xf4   : > { %5566 = dma.hbm_to_vmem [thread:$0]  (!%p6792_p2), %s6867_s1, 512, %s6870_s27, %s6874_s13, %s7769_s5, %s7769_s5, %s7768_s10  }
  0xf5   : > { %s7879_s7 = smov (!%p7796_p6, %s6684_s7), 15  ;;  %p7797_p12 = scmp.eq.s32.totalorder %s6431_s22, 0 }
  0xf6   : > { %p7799_p13 = scmp.eq.s32.totalorder %s6572_s23, 0  ;;  %p7803_p8 = scmp.lt.s32.totalorder %s6431_s22, 8 }
  0xf7   : > { %p7795_p5 = scmp.lt.s32.totalorder %s7790_s30, 15  ;;  %s128_s14 = sadd.s32 1, %s7791_s6 }
  0xf8   : > { %p135_p10 = scmp.ne.s32.totalorder %s7791_s6, %s7792_s29  ;;  %p141_p4 = scmp.ne.s32.totalorder %s7792_s29, %s7793_s18 }
  0xf9   : > { %s7877_s30 = smov (!%p7795_p5, %s7790_s30), 15  ;;  %s444_s27 = sand.u32 1, %s7791_s6  }
  0xfa   : > { %s124_s26 = ssub.s32 %s7877_s30, %s7879_s7  ;;  %p6917_p7 = por %p135_p10, %p7797_p12 }
  0xfb   : > { %s125_s11 = sor.u32 %s124_s26, %s7794_s9  ;;  %p6923_p9 = por %p141_p4, %p7799_p13 }
  0xfc   : > { %p126_p2 = scmp.eq.s32.totalorder %s125_s11, 0  ;;  %s4809_s7 = sshll.u32 %s7877_s30, 1 }
  0xfd   : > { %s7800_s1 = scalar_select %p6923_p9, 1, 0 }
  0xfe   : > { %s7881_s6 = smov (!%p126_p2, %s7791_s6), %s128_s14  ;;  %s6931_s13 = sshll.u32 %s444_s27, 3 }
  0xff   : > { %s6934_s25 = sadd.s32 %s4809_s7, %s6692_s12  ;;  %s7801_s18 = sld [smem:[#allocation53_spill]] }
 0x100   : > { %s4811_s20 = sshll.u32 %s6934_s25, 6  ;;  %s446_s11 = scalar_lea.vmem [#allocation10], %s6931_s13 }
 0x101   : > { %s459_s15 = sshll.u32 %s446_s11, 4  ;;  %p6951_p3 = pnand %p7803_p8, %p6917_p7  ;;  %s6945_s15 = int_to_ptr.vmem [resolvable:$true] %s459_s15 }
 0x102   : > { %s6167_s12 = scalar_lea.hbm %s6717_s28, 128  ;;  %p7805_p1 = scmp.ne.s32.totalorder %s7767_s19, 0 }
 0x103   : > { %p6168_p11 = scmp.ne.s32.totalorder %s6717_s28, %s6167_s12  ;;  %s6172_s7 = scalar_lea.hbm %s7678_s4, 4096 }
 0x104   : > { %p7806_p0 = pneg %p7805_p1  ;;  %p6173_p10 = scmp.lt.u32.totalorder %s6717_s28, %s7678_s4 }
 0x105   : > { %s7802_s9 = smov %s7801_s18  ;;  %s6942_s26 = scalar_lea.hbm %s7801_s18, %s4811_s20 }
 0x106   : > { %p6170_p5 = pnand %p6168_p11, %p7806_p0  ;;  %p6174_p4 = scmp.lt.u32.totalorder %s6172_s7, %s6167_s12 }
 0x107   : > { %p6176_p7 = scmp.lt.u32.totalorder %s6167_s12, %s6717_s28 }
 0x108   : > { %p6171_p6 = pneg %p6170_p5  ;;  %p6175_p12 = por %p6174_p4, %p6173_p10 }
 0x10a   : > { %p6177_p2 = por %p6176_p7, %p6175_p12 }
 0x10c   : > { %p6178_p13 = pnand %p6177_p2, %p6171_p6 }
 0x10e   : > { %6181 = shalt.err (!%p6178_p13)
}
 0x10f   : > { %s6182_s21 = scalar_lea.vmem %s6753_s24, 128  ;;  %p7807_p11 = pmov %p7806_p0 }
 0x110   : > { %p6183_p8 = scmp.ne.s32.totalorder %s6753_s24, %s6182_s21  ;;  %s6441_s18 = smov [#allocation13]  }
 0x111   : > { %s6187_s11 = sshll.u32 %s6441_s18, 4  ;;  %s6188_s11 = int_to_ptr.vmem [resolvable:$false] %s6187_s11 }
 0x112   : > { %p6185_p0 = pnand %p6183_p8, %p7807_p11  ;;  %s6189_s14 = scalar_lea.vmem %s6188_s11, 256 }
 0x113   : > { %p6190_p9 = scmp.lt.s32.totalorder %s6753_s24, %s6188_s11  ;;  %p6191_p10 = scmp.lt.s32.totalorder %s6189_s14, %s6182_s21 }
 0x114   : > { %p6186_p5 = pneg %p6185_p0 }
 0x115   : > { %p6192_p4 = por %p6191_p10, %p6190_p9 }
 0x117   : > { %p6193_p12 = pnand %p6192_p4, %p6186_p5 }
 0x119   : > { %6196 = shalt.err (!%p6193_p12)
}
 0x11a   : > { %s7808_s12 = scalar_lea.sflag [#allocation12], %s6695_s2  ;;  %s6197_s27 = scalar_lea.hbm %s6942_s26, 128 }
 0x11b   : > { %5578 = dma.hbm_to_vmem [thread:$0]  (!%p7805_p1), %s6717_s28, 128, %s6753_s24, %s7808_s12, %s7769_s5, %s7769_s5, %s7768_s10  }
 0x11c   : > { %p6198_p9 = scmp.ne.s32.totalorder %s6942_s26, %s6197_s27  ;;  %p6199_p6 = pneg %p6951_p3 }
 0x11d   : > { %s6202_s3 = scalar_lea.hbm %s7802_s9, 4096  ;;  %p6203_p13 = scmp.lt.u32.totalorder %s6942_s26, %s7802_s9 }
 0x11e   : > { %p6200_p7 = pnand %p6199_p6, %p6198_p9  ;;  %p6204_p8 = scmp.lt.u32.totalorder %s6202_s3, %s6197_s27 }
 0x11f   : > { %p6206_p0 = scmp.lt.u32.totalorder %s6197_s27, %s6942_s26 }
 0x120   : > { %p6201_p2 = pneg %p6200_p7  ;;  %p6205_p11 = por %p6204_p8, %p6203_p13 }
 0x122   : > { %p6207_p1 = por %p6206_p0, %p6205_p11 }
 0x124   : > { %p6208_p5 = pnand %p6207_p1, %p6201_p2 }
 0x126   : > { %6211 = shalt.err (!%p6208_p5)
}
 0x127   : > { %s6212_s28 = scalar_lea.vmem %s6945_s15, 128  ;;  %s6442_s24 = smov [#allocation10]  }
 0x128   : > { %p6213_p10 = scmp.ne.s32.totalorder %s6945_s15, %s6212_s28  ;;  %s6217_s18 = sshll.u32 %s6442_s24, 4  ;;  %s6218_s18 = int_to_ptr.vmem [resolvable:$false] %s6217_s18 }
 0x129   : > { %s6219_s11 = scalar_lea.vmem %s6218_s18, 256  ;;  %p6220_p9 = scmp.lt.s32.totalorder %s6945_s15, %s6218_s18 }
 0x12a   : > { %p6215_p4 = pnand %p6213_p10, %p6199_p6  ;;  %p6221_p7 = scmp.lt.s32.totalorder %s6219_s11, %s6212_s28 }
 0x12c   : > { %p6216_p12 = pneg %p6215_p4  ;;  %p6222_p13 = por %p6221_p7, %p6220_p9 }
 0x12e   : > { %p6223_p8 = pnand %p6222_p13, %p6216_p12 }
 0x130   : > { %6226 = shalt.err (!%p6223_p8)
}
 0x131   : > { %s7809_s14 = scalar_lea.sflag [#allocation9], %s6695_s2  ;;  %s7810_s19 = sld [smem:[#allocation55_spill]] }
 0x132   : > { %5572 = dma.hbm_to_vmem [thread:$0]  (!%p6951_p3), %s6942_s26, 128, %s6945_s15, %s7809_s14, %s7769_s5, %s7769_s5, %s7768_s10  }
 0x133   : > { %s524_s29 = scalar_lea.vmem [#allocation14], %s6931_s13  ;;  %s521_s28 = scalar_lea.sflag [#allocation15], %s6695_s2 }
 0x134   : > { %s537_s21 = sshll.u32 %s524_s29, 4  ;;  %s7021_s21 = int_to_ptr.vmem [resolvable:$true] %s537_s21 }
 0x137   : > { %s7811_s7 = smov %s7810_s19  ;;  %s7018_s3 = scalar_lea.hbm %s7810_s19, %s4811_s20 }
 0x138   : > { %s6227_s24 = scalar_lea.hbm %s7018_s3, 128  ;;  %s6232_s20 = scalar_lea.hbm %s7811_s7, 4096 }
 0x139   : > { %p6228_p2 = scmp.ne.s32.totalorder %s7018_s3, %s6227_s24  ;;  %p6233_p1 = scmp.lt.u32.totalorder %s7018_s3, %s7811_s7 }
 0x13a   : > { %p6234_p5 = scmp.lt.u32.totalorder %s6232_s20, %s6227_s24  ;;  %p6236_p4 = scmp.lt.u32.totalorder %s6227_s24, %s7018_s3 }
 0x13b   : > { %p6230_p11 = pnand %p6228_p2, %p6199_p6 }
 0x13c   : > { %p6235_p10 = por %p6234_p5, %p6233_p1 }
 0x13d   : > { %p6231_p0 = pneg %p6230_p11 }
 0x13e   : > { %p6237_p12 = por %p6236_p4, %p6235_p10 }
 0x140   : > { %p6238_p9 = pnand %p6237_p12, %p6231_p0 }
 0x142   : > { %6241 = shalt.err (!%p6238_p9)
}
 0x143   : > { %s6242_s13 = scalar_lea.vmem %s7021_s21, 128  ;;  %s6443_s11 = smov [#allocation14]  }
 0x144   : > { %p6243_p7 = scmp.ne.s32.totalorder %s7021_s21, %s6242_s13  ;;  %s6247_s14 = sshll.u32 %s6443_s11, 4  ;;  %s6248_s14 = int_to_ptr.vmem [resolvable:$false] %s6247_s14 }
 0x145   : > { %s6249_s12 = scalar_lea.vmem %s6248_s14, 256  ;;  %p6250_p2 = scmp.lt.s32.totalorder %s7021_s21, %s6248_s14 }
 0x146   : > { %p6245_p13 = pnand %p6243_p7, %p6199_p6  ;;  %p6251_p11 = scmp.lt.s32.totalorder %s6249_s12, %s6242_s13 }
 0x148   : > { %p6246_p8 = pneg %p6245_p13  ;;  %p6252_p1 = por %p6251_p11, %p6250_p2 }
 0x14a   : > { %p6253_p5 = pnand %p6252_p1, %p6246_p8 }
 0x14c   : > { %6256 = shalt.err (!%p6253_p5)
}
 0x14d   : > { %5581 = dma.hbm_to_vmem [thread:$0]  (!%p6951_p3), %s7018_s3, 128, %s7021_s21, %s521_s28, %s7769_s5, %s7769_s5, %s7768_s10  }
 0x14e   : > { %s7812_s27 = sld [smem:[#allocation40_spill]] }
 0x154   : > { %p7813_p6 = scmp.ne.s32.totalorder %s7812_s27, 0 }
 0x155   : > { %s7814_s19 = sld [smem:[#allocation49_spill]] (!%p7813_p6)  ;;  %s7055_s29 = sand.u32 (!%p7813_p6), 1, %s6407_s16  }
 0x156   : > { %549 = sbr.rel (%p7813_p6) target bundleno = 993 (0x3e1), region = 56  ;;  %s7058_s24 = sshll.u32 (!%p7813_p6), %s7055_s29, 5 }
 0x157   : > { %s552_s30 = scalar_lea.sflag (!%p7813_p6), [#allocation6], %s7055_s29  ;;  %s7062_s15 = scalar_lea.vmem (!%p7813_p6), [#allocation5], %s7058_s24 }
 0x15b   : > { %p7815_p0 = scmp.ne.s32.totalorder (!%p7813_p6), %s7814_s19, 0 }
 0x15d   : > { %6342 = dma.done.wait (%p7815_p0), %s552_s30, 512  }
 0x15e   : > { %6344 = vsyncadd (%p7815_p0), %s552_s30, 4294966784  ;;  %s7816_s2 = sld [smem:[#allocation33_spill]]  ;;  %s7817_s10 = sld [smem:[#allocation45_spill]] }
 0x15f   : > { %s560_s5 = sand.u32 1, %s6572_s23  }
 0x160   : > { %s561_s28 = scalar_lea.sflag [#allocation9], %s560_s5 }
 0x164   : > { %s562_s3 = sand.u32 1, %s7816_s2   ;;  %p7818_p3 = scmp.ne.s32.totalorder %s7817_s10, 0 }
 0x165   : > { %s7070_s21 = sshll.u32 %s562_s3, 3 }
 0x166   : > { %s564_s25 = scalar_lea.vmem [#allocation8], %s7070_s21 }
 0x167   : > { %6346 = dma.done.wait (%p7818_p3), %s561_s28, 128  }
 0x168   : > { %6348 = vsyncadd (%p7818_p3), %s561_s28, 4294967168  ;;  %s7819_s20 = sld [smem:[#allocation31_spill]]  ;;  %p7820_p10 = scmp.ne.s32.totalorder %s7800_s1, 0 }
 0x16e   : > { %s571_s26 = sand.u32 1, %s7819_s20  }
 0x16f   : > { %s7078_s18 = sshll.u32 %s571_s26, 3 }
 0x170   : > { %s573_s13 = scalar_lea.vmem [#allocation10], %s7078_s18 }
 0x171   : > { %6350 = dma.done.wait (%p7820_p10), %s561_s28, 128  }
 0x172   : > { %6352 = vsyncadd (%p7820_p10), %s561_s28, 4294967168  ;;  %s579_s11 = scalar_lea.sflag [#allocation12], %s560_s5  ;;  %s7086_s14 = scalar_lea.vmem [#allocation11], %s7058_s24 }
 0x173   : > { %6354 = dma.done.wait (%p7815_p0), %s579_s11, 512  }
 0x174   : > { %6356 = vsyncadd (%p7815_p0), %s579_s11, 4294966784  ;;  %s591_s12 = scalar_lea.vmem [#allocation13], %s7070_s21 }
 0x175   : > { %6358 = dma.done.wait (%p7818_p3), %s579_s11, 128  }
 0x176   : > { %6360 = vsyncadd (%p7818_p3), %s579_s11, 4294967168  ;;  %s597_s27 = scalar_lea.sflag [#allocation15], %s560_s5  ;;  %s600_s30 = scalar_lea.vmem [#allocation14], %s7078_s18 }
 0x177   : > { %6362 = dma.done.wait (%p7820_p10), %s597_s27, 128  }
 0x178   : > { %6364 = vsyncadd (%p7820_p10), %s597_s27, 4294967168  ;;  %p7821_p4 = scmp.eq.s32.totalorder %s6572_s23, 0 }
 0x17a   : > { %6366 = dma.done.wait (%p7821_p4), [#allocation15], 18432   ;;  %p7822_p12 = pmov %p7821_p4 }
 0x17b   : > { %p7823_p9 = pmov %p7821_p4 }
 0x17c   : > { %6368 = vsyncadd (%p7822_p12), [#allocation15], 4294948864 }
 0x17d   : > { %6370 = dma.done.wait (%p7823_p9), [#allocation18], 32   ;;  %p7824_p7 = pmov %p7821_p4 }
 0x17e   : > { %vm700_vm0 = vsmask.f32 256  ;;  %vm785_vm1 = vsmask.f32 7938  ;;  %v692_v0 = vld [vmem:[%s7062_s15] sm:$0xf] }
 0x17f   : > { %6372 = vsyncadd (%p7824_p7), [#allocation18], 4294967264  ;;  %vm784_vm2 = vcmask 27648   ;;  %vm792_vm3 = vcmask 24576   ;;  %v693_v1 = vld [vmem:[%s7062_s15 + $0x4] sm:$0xf] }
 0x180   : > { %v704_v2 = vshrl.u32 %v692_v0, 16  ;;  %v707_v3 = vshll.u32 %v692_v0, 16  ;;  %v712_v4 = vshrl.u32 %v693_v1, 16  ;;  %vm701_vm4 = vsmask.f32 4368  ;;  %vm7116_vm5 = vmand %vm784_vm2, %vm785_vm1  ;;  %s7195_s23 = scalar_lea.vmem [#allocation20], %s7058_s24 }
 0x181   : > { %v787_v5 = vld [vmem:[#allocation2 + $0xc] sm:$0xf]  ;;  %v694_v6 = vld [vmem:[%s7062_s15 + $0x8] sm:$0xf]  ;;  %v695_v7 = vld [vmem:[%s7062_s15 + $0xc] sm:$0xf] }
 0x182   : > { %v715_v8 = vshll.u32 %v693_v1, 16  ;;  %v706_v9 = vrot.slane %v704_v2, 7  ;;  %v714_v11 = vrot.slane %v712_v4, 7  ;;  %v794_v12 = vld [vmem:[#allocation2 + $0x14] sm:$0x1]  ;;  %v721_v13 = vshrl.u32 %v694_v6, 16  ;;  %vm7122_vm6 = vmand %vm792_vm3, %vm700_vm0 }
 0x183   : > { %v724_v14 = vshll.u32 %v694_v6, 16  ;;  %v797_v16 = vld [vmem:[#allocation2 + $0x18] sm:$0xf]  ;;  %v729_v17 = vshrl.u32 %v695_v7, 16  ;;  %v696_v18 = vld [vmem:[%s7062_s15 + $0x10] sm:$0xf]  ;;  %vm7136_vm7 = vmor %vm700_vm0, %vm701_vm4 }
 0x184   : > { %v732_v19 = vshll.u32 %v695_v7, 16  ;;  %v709_v20 = vor.u32 %v707_v3, %v706_v9  ;;  %v719_v21 = vrot.slane %v714_v11, 4  ;;  %v723_v22 = vrot.slane %v721_v13, 7  ;;  %v697_v24 = vld [vmem:[%s7062_s15 + $0x14] sm:$0xf]  ;;  %vm7150_vm8 = vmand %vm792_vm3, %vm785_vm1  ;;  %s7833_s1 = sld [smem:[#allocation36_spill]] }
 0x185   : > { %v738_v23 = vshrl.u32 %v696_v18, 16  ;;  %v731_v25 = vrot.slane %v729_v17, 7  ;;  %v801_v26 = vld [vmem:[#allocation2 + $0x20] sm:$0x1]  ;;  %v741_v27 = vshll.u32 %v696_v18, 16  ;;  %v746_v28 = vshrl.u32 %v697_v24, 16 }
 0x186   : > { %v710_v29 = vrot.slane %v706_v9, 4  ;;  %v788_v30 = vsel %vm7116_vm5, %v709_v20, %v787_v5  ;;  %v795_v31 = vsel %vm7122_vm6, %v719_v21, %v794_v12  ;;  %v726_v32 = vor.u32 %v724_v14, %v723_v22  ;;  %v804_v34 = vld [vmem:[#allocation2 + $0x24] sm:$0xf]  ;;  %v698_v35 = vld [vmem:[%s7062_s15 + $0x18] sm:$0xf] }
 0x187   : > { %v740_v33 = vrot.slane %v738_v23, 7  ;;  %789 = vst [vmem:[#allocation2 + $0xc] sm:$0xf] %v788_v30  ;;  %796 = vst [vmem:[#allocation2 + $0x14] sm:$0x1] %v795_v31  ;;  %v736_v36 = vrot.slane %v731_v25, 4  ;;  %v717_v47 = vor.u32 %v715_v8, %v714_v11  ;;  %v734_v56 = vor.u32 %v732_v19, %v731_v25 }
 0x188   : > { %v748_v37 = vrot.slane %v746_v28, 7  ;;  %v755_v38 = vshrl.u32 %v698_v35, 16  ;;  %v758_v39 = vshll.u32 %v698_v35, 16  ;;  %v699_v40 = vld [vmem:[%s7062_s15 + $0x1c] sm:$0xf]  ;;  %v798_v42 = vsel %vm7116_vm5, %v726_v32, %v797_v16 }
 0x189   : > { %v743_v43 = vor.u32 %v741_v27, %v740_v33  ;;  %v808_v44 = vld [vmem:[#allocation2 + $0x2c] sm:$0x1]  ;;  %v811_v45 = vld [vmem:[#allocation2 + $0x30] sm:$0xf]  ;;  %v763_v46 = vshrl.u32 %v699_v40, 16  ;;  %v802_v48 = vsel %vm7122_vm6, %v736_v36, %v801_v26  ;;  %v727_v52 = vrot.slane %v723_v22, 4 }
 0x18a   : > { %799 = vst [vmem:[#allocation2 + $0x18] sm:$0xf] %v798_v42  ;;  %v753_v49 = vrot.slane %v748_v37, 4  ;;  %v757_v50 = vrot.slane %v755_v38, 7  ;;  %v815_v51 = vld [vmem:[#allocation2 + $0x38] sm:$0x1]  ;;  %v718_v55 = vsel %vm7136_vm7, %v710_v29, %v717_v47 }
 0x18b   : > { %803 = vst [vmem:[#allocation2 + $0x20] sm:$0x1] %v802_v48  ;;  %v805_v53 = vsel %vm7116_vm5, %v743_v43, %v804_v34  ;;  %v765_v54 = vrot.slane %v763_v46, 7  ;;  %v818_v57 = vld [vmem:[#allocation2] sm:$0x1]  ;;  %v744_v62 = vrot.slane %v740_v33, 4  ;;  %v735_v3 = vsel %vm7136_vm7, %v727_v52, %v734_v56 }
 0x18c   : > { %v833_v58 = vld [vmem:[#allocation2 + $0x3c] sm:$0x1]  ;;  %806 = vst [vmem:[#allocation2 + $0x24] sm:$0xf] %v805_v53  ;;  %v809_v60 = vsel %vm7122_vm6, %v753_v49, %v808_v44  ;;  %v760_v61 = vor.u32 %v758_v39, %v757_v50  ;;  %791 = vst.msk [vmem:[#allocation2 + $0x10] sm:$0xf] %vm784_vm2, %v718_v55 }
 0x18d   : > { %v749_v63 = vshll.u32 %v697_v24, 16  ;;  %v837_v0 = vld [vmem:[#allocation2 + $0x8] sm:$0x1]  ;;  %v852_v1 = vld [vmem:[#allocation2 + $0x44] sm:$0x1]  ;;  %v770_v2 = vrot.slane %v765_v54, 4 }
 0x18e   : > { %810 = vst [vmem:[#allocation2 + $0x2c] sm:$0x1] %v809_v60  ;;  %v761_v4 = vrot.slane %v757_v50, 4  ;;  %v766_v5 = vshll.u32 %v699_v40, 16  ;;  %v812_v6 = vsel %vm7116_vm5, %v760_v61, %v811_v45  ;;  %800 = vst.msk [vmem:[#allocation2 + $0x1c] sm:$0xf] %vm784_vm2, %v735_v3 }
 0x18f   : > { %v751_v7 = vor.u32 %v749_v63, %v748_v37  ;;  %v819_v8 = vsel %vm7122_vm6, 0, %v818_v57  ;;  %v834_v9 = vsel %vm7122_vm6, 0, %v833_v58  ;;  %813 = vst [vmem:[#allocation2 + $0x30] sm:$0xf] %v812_v6  ;;  %v816_v11 = vsel %vm7122_vm6, %v770_v2, %v815_v51  ;;  %v821_v13 = vld [vmem:[#allocation2 + $0xc] sm:$0x1] }
 0x190   : > { %v768_v12 = vor.u32 %v766_v5, %v765_v54  ;;  %820 = vst [vmem:[#allocation2] sm:$0x1] %v819_v8  ;;  %835 = vst [vmem:[#allocation2 + $0x3c] sm:$0x1] %v834_v9  ;;  %v838_v14 = vsel %vm7150_vm8, 0, %v837_v0  ;;  %v853_v17 = vsel %vm7150_vm8, 0, %v852_v1 }
 0x191   : > { %v840_v16 = vld [vmem:[#allocation2 + $0x14] sm:$0x1]  ;;  %817 = vst [vmem:[#allocation2 + $0x38] sm:$0x1] %v816_v11  ;;  %v752_v18 = vsel %vm7136_vm7, %v744_v62, %v751_v7  ;;  %v822_v19 = vsel %vm7122_vm6, 0, %v821_v13  ;;  %p4839_p13 = scmp.le.s32.totalorder %s7833_s1, 0 }
 0x192   : > { %839 = vst [vmem:[#allocation2 + $0x8] sm:$0x1] %v838_v14  ;;  %v841_v20 = vsel %vm7150_vm8, 0, %v840_v16  ;;  %854 = vst [vmem:[#allocation2 + $0x44] sm:$0x1] %v853_v17  ;;  %v769_v21 = vsel %vm7136_vm7, %v761_v4, %v768_v12 }
 0x193   : > { %807 = vst.msk [vmem:[#allocation2 + $0x28] sm:$0xf] %vm784_vm2, %v752_v18  ;;  %823 = vst [vmem:[#allocation2 + $0xc] sm:$0x1] %v822_v19  ;;  %v824_v22 = vld [vmem:[#allocation2 + $0x18] sm:$0x1] }
 0x194   : > { %842 = vst [vmem:[#allocation2 + $0x14] sm:$0x1] %v841_v20  ;;  %814 = vst.msk [vmem:[#allocation2 + $0x34] sm:$0xf] %vm784_vm2, %v769_v21  ;;  %v825_v23 = vsel %vm7122_vm6, 0, %v824_v22  ;;  %858 = sbr.rel (%p4839_p13) target bundleno = 419 (0x1a3), region = 96 }
 0x195   : > { %v843_v24 = vld [vmem:[#allocation2 + $0x20] sm:$0x1]  ;;  %826 = vst [vmem:[#allocation2 + $0x18] sm:$0x1] %v825_v23  ;;  %v827_v25 = vld [vmem:[#allocation2 + $0x24] sm:$0x1] }
 0x196   : > { %v844_v26 = vsel %vm7150_vm8, 0, %v843_v24  ;;  %v828_v27 = vsel %vm7122_vm6, 0, %v827_v25  ;;  %v846_v28 = vld [vmem:[#allocation2 + $0x2c] sm:$0x1]  ;;  %v830_v30 = vld [vmem:[#allocation2 + $0x30] sm:$0x1] }
 0x197   : > { %845 = vst [vmem:[#allocation2 + $0x20] sm:$0x1] %v844_v26  ;;  %829 = vst [vmem:[#allocation2 + $0x24] sm:$0x1] %v828_v27  ;;  %v847_v29 = vsel %vm7150_vm8, 0, %v846_v28  ;;  %v831_v31 = vsel %vm7122_vm6, 0, %v830_v30 }
 0x198   : > { %848 = vst [vmem:[#allocation2 + $0x2c] sm:$0x1] %v847_v29  ;;  %v849_v32 = vld [vmem:[#allocation2 + $0x38] sm:$0x1]  ;;  %832 = vst [vmem:[#allocation2 + $0x30] sm:$0x1] %v831_v31 }
 0x199   : > { %v850_v33 = vsel %vm7150_vm8, 0, %v849_v32  ;;  %v859_v34 = vld [vmem:[%s564_s25] sm:$0xf] (!%p4839_p13)  ;;  %v860_v35 = vld [vmem:[%s564_s25 + $0x4] sm:$0xf] (!%p4839_p13) }
 0x19a   : > { %851 = vst [vmem:[#allocation2 + $0x38] sm:$0x1] %v850_v33  ;;  %v862_v36 = vshrl.u32 (!%p4839_p13), %v859_v34, 16  ;;  %v865_v37 = vshll.u32 (!%p4839_p13), %v859_v34, 16  ;;  %v870_v38 = vshrl.u32 (!%p4839_p13), %v860_v35, 16  ;;  %v873_v39 = vshll.u32 (!%p4839_p13), %v860_v35, 16 }
 0x19b   : > { %v881_v43 = vld [vmem:[#allocation2] sm:$0xf]  ;;  %v885_v44 = vld [vmem:[#allocation2 + $0x8] sm:$0x1] }
 0x19c   : > { %v864_v40 = vrot.slane %v862_v36, 7  ;;  %v872_v42 = vrot.slane %v870_v38, 7 }
 0x19e   : > { %v867_v45 = vor.u32 %v865_v37, %v864_v40  ;;  %v868_v46 = vrot.slane %v864_v40, 4  ;;  %v875_v47 = vor.u32 %v873_v39, %v872_v42  ;;  %v877_v48 = vrot.slane %v872_v42, 4 }
 0x1a0   : > { %v882_v49 = vsel %vm7116_vm5, %v867_v45, %v881_v43  ;;  %v876_v50 = vsel %vm7136_vm7, %v868_v46, %v875_v47  ;;  %v886_v51 = vsel %vm7122_vm6, %v877_v48, %v885_v44 }
 0x1a1   : > { %883 = vst [vmem:[#allocation2] sm:$0xf] %v882_v49  ;;  %884 = vst.msk [vmem:[#allocation2 + $0x4] sm:$0xf] %vm784_vm2, %v876_v50 }
 0x1a2   : > { %887 = vst [vmem:[#allocation2 + $0x8] sm:$0x1] %v886_v51 }
 0x1a3 PF: > { %s7834_s19 = sld [smem:[#allocation36_spill]] }
 0x1a9   : > { %p4840_p8 = scmp.ne.s32.totalorder %s7834_s19, 0 }
 0x1aa   : > { %v892_v52 = vld [vmem:[#allocation2] sm:$0xf] (!%p4840_p8)  ;;  %v896_v53 = vld [vmem:[#allocation2 + $0x8] sm:$0x1] (!%p4840_p8)  ;;  %v6444_v55 = vmov (!%p4840_p8), 0  }
 0x1ab   : > { %891 = sbr.rel (%p4840_p8) target bundleno = 434 (0x1b2), region = 100  ;;  %v893_v54 = vsel (!%p4840_p8), %vm7116_vm5, 0, %v892_v52  ;;  %895 = vst.msk [vmem:[#allocation2 + $0x4] sm:$0xf] (!%p4840_p8), %vm784_vm2, %v6444_v55  ;;  %v897_v56 = vsel (!%p4840_p8), %vm7122_vm6, 0, %v896_v53 }
 0x1ac   : > { %894 = vst [vmem:[#allocation2] sm:$0xf] (!%p4840_p8), %v893_v54  ;;  %898 = vst [vmem:[#allocation2 + $0x8] sm:$0x1] (!%p4840_p8), %v897_v56 }
 0x1b2 PF: > { %s7835_s24 = sld [smem:[#allocation36_spill]] }
 0x1b8   : > { %p4841_p2 = scmp.ge.s32.totalorder %s7835_s24, 3 }
 0x1b9   : > { %v903_v57 = vld [vmem:[%s573_s13] sm:$0xf] (!%p4841_p2)  ;;  %v904_v58 = vld [vmem:[%s573_s13 + $0x4] sm:$0xf] (!%p4841_p2)  ;;  %v926_v2 = vld [vmem:[#allocation2 + $0x3c] sm:$0xf] (!%p4841_p2) }
 0x1ba   : > { %902 = sbr.rel (%p4841_p2) target bundleno = 451 (0x1c3), region = 104  ;;  %v906_v60 = vshrl.u32 (!%p4841_p2), %v903_v57, 16  ;;  %v909_v61 = vshll.u32 (!%p4841_p2), %v903_v57, 16  ;;  %v914_v62 = vshrl.u32 (!%p4841_p2), %v904_v58, 16  ;;  %v917_v63 = vshll.u32 (!%p4841_p2), %v904_v58, 16 }
 0x1bb   : > { %v930_v3 = vld [vmem:[#allocation2 + $0x44] sm:$0x1] (!%p4841_p2) }
 0x1bc   : > { %v908_v0 = vrot.slane (!%p4841_p2), %v906_v60, 7  ;;  %v916_v1 = vrot.slane (!%p4841_p2), %v914_v62, 7 }
 0x1be   : > { %v911_v4 = vor.u32 (!%p4841_p2), %v909_v61, %v908_v0  ;;  %v912_v5 = vrot.slane (!%p4841_p2), %v908_v0, 4  ;;  %v919_v6 = vor.u32 (!%p4841_p2), %v917_v63, %v916_v1  ;;  %v921_v7 = vrot.slane (!%p4841_p2), %v916_v1, 4 }
 0x1c0   : > { %v927_v8 = vsel (!%p4841_p2), %vm7116_vm5, %v911_v4, %v926_v2  ;;  %v920_v9 = vsel (!%p4841_p2), %vm7136_vm7, %v912_v5, %v919_v6  ;;  %v931_v11 = vsel (!%p4841_p2), %vm7122_vm6, %v921_v7, %v930_v3 }
 0x1c1   : > { %928 = vst [vmem:[#allocation2 + $0x3c] sm:$0xf] %v927_v8  ;;  %929 = vst.msk [vmem:[#allocation2 + $0x40] sm:$0xf] %vm784_vm2, %v920_v9 }
 0x1c2   : > { %932 = vst [vmem:[#allocation2 + $0x44] sm:$0x1] %v931_v11 }
 0x1c3 PF: > { %s7836_s15 = sld [smem:[#allocation36_spill]] }
 0x1c9   : > { %p4842_p11 = scmp.ne.s32.totalorder %s7836_s15, 3 }
 0x1ca   : > { %v938_v12 = vld [vmem:[#allocation2 + $0x3c] sm:$0xf] (!%p4842_p11)  ;;  %v942_v13 = vld [vmem:[#allocation2 + $0x44] sm:$0x1] (!%p4842_p11)  ;;  %v6445_v16 = vmov (!%p4842_p11), 0  }
 0x1cb   : > { %936 = sbr.rel (%p4842_p11) target bundleno = 466 (0x1d2), region = 108  ;;  %v939_v14 = vsel (!%p4842_p11), %vm7116_vm5, 0, %v938_v12  ;;  %941 = vst.msk [vmem:[#allocation2 + $0x40] sm:$0xf] (!%p4842_p11), %vm784_vm2, %v6445_v16  ;;  %v943_v17 = vsel (!%p4842_p11), %vm7122_vm6, 0, %v942_v13 }
 0x1cc   : > { %940 = vst [vmem:[#allocation2 + $0x3c] sm:$0xf] (!%p4842_p11), %v939_v14  ;;  %944 = vst [vmem:[#allocation2 + $0x44] sm:$0x1] (!%p4842_p11), %v943_v17 }
 0x1d2 PF: > { %v1670_v18 = vld [vmem:[%s7086_s14] sm:$0xf]  ;;  %v7243_v19 = vld [vmem:[%s7086_s14 + $0x4] sm:$0xf]  ;;  %v1672_v24 = vld [vmem:[%s7086_s14 + $0x8] sm:$0xf] }
 0x1d3   : > { %v1679_v20 = vshrl.u32 %v1670_v18, 16  ;;  %v1682_v21 = vshll.u32 %v1670_v18, 16  ;;  %v1687_v22 = vshrl.u32 %v7243_v19, 16  ;;  %v1759_v23 = vld [vmem:[#allocation3 + $0xc] sm:$0xf]  ;;  %v5717_v26 = vld [vmem:[#allocation2] sm:$0xff]  }
 0x1d4   : > { %v7248_v25 = vld [vmem:[%s7086_s14 + $0xc] sm:$0xf]  ;;  %v1696_v30 = vshrl.u32 %v1672_v24, 16  ;;  %v1699_v31 = vshll.u32 %v1672_v24, 16  ;;  %v1766_v32 = vld [vmem:[#allocation3 + $0x18] sm:$0xf] }
 0x1d5   : > { %v7250_v27 = vrot.slane %v1679_v20, 7  ;;  %v7252_v28 = vrot.slane %v1687_v22, 7  ;;  %v1763_v29 = vld [vmem:[#allocation3 + $0x14] sm:$0x1]  ;;  %v1704_v33 = vshrl.u32 %v7248_v25, 16  ;;  %vm973_vm9 = vcmask 31744  }
 0x1d6   : > { %v1674_v34 = vld [vmem:[%s7086_s14 + $0x10] sm:$0xf]  ;;  %v7258_v37 = vrot.slane %v1696_v30, 7  ;;  %v1770_v38 = vld [vmem:[#allocation3 + $0x20] sm:$0x1]  ;;  %v5718_v42 = vld [vmem:[#allocation2 + $0xc] sm:$0xff]  }
 0x1d7   : > { %v1684_v35 = vor.u32 %v1682_v21, %v7250_v27  ;;  %v1694_v36 = vrot.slane %v7252_v28, 4  ;;  %v1713_v39 = vshrl.u32 %v1674_v34, 16  ;;  %v7261_v40 = vld [vmem:[%s7086_s14 + $0x14] sm:$0xf]  ;;  %v7263_v43 = vrot.slane %v1704_v33, 7  ;;  %v5719_v54 = vld [vmem:[#allocation2 + $0x18] sm:$0xff]  }
 0x1d8   : > { %v1716_v44 = vshll.u32 %v1674_v34, 16  ;;  %v1773_v45 = vld [vmem:[#allocation3 + $0x24] sm:$0xf]  ;;  %v1721_v46 = vshrl.u32 %v7261_v40, 16  ;;  %v976_v47 = vsel %vm973_vm9, %v5717_v26, 0  ;;  %v1701_v50 = vor.u32 %v1699_v31, %v7258_v37  ;;  %v5720_v13 = vld [vmem:[#allocation2 + $0x24] sm:$0xff]  }
 0x1d9   : > { %v1760_v48 = vsel %vm7116_vm5, %v1684_v35, %v1759_v23  ;;  %v1764_v49 = vsel %vm7122_vm6, %v1694_v36, %v1763_v29  ;;  %v7272_v51 = vrot.slane %v1713_v39, 7  ;;  %v1777_v52 = vld [vmem:[#allocation3 + $0x2c] sm:$0x1]  ;;  %v1676_v53 = vld [vmem:[%s7086_s14 + $0x18] sm:$0xf]  ;;  %987 = vst [vmem:[#allocation4] sm:$0xff] %v976_v47 }
 0x1da   : > { %1761 = vst [vmem:[#allocation3 + $0xc] sm:$0xf] %v1760_v48  ;;  %1765 = vst [vmem:[#allocation3 + $0x14] sm:$0x1] %v1764_v49  ;;  %v1711_v55 = vrot.slane %v7263_v43, 4  ;;  %v7276_v56 = vrot.slane %v1721_v46, 7  ;;  %v1767_v61 = vsel %vm7116_vm5, %v1701_v50, %v1766_v32 }
 0x1db   : > { %v1730_v57 = vshrl.u32 %v1676_v53, 16  ;;  %v1733_v58 = vshll.u32 %v1676_v53, 16  ;;  %v7279_v60 = vld [vmem:[%s7086_s14 + $0x1c] sm:$0xf]  ;;  %v1718_v62 = vor.u32 %v1716_v44, %v7272_v51  ;;  %v1780_v63 = vld [vmem:[#allocation3 + $0x30] sm:$0xf] }
 0x1dc   : > { %v1738_v0 = vshrl.u32 %v7279_v60, 16  ;;  %v979_v1 = vsel %vm973_vm9, %v5718_v42, 0  ;;  %1768 = vst [vmem:[#allocation3 + $0x18] sm:$0xf] %v1767_v61  ;;  %v1771_v2 = vsel %vm7122_vm6, %v1711_v55, %v1770_v38  ;;  %v1728_v3 = vrot.slane %v7276_v56, 4  ;;  %v5721_v16 = vld [vmem:[#allocation2] sm:$0xff]  }
 0x1dd   : > { %v7289_v4 = vrot.slane %v1730_v57, 7  ;;  %v1784_v5 = vld [vmem:[#allocation3 + $0x38] sm:$0x1]  ;;  %988 = vst [vmem:[#allocation4 + $0x90] sm:$0xff] %v979_v1  ;;  %1772 = vst [vmem:[#allocation3 + $0x20] sm:$0x1] %v1771_v2  ;;  %v1774_v6 = vsel %vm7116_vm5, %v1718_v62, %v1773_v45 }
 0x1de   : > { %v7293_v7 = vrot.slane %v1738_v0, 7  ;;  %v982_v8 = vsel %vm973_vm9, %v5719_v54, 0  ;;  %1775 = vst [vmem:[#allocation3 + $0x24] sm:$0xf] %v1774_v6  ;;  %v1778_v9 = vsel %vm7122_vm6, %v1728_v3, %v1777_v52  ;;  %v985_v20 = vsel %vm973_vm9, %v5720_v13, 0  ;;  %v5723_v21 = vld [vmem:[#allocation2 + $0xc] sm:$0xff]  }
 0x1df   : > { %v1735_v11 = vor.u32 %v1733_v58, %v7289_v4  ;;  %989 = vst [vmem:[#allocation4 + $0x120] sm:$0xff] %v982_v8  ;;  %1779 = vst [vmem:[#allocation3 + $0x2c] sm:$0x1] %v1778_v9  ;;  %v5722_v17 = vld [vmem:[#allocation2 + $0x8] ss:$0 sps:$4 sm:$0x11]  }
 0x1e0   : > { %v1745_v12 = vrot.slane %v7293_v7, 4  ;;  %vm1051_vm10 = vsmask.f32 7424  ;;  %990 = vst [vmem:[#allocation4 + $0x1b0] sm:$0xff] %v985_v20  ;;  %v1036_v22 = vsel %vm973_vm9, %v5721_v16, 0  ;;  %v1038_v23 = vsel %vm973_vm9, %v5722_v17, 0 }
 0x1e1   : > { %v1781_v14 = vsel %vm7116_vm5, %v1735_v11, %v1780_v63  ;;  %v1052_v24 = vshrl.u32 %v1036_v22, 16  ;;  %v1054_v26 = vshll.u32 %v1036_v22, 16  ;;  %v1058_v29 = vshll.u32 %v1038_v23, 16  ;;  %v5724_v30 = vld [vmem:[#allocation2 + $0x14] ss:$0 sps:$4 sm:$0x11]  }
 0x1e2   : > { %1782 = vst [vmem:[#allocation3 + $0x30] sm:$0xf] %v1781_v14  ;;  %v1785_v18 = vsel %vm7122_vm6, %v1745_v12, %v1784_v5  ;;  %v1040_v31 = vsel %vm973_vm9, %v5723_v21, 0  ;;  %v5725_v32 = vld [vmem:[#allocation2 + $0x18] sm:$0xff]   ;;  %v1042_v35 = vsel %vm973_vm9, %v5724_v30, 0  ;;  %v5727_v52 = vld [vmem:[#allocation2 + $0x24] sm:$0xff]  }
 0x1e3   : > { %1786 = vst [vmem:[#allocation3 + $0x38] sm:$0x1] %v1785_v18  ;;  %v1056_v33 = vrot.slane %v1054_v26, 1  ;;  %v1060_v34 = vrot.slane %v1058_v29, 1  ;;  %v1062_v36 = vshrl.u32 %v1040_v31, 16  ;;  %v1064_v38 = vshll.u32 %v1040_v31, 16 }
 0x1e4   : > { %v1068_v39 = vshll.u32 %v1042_v35, 16  ;;  %v5726_v42 = vld [vmem:[#allocation2 + $0x20] ss:$0 sps:$4 sm:$0x11]   ;;  %v1044_v44 = vsel %vm973_vm9, %v5725_v32, 0  ;;  %vm1168_vm11 = vcmask 1046528  }
 0x1e5   : > { %v1057_v45 = vor.u32 %v1056_v33, %v1052_v24  ;;  %v1072_v46 = vshrl.u32 %v1044_v44, 16  ;;  %v1074_v47 = vshll.u32 %v1044_v44, 16  ;;  %v1066_v48 = vrot.slane %v1064_v38, 1  ;;  %v5728_v57 = vld [vmem:[#allocation2 + $0x2c] ss:$0 sps:$4 sm:$0x11]  }
 0x1e6   : > { %v1070_v49 = vrot.slane %v1068_v39, 1  ;;  %v1046_v50 = vsel %vm973_vm9, %v5726_v42, 0  ;;  %v1048_v61 = vsel %vm973_vm9, %v5727_v52, 0  ;;  %v5737_v62 = vld [vmem:[#allocation2 + $0xc] sm:$0xff]   ;;  %v1050_v1 = vsel %vm973_vm9, %v5728_v57, 0  ;;  %v5738_v3 = vld [vmem:[#allocation2 + $0x18] sm:$0xff]  }
 0x1e7   : > { %v1061_v53 = vsel %vm1051_vm10, %v1057_v45, %v1060_v34  ;;  %v1076_v54 = vrot.slane %v1074_v47, 1  ;;  %v1078_v55 = vshll.u32 %v1046_v50, 16  ;;  %v1067_v58 = vor.u32 %v1066_v48, %v1062_v36  ;;  %v5729_v9 = vld [vmem:[#allocation2] sm:$0xfe]   ;;  %v5731_v22 = vld [vmem:[#allocation2 + $0xc] sm:$0xfe]  }
 0x1e8   : > { %1096 = vst [vmem:[#allocation4 + $0x8] sm:$0xff] %v1061_v53  ;;  %v1082_v2 = vshrl.u32 %v1048_v61, 16  ;;  %v1084_v6 = vshll.u32 %v1048_v61, 16  ;;  %v1088_v8 = vshll.u32 %v1050_v1, 16  ;;  %v1218_v13 = vsel %vm973_vm9, %v5737_v62, 0  ;;  %v5739_v31 = vld [vmem:[#allocation2 + $0x24] sm:$0xff]  }
 0x1e9   : > { %v1077_v63 = vor.u32 %v1076_v54, %v1072_v46  ;;  %v1080_v0 = vrot.slane %v1078_v55, 1  ;;  %v1071_v5 = vsel %vm1051_vm10, %v1067_v58, %v1070_v49  ;;  %v5730_v12 = vld [vmem:[#allocation2 + $0x8] ss:$0 sps:$4 sm:$0x11]   ;;  %v1145_v17 = vsel %vm973_vm9, %v5729_v9, 0  ;;  %1229 = vst [vmem:[#allocation4 + $0x18] sm:$0xff] %v1218_v13 }
 0x1ea   : > { %1097 = vst [vmem:[#allocation4 + $0x98] sm:$0xff] %v1071_v5  ;;  %v1086_v14 = vrot.slane %v1084_v6, 1  ;;  %v1090_v16 = vrot.slane %v1088_v8, 1  ;;  %v1221_v18 = vsel %vm973_vm9, %v5738_v3, 0  ;;  %v1147_v20 = vsel %vm973_vm9, %v5730_v12, 0  ;;  %v5740_v38 = vld [vmem:[#allocation2 + $0x30] sm:$0xff]  }
 0x1eb   : > { %v1081_v11 = vsel %vm1051_vm10, %v1077_v63, %v1080_v0  ;;  %v1169_v21 = vrot.slane %v1145_v17, 1  ;;  %1230 = vst [vmem:[#allocation4 + $0xa8] sm:$0xff] %v1221_v18  ;;  %v1170_v24 = vrot.slane %v1147_v20, 1  ;;  %v5732_v26 = vld [vmem:[#allocation2 + $0x14] ss:$0 sps:$4 sm:$0x11]  }
 0x1ec   : > { %1098 = vst [vmem:[#allocation4 + $0x128] sm:$0xff] %v1081_v11  ;;  %v1087_v23 = vor.u32 %v1086_v14, %v1082_v2  ;;  %v1149_v29 = vsel %vm973_vm9, %v5731_v22, 0  ;;  %v5733_v30 = vld [vmem:[#allocation2 + $0x18] sm:$0xfe]   ;;  %v1151_v34 = vsel %vm973_vm9, %v5732_v26, 0  ;;  %v1224_v52 = vsel %vm973_vm9, %v5739_v31, 0 }
 0x1ed   : > { %v1171_v33 = vsel %vm1168_vm11, %v1169_v21, %v1170_v24  ;;  %v1172_v35 = vrot.slane %v1149_v29, 1  ;;  %v5734_v36 = vld [vmem:[#allocation2 + $0x20] ss:$0 sps:$4 sm:$0x11]   ;;  %v1173_v39 = vrot.slane %v1151_v34, 1  ;;  %v1153_v42 = vsel %vm973_vm9, %v5733_v30, 0 }
 0x1ee   : > { %v1091_v32 = vsel %vm1051_vm10, %v1087_v23, %v1090_v16  ;;  %1185 = vst [vmem:[#allocation4 + $0x10] sm:$0xff] %v1171_v33  ;;  %v1155_v44 = vsel %vm973_vm9, %v5734_v36, 0  ;;  %v1175_v45 = vrot.slane %v1153_v42, 1  ;;  %v5735_v46 = vld [vmem:[#allocation2 + $0x24] sm:$0xfe]   ;;  %1231 = vst [vmem:[#allocation4 + $0x138] sm:$0xff] %v1224_v52 }
 0x1ef   : > { %1099 = vst [vmem:[#allocation4 + $0x1b8] sm:$0xff] %v1091_v32  ;;  %v1174_v47 = vsel %vm1168_vm11, %v1172_v35, %v1173_v39  ;;  %v1176_v48 = vrot.slane %v1155_v44, 1  ;;  %v5736_v49 = vld [vmem:[#allocation2 + $0x2c] ss:$0 sps:$4 sm:$0x11]   ;;  %v1157_v50 = vsel %vm973_vm9, %v5735_v46, 0 }
 0x1f0   : > { %1186 = vst [vmem:[#allocation4 + $0xa0] sm:$0xff] %v1174_v47  ;;  %v1159_v54 = vsel %vm973_vm9, %v5736_v49, 0  ;;  %v1178_v55 = vrot.slane %v1157_v50, 1  ;;  %v1227_v58 = vsel %vm973_vm9, %v5740_v38, 0  ;;  %v5741_v62 = vld [vmem:[#allocation2 + $0xc] sm:$0xff]   ;;  %v5743_v2 = vld [vmem:[#allocation2 + $0x18] sm:$0xff]  }
 0x1f1   : > { %v1177_v53 = vsel %vm1168_vm11, %v1175_v45, %v1176_v48  ;;  %v1179_v57 = vrot.slane %v1159_v54, 1  ;;  %1232 = vst [vmem:[#allocation4 + $0x1c8] sm:$0xff] %v1227_v58  ;;  %v5742_v63 = vld [vmem:[#allocation2 + $0x14] ss:$0 sps:$4 sm:$0x11]   ;;  %v1278_v0 = vsel %vm973_vm9, %v5741_v62, 0 }
 0x1f2   : > { %1187 = vst [vmem:[#allocation4 + $0x130] sm:$0xff] %v1177_v53  ;;  %v1280_v1 = vsel %vm973_vm9, %v5742_v63, 0  ;;  %v5744_v3 = vld [vmem:[#allocation2 + $0x20] ss:$0 sps:$4 sm:$0x11]   ;;  %v1293_v5 = vshrl.u32 %v1278_v0, 16 }
 0x1f3   : > { %v1180_v61 = vsel %vm1168_vm11, %v1178_v55, %v1179_v57  ;;  %v1295_v6 = vshll.u32 %v1278_v0, 16  ;;  %v1299_v8 = vshll.u32 %v1280_v1, 16  ;;  %v5745_v9 = vld [vmem:[#allocation2 + $0x24] sm:$0xff]   ;;  %v1282_v11 = vsel %vm973_vm9, %v5743_v2, 0  ;;  %v5747_v22 = vld [vmem:[#allocation2 + $0x30] sm:$0xff]   ;;  %v5757_v33 = vld [vmem:[#allocation2 + $0x18] sm:$0xff]  }
 0x1f4   : > { %1188 = vst [vmem:[#allocation4 + $0x1c0] sm:$0xff] %v1180_v61  ;;  %v1284_v12 = vsel %vm973_vm9, %v5744_v3, 0  ;;  %v1303_v16 = vshrl.u32 %v1282_v11, 16  ;;  %v1305_v17 = vshll.u32 %v1282_v11, 16  ;;  %v1286_v21 = vsel %vm973_vm9, %v5745_v9, 0  ;;  %v5758_v42 = vld [vmem:[#allocation2 + $0x24] sm:$0xff]  }
 0x1f5   : > { %v1297_v13 = vrot.slane %v1295_v6, 1  ;;  %v1301_v14 = vrot.slane %v1299_v8, 1  ;;  %v1309_v18 = vshll.u32 %v1284_v12, 16  ;;  %v5746_v20 = vld [vmem:[#allocation2 + $0x2c] ss:$0 sps:$4 sm:$0x11]  }
 0x1f6   : > { %v1307_v24 = vrot.slane %v1305_v17, 1  ;;  %v1313_v26 = vshrl.u32 %v1286_v21, 16  ;;  %v1315_v29 = vshll.u32 %v1286_v21, 16  ;;  %v1288_v31 = vsel %vm973_vm9, %v5746_v20, 0  ;;  %v5749_v50 = vld [vmem:[#allocation2 + $0xc] sm:$0xfe]  }
 0x1f7   : > { %v1298_v23 = vor.u32 %v1297_v13, %v1293_v5  ;;  %v1311_v30 = vrot.slane %v1309_v18, 1  ;;  %v1290_v32 = vsel %vm973_vm9, %v5747_v22, 0  ;;  %v1319_v38 = vshll.u32 %v1288_v31, 16  ;;  %v5748_v39 = vld [vmem:[#allocation2 + $0x38] ss:$0 sps:$4 sm:$0x11]  }
 0x1f8   : > { %v1308_v35 = vor.u32 %v1307_v24, %v1303_v16  ;;  %v1317_v36 = vrot.slane %v1315_v29, 1  ;;  %v1323_v44 = vshrl.u32 %v1290_v32, 16  ;;  %v1325_v45 = vshll.u32 %v1290_v32, 16  ;;  %v5750_v54 = vld [vmem:[#allocation2 + $0x14] ss:$0 sps:$4 sm:$0x11]  }
 0x1f9   : > { %v1302_v34 = vsel %vm1051_vm10, %v1298_v23, %v1301_v14  ;;  %v1321_v48 = vrot.slane %v1319_v38, 1  ;;  %v1292_v49 = vsel %vm973_vm9, %v5748_v39, 0  ;;  %v1459_v55 = vsel %vm973_vm9, %v5757_v33, 0  ;;  %v5759_v57 = vld [vmem:[#allocation2 + $0x30] sm:$0xff]   ;;  %v5760_v3 = vld [vmem:[#allocation2 + $0x3c] sm:$0xff]  }
 0x1fa   : > { %1337 = vst [vmem:[#allocation4 + $0x20] sm:$0xff] %v1302_v34  ;;  %v1312_v46 = vsel %vm1051_vm10, %v1308_v35, %v1311_v30  ;;  %v1318_v47 = vor.u32 %v1317_v36, %v1313_v26  ;;  %v1327_v52 = vrot.slane %v1325_v45, 1  ;;  %v1329_v53 = vshll.u32 %v1292_v49, 16  ;;  %1470 = vst [vmem:[#allocation4 + $0x30] sm:$0xff] %v1459_v55  ;;  %v5751_v6 = vld [vmem:[#allocation2 + $0x18] sm:$0xfe]  }
 0x1fb   : > { %1338 = vst [vmem:[#allocation4 + $0xb0] sm:$0xff] %v1312_v46  ;;  %v1386_v61 = vsel %vm973_vm9, %v5749_v50, 0  ;;  %v1462_v62 = vsel %vm973_vm9, %v5758_v42, 0  ;;  %v1388_v1 = vsel %vm973_vm9, %v5750_v54, 0  ;;  %v1390_v12 = vsel %vm973_vm9, %v5751_v6, 0  ;;  %v5761_v33 = vld [vmem:[#allocation2 + $0x18] sm:$0xff]  }
 0x1fc   : > { %v1322_v58 = vsel %vm1051_vm10, %v1318_v47, %v1321_v48  ;;  %v1328_v63 = vor.u32 %v1327_v52, %v1323_v44  ;;  %v1331_v0 = vrot.slane %v1329_v53, 1  ;;  %v1409_v2 = vrot.slane %v1386_v61, 1  ;;  %1471 = vst [vmem:[#allocation4 + $0xc0] sm:$0xff] %v1462_v62  ;;  %v5752_v8 = vld [vmem:[#allocation2 + $0x20] ss:$0 sps:$4 sm:$0x11]  }
 0x1fd   : > { %1339 = vst [vmem:[#allocation4 + $0x140] sm:$0xff] %v1322_v58  ;;  %v1410_v5 = vrot.slane %v1388_v1, 1  ;;  %v1392_v13 = vsel %vm973_vm9, %v5752_v8, 0  ;;  %v5753_v14 = vld [vmem:[#allocation2 + $0x24] sm:$0xfe]   ;;  %v1412_v16 = vrot.slane %v1390_v12, 1 }
 0x1fe   : > { %v1332_v9 = vsel %vm1051_vm10, %v1328_v63, %v1331_v0  ;;  %v1413_v17 = vrot.slane %v1392_v13, 1  ;;  %v5754_v18 = vld [vmem:[#allocation2 + $0x2c] ss:$0 sps:$4 sm:$0x11]   ;;  %v1465_v20 = vsel %vm973_vm9, %v5759_v57, 0  ;;  %v1394_v21 = vsel %vm973_vm9, %v5753_v14, 0 }
 0x1ff   : > { %1340 = vst [vmem:[#allocation4 + $0x1d0] sm:$0xff] %v1332_v9  ;;  %v1411_v11 = vsel %vm1168_vm11, %v1409_v2, %v1410_v5  ;;  %1472 = vst [vmem:[#allocation4 + $0x150] sm:$0xff] %v1465_v20  ;;  %v1468_v22 = vsel %vm973_vm9, %v5760_v3, 0  ;;  %v1396_v24 = vsel %vm973_vm9, %v5754_v18, 0  ;;  %v1415_v26 = vrot.slane %v1394_v21, 1  ;;  %v5763_v47 = vld [vmem:[#allocation2 + $0x24] sm:$0xff]  }
 0x200   : > { %1425 = vst [vmem:[#allocation4 + $0x28] sm:$0xff] %v1411_v11  ;;  %v1414_v23 = vsel %vm1168_vm11, %v1412_v16, %v1413_v17  ;;  %v5755_v29 = vld [vmem:[#allocation2 + $0x30] sm:$0xfe]   ;;  %1473 = vst [vmem:[#allocation4 + $0x1e0] sm:$0xff] %v1468_v22  ;;  %v1416_v30 = vrot.slane %v1396_v24, 1  ;;  %v1519_v39 = vsel %vm973_vm9, %v5761_v33, 0 }
 0x201   : > { %1426 = vst [vmem:[#allocation4 + $0xb8] sm:$0xff] %v1414_v23  ;;  %v5756_v31 = vld [vmem:[#allocation2 + $0x38] ss:$0 sps:$4 sm:$0x11]   ;;  %v1398_v32 = vsel %vm973_vm9, %v5755_v29, 0  ;;  %v1534_v45 = vshrl.u32 %v1519_v39, 16 }
 0x202   : > { %v1417_v34 = vsel %vm1168_vm11, %v1415_v26, %v1416_v30  ;;  %v1400_v35 = vsel %vm973_vm9, %v5756_v31, 0  ;;  %v1418_v36 = vrot.slane %v1398_v32, 1  ;;  %v5762_v44 = vld [vmem:[#allocation2 + $0x20] ss:$0 sps:$4 sm:$0x11]   ;;  %v1536_v46 = vshll.u32 %v1519_v39, 16 }
 0x203   : > { %1427 = vst [vmem:[#allocation4 + $0x148] sm:$0xff] %v1417_v34  ;;  %v1419_v38 = vrot.slane %v1400_v35, 1  ;;  %v1521_v48 = vsel %vm973_vm9, %v5762_v44, 0  ;;  %v5764_v50 = vld [vmem:[#allocation2 + $0x2c] ss:$0 sps:$4 sm:$0x11]  }
 0x204   : > { %v1538_v49 = vrot.slane %v1536_v46, 1  ;;  %v1523_v52 = vsel %vm973_vm9, %v5763_v47, 0  ;;  %v1540_v53 = vshll.u32 %v1521_v48, 16  ;;  %v5765_v57 = vld [vmem:[#allocation2 + $0x30] sm:$0xff]   ;;  %v1525_v61 = vsel %vm973_vm9, %v5764_v50, 0  ;;  %v5767_v62 = vld [vmem:[#allocation2 + $0x3c] sm:$0xff]  }
 0x205   : > { %v1420_v42 = vsel %vm1168_vm11, %v1418_v36, %v1419_v38  ;;  %v1544_v54 = vshrl.u32 %v1523_v52, 16  ;;  %v1546_v55 = vshll.u32 %v1523_v52, 16  ;;  %v1550_v1 = vshll.u32 %v1525_v61, 16  ;;  %v5766_v2 = vld [vmem:[#allocation2 + $0x38] ss:$0 sps:$4 sm:$0x11]  }
 0x206   : > { %1428 = vst [vmem:[#allocation4 + $0x1d8] sm:$0xff] %v1420_v42  ;;  %v1539_v58 = vor.u32 %v1538_v49, %v1534_v45  ;;  %v1542_v63 = vrot.slane %v1540_v53, 1  ;;  %v1527_v3 = vsel %vm973_vm9, %v5765_v57, 0  ;;  %v1531_v5 = vsel %vm973_vm9, %v5767_v62, 0  ;;  %v5769_v24 = vld [vmem:[#allocation2 + $0x18] sm:$0xfe]  }
 0x207   : > { %v1548_v0 = vrot.slane %v1546_v55, 1  ;;  %v1552_v9 = vrot.slane %v1550_v1, 1  ;;  %v1529_v11 = vsel %vm973_vm9, %v5766_v2, 0  ;;  %v1554_v12 = vshrl.u32 %v1527_v3, 16  ;;  %v5771_v46 = vld [vmem:[#allocation2 + $0x24] sm:$0xfe]  }
 0x208   : > { %v1543_v6 = vsel %vm1051_vm10, %v1539_v58, %v1542_v63  ;;  %v1556_v13 = vshll.u32 %v1527_v3, 16  ;;  %v1560_v14 = vshll.u32 %v1529_v11, 16  ;;  %v5768_v16 = vld [vmem:[#allocation2 + $0x44] ss:$0 sps:$4 sm:$0x11]   ;;  %v1564_v18 = vshrl.u32 %v1531_v5, 16 }
 0x209   : > { %v1549_v8 = vor.u32 %v1548_v0, %v1544_v54  ;;  %1578 = vst [vmem:[#allocation4 + $0x38] sm:$0xff] %v1543_v6  ;;  %v1566_v20 = vshll.u32 %v1531_v5, 16  ;;  %v1533_v23 = vsel %vm973_vm9, %v5768_v16, 0  ;;  %v1685_v26 = vrot.slane %v7250_v27, 4  ;;  %v5773_v50 = vld [vmem:[#allocation2 + $0x30] sm:$0xfe]  }
 0x20a   : > { %v1558_v21 = vrot.slane %v1556_v13, 1  ;;  %v1562_v22 = vrot.slane %v1560_v14, 1  ;;  %v1570_v30 = vshll.u32 %v1533_v23, 16  ;;  %v5770_v31 = vld [vmem:[#allocation2 + $0x20] ss:$0 sps:$4 sm:$0x11]  }
 0x20b   : > { %v1553_v17 = vsel %vm1051_vm10, %v1549_v8, %v1552_v9  ;;  %v1568_v29 = vrot.slane %v1566_v20, 1  ;;  %v1690_v32 = vshll.u32 %v7243_v19, 16  ;;  %v1627_v34 = vsel %vm973_vm9, %v5769_v24, 0  ;;  %v5772_v27 = vld [vmem:[#allocation2 + $0x2c] ss:$0 sps:$4 sm:$0x11]  }
 0x20c   : > { %1579 = vst [vmem:[#allocation4 + $0xc8] sm:$0xff] %v1553_v17  ;;  %v1559_v33 = vor.u32 %v1558_v21, %v1554_v12  ;;  %v1702_v35 = vrot.slane %v7258_v37, 4  ;;  %v1572_v38 = vrot.slane %v1570_v30, 1  ;;  %v1629_v39 = vsel %vm973_vm9, %v5770_v31, 0  ;;  %v5775_v0 = vld [vmem:[#allocation2 + $0x3c] sm:$0xfe]  }
 0x20d   : > { %v1569_v36 = vor.u32 %v1568_v29, %v1564_v18  ;;  %v1650_v42 = vrot.slane %v1627_v34, 1  ;;  %v1651_v45 = vrot.slane %v1629_v39, 1  ;;  %v1692_v47 = vor.u32 %v1690_v32, %v7252_v28  ;;  %v5774_v55 = vld [vmem:[#allocation2 + $0x38] ss:$0 sps:$4 sm:$0x11]  }
 0x20e   : > { %v1563_v44 = vsel %vm1051_vm10, %v1559_v33, %v1562_v22  ;;  %v1631_v37 = vsel %vm973_vm9, %v5771_v46, 0  ;;  %v1633_v49 = vsel %vm973_vm9, %v5772_v27, 0  ;;  %v1707_v28 = vshll.u32 %v7248_v25, 16  ;;  %v1787_v2 = vld [vmem:[#allocation3] sm:$0x1] }
 0x20f   : > { %1580 = vst [vmem:[#allocation4 + $0x158] sm:$0xff] %v1563_v44  ;;  %v1573_v19 = vsel %vm1051_vm10, %v1569_v36, %v1572_v38  ;;  %v1652_v48 = vsel %vm1168_vm11, %v1650_v42, %v1651_v45  ;;  %v1693_v52 = vsel %vm7136_vm7, %v1685_v26, %v1692_v47  ;;  %v1653_v53 = vrot.slane %v1631_v37, 1  ;;  %v5776_v5 = vld [vmem:[#allocation2 + $0x44] ss:$0 sps:$4 sm:$0x11]  }
 0x210   : > { %1581 = vst [vmem:[#allocation4 + $0x1e8] sm:$0xff] %v1573_v19  ;;  %1666 = vst [vmem:[#allocation4 + $0x40] sm:$0xff] %v1652_v48  ;;  %v1654_v54 = vrot.slane %v1633_v49, 1  ;;  %v1635_v57 = vsel %vm973_vm9, %v5773_v50, 0  ;;  %v1719_v58 = vrot.slane %v7272_v51, 4  ;;  %v1637_v62 = vsel %vm973_vm9, %v5774_v55, 0 }
 0x211   : > { %1762 = vst.msk [vmem:[#allocation3 + $0x10] sm:$0xf] %vm784_vm2, %v1693_v52  ;;  %v1656_v63 = vrot.slane %v1635_v57, 1  ;;  %v1709_v1 = vor.u32 %v1707_v28, %v7263_v43  ;;  %v1657_v3 = vrot.slane %v1637_v62, 1  ;;  %v1724_v6 = vshll.u32 %v7261_v40, 16 }
 0x212   : > { %v1655_v61 = vsel %vm1168_vm11, %v1653_v53, %v1654_v54  ;;  %v1736_v25 = vrot.slane %v7289_v4, 4  ;;  %v1639_v8 = vsel %vm973_vm9, %v5775_v0, 0  ;;  %v1741_v9 = vshll.u32 %v7279_v60, 16  ;;  %v1790_v12 = vld [vmem:[#allocation3 + $0xc] sm:$0x1] }
 0x213   : > { %1667 = vst [vmem:[#allocation4 + $0xd0] sm:$0xff] %v1655_v61  ;;  %v1710_v51 = vsel %vm7136_vm7, %v1702_v35, %v1709_v1  ;;  %v1788_v11 = vsel %vm7122_vm6, 0, %v1787_v2  ;;  %v1658_v43 = vsel %vm1168_vm11, %v1656_v63, %v1657_v3  ;;  %v1641_v13 = vsel %vm973_vm9, %v5776_v5, 0  ;;  %v1793_v4 = vld [vmem:[#allocation3 + $0x18] sm:$0x1] }
 0x214   : > { %v1659_v14 = vrot.slane %v1639_v8, 1  ;;  %1769 = vst.msk [vmem:[#allocation3 + $0x1c] sm:$0xf] %vm784_vm2, %v1710_v51  ;;  %v1726_v40 = vor.u32 %v1724_v6, %v7276_v56  ;;  %1789 = vst [vmem:[#allocation3] sm:$0x1] %v1788_v11  ;;  %v1660_v17 = vrot.slane %v1641_v13, 1  ;;  %v1743_v60 = vor.u32 %v1741_v9, %v7293_v7 }
 0x215   : > { %v1796_v16 = vld [vmem:[#allocation3 + $0x24] sm:$0x1]  ;;  %1668 = vst [vmem:[#allocation4 + $0x160] sm:$0xff] %v1658_v43  ;;  %v1791_v18 = vsel %vm7122_vm6, 0, %v1790_v12  ;;  %v1794_v20 = vsel %vm7122_vm6, 0, %v1793_v4 }
 0x216   : > { %v1799_v21 = vld [vmem:[#allocation3 + $0x30] sm:$0x1]  ;;  %v1727_v22 = vsel %vm7136_vm7, %v1719_v58, %v1726_v40  ;;  %1792 = vst [vmem:[#allocation3 + $0xc] sm:$0x1] %v1791_v18  ;;  %1795 = vst [vmem:[#allocation3 + $0x18] sm:$0x1] %v1794_v20  ;;  %v1661_v26 = vsel %vm1168_vm11, %v1659_v14, %v1660_v17  ;;  %v1744_v29 = vsel %vm7136_vm7, %v1736_v25, %v1743_v60 }
 0x217   : > { %v1797_v56 = vsel %vm7122_vm6, 0, %v1796_v16  ;;  %v1800_v23 = vsel %vm7122_vm6, 0, %v1799_v21  ;;  %v1802_v24 = vld [vmem:[#allocation3 + $0x3c] sm:$0x1]  ;;  %v1805_v7 = vld [vmem:[#allocation3 + $0x8] sm:$0x1] }
 0x218   : > { %1776 = vst.msk [vmem:[#allocation3 + $0x28] sm:$0xf] %vm784_vm2, %v1727_v22  ;;  %1798 = vst [vmem:[#allocation3 + $0x24] sm:$0x1] %v1797_v56  ;;  %v1803_v30 = vsel %vm7122_vm6, 0, %v1802_v24  ;;  %v1806_v31 = vsel %vm7150_vm8, 0, %v1805_v7 }
 0x219   : > { %1801 = vst [vmem:[#allocation3 + $0x30] sm:$0x1] %v1800_v23  ;;  %v1808_v32 = vld [vmem:[#allocation3 + $0x14] sm:$0x1]  ;;  %v1811_v33 = vld [vmem:[#allocation3 + $0x20] sm:$0x1] }
 0x21a   : > { %1669 = vst [vmem:[#allocation4 + $0x1f0] sm:$0xff] %v1661_v26  ;;  %1783 = vst.msk [vmem:[#allocation3 + $0x34] sm:$0xf] %vm784_vm2, %v1744_v29  ;;  %v1809_v34 = vsel %vm7150_vm8, 0, %v1808_v32  ;;  %v1812_v35 = vsel %vm7150_vm8, 0, %v1811_v33  ;;  %1825 = sbr.rel (%p4839_p13) target bundleno = 552 (0x228), region = 112 }
 0x21b   : > { %1804 = vst [vmem:[#allocation3 + $0x3c] sm:$0x1] %v1803_v30  ;;  %1807 = vst [vmem:[#allocation3 + $0x8] sm:$0x1] %v1806_v31  ;;  %v1814_v36 = vld [vmem:[#allocation3 + $0x2c] sm:$0x1] }
 0x21c   : > { %v1817_v38 = vld [vmem:[#allocation3 + $0x38] sm:$0x1]  ;;  %1810 = vst [vmem:[#allocation3 + $0x14] sm:$0x1] %v1809_v34  ;;  %1813 = vst [vmem:[#allocation3 + $0x20] sm:$0x1] %v1812_v35 }
 0x21d   : > { %v1815_v39 = vsel %vm7150_vm8, 0, %v1814_v36  ;;  %v1818_v42 = vsel %vm7150_vm8, 0, %v1817_v38  ;;  %v1820_v44 = vld [vmem:[#allocation3 + $0x44] sm:$0x1]  ;;  %v1826_v46 = vld [vmem:[%s591_s12] sm:$0xf] (!%p4839_p13) }
 0x21e   : > { %1816 = vst [vmem:[#allocation3 + $0x2c] sm:$0x1] %v1815_v39  ;;  %1819 = vst [vmem:[#allocation3 + $0x38] sm:$0x1] %v1818_v42  ;;  %v1821_v45 = vsel %vm7150_vm8, 0, %v1820_v44  ;;  %v1829_v47 = vshrl.u32 (!%p4839_p13), %v1826_v46, 16 }
 0x21f   : > { %1822 = vst [vmem:[#allocation3 + $0x44] sm:$0x1] %v1821_v45  ;;  %v1827_v27 = vld [vmem:[%s591_s12 + $0x4] sm:$0xf] (!%p4839_p13)  ;;  %v1832_v19 = vshll.u32 (!%p4839_p13), %v1826_v46, 16 }
 0x220   : > { %v1837_v48 = vshrl.u32 (!%p4839_p13), %v1827_v27, 16  ;;  %v1840_v37 = vshll.u32 (!%p4839_p13), %v1827_v27, 16  ;;  %v1831_v49 = vrot.slane (!%p4839_p13), %v1829_v47, 7  ;;  %v1848_v52 = vld [vmem:[#allocation3] sm:$0xf] (!%p4839_p13) }
 0x222   : > { %v1839_v50 = vrot.slane %v1837_v48, 7  ;;  %v1852_v53 = vld [vmem:[#allocation3 + $0x8] sm:$0x1]  ;;  %v1834_v59 = vor.u32 %v1832_v19, %v1831_v49  ;;  %v1835_v54 = vrot.slane %v1831_v49, 4 }
 0x224   : > { %v1842_v55 = vor.u32 %v1840_v37, %v1839_v50  ;;  %v1844_v28 = vrot.slane %v1839_v50, 4  ;;  %v1849_v57 = vsel %vm7116_vm5, %v1834_v59, %v1848_v52 }
 0x225   : > { %1850 = vst [vmem:[#allocation3] sm:$0xf] %v1849_v57 }
 0x226   : > { %v1843_v58 = vsel %vm7136_vm7, %v1835_v54, %v1842_v55  ;;  %v1853_v61 = vsel %vm7122_vm6, %v1844_v28, %v1852_v53 }
 0x227   : > { %1851 = vst.msk [vmem:[#allocation3 + $0x4] sm:$0xf] %vm784_vm2, %v1843_v58  ;;  %1854 = vst [vmem:[#allocation3 + $0x8] sm:$0x1] %v1853_v61 }
 0x228 PF: > { %1857 = sbr.rel (%p4840_p8) target bundleno = 561 (0x231), region = 116  ;;  %v6446_v1 = vmov (!%p4840_p8), 0  }
 0x229   : > { %1861 = vst.msk [vmem:[#allocation3 + $0x4] sm:$0xf] (!%p4840_p8), %vm784_vm2, %v6446_v1 }
 0x22c   : > { %v1858_v62 = vld [vmem:[#allocation3] sm:$0xf] (!%p4840_p8) }
 0x22d   : > { %v1859_v0 = vsel (!%p4840_p8), %vm7116_vm5, 0, %v1858_v62 }
 0x22e   : > { %v1862_v63 = vld [vmem:[#allocation3 + $0x8] sm:$0x1] (!%p4840_p8)  ;;  %1860 = vst [vmem:[#allocation3] sm:$0xf] (!%p4840_p8), %v1859_v0 }
 0x22f   : > { %v1863_v2 = vsel %vm7122_vm6, 0, %v1862_v63 }
 0x230   : > { %1864 = vst [vmem:[#allocation3 + $0x8] sm:$0x1] %v1863_v2 }
 0x231 PF: > { %1867 = sbr.rel (%p4841_p2) target bundleno = 571 (0x23b), region = 120  ;;  %v1868_v3 = vld [vmem:[%s600_s30] sm:$0xf] (!%p4841_p2)  ;;  %v1869_v5 = vld [vmem:[%s600_s30 + $0x4] sm:$0xf] (!%p4841_p2) }
 0x232   : > { %v1871_v6 = vshrl.u32 (!%p4841_p2), %v1868_v3, 16  ;;  %v1874_v25 = vshll.u32 (!%p4841_p2), %v1868_v3, 16  ;;  %v1879_v8 = vshrl.u32 (!%p4841_p2), %v1869_v5, 16  ;;  %v1882_v51 = vshll.u32 (!%p4841_p2), %v1869_v5, 16  ;;  %v1891_v12 = vld [vmem:[#allocation3 + $0x3c] sm:$0xf] (!%p4841_p2) }
 0x233   : > { %v1895_v43 = vld [vmem:[#allocation3 + $0x44] sm:$0x1] (!%p4841_p2) }
 0x234   : > { %v1873_v9 = vrot.slane (!%p4841_p2), %v1871_v6, 7  ;;  %v1881_v11 = vrot.slane (!%p4841_p2), %v1879_v8, 7 }
 0x236   : > { %v1876_v13 = vor.u32 (!%p4841_p2), %v1874_v25, %v1873_v9  ;;  %v1877_v14 = vrot.slane (!%p4841_p2), %v1873_v9, 4  ;;  %v1884_v40 = vor.u32 (!%p4841_p2), %v1882_v51, %v1881_v11  ;;  %v1886_v4 = vrot.slane (!%p4841_p2), %v1881_v11, 4 }
 0x238   : > { %v1892_v16 = vsel %vm7116_vm5, %v1876_v13, %v1891_v12  ;;  %v1885_v17 = vsel %vm7136_vm7, %v1877_v14, %v1884_v40  ;;  %v1896_v60 = vsel %vm7122_vm6, %v1886_v4, %v1895_v43 }
 0x239   : > { %1893 = vst [vmem:[#allocation3 + $0x3c] sm:$0xf] %v1892_v16  ;;  %1894 = vst.msk [vmem:[#allocation3 + $0x40] sm:$0xf] %vm784_vm2, %v1885_v17 }
 0x23a   : > { %1897 = vst [vmem:[#allocation3 + $0x44] sm:$0x1] %v1896_v60 }
 0x23b PF: > { %1900 = sbr.rel (%p4842_p11) target bundleno = 580 (0x244), region = 124  ;;  %v6447_v22 = vmov (!%p4842_p11), 0  }
 0x23c   : > { %1905 = vst.msk [vmem:[#allocation3 + $0x40] sm:$0xf] (!%p4842_p11), %vm784_vm2, %v6447_v22 }
 0x240   : > { %v1902_v18 = vld [vmem:[#allocation3 + $0x3c] sm:$0xf] (!%p4842_p11) }
 0x241   : > { %v1906_v20 = vld [vmem:[#allocation3 + $0x44] sm:$0x1] (!%p4842_p11)  ;;  %v1903_v21 = vsel (!%p4842_p11), %vm7116_vm5, 0, %v1902_v18 }
 0x242   : > { %v1907_v41 = vsel %vm7122_vm6, 0, %v1906_v20  ;;  %1904 = vst [vmem:[#allocation3 + $0x3c] sm:$0xf] %v1903_v21 }
 0x243   : > { %1908 = vst [vmem:[#allocation3 + $0x44] sm:$0x1] %v1907_v41 }
 0x244 PF: > { %v5777_v56 = vld [vmem:[#allocation16 + $0x40] sm:$0xff]   ;;  %v5781_v26 = vld [vmem:[#allocation16 + $0x48] sm:$0xff]   ;;  %v5785_v15 = vld [vmem:[#allocation16 + $0x50] sm:$0xff]   ;;  %vm4509_vm12 = vcmask 60416   ;;  %s7841_s21 = sld [smem:[#allocation36_spill]]  ;;  %s7842_s28 = sld [smem:[#allocation37_spill]] }
 0x245   : > { %v5778_v23 = vld [vmem:[#allocation16 + $0xc0] sm:$0xff]   ;;  %5151 = vmatprep.subr.bf16.mxu0 %v5777_v56  ;;  %v5782_v10 = vld [vmem:[#allocation16 + $0xc8] sm:$0xff]   ;;  %v5786_v31 = vld [vmem:[#allocation16 + $0xd0] sm:$0xff]   ;;  %s7843_s18 = sld [smem:[#allocation48_spill]]  ;;  %s4535_s11 = sshll.u32 %s7195_s23, 4  ;;  %s7592_s11 = int_to_ptr.vmem [resolvable:$true] %s4535_s11 }
 0x246   : > { %v5779_v24 = vld [vmem:[#allocation16] sm:$0xff]   ;;  %5191 = vmatprep.subr.bf16.mxu1 %v5778_v23  ;;  %v5783_v29 = vld [vmem:[#allocation16 + $0x8] sm:$0xff]   ;;  %v5787_v32 = vld [vmem:[#allocation16 + $0x10] sm:$0xff]   ;;  %s7844_s27 = sld [smem:[#allocation58_spill]]  ;;  %s4519_s1 = scalar_lea.sflag [#allocation7], %s7055_s29 }
 0x247   : > { %v5780_v7 = vld [vmem:[#allocation16 + $0x80] sm:$0xff]   ;;  %5152 = vmatpush3.bf16.msra.mxu0 %v5779_v24  ;;  %v5784_v30 = vld [vmem:[#allocation16 + $0x88] sm:$0xff]   ;;  %v5788_v33 = vld [vmem:[#allocation16 + $0x90] sm:$0xff]   ;;  %s6257_s19 = scalar_lea.vmem %s7592_s11, 512  ;;  %s6448_s24 = smov [#allocation20]  }
 0x248   : > { %5192 = vmatpush3.bf16.msra.mxu1 %v5780_v7  ;;  %5153 = vmatprep.subr.bf16.mxu0 %v5781_v26  ;;  %v5789_v34 = vld [vmem:[#allocation16 + $0x58] sm:$0xff]   ;;  %v5793_v39 = vld [vmem:[#allocation16 + $0x60] sm:$0xff]   ;;  %v5797_v46 = vld [vmem:[#allocation16 + $0x68] sm:$0xff]   ;;  %p6258_p1 = scmp.ne.s32.totalorder %s7592_s11, %s6257_s19  ;;  %s6261_s15 = sshll.u32 %s6448_s24, 4  ;;  %s6262_s15 = int_to_ptr.vmem [resolvable:$false] %s6261_s15 }
 0x249   : > { %5193 = vmatprep.subr.bf16.mxu1 %v5782_v10  ;;  %v5790_v35 = vld [vmem:[#allocation16 + $0xd8] sm:$0xff]   ;;  %v5794_v42 = vld [vmem:[#allocation16 + $0xe0] sm:$0xff]   ;;  %v5798_v27 = vld [vmem:[#allocation16 + $0xe8] sm:$0xff]   ;;  %s6263_s2 = scalar_lea.vmem %s6262_s15, 1024  ;;  %p6264_p3 = scmp.lt.s32.totalorder %s7592_s11, %s6262_s15 }
 0x24a   : > { %v5791_v36 = vld [vmem:[#allocation16 + $0x18] sm:$0xff]   ;;  %v5795_v44 = vld [vmem:[#allocation16 + $0x20] sm:$0xff]   ;;  %v5799_v47 = vld [vmem:[#allocation16 + $0x28] sm:$0xff]   ;;  %s5150_s25 = sshll.u32 %s7841_s21, 3  ;;  %s5124_s20 = sshll.u32 %s7842_s28, 5 }
 0x24b   : > { %5154 = vmatpush3.bf16.msra.mxu0 %v5783_v29  ;;  %v5792_v38 = vld [vmem:[#allocation16 + $0x98] sm:$0xff]   ;;  %v5796_v45 = vld [vmem:[#allocation16 + $0xa0] sm:$0xff]   ;;  %v5800_v19 = vld [vmem:[#allocation16 + $0xa8] sm:$0xff]   ;;  %s4532_s26 = sadd.s32 %s5150_s25, %s5124_s20  ;;  %p7845_p5 = scmp.ne.s32.totalorder %s7843_s18, 0 }
 0x24c   : > { %5194 = vmatpush3.bf16.msra.mxu1 %v5784_v30  ;;  %5155 = vmatprep.subr.bf16.mxu0 %v5785_v15  ;;  %v5801_v48 = vld [vmem:[#allocation16 + $0x70] sm:$0xff]   ;;  %v5805_v52 = vld [vmem:[#allocation16 + $0x78] sm:$0xff]   ;;  %v2631_v55 = vld [vmem:[#allocation4 + $0x8] sm:$0xff]  ;;  %s5125_s13 = sshll.u32 %s4532_s26, 6  ;;  %p6265_p10 = scmp.lt.s32.totalorder %s6263_s2, %s6257_s19 }
 0x24d   : > { %5195 = vmatprep.subr.bf16.mxu1 %v5786_v31  ;;  %v5802_v37 = vld [vmem:[#allocation16 + $0xf0] sm:$0xff]   ;;  %v5806_v53 = vld [vmem:[#allocation16 + $0xf8] sm:$0xff]   ;;  %v2630_v57 = vld [vmem:[#allocation4] sm:$0xff]  ;;  %3886 = vmatprep.mubr.bf16.mxu0 %v2631_v55  ;;  %s7590_s30 = scalar_lea.hbm %s7844_s27, %s5125_s13  ;;  %p6259_p6 = pnand %p6258_p1, %p7845_p5 }
 0x24e   : > { %v5803_v49 = vld [vmem:[#allocation16 + $0x30] sm:$0xff]   ;;  %v5807_v59 = vld [vmem:[#allocation16 + $0x38] sm:$0xff]   ;;  %v5809_v61 = vld [vmem:[#allocation16 + $0x140] sm:$0xff]   ;;  %p6266_p4 = por %p6265_p10, %p6264_p3 }
 0x24f   : > { %5156 = vmatpush3.bf16.msra.mxu0 %v5787_v32  ;;  %v5804_v50 = vld [vmem:[#allocation16 + $0xb0] sm:$0xff]   ;;  %v5808_v54 = vld [vmem:[#allocation16 + $0xb8] sm:$0xff]   ;;  %v5810_v62 = vld [vmem:[#allocation16 + $0x1c0] sm:$0xff]   ;;  %p6260_p0 = pneg %p6259_p6 }
 0x250   : > { %5196 = vmatpush3.bf16.msra.mxu1 %v5788_v33  ;;  %5157 = vmatprep.subr.bf16.mxu0 %v5789_v34  ;;  %v2633_v28 = vld [vmem:[#allocation4 + $0x18] sm:$0xff]  ;;  %v2632_v58 = vld [vmem:[#allocation4 + $0x10] sm:$0xff]  ;;  %v5811_v63 = vld [vmem:[#allocation16 + $0x100] sm:$0xff]  }
 0x251   : > { %5197 = vmatprep.subr.bf16.mxu1 %v5790_v35  ;;  %3951 = vmatprep.mubr.bf16.mxu1 %v2633_v28  ;;  %v5812_v0 = vld [vmem:[#allocation16 + $0x180] sm:$0xff]   ;;  %v5813_v1 = vld [vmem:[#allocation16 + $0x148] sm:$0xff]   ;;  %v2649_v6 = vld [vmem:[#allocation4 + $0x98] sm:$0xff]  ;;  %p6267_p12 = pnand %p6266_p4, %p6260_p0 }
 0x252   : > { %v5814_v2 = vld [vmem:[#allocation16 + $0x1c8] sm:$0xff]   ;;  %v2648_v8 = vld [vmem:[#allocation4 + $0x90] sm:$0xff]  ;;  %v2650_v51 = vld [vmem:[#allocation4 + $0xa0] sm:$0xff] }
 0x253   : > { %5158 = vmatpush3.bf16.msra.mxu0 %v5791_v36  ;;  %v5815_v3 = vld [vmem:[#allocation16 + $0x108] sm:$0xff]   ;;  %v5817_v9 = vld [vmem:[#allocation16 + $0x150] sm:$0xff]   ;;  %v5821_v13 = vld [vmem:[#allocation16 + $0x158] sm:$0xff]  }
 0x254   : > { %5198 = vmatpush3.bf16.msra.mxu1 %v5792_v38  ;;  %5159 = vmatprep.subr.bf16.mxu0 %v5793_v39  ;;  %v5816_v5 = vld [vmem:[#allocation16 + $0x188] sm:$0xff]   ;;  %v5818_v11 = vld [vmem:[#allocation16 + $0x1d0] sm:$0xff]   ;;  %v5822_v14 = vld [vmem:[#allocation16 + $0x1d8] sm:$0xff]  }
 0x255   : > { %5199 = vmatprep.subr.bf16.mxu1 %v5794_v42  ;;  %v2651_v25 = vld [vmem:[#allocation4 + $0xa8] sm:$0xff]  ;;  %v5819_v12 = vld [vmem:[#allocation16 + $0x110] sm:$0xff]   ;;  %v5823_v40 = vld [vmem:[#allocation16 + $0x118] sm:$0xff]  }
 0x256   : > { %v5820_v43 = vld [vmem:[#allocation16 + $0x190] sm:$0xff]   ;;  %v5824_v4 = vld [vmem:[#allocation16 + $0x198] sm:$0xff]   ;;  %v2667_v16 = vld [vmem:[#allocation4 + $0x128] sm:$0xff] }
 0x257   : > { %5160 = vmatpush3.bf16.msra.mxu0 %v5795_v44  ;;  %v2669_v17 = vld [vmem:[#allocation4 + $0x138] sm:$0xff]  ;;  %v2666_v60 = vld [vmem:[#allocation4 + $0x120] sm:$0xff]  ;;  %v2668_v18 = vld [vmem:[#allocation4 + $0x130] sm:$0xff] }
 0x258   : > { %5200 = vmatpush3.bf16.msra.mxu1 %v5796_v45  ;;  %5161 = vmatprep.subr.bf16.mxu0 %v5797_v46  ;;  %v5825_v20 = vld [vmem:[#allocation16 + $0x160] sm:$0xff]   ;;  %v5829_v56 = vld [vmem:[#allocation16 + $0x168] sm:$0xff]   ;;  %v2685_v26 = vld [vmem:[#allocation4 + $0x1b8] sm:$0xff] }
 0x259   : > { %5201 = vmatprep.subr.bf16.mxu1 %v5798_v27  ;;  %v5826_v21 = vld [vmem:[#allocation16 + $0x1e0] sm:$0xff]   ;;  %v5830_v23 = vld [vmem:[#allocation16 + $0x1e8] sm:$0xff]   ;;  %v2684_v29 = vld [vmem:[#allocation4 + $0x1b0] sm:$0xff] }
 0x25a   : > { %v5827_v22 = vld [vmem:[#allocation16 + $0x120] sm:$0xff]   ;;  %v5831_v24 = vld [vmem:[#allocation16 + $0x128] sm:$0xff]   ;;  %v5833_v15 = vld [vmem:[#allocation16 + $0x170] sm:$0xff]  }
 0x25b   : > { %5162 = vmatpush3.bf16.msra.mxu0 %v5799_v47  ;;  %v5828_v41 = vld [vmem:[#allocation16 + $0x1a0] sm:$0xff]   ;;  %v5832_v7 = vld [vmem:[#allocation16 + $0x1a8] sm:$0xff]   ;;  %v5834_v31 = vld [vmem:[#allocation16 + $0x1f0] sm:$0xff]  }
 0x25c   : > { %5202 = vmatpush3.bf16.msra.mxu1 %v5800_v19  ;;  %5163 = vmatprep.subr.bf16.mxu0 %v5801_v48  ;;  %v2687_v10 = vld [vmem:[#allocation4 + $0x1c8] sm:$0xff]  ;;  %v2686_v30 = vld [vmem:[#allocation4 + $0x1c0] sm:$0xff]  ;;  %v5835_v32 = vld [vmem:[#allocation16 + $0x130] sm:$0xff]  }
 0x25d   : > { %5203 = vmatprep.subr.bf16.mxu1 %v5802_v37  ;;  %v5836_v33 = vld [vmem:[#allocation16 + $0x1b0] sm:$0xff]   ;;  %v5837_v34 = vld [vmem:[#allocation16 + $0x178] sm:$0xff]   ;;  %v2635_v39 = vld [vmem:[#allocation4 + $0x28] sm:$0xff] }
 0x25e   : > { %v5838_v35 = vld [vmem:[#allocation16 + $0x1f8] sm:$0xff]   ;;  %v2634_v44 = vld [vmem:[#allocation4 + $0x20] sm:$0xff]  ;;  %v2636_v45 = vld [vmem:[#allocation4 + $0x30] sm:$0xff] }
 0x25f   : > { %5164 = vmatpush3.bf16.msra.mxu0 %v5803_v49  ;;  %v5839_v36 = vld [vmem:[#allocation16 + $0x138] sm:$0xff]   ;;  %v5841_v46 = vld [vmem:[#allocation16 + $0x240] sm:$0xff]   ;;  %v5845_v48 = vld [vmem:[#allocation16 + $0x248] sm:$0xff]  }
 0x260   : > { %5204 = vmatpush3.bf16.msra.mxu1 %v5804_v50  ;;  %5165 = vmatprep.subr.bf16.mxu0 %v5805_v52  ;;  %v5840_v38 = vld [vmem:[#allocation16 + $0x1b8] sm:$0xff]   ;;  %v5842_v27 = vld [vmem:[#allocation16 + $0x2c0] sm:$0xff]   ;;  %v5846_v37 = vld [vmem:[#allocation16 + $0x2c8] sm:$0xff]  }
 0x261   : > { %5205 = vmatprep.subr.bf16.mxu1 %v5806_v53  ;;  %v2637_v42 = vld [vmem:[#allocation4 + $0x38] sm:$0xff]  ;;  %v5843_v47 = vld [vmem:[#allocation16 + $0x200] sm:$0xff]   ;;  %v5847_v49 = vld [vmem:[#allocation16 + $0x208] sm:$0xff]  }
 0x262   : > { %v5844_v19 = vld [vmem:[#allocation16 + $0x280] sm:$0xff]   ;;  %v5848_v50 = vld [vmem:[#allocation16 + $0x288] sm:$0xff]   ;;  %v2653_v52 = vld [vmem:[#allocation4 + $0xb8] sm:$0xff] }
 0x263   : > { %5166 = vmatpush3.bf16.msra.mxu0 %v5807_v59  ;;  %v2655_v53 = vld [vmem:[#allocation4 + $0xc8] sm:$0xff]  ;;  %v2652_v59 = vld [vmem:[#allocation4 + $0xb0] sm:$0xff] }
 0x264   : > { %5206 = vmatpush3.bf16.msra.mxu1 %v5808_v54  ;;  %5231 = vmatprep.subr.bf16.mxu0 %v5809_v61  ;;  %v2654_v54 = vld [vmem:[#allocation4 + $0xc0] sm:$0xff]  ;;  %v5849_v55 = vld [vmem:[#allocation16 + $0x250] sm:$0xff]   ;;  %v5853_v61 = vld [vmem:[#allocation16 + $0x258] sm:$0xff]  }
 0x265   : > { %5271 = vmatprep.subr.bf16.mxu1 %v5810_v62  ;;  %v5850_v28 = vld [vmem:[#allocation16 + $0x2d0] sm:$0xff]   ;;  %v5854_v62 = vld [vmem:[#allocation16 + $0x2d8] sm:$0xff]  }
 0x266   : > { %3887 = vmatmul.mubr.bf16.vlgmr.msra.gmra.mrb[0].mxu0 %v2630_v57  ;;  %v5851_v57 = vld [vmem:[#allocation16 + $0x210] sm:$0xff]  }
 0x267   : > { %3952 = vmatmul.mubr.bf16.vlgmr.msra.gmra.mrb[0].mxu1 %v2632_v58  ;;  %5232 = vmatpush3.bf16.msra.mxu0 %v5811_v63  ;;  %v5852_v58 = vld [vmem:[#allocation16 + $0x290] sm:$0xff]   ;;  %v5855_v63 = vld [vmem:[#allocation16 + $0x218] sm:$0xff]  }
 0x268   : > { %5272 = vmatpush3.bf16.msra.mxu1 %v5812_v0  ;;  %5233 = vmatprep.subr.bf16.mxu0 %v5813_v1  ;;  %v5856_v0 = vld [vmem:[#allocation16 + $0x298] sm:$0xff]   ;;  %v2671_v1 = vld [vmem:[#allocation4 + $0x148] sm:$0xff] }
 0x269   : > { %5273 = vmatprep.subr.bf16.mxu1 %v5814_v2  ;;  %3894 = vmatprep.mubr.bf16.mxu0 %v2649_v6  ;;  %v2673_v2 = vld [vmem:[#allocation4 + $0x158] sm:$0xff]  ;;  %v5857_v6 = vld [vmem:[#allocation16 + $0x260] sm:$0xff]  }
 0x26a   : > { %3959 = vmatprep.mubr.bf16.mxu1 %v2651_v25  ;;  %v5858_v25 = vld [vmem:[#allocation16 + $0x2e0] sm:$0xff]  }
 0x26b   : > { %5234 = vmatpush3.bf16.msra.mxu0 %v5815_v3  ;;  %v2670_v3 = vld [vmem:[#allocation4 + $0x140] sm:$0xff] }
 0x26c   : > { %5274 = vmatpush3.bf16.msra.mxu1 %v5816_v5  ;;  %5235 = vmatprep.subr.bf16.mxu0 %v5817_v9  ;;  %v2672_v5 = vld [vmem:[#allocation4 + $0x150] sm:$0xff]  ;;  %v5861_v9 = vld [vmem:[#allocation16 + $0x268] sm:$0xff]  }
 0x26d   : > { %5275 = vmatprep.subr.bf16.mxu1 %v5818_v11  ;;  %v5862_v11 = vld [vmem:[#allocation16 + $0x2e8] sm:$0xff]  }
 0x26e   : > { %3895 = vmatmul.mubr.bf16.gmra.mrb[4].mxu0 %v2648_v8  ;;  %v5859_v8 = vld [vmem:[#allocation16 + $0x220] sm:$0xff]  }
 0x26f   : > { %3960 = vmatmul.mubr.bf16.gmra.mrb[4].mxu1 %v2650_v51  ;;  %5236 = vmatpush3.bf16.msra.mxu0 %v5819_v12  ;;  %v5860_v51 = vld [vmem:[#allocation16 + $0x2a0] sm:$0xff]   ;;  %v5863_v12 = vld [vmem:[#allocation16 + $0x228] sm:$0xff]  }
 0x270   : > { %5276 = vmatpush3.bf16.msra.mxu1 %v5820_v43  ;;  %5237 = vmatprep.subr.bf16.mxu0 %v5821_v13  ;;  %v5864_v43 = vld [vmem:[#allocation16 + $0x2a8] sm:$0xff]   ;;  %v2689_v13 = vld [vmem:[#allocation4 + $0x1d8] sm:$0xff] }
 0x271   : > { %5277 = vmatprep.subr.bf16.mxu1 %v5822_v14  ;;  %3902 = vmatprep.mubr.bf16.mxu0 %v2667_v16  ;;  %v2691_v14 = vld [vmem:[#allocation4 + $0x1e8] sm:$0xff]  ;;  %v5865_v16 = vld [vmem:[#allocation16 + $0x270] sm:$0xff]  }
 0x272   : > { %3967 = vmatprep.mubr.bf16.mxu1 %v2669_v17  ;;  %v5866_v17 = vld [vmem:[#allocation16 + $0x2f0] sm:$0xff]  }
 0x273   : > { %5238 = vmatpush3.bf16.msra.mxu0 %v5823_v40  ;;  %v2688_v40 = vld [vmem:[#allocation4 + $0x1d0] sm:$0xff] }
 0x274   : > { %5278 = vmatpush3.bf16.msra.mxu1 %v5824_v4  ;;  %5239 = vmatprep.subr.bf16.mxu0 %v5825_v20  ;;  %v2690_v4 = vld [vmem:[#allocation4 + $0x1e0] sm:$0xff]  ;;  %v5869_v20 = vld [vmem:[#allocation16 + $0x278] sm:$0xff]  }
 0x275   : > { %5279 = vmatprep.subr.bf16.mxu1 %v5826_v21  ;;  %v5870_v21 = vld [vmem:[#allocation16 + $0x2f8] sm:$0xff]  }
 0x276   : > { %3903 = vmatmul.mubr.bf16.gmra.mrb[8].mxu0 %v2666_v60  ;;  %v5867_v60 = vld [vmem:[#allocation16 + $0x230] sm:$0xff]  }
 0x277   : > { %3968 = vmatmul.mubr.bf16.gmra.mrb[8].mxu1 %v2668_v18  ;;  %5240 = vmatpush3.bf16.msra.mxu0 %v5827_v22  ;;  %v5868_v18 = vld [vmem:[#allocation16 + $0x2b0] sm:$0xff]   ;;  %v5871_v22 = vld [vmem:[#allocation16 + $0x238] sm:$0xff]  }
 0x278   : > { %5280 = vmatpush3.bf16.msra.mxu1 %v5828_v41  ;;  %5241 = vmatprep.subr.bf16.mxu0 %v5829_v56  ;;  %v5872_v41 = vld [vmem:[#allocation16 + $0x2b8] sm:$0xff]  }
 0x279   : > { %5281 = vmatprep.subr.bf16.mxu1 %v5830_v23  ;;  %3910 = vmatprep.mubr.bf16.mxu0 %v2685_v26  ;;  %v5873_v56 = vld [vmem:[#allocation3] sm:$0xff]  }
 0x27a   : > { %3975 = vmatprep.mubr.bf16.mxu1 %v2687_v10  ;;  %v5874_v23 = vld [vmem:[#allocation3] sm:$0xfe]  }
 0x27b   : > { %5242 = vmatpush3.bf16.msra.mxu0 %v5831_v24  ;;  %v5875_v24 = vld [vmem:[#allocation3 + $0x8] ss:$0 sps:$4 sm:$0x11]   ;;  %v5876_v26 = vld [vmem:[#allocation3] sm:$0xff]   ;;  %v2106_v10 = vsel %vm973_vm9, %v5874_v23, 0 }
 0x27c   : > { %5282 = vmatpush3.bf16.msra.mxu1 %v5832_v7  ;;  %5243 = vmatprep.subr.bf16.mxu0 %v5833_v15  ;;  %v2638_v7 = vld [vmem:[#allocation4 + $0x40] sm:$0xff]  ;;  %v2129_v15 = vrot.slane %v2106_v10, 1 }
 0x27d   : > { %5283 = vmatprep.subr.bf16.mxu1 %v5834_v31  ;;  %v1998_v31 = vsel %vm973_vm9, %v5876_v26, 0  ;;  %v5903_v26 = vld [vmem:[#allocation3 + $0x20] ss:$0 sps:$4 sm:$0x11]  }
 0x27e   : > { %3911 = vmatmul.mubr.bf16.gmra.mrb[12].mxu0 %v2684_v29  ;;  %v5878_v29 = vld [vmem:[#allocation16 + $0x340] sm:$0xff]  }
 0x27f   : > { %3976 = vmatmul.mubr.bf16.gmra.mrb[12].mxu1 %v2686_v30  ;;  %5244 = vmatpush3.bf16.msra.mxu0 %v5835_v32  ;;  %v2108_v30 = vsel %vm973_vm9, %v5875_v24, 0  ;;  %v5879_v32 = vld [vmem:[#allocation16 + $0x3c0] sm:$0xff]  }
 0x280   : > { %5284 = vmatpush3.bf16.msra.mxu1 %v5836_v33  ;;  %5245 = vmatprep.subr.bf16.mxu0 %v5837_v34  ;;  %v2130_v33 = vrot.slane %v2108_v30, 1  ;;  %v5877_v34 = vld [vmem:[#allocation3 + $0x8] ss:$0 sps:$4 sm:$0x11]  }
 0x281   : > { %5285 = vmatprep.subr.bf16.mxu1 %v5838_v35  ;;  %4016 = vmatprep.mubr.bf16.mxu0 %v2635_v39  ;;  %v2013_v35 = vshrl.u32 %v1998_v31, 16  ;;  %v2000_v39 = vsel %vm973_vm9, %v5877_v34, 0  ;;  %v5905_v24 = vld [vmem:[#allocation16 + $0x3e0] sm:$0xff]  }
 0x282   : > { %4081 = vmatprep.mubr.bf16.mxu1 %v2637_v42 }
 0x283   : > { %5246 = vmatpush3.bf16.msra.mxu0 %v5839_v36  ;;  %v2015_v36 = vshll.u32 %v1998_v31, 16 }
 0x284   : > { %5286 = vmatpush3.bf16.msra.mxu1 %v5840_v38  ;;  %5311 = vmatprep.subr.bf16.mxu0 %v5841_v46  ;;  %v2131_v38 = vsel %vm1168_vm11, %v2129_v15, %v2130_v33  ;;  %v2008_v15 = vsel %vm973_vm9, %v5903_v26, 0  ;;  %v5906_v33 = vld [vmem:[#allocation16 + $0x320] sm:$0xff]  }
 0x285   : > { %5351 = vmatprep.subr.bf16.mxu1 %v5842_v27  ;;  %v2017_v42 = vrot.slane %v2015_v36, 1  ;;  %v5881_v27 = vld [vmem:[#allocation16 + $0x380] sm:$0xff]  }
 0x286   : > { %4017 = vmatmul.mubr.bf16.vlgmr.msra.gmra.mrb[16].mxu0 %v2634_v44  ;;  %v2019_v44 = vshll.u32 %v2000_v39, 16  ;;  %v5909_v39 = vld [vmem:[#allocation16 + $0x3e8] sm:$0xff]  }
 0x287   : > { %4082 = vmatmul.mubr.bf16.vlgmr.msra.gmra.mrb[16].mxu1 %v2636_v45  ;;  %5312 = vmatpush3.bf16.msra.mxu0 %v5843_v47  ;;  %v5880_v45 = vld [vmem:[#allocation16 + $0x300] sm:$0xff]   ;;  %v2018_v46 = vor.u32 %v2017_v42, %v2013_v35 }
 0x288   : > { %5352 = vmatpush3.bf16.msra.mxu1 %v5844_v19  ;;  %5313 = vmatprep.subr.bf16.mxu0 %v5845_v48  ;;  %v2021_v47 = vrot.slane %v2019_v44, 1  ;;  %v5882_v19 = vld [vmem:[#allocation16 + $0x348] sm:$0xff]   ;;  %v5907_v35 = vld [vmem:[#allocation16 + $0x3a0] sm:$0xff]  }
 0x289   : > { %5353 = vmatprep.subr.bf16.mxu1 %v5846_v37  ;;  %4024 = vmatprep.mubr.bf16.mxu0 %v2653_v52  ;;  %v5883_v48 = vld [vmem:[#allocation16 + $0x3c8] sm:$0xff]  }
 0x28a   : > { %4089 = vmatprep.mubr.bf16.mxu1 %v2655_v53  ;;  %v2022_v37 = vsel %vm1051_vm10, %v2018_v46, %v2021_v47  ;;  %v5886_v52 = vld [vmem:[#allocation3 + $0xc] sm:$0xff]   ;;  %v5912_v46 = vld [vmem:[#allocation3 + $0x24] sm:$0xff]  }
 0x28b   : > { %5314 = vmatpush3.bf16.msra.mxu0 %v5847_v49  ;;  %v5884_v49 = vld [vmem:[#allocation16 + $0x308] sm:$0xff]   ;;  %v5914_v47 = vld [vmem:[#allocation3 + $0x2c] ss:$0 sps:$4 sm:$0x11]  }
 0x28c   : > { %5354 = vmatpush3.bf16.msra.mxu1 %v5848_v50  ;;  %5315 = vmatprep.subr.bf16.mxu0 %v5849_v55  ;;  %v5885_v50 = vld [vmem:[#allocation16 + $0x388] sm:$0xff]  }
 0x28d   : > { %5355 = vmatprep.subr.bf16.mxu1 %v5850_v28  ;;  %v5887_v53 = vld [vmem:[#allocation3 + $0xc] sm:$0xfe]  }
 0x28e   : > { %4025 = vmatmul.mubr.bf16.gmra.mrb[20].mxu0 %v2652_v59  ;;  %v5888_v59 = vld [vmem:[#allocation3 + $0x14] ss:$0 sps:$4 sm:$0x11]   ;;  %v5889_v55 = vld [vmem:[#allocation3 + $0xc] sm:$0xff]   ;;  %v2110_v28 = vsel %vm973_vm9, %v5887_v53, 0 }
 0x28f   : > { %4090 = vmatmul.mubr.bf16.gmra.mrb[20].mxu1 %v2654_v54  ;;  %5316 = vmatpush3.bf16.msra.mxu0 %v5851_v57  ;;  %v2656_v54 = vld [vmem:[#allocation4 + $0xd0] sm:$0xff]  ;;  %v5910_v44 = vld [vmem:[#allocation16 + $0x328] sm:$0xff]  }
 0x290   : > { %5356 = vmatpush3.bf16.msra.mxu1 %v5852_v58  ;;  %5317 = vmatprep.subr.bf16.mxu0 %v5853_v61  ;;  %v5891_v57 = vld [vmem:[#allocation16 + $0x350] sm:$0xff]   ;;  %v2112_v58 = vsel %vm973_vm9, %v5888_v59, 0  ;;  %v2132_v61 = vrot.slane %v2110_v28, 1 }
 0x291   : > { %5357 = vmatprep.subr.bf16.mxu1 %v5854_v62  ;;  %4032 = vmatprep.mubr.bf16.mxu0 %v2671_v1  ;;  %v2002_v62 = vsel %vm973_vm9, %v5889_v55, 0  ;;  %v5890_v1 = vld [vmem:[#allocation3 + $0x14] ss:$0 sps:$4 sm:$0x11]   ;;  %v5918_v59 = vld [vmem:[#allocation16 + $0x3f0] sm:$0xff]  }
 0x292   : > { %4097 = vmatprep.mubr.bf16.mxu1 %v2673_v2  ;;  %v2023_v2 = vshrl.u32 %v2002_v62, 16  ;;  %v5916_v55 = vld [vmem:[#allocation3 + $0x2c] ss:$0 sps:$4 sm:$0x11]  }
 0x293   : > { %5318 = vmatpush3.bf16.msra.mxu0 %v5855_v63  ;;  %v5892_v63 = vld [vmem:[#allocation16 + $0x3d0] sm:$0xff]  }
 0x294   : > { %5358 = vmatpush3.bf16.msra.mxu1 %v5856_v0  ;;  %5319 = vmatprep.subr.bf16.mxu0 %v5857_v6  ;;  %v2133_v0 = vrot.slane %v2112_v58, 1  ;;  %v2004_v6 = vsel %vm973_vm9, %v5890_v1, 0 }
 0x295   : > { %5359 = vmatprep.subr.bf16.mxu1 %v5858_v25 }
 0x296   : > { %4033 = vmatmul.mubr.bf16.gmra.mrb[24].mxu0 %v2670_v3  ;;  %v2025_v3 = vshll.u32 %v2002_v62, 16 }
 0x297   : > { %4098 = vmatmul.mubr.bf16.gmra.mrb[24].mxu1 %v2672_v5  ;;  %5320 = vmatpush3.bf16.msra.mxu0 %v5859_v8  ;;  %v2134_v5 = vsel %vm1168_vm11, %v2132_v61, %v2133_v0  ;;  %v2029_v8 = vshll.u32 %v2004_v6, 16  ;;  %v2012_v61 = vsel %vm973_vm9, %v5916_v55, 0  ;;  %v5919_v0 = vld [vmem:[#allocation16 + $0x330] sm:$0xff]   ;;  %v5922_v6 = vld [vmem:[#allocation16 + $0x3f8] sm:$0xff]  }
 0x298   : > { %5360 = vmatpush3.bf16.msra.mxu1 %v5860_v51  ;;  %5321 = vmatprep.subr.bf16.mxu0 %v5861_v9  ;;  %v2027_v25 = vrot.slane %v2025_v3, 1  ;;  %v5893_v51 = vld [vmem:[#allocation16 + $0x310] sm:$0xff]   ;;  %v5945_v55 = vld [vmem:[#allocation3 + $0x24] sm:$0xff]  }
 0x299   : > { %5361 = vmatprep.subr.bf16.mxu1 %v5862_v11  ;;  %4040 = vmatprep.mubr.bf16.mxu0 %v2689_v13  ;;  %v5894_v11 = vld [vmem:[#allocation16 + $0x390] sm:$0xff]   ;;  %v5896_v13 = vld [vmem:[#allocation16 + $0x3d8] sm:$0xff]  }
 0x29a   : > { %4105 = vmatprep.mubr.bf16.mxu1 %v2691_v14  ;;  %v2028_v9 = vor.u32 %v2027_v25, %v2023_v2  ;;  %v5920_v2 = vld [vmem:[#allocation16 + $0x3b0] sm:$0xff]  }
 0x29b   : > { %5322 = vmatpush3.bf16.msra.mxu0 %v5863_v12  ;;  %v2031_v12 = vrot.slane %v2029_v8, 1  ;;  %v5923_v8 = vld [vmem:[#allocation16 + $0x338] sm:$0xff]  }
 0x29c   : > { %5362 = vmatpush3.bf16.msra.mxu1 %v5864_v43  ;;  %5323 = vmatprep.subr.bf16.mxu0 %v5865_v16  ;;  %v5895_v43 = vld [vmem:[#allocation16 + $0x358] sm:$0xff]   ;;  %v5899_v16 = vld [vmem:[#allocation3 + $0x18] sm:$0xff]  }
 0x29d   : > { %5363 = vmatprep.subr.bf16.mxu1 %v5866_v17  ;;  %v2032_v14 = vsel %vm1051_vm10, %v2028_v9, %v2031_v12  ;;  %v5900_v17 = vld [vmem:[#allocation3 + $0x18] sm:$0xfe]   ;;  %v5925_v9 = vld [vmem:[#allocation3 + $0xc] sm:$0xff]  }
 0x29e   : > { %4041 = vmatmul.mubr.bf16.gmra.mrb[28].mxu0 %v2688_v40  ;;  %v5897_v40 = vld [vmem:[#allocation16 + $0x318] sm:$0xff]   ;;  %v5927_v12 = vld [vmem:[#allocation3 + $0x18] sm:$0xff]  }
 0x29f   : > { %4106 = vmatmul.mubr.bf16.gmra.mrb[28].mxu1 %v2690_v4  ;;  %5324 = vmatpush3.bf16.msra.mxu0 %v5867_v60  ;;  %v5898_v4 = vld [vmem:[#allocation16 + $0x398] sm:$0xff]  }
 0x2a0   : > { %5364 = vmatpush3.bf16.msra.mxu1 %v5868_v18  ;;  %5325 = vmatprep.subr.bf16.mxu0 %v5869_v20  ;;  %v5901_v60 = vld [vmem:[#allocation3 + $0x20] ss:$0 sps:$4 sm:$0x11]   ;;  %v2674_v18 = vld [vmem:[#allocation4 + $0x160] sm:$0xff]  ;;  %v5902_v20 = vld [vmem:[#allocation3 + $0x18] sm:$0xff]  }
 0x2a1   : > { %5365 = vmatprep.subr.bf16.mxu1 %v5870_v21  ;;  %5981 = vmatprep.mubr.msk.bf16.mxu0 %vm973_vm9, %v5873_v56  ;;  %v2114_v21 = vsel %vm973_vm9, %v5900_v17, 0  ;;  %v2006_v23 = vsel %vm973_vm9, %v5902_v20, 0 }
 0x2a2   : > { %4211 = vmatprep.mubr.bf16.mxu1 %v2131_v38  ;;  %v2135_v56 = vrot.slane %v2114_v21, 1  ;;  %v2033_v10 = vshrl.u32 %v2006_v23, 16  ;;  %v5908_v38 = vld [vmem:[#allocation16 + $0x368] sm:$0xff]  }
 0x2a3   : > { %5326 = vmatpush3.bf16.msra.mxu0 %v5871_v22  ;;  %v5904_v22 = vld [vmem:[#allocation16 + $0x360] sm:$0xff]   ;;  %v5930_v21 = vld [vmem:[#allocation3 + $0x14] ss:$0 sps:$4 sm:$0x11]  }
 0x2a4   : > { %5366 = vmatpush3.bf16.msra.mxu1 %v5872_v41  ;;  %5391 = vmatprep.subr.bf16.mxu0 %v5878_v29  ;;  %v2116_v41 = vsel %vm973_vm9, %v5901_v60, 0  ;;  %v2035_v29 = vshll.u32 %v2006_v23, 16  ;;  %v5929_v60 = vld [vmem:[#allocation3 + $0xc] sm:$0xfe]   ;;  %v2348_v23 = vsel %vm973_vm9, %v5930_v21, 0 }
 0x2a5   : > { %5431 = vmatprep.subr.bf16.mxu1 %v5879_v32  ;;  %v2039_v32 = vshll.u32 %v2008_v15, 16  ;;  %v2370_v26 = vrot.slane %v2348_v23, 1  ;;  %v5935_v15 = vld [vmem:[#allocation3 + $0x18] sm:$0xff]  }
 0x2a6   : > { %4147 = vmatmul.mubr.bf16.vlgmr.msra.gmra.mrb[32].mxu0 %v2638_v7  ;;  %v2136_v7 = vrot.slane %v2116_v41, 1  ;;  %v2037_v31 = vrot.slane %v2035_v29, 1  ;;  %v2346_v41 = vsel %vm973_vm9, %v5929_v60, 0  ;;  %v5934_v29 = vld [vmem:[#allocation16 + $0x408] sm:$0xff]   ;;  %v5957_v60 = vld [vmem:[#allocation3 + $0x3c] sm:$0xff]  }
 0x2a7   : > { %5392 = vmatpush3.bf16.msra.mxu0 %v5880_v45  ;;  %4212 = vmatmul.mubr.bf16.vlgmr.msra.gmra.mrb[32].mxu1 %v2022_v37  ;;  %v2041_v36 = vrot.slane %v2039_v32, 1  ;;  %v5911_v45 = vld [vmem:[#allocation16 + $0x3a8] sm:$0xff]   ;;  %v5937_v32 = vld [vmem:[#allocation3 + $0x24] sm:$0xff]  }
 0x2a8   : > { %5393 = vmatprep.subr.bf16.mxu0 %v5882_v19  ;;  %5432 = vmatpush3.bf16.msra.mxu1 %v5881_v27  ;;  %v2137_v30 = vsel %vm1168_vm11, %v2135_v56, %v2136_v7  ;;  %v2038_v34 = vor.u32 %v2037_v31, %v2033_v10  ;;  %v5913_v27 = vld [vmem:[#allocation3 + $0x24] sm:$0xfe]   ;;  %v2692_v19 = vld [vmem:[#allocation4 + $0x1f0] sm:$0xff]  ;;  %v5933_v10 = vld [vmem:[#allocation16 + $0x448] sm:$0xff]  }
 0x2a9   : > { %5433 = vmatprep.subr.bf16.mxu1 %v5883_v48  ;;  %5982 = vmatprep.mubr.msk.bf16.mxu0 %vm973_vm9, %v5886_v52  ;;  %v5915_v48 = vld [vmem:[#allocation3 + $0x24] sm:$0xff]   ;;  %v2118_v37 = vsel %vm973_vm9, %v5913_v27, 0  ;;  %v5936_v31 = vld [vmem:[#allocation3 + $0x20] ss:$0 sps:$4 sm:$0x11]  }
 0x2aa   : > { %4219 = vmatprep.mubr.bf16.mxu1 %v2134_v5  ;;  %v2042_v42 = vsel %vm1051_vm10, %v2038_v34, %v2041_v36  ;;  %v2138_v52 = vrot.slane %v2118_v37, 1  ;;  %v2010_v53 = vsel %vm973_vm9, %v5915_v48, 0  ;;  %v5921_v5 = vld [vmem:[#allocation16 + $0x378] sm:$0xff]   ;;  %v5932_v56 = vld [vmem:[#allocation16 + $0x400] sm:$0xff]   ;;  %v5938_v34 = vld [vmem:[#allocation3 + $0x18] sm:$0xff]  }
 0x2ab   : > { %5394 = vmatpush3.bf16.msra.mxu0 %v5884_v49  ;;  %v5917_v49 = vld [vmem:[#allocation16 + $0x370] sm:$0xff]   ;;  %v2043_v28 = vshrl.u32 %v2010_v53, 16  ;;  %v5940_v27 = vld [vmem:[#allocation3 + $0x20] ss:$0 sps:$4 sm:$0x11]  }
 0x2ac   : > { %5434 = vmatpush3.bf16.msra.mxu1 %v5885_v50  ;;  %5395 = vmatprep.subr.bf16.mxu0 %v5891_v57  ;;  %v2120_v50 = vsel %vm973_vm9, %v5914_v47, 0  ;;  %v2045_v57 = vshll.u32 %v2010_v53, 16  ;;  %v5942_v48 = vld [vmem:[#allocation16 + $0x410] sm:$0xff]   ;;  %v2352_v37 = vsel %vm973_vm9, %v5940_v27, 0  ;;  %v5943_v53 = vld [vmem:[#allocation16 + $0x458] sm:$0xff]  }
 0x2ad   : > { %5435 = vmatprep.subr.bf16.mxu1 %v5892_v63  ;;  %v2049_v63 = vshll.u32 %v2012_v61, 16  ;;  %v5948_v61 = vld [vmem:[#allocation3 + $0x24] sm:$0xff]  }
 0x2ae   : > { %4155 = vmatmul.mubr.bf16.gmra.mrb[36].mxu0 %v2656_v54  ;;  %v2139_v54 = vrot.slane %v2120_v50, 1  ;;  %v2047_v62 = vrot.slane %v2045_v57, 1  ;;  %v5947_v57 = vld [vmem:[#allocation3 + $0x30] sm:$0xff]  }
 0x2af   : > { %5396 = vmatpush3.bf16.msra.mxu0 %v5893_v51  ;;  %4220 = vmatmul.mubr.bf16.gmra.mrb[36].mxu1 %v2032_v14  ;;  %v2051_v3 = vrot.slane %v2049_v63, 1  ;;  %v5924_v51 = vld [vmem:[#allocation16 + $0x3b8] sm:$0xff]  }
 0x2b0   : > { %5436 = vmatpush3.bf16.msra.mxu1 %v5894_v11  ;;  %5397 = vmatprep.subr.bf16.mxu0 %v5895_v43  ;;  %v2140_v58 = vsel %vm1168_vm11, %v2138_v52, %v2139_v54  ;;  %v2048_v1 = vor.u32 %v2047_v62, %v2043_v28  ;;  %v5926_v11 = vld [vmem:[#allocation3 + $0x14] ss:$0 sps:$4 sm:$0x11]   ;;  %v2238_v43 = vsel %vm973_vm9, %v5925_v9, 0  ;;  %v2373_v52 = vrot.slane %v2352_v37, 1  ;;  %v5952_v9 = vld [vmem:[#allocation16 + $0x420] sm:$0xff]  }
 0x2b1   : > { %5437 = vmatprep.subr.bf16.mxu1 %v5896_v13  ;;  %5983 = vmatprep.mubr.msk.bf16.mxu0 %vm973_vm9, %v5899_v16  ;;  %v5928_v13 = vld [vmem:[#allocation3 + $0xc] sm:$0xff]   ;;  %v2240_v14 = vsel %vm973_vm9, %v5926_v11, 0  ;;  %v5968_v37 = vld [vmem:[#allocation3 + $0x38] ss:$0 sps:$4 sm:$0x11]  }
 0x2b2   : > { %4227 = vmatprep.mubr.bf16.mxu1 %v2137_v30  ;;  %v2052_v25 = vsel %vm1051_vm10, %v2048_v1, %v2051_v3  ;;  %v2259_v16 = vshll.u32 %v2240_v14, 16  ;;  %v5946_v28 = vld [vmem:[#allocation3 + $0x2c] ss:$0 sps:$4 sm:$0x11]   ;;  %v5949_v3 = vld [vmem:[#allocation3 + $0x24] sm:$0xfe]  }
 0x2b3   : > { %5398 = vmatpush3.bf16.msra.mxu0 %v5897_v40  ;;  %v2253_v40 = vshrl.u32 %v2238_v43, 16  ;;  %v2248_v62 = vsel %vm973_vm9, %v5946_v28, 0  ;;  %v5953_v14 = vld [vmem:[#allocation16 + $0x468] sm:$0xff]  }
 0x2b4   : > { %5438 = vmatpush3.bf16.msra.mxu1 %v5898_v4  ;;  %5399 = vmatprep.subr.bf16.mxu0 %v5904_v22  ;;  %v2255_v4 = vshll.u32 %v2238_v43, 16  ;;  %v2261_v20 = vrot.slane %v2259_v16, 1  ;;  %v2279_v1 = vshll.u32 %v2248_v62, 16  ;;  %v5955_v16 = vld [vmem:[#allocation3 + $0x30] sm:$0xff]  }
 0x2b5   : > { %5439 = vmatprep.subr.bf16.mxu1 %v5905_v24  ;;  %v2369_v24 = vrot.slane %v2346_v41, 1 }
 0x2b6   : > { %4163 = vmatmul.mubr.bf16.gmra.mrb[40].mxu0 %v2674_v18  ;;  %v2257_v17 = vrot.slane %v2255_v4, 1  ;;  %v5931_v18 = vld [vmem:[#allocation16 + $0x440] sm:$0xff]  }
 0x2b7   : > { %5400 = vmatpush3.bf16.msra.mxu0 %v5906_v33  ;;  %4228 = vmatmul.mubr.bf16.gmra.mrb[40].mxu1 %v2042_v42  ;;  %v2371_v30 = vsel %vm1168_vm11, %v2369_v24, %v2370_v26  ;;  %v2242_v33 = vsel %vm973_vm9, %v5935_v15, 0  ;;  %v5959_v24 = vld [vmem:[#allocation3 + $0x30] sm:$0xfe]   ;;  %v5962_v15 = vld [vmem:[#allocation16 + $0x430] sm:$0xff]  }
 0x2b8   : > { %5440 = vmatpush3.bf16.msra.mxu1 %v5907_v35  ;;  %5401 = vmatprep.subr.bf16.mxu0 %v5908_v38  ;;  %v2258_v22 = vor.u32 %v2257_v17, %v2253_v40  ;;  %v2244_v35 = vsel %vm973_vm9, %v5936_v31, 0  ;;  %v2263_v36 = vshrl.u32 %v2242_v33, 16  ;;  %v2265_v38 = vshll.u32 %v2242_v33, 16  ;;  %v5954_v40 = vld [vmem:[#allocation16 + $0x428] sm:$0xff]  }
 0x2b9   : > { %5441 = vmatprep.subr.bf16.mxu1 %v5909_v39  ;;  %5984 = vmatprep.mubr.msk.bf16.mxu0 %vm973_vm9, %v5912_v46  ;;  %v2269_v39 = vshll.u32 %v2244_v35, 16  ;;  %v5956_v17 = vld [vmem:[#allocation3 + $0x38] ss:$0 sps:$4 sm:$0x11]   ;;  %v5963_v35 = vld [vmem:[#allocation16 + $0x478] sm:$0xff]  }
 0x2ba   : > { %4235 = vmatprep.mubr.bf16.mxu1 %v2140_v58  ;;  %v2262_v7 = vsel %vm1051_vm10, %v2258_v22, %v2261_v20  ;;  %v2267_v42 = vrot.slane %v2265_v38, 1  ;;  %v2246_v58 = vsel %vm973_vm9, %v5945_v55, 0  ;;  %v5958_v20 = vld [vmem:[#allocation3 + $0x30] sm:$0xff]   ;;  %v2252_v21 = vsel %vm973_vm9, %v5956_v17, 0  ;;  %v5977_v55 = vld [vmem:[#allocation3 + $0x24] sm:$0xff]  }
 0x2bb   : > { %5402 = vmatpush3.bf16.msra.mxu0 %v5910_v44  ;;  %v5939_v44 = vld [vmem:[#allocation3 + $0x18] sm:$0xfe]   ;;  %v2271_v46 = vrot.slane %v2269_v39, 1  ;;  %v2273_v63 = vshrl.u32 %v2246_v58, 16 }
 0x2bc   : > { %5442 = vmatpush3.bf16.msra.mxu1 %v5911_v45  ;;  %5403 = vmatprep.subr.bf16.mxu0 %v5917_v49  ;;  %v5941_v45 = vld [vmem:[#allocation16 + $0x450] sm:$0xff]   ;;  %v2268_v47 = vor.u32 %v2267_v42, %v2263_v36  ;;  %v5964_v36 = vld [vmem:[#allocation16 + $0x438] sm:$0xff]  }
 0x2bd   : > { %5443 = vmatprep.subr.bf16.mxu1 %v5918_v59  ;;  %v5944_v59 = vld [vmem:[#allocation16 + $0x418] sm:$0xff]   ;;  %v5965_v39 = vld [vmem:[#allocation3 + $0x18] sm:$0xfe]  }
 0x2be   : > { %4171 = vmatmul.mubr.bf16.gmra.mrb[44].mxu0 %v2692_v19  ;;  %v2350_v19 = vsel %vm973_vm9, %v5939_v44, 0  ;;  %v2272_v50 = vsel %vm1051_vm10, %v2268_v47, %v2271_v46  ;;  %v5966_v42 = vld [vmem:[#allocation3 + $0x20] ss:$0 sps:$4 sm:$0x11]   ;;  %v2587_v44 = vsel %vm973_vm9, %v5965_v39, 0 }
 0x2bf   : > { %5404 = vmatpush3.bf16.msra.mxu0 %v5919_v0  ;;  %4236 = vmatmul.mubr.bf16.gmra.mrb[44].mxu1 %v2052_v25  ;;  %v2372_v49 = vrot.slane %v2350_v19, 1  ;;  %v2275_v0 = vshll.u32 %v2246_v58, 16  ;;  %v5950_v25 = vld [vmem:[#allocation3 + $0x2c] ss:$0 sps:$4 sm:$0x11]   ;;  %v2589_v46 = vsel %vm973_vm9, %v5966_v42, 0 }
 0x2c0   : > { %5444 = vmatpush3.bf16.msra.mxu1 %v5920_v2  ;;  %5405 = vmatprep.subr.bf16.mxu0 %v5921_v5  ;;  %v5951_v5 = vld [vmem:[#allocation16 + $0x460] sm:$0xff]   ;;  %v2356_v11 = vsel %vm973_vm9, %v5950_v25, 0  ;;  %v2610_v27 = vrot.slane %v2587_v44, 1  ;;  %v5967_v47 = vld [vmem:[#allocation3 + $0x30] sm:$0xfe]  }
 0x2c1   : > { %5445 = vmatprep.subr.bf16.mxu1 %v5922_v6  ;;  %5985 = vmatprep.mubr.msk.bf16.mxu1 %vm973_vm9, %v5927_v12  ;;  %v2374_v54 = vsel %vm1168_vm11, %v2372_v49, %v2373_v52  ;;  %v2277_v2 = vrot.slane %v2275_v0, 1  ;;  %v2281_v6 = vrot.slane %v2279_v1, 1  ;;  %v5971_v19 = vld [vmem:[#allocation3 + $0x30] sm:$0xff]   ;;  %v2595_v49 = vsel %vm973_vm9, %v5967_v47, 0 }
 0x2c2   : > { %4276 = vmatprep.mubr.bf16.mxu0 %v2262_v7  ;;  %v5961_v7 = vld [vmem:[#allocation16 + $0x470] sm:$0xff]  }
 0x2c3   : > { %5406 = vmatpush3.bf16.msra.mxu0 %v5923_v8  ;;  %v2278_v8 = vor.u32 %v2277_v2, %v2273_v63  ;;  %v5972_v63 = vld [vmem:[#allocation3 + $0x38] ss:$0 sps:$4 sm:$0x11]   ;;  %v2487_v2 = vsel %vm973_vm9, %v5971_v19, 0 }
 0x2c4   : > { %5446 = vmatpush3.bf16.msra.mxu1 %v5924_v51  ;;  %5471 = vmatprep.subr.bf16.mxu0 %v5931_v18  ;;  %v2354_v51 = vsel %vm973_vm9, %v5949_v3, 0  ;;  %v2516_v25 = vshll.u32 %v2487_v2, 16 }
 0x2c5   : > { %5511 = vmatprep.subr.bf16.mxu1 %v5931_v18  ;;  %v2375_v12 = vrot.slane %v2354_v51, 1  ;;  %v2282_v43 = vsel %vm1051_vm10, %v2278_v8, %v2281_v6  ;;  %v2250_v18 = vsel %vm973_vm9, %v5955_v16, 0  ;;  %v2514_v6 = vshrl.u32 %v2487_v2, 16  ;;  %v5979_v16 = vld [vmem:[#allocation3 + $0x3c] sm:$0xff]  }
 0x2c6   : > { %5986 = vmatmul.mubr.msk.bf16.vlgmr.msra.gmra.mrb[48].mxu0 %vm973_vm9, %v5928_v13  ;;  %v2376_v13 = vrot.slane %v2356_v11, 1  ;;  %v2283_v22 = vshrl.u32 %v2250_v18, 16  ;;  %v2285_v41 = vshll.u32 %v2250_v18, 16  ;;  %v5974_v11 = vld [vmem:[#allocation3 + $0x2c] ss:$0 sps:$4 sm:$0x11]  }
 0x2c7   : > { %4342 = vmatmul.mubr.bf16.vlgmr.msra.gmra.mrb[48].mxu1 %v2371_v30  ;;  %5472 = vmatpush3.bf16.msra.mxu0 %v5932_v56  ;;  %v2358_v30 = vsel %vm973_vm9, %v5959_v24, 0  ;;  %v5978_v24 = vld [vmem:[#allocation3 + $0x2c] ss:$0 sps:$4 sm:$0x11]  }
 0x2c8   : > { %5519 = vmatpush3.bf16.msra.mxu1 %v5932_v56  ;;  %5473 = vmatprep.subr.bf16.mxu0 %v5933_v10  ;;  %v2377_v4 = vsel %vm1168_vm11, %v2375_v12, %v2376_v13  ;;  %v2289_v56 = vshll.u32 %v2252_v21, 16  ;;  %v2287_v23 = vrot.slane %v2285_v41, 1  ;;  %v2518_v12 = vrot.slane %v2516_v25, 1  ;;  %v5976_v21 = vld [vmem:[#allocation3 + $0x44] ss:$0 sps:$4 sm:$0x11]  }
 0x2c9   : > { %5512 = vmatprep.subr.bf16.mxu1 %v5933_v10  ;;  %5987 = vmatprep.mubr.msk.bf16.mxu1 %vm973_vm9, %v5937_v32  ;;  %v5960_v10 = vld [vmem:[#allocation3 + $0x38] ss:$0 sps:$4 sm:$0x11]   ;;  %v2378_v32 = vrot.slane %v2358_v30, 1 }
 0x2ca   : > { %4284 = vmatprep.mubr.bf16.mxu0 %v2272_v50  ;;  %v2291_v26 = vrot.slane %v2289_v56, 1  ;;  %v2360_v31 = vsel %vm973_vm9, %v5960_v10, 0  ;;  %v5970_v50 = vld [vmem:[#allocation3 + $0x20] ss:$0 sps:$4 sm:$0x11]   ;;  %v2519_v17 = vor.u32 %v2518_v12, %v2514_v6 }
 0x2cb   : > { %5474 = vmatpush3.bf16.msra.mxu0 %v5934_v29 }
 0x2cc   : > { %5520 = vmatpush3.bf16.msra.mxu1 %v5934_v29  ;;  %5475 = vmatprep.subr.bf16.mxu0 %v5941_v45  ;;  %v2288_v29 = vor.u32 %v2287_v23, %v2283_v22 }
 0x2cd   : > { %5513 = vmatprep.subr.bf16.mxu1 %v5941_v45  ;;  %v5969_v45 = vld [vmem:[#allocation3 + $0x18] sm:$0xff]  }
 0x2ce   : > { %5988 = vmatmul.mubr.msk.bf16.gmra.mrb[52].mxu0 %vm973_vm9, %v5938_v34  ;;  %v2292_v33 = vsel %vm1051_vm10, %v2288_v29, %v2291_v26  ;;  %v2379_v34 = vrot.slane %v2360_v31, 1  ;;  %v2491_v29 = vsel %vm973_vm9, %v5979_v16, 0 }
 0x2cf   : > { %5476 = vmatpush3.bf16.msra.mxu0 %v5942_v48  ;;  %4350 = vmatmul.mubr.bf16.gmra.mrb[52].mxu1 %v2374_v54  ;;  %v2479_v54 = vsel %vm973_vm9, %v5969_v45, 0 }
 0x2d0   : > { %5521 = vmatpush3.bf16.msra.mxu1 %v5942_v48  ;;  %5477 = vmatprep.subr.bf16.mxu0 %v5943_v53  ;;  %v2380_v38 = vsel %vm1168_vm11, %v2378_v32, %v2379_v34  ;;  %v2611_v48 = vrot.slane %v2589_v46, 1  ;;  %v2494_v58 = vshrl.u32 %v2479_v54, 16 }
 0x2d1   : > { %5514 = vmatprep.subr.bf16.mxu1 %v5943_v53  ;;  %5989 = vmatprep.mubr.msk.bf16.mxu1 %vm973_vm9, %v5947_v57  ;;  %v2597_v53 = vsel %vm973_vm9, %v5968_v37, 0  ;;  %v2481_v57 = vsel %vm973_vm9, %v5970_v50, 0 }
 0x2d2   : > { %4292 = vmatprep.mubr.bf16.mxu0 %v2282_v43  ;;  %v2612_v52 = vsel %vm1168_vm11, %v2610_v27, %v2611_v48  ;;  %v2617_v28 = vrot.slane %v2597_v53, 1  ;;  %v2500_v62 = vshll.u32 %v2481_v57, 16  ;;  %v2483_v43 = vsel %vm973_vm9, %v5977_v55, 0 }
 0x2d3   : > { %5478 = vmatpush3.bf16.msra.mxu0 %v5944_v59  ;;  %v2504_v22 = vshrl.u32 %v2483_v43, 16  ;;  %v2506_v10 = vshll.u32 %v2483_v43, 16 }
 0x2d4   : > { %5522 = vmatpush3.bf16.msra.mxu1 %v5944_v59  ;;  %5479 = vmatprep.subr.bf16.mxu0 %v5951_v5  ;;  %v2616_v59 = vrot.slane %v2595_v49, 1  ;;  %v2502_v3 = vrot.slane %v2500_v62, 1 }
 0x2d5   : > { %5515 = vmatprep.subr.bf16.mxu1 %v5951_v5  ;;  %v2489_v5 = vsel %vm973_vm9, %v5972_v63, 0  ;;  %v2508_v31 = vrot.slane %v2506_v10, 1 }
 0x2d6   : > { %5990 = vmatmul.mubr.msk.bf16.gmra.mrb[56].mxu0 %vm973_vm9, %v5948_v61  ;;  %v2496_v61 = vshll.u32 %v2479_v54, 16  ;;  %v2618_v0 = vsel %vm1168_vm11, %v2616_v59, %v2617_v28  ;;  %v2520_v51 = vshll.u32 %v2489_v5, 16 }
 0x2d7   : > { %5480 = vmatpush3.bf16.msra.mxu0 %v5952_v9  ;;  %4358 = vmatmul.mubr.bf16.gmra.mrb[56].mxu1 %v2377_v4  ;;  %v2593_v4 = vsel %vm973_vm9, %v5974_v11, 0 }
 0x2d8   : > { %5523 = vmatpush3.bf16.msra.mxu1 %v5952_v9  ;;  %5481 = vmatprep.subr.bf16.mxu0 %v5953_v14  ;;  %v2498_v1 = vrot.slane %v2496_v61, 1  ;;  %v5973_v9 = vld [vmem:[#allocation3 + $0x24] sm:$0xfe]   ;;  %v2614_v18 = vrot.slane %v2593_v4, 1 }
 0x2d9   : > { %5516 = vmatprep.subr.bf16.mxu1 %v5953_v14  ;;  %5991 = vmatprep.mubr.msk.bf16.mxu1 %vm973_vm9, %v5957_v60  ;;  %v2522_v14 = vrot.slane %v2520_v51, 1 }
 0x2da   : > { %4300 = vmatprep.mubr.bf16.mxu0 %v2292_v33  ;;  %v2499_v8 = vor.u32 %v2498_v1, %v2494_v58  ;;  %v5980_v33 = vld [vmem:[#allocation3 + $0x44] ss:$0 sps:$4 sm:$0x11]  }
 0x2db   : > { %5482 = vmatpush3.bf16.msra.mxu0 %v5954_v40  ;;  %v2523_v41 = vsel %vm1051_vm10, %v2519_v17, %v2522_v14  ;;  %v2493_v42 = vsel %vm973_vm9, %v5980_v33, 0 }
 0x2dc   : > { %5524 = vmatpush3.bf16.msra.mxu1 %v5954_v40  ;;  %5483 = vmatprep.subr.bf16.mxu0 %v5961_v7  ;;  %v2503_v13 = vsel %vm1051_vm10, %v2499_v8, %v2502_v3  ;;  %v2591_v40 = vsel %vm973_vm9, %v5973_v9, 0  ;;  %v2530_v45 = vshll.u32 %v2493_v42, 16 }
 0x2dd   : > { %5517 = vmatprep.subr.bf16.mxu1 %v5961_v7  ;;  %v2613_v60 = vrot.slane %v2591_v40, 1  ;;  %v2601_v7 = vsel %vm973_vm9, %v5976_v21, 0 }
 0x2de   : > { %5992 = vmatmul.mubr.msk.bf16.gmra.mrb[60].mxu0 %vm973_vm9, %v5958_v20  ;;  %v5975_v20 = vld [vmem:[#allocation3 + $0x3c] sm:$0xfe]   ;;  %v2620_v30 = vrot.slane %v2601_v7, 1  ;;  %v2532_v47 = vrot.slane %v2530_v45, 1 }
 0x2df   : > { %5484 = vmatpush3.bf16.msra.mxu0 %v5962_v15  ;;  %4366 = vmatmul.mubr.bf16.gmra.mrb[60].mxu1 %v2380_v38  ;;  %v2615_v56 = vsel %vm1168_vm11, %v2613_v60, %v2614_v18  ;;  %v2599_v23 = vsel %vm973_vm9, %v5975_v20, 0  ;;  %v2509_v38 = vor.u32 %v2508_v31, %v2504_v22 }
 0x2e0   : > { %5525 = vmatpush3.bf16.msra.mxu1 %v5962_v15  ;;  %5485 = vmatprep.subr.bf16.mxu0 %v5963_v35  ;;  %v2619_v26 = vrot.slane %v2599_v23, 1  ;;  %v2485_v15 = vsel %vm973_vm9, %v5978_v24, 0 }
 0x2e1   : > { %5518 = vmatprep.subr.bf16.mxu1 %v5963_v35  ;;  %4406 = vmatprep.mubr.bf16.mxu0 %v2612_v52  ;;  %v2510_v32 = vshll.u32 %v2485_v15, 16  ;;  %v2524_v35 = vshrl.u32 %v2491_v29, 16 }
 0x2e2   : > { %4422 = vmatprep.mubr.bf16.mxu1 %v2618_v0  ;;  %v2621_v34 = vsel %vm1168_vm11, %v2619_v26, %v2620_v30 }
 0x2e3   : > { %5486 = vmatpush3.bf16.msra.mxu0 %v5964_v36  ;;  %v2512_v39 = vrot.slane %v2510_v32, 1 }
 0x2e4   : > { %5526 = vmatpush3.bf16.msra.mxu1 %v5964_v36  ;;  %v2526_v36 = vshll.u32 %v2491_v29, 16 }
 0x2e5   : > { %v2513_v46 = vsel %vm1051_vm10, %v2509_v38, %v2512_v39 }
 0x2e6   : > { %4407 = vmatmul.mubr.bf16.vlgmr.msra.gmra.mrb[64].mxu0 %v2503_v13  ;;  %v2528_v44 = vrot.slane %v2526_v36, 1 }
 0x2e7   : > { %4423 = vmatmul.mubr.bf16.vlgmr.msra.gmra.mrb[64].mxu1 %v2523_v41  ;;  %4414 = vmatprep.mubr.bf16.mxu0 %v2615_v56 }
 0x2e8   : > { %4430 = vmatprep.mubr.bf16.mxu1 %v2621_v34  ;;  %v2529_v27 = vor.u32 %v2528_v44, %v2524_v35 }
 0x2ea   : > { %v2533_v19 = vsel %vm1051_vm10, %v2529_v27, %v2532_v47 }
 0x2ee   : > { %4415 = vmatmul.mubr.bf16.gmra.mrb[68].mxu0 %v2513_v46 }
 0x2ef   : > { %4431 = vmatmul.mubr.bf16.gmra.mrb[68].mxu1 %v2533_v19 }
 0x339   : > { %v5167_v48 = vpop.f32.mrb[0].mxu0 }
 0x33a   : > { %v5207_v37 = vpop.f32.mrb[0].mxu1  ;;  %v5168_v49 = vpop.f32.mrb[1].mxu0 }
 0x33b   : > { %v5169_v50 = vadd.f32 %v5168_v49, %v5167_v48  ;;  %v5208_v52 = vpop.f32.mrb[1].mxu1  ;;  %v5170_v53 = vpop.f32.mrb[2].mxu0 }
 0x33c   : > { %v5209_v59 = vadd.f32 %v5208_v52, %v5207_v37  ;;  %v5210_v54 = vpop.f32.mrb[2].mxu1  ;;  %v5171_v55 = vpop.f32.mrb[3].mxu0 }
 0x33d   : > { %v5172_v28 = vadd.f32 %v5171_v55, %v5170_v53  ;;  %v5211_v57 = vpop.f32.mrb[3].mxu1 }
 0x33e   : > { %v3954_v58 = vadd.f32 %v5209_v59, %v5169_v50  ;;  %v5212_v61 = vadd.f32 %v5211_v57, %v5210_v54 }
 0x340   : > { %v3957_v62 = vadd.f32 %v5212_v61, %v5172_v28 }
 0x341   : > { %v5173_v63 = vpop.f32.mrb[4].mxu0 }
 0x342   : > { %v5213_v0 = vpop.f32.mrb[4].mxu1  ;;  %v5174_v1 = vpop.f32.mrb[5].mxu0 }
 0x343   : > { %v5214_v2 = vpop.f32.mrb[5].mxu1  ;;  %v5175_v3 = vadd.f32 %v5174_v1, %v5173_v63  ;;  %v5176_v6 = vpop.f32.mrb[6].mxu0 }
 0x344   : > { %v5215_v5 = vadd.f32 %v5214_v2, %v5213_v0  ;;  %v5216_v25 = vpop.f32.mrb[6].mxu1  ;;  %v5177_v8 = vpop.f32.mrb[7].mxu0 }
 0x345   : > { %v5217_v51 = vpop.f32.mrb[7].mxu1  ;;  %v5178_v11 = vadd.f32 %v5177_v8, %v5176_v6 }
 0x346   : > { %v3962_v9 = vadd.f32 %v5215_v5, %v5175_v3  ;;  %v5218_v12 = vadd.f32 %v5217_v51, %v5216_v25 }
 0x348   : > { %v3965_v43 = vadd.f32 %v5218_v12, %v5178_v11 }
 0x349   : > { %v5179_v13 = vpop.f32.mrb[8].mxu0 }
 0x34a   : > { %v5219_v14 = vpop.f32.mrb[8].mxu1  ;;  %v5180_v40 = vpop.f32.mrb[9].mxu0 }
 0x34b   : > { %v5220_v4 = vpop.f32.mrb[9].mxu1  ;;  %v5181_v16 = vadd.f32 %v5180_v40, %v5179_v13  ;;  %v5182_v60 = vpop.f32.mrb[10].mxu0 }
 0x34c   : > { %v5221_v17 = vadd.f32 %v5220_v4, %v5219_v14  ;;  %v5222_v18 = vpop.f32.mrb[10].mxu1  ;;  %v5183_v20 = vpop.f32.mrb[11].mxu0 }
 0x34d   : > { %v5223_v21 = vpop.f32.mrb[11].mxu1  ;;  %v5184_v41 = vadd.f32 %v5183_v20, %v5182_v60 }
 0x34e   : > { %v3970_v22 = vadd.f32 %v5221_v17, %v5181_v16  ;;  %v5224_v56 = vadd.f32 %v5223_v21, %v5222_v18 }
 0x350   : > { %v3973_v23 = vadd.f32 %v5224_v56, %v5184_v41 }
 0x351   : > { %v5185_v24 = vpop.f32.mrb[12].mxu0 }
 0x352   : > { %v5225_v7 = vpop.f32.mrb[12].mxu1  ;;  %v5186_v26 = vpop.f32.mrb[13].mxu0 }
 0x353   : > { %v5187_v10 = vadd.f32 %v5186_v26, %v5185_v24  ;;  %v5226_v29 = vpop.f32.mrb[13].mxu1  ;;  %v5188_v30 = vpop.f32.mrb[14].mxu0 }
 0x354   : > { %v5227_v15 = vadd.f32 %v5226_v29, %v5225_v7  ;;  %v5228_v31 = vpop.f32.mrb[14].mxu1  ;;  %v5189_v32 = vpop.f32.mrb[15].mxu0 }
 0x355   : > { %v5190_v33 = vadd.f32 %v5189_v32, %v5188_v30  ;;  %v5229_v34 = vpop.f32.mrb[15].mxu1 }
 0x356   : > { %v3978_v35 = vadd.f32 %v5227_v15, %v5187_v10  ;;  %v5230_v36 = vadd.f32 %v5229_v34, %v5228_v31 }
 0x358   : > { %v7557_v38 = vadd.f32 %v5230_v36, %v5190_v33 }
 0x359   : > { %v5247_v39 = vpop.f32.mrb[16].mxu0 }
 0x35a   : > { %v5287_v42 = vpop.f32.mrb[16].mxu1  ;;  %v5248_v44 = vpop.f32.mrb[17].mxu0 }
 0x35b   : > { %v5249_v45 = vadd.f32 %v5248_v44, %v5247_v39  ;;  %v5288_v46 = vpop.f32.mrb[17].mxu1  ;;  %v5250_v27 = vpop.f32.mrb[18].mxu0 }
 0x35c   : > { %v5289_v47 = vadd.f32 %v5288_v46, %v5287_v42  ;;  %v5290_v19 = vpop.f32.mrb[18].mxu1  ;;  %v5251_v48 = vpop.f32.mrb[19].mxu0 }
 0x35d   : > { %v4019_v37 = vadd.f32 %v5249_v45, %v3954_v58  ;;  %v5252_v49 = vadd.f32 %v5251_v48, %v5250_v27  ;;  %v5291_v50 = vpop.f32.mrb[19].mxu1 }
 0x35e   : > { %v5292_v52 = vadd.f32 %v5291_v50, %v5290_v19 }
 0x35f   : > { %v4084_v53 = vadd.f32 %v5289_v47, %v4019_v37  ;;  %v4022_v59 = vadd.f32 %v5252_v49, %v3957_v62 }
 0x361   : > { %v4087_v54 = vadd.f32 %v5292_v52, %v4022_v59  ;;  %v5253_v55 = vpop.f32.mrb[20].mxu0 }
 0x362   : > { %v5293_v28 = vpop.f32.mrb[20].mxu1  ;;  %v5254_v57 = vpop.f32.mrb[21].mxu0 }
 0x363   : > { %v5255_v61 = vadd.f32 %v5254_v57, %v5253_v55  ;;  %v5294_v63 = vpop.f32.mrb[21].mxu1  ;;  %v5256_v0 = vpop.f32.mrb[22].mxu0 }
 0x364   : > { %v5295_v1 = vadd.f32 %v5294_v63, %v5293_v28  ;;  %v5296_v2 = vpop.f32.mrb[22].mxu1  ;;  %v5257_v3 = vpop.f32.mrb[23].mxu0 }
 0x365   : > { %v4027_v5 = vadd.f32 %v5255_v61, %v3962_v9  ;;  %v5258_v6 = vadd.f32 %v5257_v3, %v5256_v0  ;;  %v5297_v25 = vpop.f32.mrb[23].mxu1 }
 0x366   : > { %v5298_v8 = vadd.f32 %v5297_v25, %v5296_v2 }
 0x367   : > { %v4092_v58 = vadd.f32 %v5295_v1, %v4027_v5  ;;  %v4030_v51 = vadd.f32 %v5258_v6, %v3965_v43 }
 0x369   : > { %v4095_v11 = vadd.f32 %v5298_v8, %v4030_v51  ;;  %v5259_v12 = vpop.f32.mrb[24].mxu0 }
 0x36a   : > { %v5299_v13 = vpop.f32.mrb[24].mxu1  ;;  %v5260_v62 = vpop.f32.mrb[25].mxu0 }
 0x36b   : > { %v5261_v14 = vadd.f32 %v5260_v62, %v5259_v12  ;;  %v5300_v40 = vpop.f32.mrb[25].mxu1  ;;  %v5262_v4 = vpop.f32.mrb[26].mxu0 }
 0x36c   : > { %v5301_v16 = vadd.f32 %v5300_v40, %v5299_v13  ;;  %v5302_v17 = vpop.f32.mrb[26].mxu1  ;;  %v5263_v60 = vpop.f32.mrb[27].mxu0 }
 0x36d   : > { %v4035_v18 = vadd.f32 %v5261_v14, %v3970_v22  ;;  %v5264_v20 = vadd.f32 %v5263_v60, %v5262_v4  ;;  %v5303_v21 = vpop.f32.mrb[27].mxu1 }
 0x36e   : > { %v5304_v41 = vadd.f32 %v5303_v21, %v5302_v17 }
 0x36f   : > { %v4100_v9 = vadd.f32 %v5301_v16, %v4035_v18  ;;  %v4038_v56 = vadd.f32 %v5264_v20, %v3973_v23 }
 0x371   : > { %v4103_v24 = vadd.f32 %v5304_v41, %v4038_v56  ;;  %v5265_v7 = vpop.f32.mrb[28].mxu0 }
 0x372   : > { %v5305_v26 = vpop.f32.mrb[28].mxu1  ;;  %v5266_v43 = vpop.f32.mrb[29].mxu0 }
 0x373   : > { %v5306_v10 = vpop.f32.mrb[29].mxu1  ;;  %v5267_v29 = vadd.f32 %v5266_v43, %v5265_v7  ;;  %v5268_v15 = vpop.f32.mrb[30].mxu0 }
 0x374   : > { %v5307_v30 = vadd.f32 %v5306_v10, %v5305_v26  ;;  %v5308_v31 = vpop.f32.mrb[30].mxu1  ;;  %v5269_v32 = vpop.f32.mrb[31].mxu0 }
 0x375   : > { %v5309_v33 = vpop.f32.mrb[31].mxu1  ;;  %v4043_v34 = vadd.f32 %v5267_v29, %v3978_v35  ;;  %v5270_v36 = vadd.f32 %v5269_v32, %v5268_v15 }
 0x376   : > { %v5310_v39 = vadd.f32 %v5309_v33, %v5308_v31 }
 0x377   : > { %v4108_v22 = vadd.f32 %v5307_v30, %v4043_v34  ;;  %v4046_v42 = vadd.f32 %v5270_v36, %v7557_v38 }
 0x379   : > { %v4111_v44 = vadd.f32 %v5310_v39, %v4046_v42  ;;  %v5327_v45 = vpop.f32.mrb[32].mxu0 }
 0x37a   : > { %v5328_v23 = vpop.f32.mrb[33].mxu0  ;;  %v5367_v49 = vpop.f32.mrb[32].mxu1 }
 0x37b   : > { %v5329_v46 = vadd.f32 %v5328_v23, %v5327_v45  ;;  %v5330_v27 = vpop.f32.mrb[34].mxu0  ;;  %v5368_v50 = vpop.f32.mrb[33].mxu1 }
 0x37c   : > { %v5331_v47 = vpop.f32.mrb[35].mxu0  ;;  %v5369_v52 = vadd.f32 %v5368_v50, %v5367_v49  ;;  %v5370_v59 = vpop.f32.mrb[34].mxu1 }
 0x37d   : > { %v4149_v19 = vadd.f32 %v5329_v46, %v4084_v53  ;;  %v5332_v48 = vadd.f32 %v5331_v47, %v5330_v27  ;;  %v5371_v55 = vpop.f32.mrb[35].mxu1 }
 0x37e   : > { %v5372_v28 = vadd.f32 %v5371_v55, %v5370_v59 }
 0x37f   : > { %v4152_v37 = vadd.f32 %v5332_v48, %v4087_v54  ;;  %v4214_v35 = vadd.f32 %v5369_v52, %v4149_v19 }
 0x381   : > { %v5333_v57 = vpop.f32.mrb[36].mxu0  ;;  %v4217_v61 = vadd.f32 %v5372_v28, %v4152_v37 }
 0x382   : > { %v5334_v63 = vpop.f32.mrb[37].mxu0  ;;  %v5373_v6 = vpop.f32.mrb[36].mxu1 }
 0x383   : > { %v5335_v38 = vadd.f32 %v5334_v63, %v5333_v57  ;;  %v5336_v0 = vpop.f32.mrb[38].mxu0  ;;  %v5374_v53 = vpop.f32.mrb[37].mxu1 }
 0x384   : > { %v5337_v1 = vpop.f32.mrb[39].mxu0  ;;  %v5375_v25 = vadd.f32 %v5374_v53, %v5373_v6  ;;  %v5376_v54 = vpop.f32.mrb[38].mxu1 }
 0x385   : > { %v4157_v2 = vadd.f32 %v5335_v38, %v4092_v58  ;;  %v5338_v3 = vadd.f32 %v5337_v1, %v5336_v0  ;;  %v5377_v8 = vpop.f32.mrb[39].mxu1 }
 0x386   : > { %v5378_v12 = vadd.f32 %v5377_v8, %v5376_v54 }
 0x387   : > { %v4160_v5 = vadd.f32 %v5338_v3, %v4095_v11  ;;  %v4222_v51 = vadd.f32 %v5375_v25, %v4157_v2 }
 0x389   : > { %v5339_v13 = vpop.f32.mrb[40].mxu0  ;;  %v4225_v62 = vadd.f32 %v5378_v12, %v4160_v5 }
 0x38a   : > { %v5340_v14 = vpop.f32.mrb[41].mxu0  ;;  %v5379_v20 = vpop.f32.mrb[40].mxu1 }
 0x38b   : > { %v5341_v40 = vadd.f32 %v5340_v14, %v5339_v13  ;;  %v5342_v4 = vpop.f32.mrb[42].mxu0  ;;  %v5380_v58 = vpop.f32.mrb[41].mxu1 }
 0x38c   : > { %v5343_v16 = vpop.f32.mrb[43].mxu0  ;;  %v5381_v21 = vadd.f32 %v5380_v58, %v5379_v20  ;;  %v5382_v11 = vpop.f32.mrb[42].mxu1 }
 0x38d   : > { %v4165_v17 = vadd.f32 %v5341_v40, %v4100_v9  ;;  %v5344_v60 = vadd.f32 %v5343_v16, %v5342_v4  ;;  %v5383_v41 = vpop.f32.mrb[43].mxu1 }
 0x38e   : > { %v5384_v7 = vadd.f32 %v5383_v41, %v5382_v11 }
 0x38f   : > { %v4168_v18 = vadd.f32 %v5344_v60, %v4103_v24  ;;  %v4230_v56 = vadd.f32 %v5381_v21, %v4165_v17 }
 0x391   : > { %v5345_v26 = vpop.f32.mrb[44].mxu0  ;;  %v4233_v43 = vadd.f32 %v5384_v7, %v4168_v18 }
 0x392   : > { %v5346_v10 = vpop.f32.mrb[45].mxu0  ;;  %v5385_v34 = vpop.f32.mrb[44].mxu1 }
 0x393   : > { %v5347_v29 = vadd.f32 %v5346_v10, %v5345_v26  ;;  %v5348_v30 = vpop.f32.mrb[46].mxu0  ;;  %v5386_v9 = vpop.f32.mrb[45].mxu1 }
 0x394   : > { %v5349_v15 = vpop.f32.mrb[47].mxu0  ;;  %v5387_v36 = vadd.f32 %v5386_v9, %v5385_v34  ;;  %v5388_v24 = vpop.f32.mrb[46].mxu1 }
 0x395   : > { %v4173_v31 = vadd.f32 %v5347_v29, %v4108_v22  ;;  %v5350_v32 = vadd.f32 %v5349_v15, %v5348_v30  ;;  %v5389_v39 = vpop.f32.mrb[47].mxu1 }
 0x396   : > { %v5390_v45 = vadd.f32 %v5389_v39, %v5388_v24 }
 0x397   : > { %v4176_v33 = vadd.f32 %v5350_v32, %v4111_v44  ;;  %v4238_v42 = vadd.f32 %v5387_v36, %v4173_v31 }
 0x399   : > { %v7560_v23 = vadd.f32 %v5390_v45, %v4176_v33  ;;  %v5407_v46 = vpop.f32.mrb[48].mxu0 }
 0x39a   : > { %v5447_v27 = vpop.f32.mrb[48].mxu1  ;;  %v5408_v47 = vpop.f32.mrb[49].mxu0 }
 0x39b   : > { %v5409_v19 = vadd.f32 %v5408_v47, %v5407_v46  ;;  %v5448_v48 = vpop.f32.mrb[49].mxu1  ;;  %v5410_v37 = vpop.f32.mrb[50].mxu0 }
 0x39c   : > { %v5449_v49 = vadd.f32 %v5448_v48, %v5447_v27  ;;  %v5450_v50 = vpop.f32.mrb[50].mxu1  ;;  %v5411_v22 = vpop.f32.mrb[51].mxu0 }
 0x39d   : > { %v4279_v52 = vadd.f32 %v5409_v19, %v4214_v35  ;;  %v5412_v44 = vadd.f32 %v5411_v22, %v5410_v37  ;;  %v5451_v59 = vpop.f32.mrb[51].mxu1 }
 0x39e   : > { %v5452_v55 = vadd.f32 %v5451_v59, %v5450_v50  ;;  %v5111_v50 = vld [vmem:[#allocation17] ss:$0 sm:$0xff] }
 0x39f   : > { %v4344_v28 = vadd.f32 %v5449_v49, %v4279_v52  ;;  %v4282_v57 = vadd.f32 %v5412_v44, %v4217_v61 }
 0x3a1   : > { %v7562_v63 = vadd.f32 %v5452_v55, %v4282_v57  ;;  %v5413_v38 = vpop.f32.mrb[52].mxu0  ;;  %v5112_v55 = vld [vmem:[#allocation19] ss:$0 sm:$0xff] }
 0x3a2   : > { %v5453_v0 = vpop.f32.mrb[52].mxu1  ;;  %v5414_v1 = vpop.f32.mrb[53].mxu0 }
 0x3a3   : > { %v5415_v2 = vadd.f32 %v5414_v1, %v5413_v38  ;;  %v5454_v3 = vpop.f32.mrb[53].mxu1  ;;  %v5416_v5 = vpop.f32.mrb[54].mxu0 }
 0x3a4   : > { %v5455_v6 = vadd.f32 %v5454_v3, %v5453_v0  ;;  %v5456_v53 = vpop.f32.mrb[54].mxu1  ;;  %v5417_v25 = vpop.f32.mrb[55].mxu0 }
 0x3a5   : > { %v4287_v54 = vadd.f32 %v5415_v2, %v4222_v51  ;;  %v5418_v8 = vadd.f32 %v5417_v25, %v5416_v5  ;;  %v5457_v12 = vpop.f32.mrb[55].mxu1 }
 0x3a6   : > { %v5458_v35 = vadd.f32 %v5457_v12, %v5456_v53 }
 0x3a7   : > { %v7564_v13 = vadd.f32 %v5455_v6, %v4287_v54  ;;  %v4290_v14 = vadd.f32 %v5418_v8, %v4225_v62 }
 0x3a9   : > { %v7566_v40 = vadd.f32 %v5458_v35, %v4290_v14  ;;  %v5419_v61 = vpop.f32.mrb[56].mxu0 }
 0x3aa   : > { %v5459_v4 = vpop.f32.mrb[56].mxu1  ;;  %v5420_v16 = vpop.f32.mrb[57].mxu0 }
 0x3ab   : > { %v5421_v17 = vadd.f32 %v5420_v16, %v5419_v61  ;;  %v5460_v60 = vpop.f32.mrb[57].mxu1  ;;  %v5422_v18 = vpop.f32.mrb[58].mxu0 }
 0x3ac   : > { %v5461_v20 = vadd.f32 %v5460_v60, %v5459_v4  ;;  %v5462_v58 = vpop.f32.mrb[58].mxu1  ;;  %v5423_v21 = vpop.f32.mrb[59].mxu0 }
 0x3ad   : > { %v4295_v11 = vadd.f32 %v5421_v17, %v4230_v56  ;;  %v5424_v41 = vadd.f32 %v5423_v21, %v5422_v18  ;;  %v5463_v51 = vpop.f32.mrb[59].mxu1 }
 0x3ae   : > { %v5464_v7 = vadd.f32 %v5463_v51, %v5462_v58 }
 0x3af   : > { %v4360_v26 = vadd.f32 %v5461_v20, %v4295_v11  ;;  %v4298_v10 = vadd.f32 %v5424_v41, %v4233_v43 }
 0x3b1   : > { %v4363_v29 = vadd.f32 %v5464_v7, %v4298_v10  ;;  %v5425_v30 = vpop.f32.mrb[60].mxu0 }
 0x3b2   : > { %v5465_v62 = vpop.f32.mrb[60].mxu1  ;;  %v5426_v15 = vpop.f32.mrb[61].mxu0 }
 0x3b3   : > { %v5427_v31 = vadd.f32 %v5426_v15, %v5425_v30  ;;  %v5466_v32 = vpop.f32.mrb[61].mxu1  ;;  %v5428_v33 = vpop.f32.mrb[62].mxu0 }
 0x3b4   : > { %v5467_v34 = vadd.f32 %v5466_v32, %v5465_v62  ;;  %v5468_v9 = vpop.f32.mrb[62].mxu1  ;;  %v5429_v36 = vpop.f32.mrb[63].mxu0 }
 0x3b5   : > { %v4303_v24 = vadd.f32 %v5427_v31, %v4238_v42  ;;  %v5430_v39 = vadd.f32 %v5429_v36, %v5428_v33  ;;  %v5469_v45 = vpop.f32.mrb[63].mxu1 }
 0x3b6   : > { %v5470_v46 = vadd.f32 %v5469_v45, %v5468_v9 }
 0x3b7   : > { %v4368_v56 = vadd.f32 %v5467_v34, %v4303_v24  ;;  %v4306_v27 = vadd.f32 %v5430_v39, %v7560_v23 }
 0x3b9   : > { %v4371_v47 = vadd.f32 %v5470_v46, %v4306_v27  ;;  %v5487_v19 = vpop.f32.mrb[64].mxu0 }
 0x3ba   : > { %v5488_v43 = vpop.f32.mrb[65].mxu0  ;;  %v5499_v49 = vpop.f32.mrb[64].mxu1 }
 0x3bb   : > { %v5489_v48 = vadd.f32 %v5488_v43, %v5487_v19  ;;  %v5490_v37 = vpop.f32.mrb[66].mxu0  ;;  %v5500_v44 = vpop.f32.mrb[65].mxu1 }
 0x3bc   : > { %v5491_v22 = vpop.f32.mrb[67].mxu0  ;;  %v5501_v57 = vadd.f32 %v5500_v44, %v5499_v49  ;;  %v5502_v42 = vpop.f32.mrb[66].mxu1 }
 0x3bd   : > { %v4409_v52 = vadd.f32 %v5489_v48, %v4344_v28  ;;  %v5492_v59 = vadd.f32 %v5491_v22, %v5490_v37  ;;  %v5503_v1 = vpop.f32.mrb[67].mxu1 }
 0x3be   : > { %v4425_v2 = vadd.f32 %v5501_v57, %v4360_v26  ;;  %v5504_v23 = vadd.f32 %v5503_v1, %v5502_v42 }
 0x3bf   : > { %v4446_v38 = vmul.f32 %v5111_v50, %v4409_v52  ;;  %v4412_v0 = vadd.f32 %v5492_v59, %v7562_v63 }
 0x3c0   : > { %v4450_v6 = vmul.f32 %v5111_v50, %v4425_v2  ;;  %v4428_v53 = vadd.f32 %v5504_v23, %v4363_v29 }
 0x3c1   : > { %v4461_v3 = vadd.f32 %v5112_v55, %v4446_v38  ;;  %v4447_v5 = vmul.f32 %v5111_v50, %v4412_v0  ;;  %v5493_v8 = vpop.f32.mrb[68].mxu0 }
 0x3c2   : > { %v4465_v28 = vadd.f32 %v5112_v55, %v4450_v6  ;;  %v4451_v12 = vmul.f32 %v5111_v50, %v4428_v53  ;;  %v5494_v35 = vpop.f32.mrb[69].mxu0  ;;  %v5505_v60 = vpop.f32.mrb[68].mxu1 }
 0x3c3   : > { %v4469_v25 = vmax.f32 %v4461_v3, 0.0  ;;  %v4462_v54 = vadd.f32 %v5112_v55, %v4447_v5  ;;  %v5495_v4 = vadd.f32 %v5494_v35, %v5493_v8  ;;  %v5496_v63 = vpop.f32.mrb[70].mxu0  ;;  %v5506_v21 = vpop.f32.mrb[69].mxu1 }
 0x3c4   : > { %v4473_v16 = vmax.f32 %v4465_v28, 0.0  ;;  %v4466_v17 = vadd.f32 %v5112_v55, %v4451_v12  ;;  %v5497_v18 = vpop.f32.mrb[71].mxu0  ;;  %v5507_v7 = vadd.f32 %v5506_v21, %v5505_v60  ;;  %v5508_v26 = vpop.f32.mrb[70].mxu1 }
 0x3c5   : > { %v5142_v14 = vpack.c.bf16 %v4469_v25, %v4469_v25  ;;  %v4470_v61 = vmax.f32 %v4462_v54, 0.0  ;;  %v4417_v58 = vadd.f32 %v5495_v4, %v7564_v13  ;;  %v5498_v11 = vadd.f32 %v5497_v18, %v5496_v63  ;;  %v5509_v30 = vpop.f32.mrb[71].mxu1 }
 0x3c6   : > { %v5146_v41 = vpack.c.bf16 %v4473_v16, %v4473_v16  ;;  %v4474_v51 = vmax.f32 %v4466_v17, 0.0  ;;  %v4433_v15 = vadd.f32 %v5507_v7, %v4368_v56  ;;  %v5510_v31 = vadd.f32 %v5509_v30, %v5508_v26 }
 0x3c7   : > { %4510 = vst.msk [vmem:[%s7195_s23] sm:$0xf] %vm4509_vm12, %v5142_v14  ;;  %v5143_v20 = vpack.c.bf16 %v4470_v61, %v4470_v61  ;;  %v4448_v10 = vmul.f32 %v5111_v50, %v4417_v58  ;;  %v4420_v29 = vadd.f32 %v5498_v11, %v7566_v40 }
 0x3c8   : > { %4514 = vst.msk [vmem:[%s7195_s23 + $0x10] sm:$0xf] %vm4509_vm12, %v5146_v41  ;;  %v5147_v62 = vpack.c.bf16 %v4474_v51, %v4474_v51  ;;  %v4452_v33 = vmul.f32 %v5111_v50, %v4433_v15  ;;  %v4436_v34 = vadd.f32 %v5510_v31, %v4371_v47 }
 0x3c9   : > { %4511 = vst.msk [vmem:[%s7195_s23 + $0x4] sm:$0xf] %vm4509_vm12, %v5143_v20  ;;  %v4463_v13 = vadd.f32 %v5112_v55, %v4448_v10  ;;  %v4449_v32 = vmul.f32 %v5111_v50, %v4420_v29 }
 0x3ca   : > { %4515 = vst.msk [vmem:[%s7195_s23 + $0x14] sm:$0xf] %vm4509_vm12, %v5147_v62  ;;  %v4467_v40 = vadd.f32 %v5112_v55, %v4452_v33  ;;  %v4453_v24 = vmul.f32 %v5111_v50, %v4436_v34 }
 0x3cb   : > { %v4471_v9 = vmax.f32 %v4463_v13, 0.0  ;;  %v4464_v36 = vadd.f32 %v5112_v55, %v4449_v32 }
 0x3cc   : > { %v4475_v46 = vmax.f32 %v4467_v40, 0.0  ;;  %v4468_v56 = vadd.f32 %v5112_v55, %v4453_v24 }
 0x3cd   : > { %v5144_v39 = vpack.c.bf16 %v4471_v9, %v4471_v9  ;;  %v4472_v45 = vmax.f32 %v4464_v36, 0.0 }
 0x3ce   : > { %v5148_v47 = vpack.c.bf16 %v4475_v46, %v4475_v46  ;;  %v4476_v19 = vmax.f32 %v4468_v56, 0.0 }
 0x3cf   : > { %4512 = vst.msk [vmem:[%s7195_s23 + $0x8] sm:$0xf] %vm4509_vm12, %v5144_v39  ;;  %v5145_v27 = vpack.c.bf16 %v4472_v45, %v4472_v45 }
 0x3d0   : > { %4516 = vst.msk [vmem:[%s7195_s23 + $0x18] sm:$0xf] %vm4509_vm12, %v5148_v47  ;;  %v5149_v43 = vpack.c.bf16 %v4476_v19, %v4476_v19 }
 0x3d1   : > { %4513 = vst.msk [vmem:[%s7195_s23 + $0xc] sm:$0xf] %vm4509_vm12, %v5145_v27 }
 0x3d2   : > { %4517 = vst.msk [vmem:[%s7195_s23 + $0x1c] sm:$0xf] %vm4509_vm12, %v5149_v43 }
 0x3d3   : > { %6270 = shalt.err (!%p6267_p12)
}
 0x3d4   : > { %s6271_s23 = scalar_lea.hbm %s7590_s30, 512  ;;  %s6275_s3 = scalar_lea.hbm %s7844_s27, 4096 }
 0x3d5   : > { %p6272_p9 = scmp.ne.s32.totalorder %s7590_s30, %s6271_s23  ;;  %p6276_p8 = scmp.lt.u32.totalorder %s7590_s30, %s7844_s27 }
 0x3d6   : > { %p6277_p2 = scmp.lt.u32.totalorder %s6275_s3, %s6271_s23  ;;  %p6279_p1 = scmp.lt.u32.totalorder %s6271_s23, %s7590_s30 }
 0x3d7   : > { %p6273_p7 = pnand %p6272_p9, %p7845_p5 }
 0x3d8   : > { %p6278_p11 = por %p6277_p2, %p6276_p8 }
 0x3d9   : > { %p6274_p13 = pneg %p6273_p7 }
 0x3da   : > { %p6280_p6 = por %p6279_p1, %p6278_p11 }
 0x3dc   : > { %p6281_p0 = pnand %p6280_p6, %p6274_p13 }
 0x3de   : > { %6284 = shalt.err (!%p6281_p0)
}
 0x3df   : > { %s6449_s25 = smov 64   ;;  %s6450_s20 = smov 4  }
 0x3e0   : > { %5551 = dma.vmem_to_hbm [thread:$0]  (%p7845_p5), %s7592_s11, 512, %s7590_s30, %s4519_s1, %s6449_s25, %s6449_s25, %s6450_s20  }
 0x3e1 PF: > { %s7846_s26 = sld [smem:[#allocation35_spill]]  ;;  %s7847_s13 = sld [smem:[#allocation50_spill]] }
 0x3e2   : > { %p5593_p3 = scmp.ge.s32.totalorder %s6431_s22, 2 }
 0x3e7   : > { %s4550_s14 = sand.u32 1, %s7846_s26   ;;  %p7848_p10 = scmp.ne.s32.totalorder %s7847_s13, 0 }
 0x3e8   : > { %s4551_s12 = scalar_lea.sflag [#allocation7], %s4550_s14 }
 0x3e9   : > { %p5583_p4 = pnand %p5593_p3, %p7848_p10 }
 0x3eb   : > { %6374 = dma.done.wait (!%p5583_p4), %s4551_s12, 512  }
 0x3ec   : > { %6376 = vsyncadd (!%p5583_p4), %s4551_s12, 4294966784  ;;  %s35_s22 = sadd.s32 1, %s6431_s22   ;;  %s7850_s30 = sld [smem:[#allocation31_spill]] }
 0x3ed   : > { %p7627_p12 = scmp.ge.s32.totalorder %s35_s22, 10   ;;  %s7851_s10 = sld [smem:[#allocation32_spill]] }
 0x3ee   : > { %s7852_s12 = sld [smem:[#allocation33_spill]]  ;;  %s7853_s13 = sld [smem:[#allocation34_spill]] }
 0x3ef   : > { %s7854_s14 = sld [smem:[#allocation46_spill]]  ;;  %s7855_s29 = sld [smem:[#allocation47_spill]] }
 0x3f0   : > { %s7856_s18 = sld [smem:[#allocation38_spill]]  ;;  %s7857_s1 = sld [smem:[#allocation39_spill]] }
 0x3f1   : > { %s7858_s20 = sld [smem:[#allocation41_spill]]  ;;  %s7859_s21 = sld [smem:[#allocation42_spill]] }
 0x3f2   : > { %s7861_s11 = smov %s7881_s6  ;;  %s7862_s15 = smov %s6407_s16 }
 0x3f3   : > { %s7863_s16 = smov %s6411_s17  ;;  %34 = sbr.rel (!%p7627_p12) target bundleno = 26 (0x1a), region = 214 }
 0x3f5   : > { %s7864_s17 = smov %s7855_s29 }
 0x3f6   : > { %s7865_s19 = smov %s7857_s1 }
 0x3fa   :  { %4556 = vsyncpa [#allocation6], 1 }
 0x3fb   :  { %4558 = vsyncpa [#allocation6 + $0x1], 1 }
 0x3fc   :  { %4559 = vsyncpa [#allocation9], 1 }
 0x3fd   :  { %4561 = vsyncpa [#allocation9 + $0x1], 1 }
 0x3fe   :  { %4562 = vsyncpa [#allocation12], 1 }
 0x3ff   :  { %4564 = vsyncpa [#allocation12 + $0x1], 1 }
 0x400   :  { %4565 = vsyncpa [#allocation15], 1 }
 0x401   :  { %4567 = vsyncpa [#allocation15 + $0x1], 1 }
 0x402   :  { %4568 = vsyncpa [#allocation18], 1 }
 0x403   :  { %4569 = vsyncpa [#allocation7], 1 }
 0x404   :  { %4571 = vsyncpa [#allocation7 + $0x1], 1 }

</bundles_post_ra>
